<compile_context>
chip_gen: v6e
topology: v6e:2x2x1
jax: 0.10.0
libtpu: 0.0.40
codegen_flags: <defaults>
</compile_context>

<pallas_src>
import functools

import numpy as np
import jax
import jax.numpy as jnp
from jax.experimental import pallas as pl
from jax.experimental.pallas import tpu as pltpu

# ----------------------------- configuration -------------------------------
PATCH = 4
EMBED = 32
DEPTHS = (2, 2)
HEADS = (2, 4)
WINDOW = 4
MLP_RATIO = 4.0
NUM_CLASSES = 10
LN_EPS = 1e-5
HEAD_PAD = 128  # lane-dense classifier store; sliced back to NUM_CLASSES outside
NEG_INF = -1e9  # additive mask for cross-window / cross-batch attention entries

# MXU matmul operand dtype (f32 accumulation everywhere).  Set to jnp.float32
# for bit-closer parity with the f32 PyTorch reference; bf16 is the perf choice
# on v5e/v6e/v7x (bf16-native MXU, half the VMEM/vld traffic).
MXU_DTYPE = jnp.bfloat16


# --------------------------- small shared helpers ---------------------------
def _full_spec(shape):
    nd = len(shape)
    return pl.BlockSpec(shape, lambda i, _nd=nd: (0,) * _nd)


def _single_block_call(kernel, args, out_shape):
    """grid=(1,) pallas_call: every operand is one whole VMEM-resident block."""
    return pl.pallas_call(
        kernel,
        out_shape=out_shape,
        grid=(1,),
        in_specs=[_full_spec(a.shape) for a in args],
        out_specs=_full_spec(out_shape.shape),
        compiler_params=pltpu.CompilerParams(dimension_semantics=("arbitrary",)),
    )(*args)


def _ln(x, g_ref, b_ref, eps):
    """LayerNorm over the last dim; x is f32, params are (1, C) refs."""
    mu = jnp.mean(x, axis=-1, keepdims=True)
    xc = x - mu
    var = jnp.mean(xc * xc, axis=-1, keepdims=True)
    return (xc * jax.lax.rsqrt(var + eps) * g_ref[...].astype(jnp.float32)
            + b_ref[...].astype(jnp.float32))


def _mm(a, b):
    """MXU matmul: bf16 (or f32) operands, f32 accumulation."""
    return jnp.dot(a.astype(MXU_DTYPE), b.astype(MXU_DTYPE),
                   preferred_element_type=jnp.float32)


# ----------------------------- Pallas kernels ------------------------------
def _patch_embed_kernel(x_ref, w_ref, b_ref, g_ref, bb_ref, o_ref, *, eps):
    """im2col'ed patches @ W + b, then LayerNorm.  One fused kernel."""
    y = _mm(x_ref[...], w_ref[...]) + b_ref[...].astype(jnp.float32)
    o_ref[...] = _ln(y, g_ref, bb_ref, eps).astype(o_ref.dtype)


def _patch_merge_kernel(x_ref, g_ref, b_ref, w_ref, o_ref, *, eps):
    """LayerNorm + bias-free channel reduction (torchvision PatchMerging)."""
    y = _ln(x_ref[...].astype(jnp.float32), g_ref, b_ref, eps)
    o_ref[...] = _mm(y, w_ref[...]).astype(o_ref.dtype)


def _final_kernel(x_ref, g_ref, b_ref, pool_ref, hw_ref, hb_ref, o_ref, *, eps):
    """Final LN -> global average pool (block-diag matmul) -> padded head."""
    y = _ln(x_ref[...].astype(jnp.float32), g_ref, b_ref, eps)              # (B*L, C)
    pooled = jnp.dot(pool_ref[...], y, preferred_element_type=jnp.float32)  # (B, C)
    logits = _mm(pooled, hw_ref[...]) + hb_ref[...].astype(jnp.float32)     # (B, HEAD_PAD)
    o_ref[...] = logits.astype(o_ref.dtype)


def _swin_block_kernel(xw_ref, g1_ref, b1_ref, wqkv_ref, bqkv_ref, bias_ref,
                       wproj_ref, bproj_ref, g2_ref, b2_ref,
                       w1_ref, b1m_ref, w2_ref, b2m_ref, o_ref,
                       *, heads, scale, eps):
    """Whole Swin block fused: LN1 -> per-head QKV -> dense block-diagonal
    window attention -> proj -> residual -> LN2 -> MLP(GELU) -> residual,
    on window-permuted tokens (permutation undone in the XLA wrapper).

    `bias_ref` is (heads, T, T): rel-pos bias + shifted-window mask embedded
    block-diagonally, with -1e9 everywhere outside a window's own block, so a
    single full-lane softmax per head reproduces per-window attention exactly.
    """
    x = xw_ref[...].astype(jnp.float32)          # (T, C) window-permuted tokens
    T, C = x.shape

    # ---- LN1 -> per-head QKV -> attention -> proj (accumulated per head)
    h = _ln(x, g1_ref, b1_ref, eps)
    h_mx = h.astype(MXU_DTYPE)

    y = jnp.zeros((T, C), jnp.float32)
    for hh in range(heads):                                   # unrolled, heads<=4
        q = (jnp.dot(h_mx, wqkv_ref[hh].astype(MXU_DTYPE),
                     preferred_element_type=jnp.float32)
             + bqkv_ref[hh].astype(jnp.float32)) * scale
        k = (jnp.dot(h_mx, wqkv_ref[heads + hh].astype(MXU_DTYPE),
                     preferred_element_type=jnp.float32)
             + bqkv_ref[heads + hh].astype(jnp.float32))
        v = (jnp.dot(h_mx, wqkv_ref[2 * heads + hh].astype(MXU_DTYPE),
                     preferred_element_type=jnp.float32)
             + bqkv_ref[2 * heads + hh].astype(jnp.float32))

        # One dense (T,T) score matmul instead of per-window tiny matmuls.
        s = jax.lax.dot_general(                              # q @ k.T, f32 acc
            q.astype(MXU_DTYPE), k.astype(MXU_DTYPE),
            dimension_numbers=(((1,), (1,)), ((), ())),
            preferred_element_type=jnp.float32)               # (T, T)
        s = s + bias_ref[hh].astype(jnp.float32)
        s = s - jnp.max(s, axis=-1, keepdims=True)
        p = jnp.exp(s)
        p = p * pl.reciprocal(jnp.sum(p, axis=-1, keepdims=True), approx=True)
        o_h = _mm(p, v)                                       # (T, Dh)
        y = y + _mm(o_h, wproj_ref[hh])                       # (T, C) proj-accumulate

    x = x + y + bproj_ref[...].astype(jnp.float32)            # residual 1

    # ---- LN2 -> MLP -> residual 2
    # TODO(synk): torch nn.GELU() is exact erf-GELU; tanh approximation is used
    # for guaranteed Mosaic lowering (max abs diff ~1e-3).
    h2 = _ln(x, g2_ref, b2_ref, eps)
    h2 = _mm(h2, w1_ref[...]) + b1m_ref[...].astype(jnp.float32)
    h2 = jax.nn.gelu(h2, approximate=True)
    h2 = _mm(h2, w2_ref[...]) + b2m_ref[...].astype(jnp.float32)

    o_ref[...] = (x + h2).astype(o_ref.dtype)


# ------------------------------ glue helpers --------------------------------
def relative_position_index(window):
    coords = np.stack(np.meshgrid(np.arange(window), np.arange(window), indexing="ij"))
    flat = coords.reshape(2, -1)
    rel = flat[:, :, None] - flat[:, None, :]
    rel = rel.transpose(1, 2, 0).astype(np.int64)
    rel[:, :, 0] += window - 1
    rel[:, :, 1] += window - 1
    rel[:, :, 0] *= 2 * window - 1
    return rel.sum(-1)  # (N, N)


def relative_position_bias(table, window, heads):
    idx = relative_position_index(window)
    N = window * window
    bias = table[idx.reshape(-1)]                 # (N*N, heads) static gather
    return bias.reshape(N, N, heads).transpose(2, 0, 1)  # (heads, N, N)


def make_window_mask(H, W, window, shift):
    """Shifted-window mask, (nwin, N, N) with values {0, -100}; None if no shift."""
    if shift == 0:
        return None
    N = window * window
    nwin = (H // window) * (W // window)
    img = np.zeros((H, W), np.float32)
    cnt = 0
    for hs in (slice(0, -window), slice(-window, -shift), slice(-shift, None)):
        for ws in (slice(0, -window), slice(-window, -shift), slice(-shift, None)):
            img[hs, ws] = cnt
            cnt += 1
    mw = img.reshape(H // window, window, W // window, window)
    mw = mw.transpose(0, 2, 1, 3).reshape(nwin, N)
    diff = mw[:, None, :] - mw[:, :, None]
    return jnp.asarray(np.where(diff != 0, -100.0, 0.0).astype(np.float32))


def window_partition(x, window):
    B, H, W, C = x.shape
    nH, nW = H // window, W // window
    xw = x.reshape(B, nH, window, nW, window, C).transpose(0, 1, 3, 2, 4, 5)
    return xw.reshape(B * nH * nW * window * window, C)


def window_unpartition(xw, B, H, W, C, window):
    nH, nW = H // window, W // window
    x = xw.reshape(B, nH, nW, window, window, C).transpose(0, 1, 3, 2, 4, 5)
    return x.reshape(B, H, W, C)


def build_attention_bias(relb, mask, B, nwin, window, heads):
    """Fused additive bias (heads, T, T): rel-pos bias + shift mask placed on the
    block diagonal; -1e9 for every cross-window / cross-batch entry."""
    N = window * window
    BW = B * nwin
    T = BW * N
    blocks = jnp.broadcast_to(relb[:, None], (heads, BW, N, N))       # (H,BW,N,N)
    if mask is not None:
        blocks = blocks + jnp.tile(mask, (B, 1, 1))[None]             # per-image mask
    same_win = jnp.eye(BW, dtype=bool)[None, :, None, :, None]        # (1,BW,1,BW,1)
    bias = jnp.where(same_win, blocks[:, :, :, None, :], jnp.float32(NEG_INF))
    return bias.reshape(heads, T, T)


# --------------------------- module-level wrappers ---------------------------
def swin_block(x, p, heads, window, shift):
    """One fused pallas_call for the whole Swin block."""
    B, H, W, C = x.shape
    if window >= H or window >= W:   # torchvision: no shift if window covers map
        shift = 0
    nwin = (H // window) * (W // window)
    Dh = C // heads
    hidden = p["w1"].shape[0]
    T = B * nwin * window * window

    xs = x
    if shift > 0:
        xs = jnp.roll(xs, shift=(-shift, -shift), axis=(1, 2))
    # TODO(synk): window (un)partition + cyclic roll stay as XLA layout shuffles;
    # the 6-D transposes are not worth the Mosaic-lowering risk at this size.
    xw = window_partition(xs, window)                                    # (T, C)

    # Per-head weight slabs so the kernel never lane-slices activations.
    wqkv_h = (p["qkv_w"].reshape(3, heads, Dh, C)
              .transpose(0, 1, 3, 2).reshape(3 * heads, C, Dh))          # (3H, C, Dh)
    bqkv_h = p["qkv_b"].reshape(3 * heads, 1, Dh)
    wproj_h = p["proj_w"].reshape(C, heads, Dh).transpose(1, 2, 0)       # (H, Dh, C)
    relb = relative_position_bias(p["rpb"], window, heads)               # (H, N, N)
    mask = make_window_mask(H, W, window, shift)                         # (nwin,N,N)|None
    bias = build_attention_bias(relb, mask, B, nwin, window, heads)      # (H, T, T)

    args = [xw, p["n1g"].reshape(1, C), p["n1b"].reshape(1, C),
            wqkv_h, bqkv_h, bias,
            wproj_h, p["proj_b"].reshape(1, C),
            p["n2g"].reshape(1, C), p["n2b"].reshape(1, C),
            p["w1"].T, p["b1"].reshape(1, hidden),
            p["w2"].T, p["b2"].reshape(1, C)]

    kern = functools.partial(_swin_block_kernel, heads=heads,
                             scale=Dh ** -0.5, eps=LN_EPS)
    yw = _single_block_call(kern, args, jax.ShapeDtypeStruct((T, C), x.dtype))

    y = window_unpartition(yw, B, H, W, C, window)
    if shift > 0:
        y = jnp.roll(y, shift=(shift, shift), axis=(1, 2))
    return y


def patch_embed(x_nchw, p):
    B, Cin, Hin, Win = x_nchw.shape
    Hp, Wp = Hin // PATCH, Win // PATCH
    # Conv2d(k=4, s=4) == non-overlapping im2col + matmul.
    patches = x_nchw.reshape(B, Cin, Hp, PATCH, Wp, PATCH)
    patches = patches.transpose(0, 2, 4, 1, 3, 5).reshape(B * Hp * Wp, Cin * PATCH * PATCH)
    w = p["w"].reshape(EMBED, Cin * PATCH * PATCH).T
    args = [patches, w, p["b"].reshape(1, EMBED),
            p["ng"].reshape(1, EMBED), p["nb"].reshape(1, EMBED)]
    y = _single_block_call(
        functools.partial(_patch_embed_kernel, eps=LN_EPS),
        args, jax.ShapeDtypeStruct((B * Hp * Wp, EMBED), x_nchw.dtype))
    return y.reshape(B, Hp, Wp, EMBED)


def patch_merging(x, p):
    B, H, W, C = x.shape
    x0 = x[:, 0::2, 0::2, :]
    x1 = x[:, 1::2, 0::2, :]
    x2 = x[:, 0::2, 1::2, :]
    x3 = x[:, 1::2, 1::2, :]
    xc = jnp.concatenate([x0, x1, x2, x3], axis=-1).reshape(-1, 4 * C)
    args = [xc, p["ng"].reshape(1, 4 * C), p["nb"].reshape(1, 4 * C), p["red_w"].T]
    y = _single_block_call(
        functools.partial(_patch_merge_kernel, eps=LN_EPS),
        args, jax.ShapeDtypeStruct((xc.shape[0], 2 * C), x.dtype))
    return y.reshape(B, H // 2, W // 2, 2 * C)


def final_head(x, params):
    B, H, W, C = x.shape
    L = H * W
    x2 = x.reshape(B * L, C)
    # block-diagonal averaging matrix -> global average pool as one matmul
    pool = np.zeros((B, B * L), np.float32)
    for b in range(B):
        pool[b, b * L:(b + 1) * L] = 1.0 / L
    # lane-dense (128-wide) classifier; real 10 logits sliced out afterwards
    hw = jnp.zeros((C, HEAD_PAD), jnp.float32).at[:, :NUM_CLASSES].set(params["head_w"].T)
    hb = jnp.zeros((1, HEAD_PAD), jnp.float32).at[:, :NUM_CLASSES].set(
        params["head_b"].reshape(1, -1))
    args = [x2, params["norm_g"].reshape(1, C), params["norm_b"].reshape(1, C),
            jnp.asarray(pool), hw, hb]
    logits = _single_block_call(
        functools.partial(_final_kernel, eps=LN_EPS),
        args, jax.ShapeDtypeStruct((B, HEAD_PAD), x.dtype))
    return logits[:, :NUM_CLASSES]


# ------------------------------ full forward --------------------------------
def forward(params, x_nchw):
    x = patch_embed(x_nchw, params["patch"])                 # (B, Hp, Wp, EMBED)
    for s, stage in enumerate(params["stages"]):
        for i, blk in enumerate(stage["blocks"]):
            shift = 0 if (i % 2 == 0) else WINDOW // 2
            x = swin_block(x, blk, HEADS[s], WINDOW, shift)
        if stage["merge"] is not None:
            x = patch_merging(x, stage["merge"])
    return final_head(x, params)                             # (B, NUM_CLASSES)


# ------------------------------ parameters ----------------------------------
class KeyGen:
    def __init__(self, seed):
        self.key = jax.random.PRNGKey(seed)
        self.i = 0

    def __call__(self):
        self.i += 1
        return jax.random.fold_in(self.key, self.i)


def init_params():
    kg = KeyGen(0)

    def w(shape):
        return 0.02 * jax.random.normal(kg(), shape, jnp.float32)

    params = {
        "patch": dict(
            w=w((EMBED, 3, PATCH, PATCH)),
            b=jnp.zeros((EMBED,), jnp.float32),
            ng=jnp.ones((EMBED,), jnp.float32),
            nb=jnp.zeros((EMBED,), jnp.float32),
        )
    }
    stages = []
    dim = EMBED
    for s in range(len(DEPTHS)):
        hidden = int(MLP_RATIO * dim)
        blocks = []
        for _ in range(DEPTHS[s]):
            blocks.append(dict(
                n1g=jnp.ones((dim,), jnp.float32), n1b=jnp.zeros((dim,), jnp.float32),
                qkv_w=w((3 * dim, dim)), qkv_b=jnp.zeros((3 * dim,), jnp.float32),
                rpb=w(((2 * WINDOW - 1) ** 2, HEADS[s])),
                proj_w=w((dim, dim)), proj_b=jnp.zeros((dim,), jnp.float32),
                n2g=jnp.ones((dim,), jnp.float32), n2b=jnp.zeros((dim,), jnp.float32),
                w1=w((hidden, dim)), b1=jnp.zeros((hidden,), jnp.float32),
                w2=w((dim, hidden)), b2=jnp.zeros((dim,), jnp.float32),
            ))
        merge = None
        if s < len(DEPTHS) - 1:
            merge = dict(
                ng=jnp.ones((4 * dim,), jnp.float32),
                nb=jnp.zeros((4 * dim,), jnp.float32),
                red_w=w((2 * dim, 4 * dim)),
            )
        stages.append(dict(blocks=blocks, merge=merge))
        if s < len(DEPTHS) - 1:
            dim *= 2
    params["stages"] = stages
    params["norm_g"] = jnp.ones((dim,), jnp.float32)
    params["norm_b"] = jnp.zeros((dim,), jnp.float32)
    params["head_w"] = w((NUM_CLASSES, dim))
    params["head_b"] = jnp.zeros((NUM_CLASSES,), jnp.float32)
    return params


# --------------------------------- main --------------------------------------
if __name__ == "__main__":
    key = jax.random.PRNGKey(0)
    x = jax.random.normal(key, (2, 3, 32, 32), jnp.float32)  # NCHW, like PyTorch
    params = init_params()

    logits = jax.jit(forward)(params, x)
    jax.block_until_ready(logits)

    assert logits.shape == (2, NUM_CLASSES), logits.shape
    assert bool(jnp.all(jnp.isfinite(logits)))
    print("KERNEL_OK")
</pallas_src>

<mosaic_0001>
module attributes {stable_mosaic.version = 11 : i64} {
  func.func @_patch_embed_kernel(%arg0: i32, %arg1: memref<128x48xf32, #tpu.memory_space<vmem>>, %arg2: memref<48x32xf32, #tpu.memory_space<vmem>>, %arg3: memref<1x32xf32, #tpu.memory_space<vmem>>, %arg4: memref<1x32xf32, #tpu.memory_space<vmem>>, %arg5: memref<1x32xf32, #tpu.memory_space<vmem>>, %arg6: memref<128x32xf32, #tpu.memory_space<vmem>>) attributes {dimension_semantics = [#tpu.dimension_semantics<arbitrary>], iteration_bounds = array<i64: 1>, scalar_prefetch = 0 : i64, scratch_operands = 0 : i64, tpu.core_type = #tpu.core_type<tc>, window_params = [{pipeline_mode = #tpu.pipeline_mode<synchronous>, transform_indices = @transform_0, window_bounds = array<i64: 128, 48>}, {pipeline_mode = #tpu.pipeline_mode<synchronous>, transform_indices = @transform_1, window_bounds = array<i64: 48, 32>}, {pipeline_mode = #tpu.pipeline_mode<synchronous>, transform_indices = @transform_2, window_bounds = array<i64: 1, 32>}, {pipeline_mode = #tpu.pipeline_mode<synchronous>, transform_indices = @transform_3, window_bounds = array<i64: 1, 32>}, {pipeline_mode = #tpu.pipeline_mode<synchronous>, transform_indices = @transform_4, window_bounds = array<i64: 1, 32>}, {pipeline_mode = #tpu.pipeline_mode<synchronous>, transform_indices = @transform_5, window_bounds = array<i64: 128, 32>}]} {
    %c0 = arith.constant 0 : index
    %c0_0 = arith.constant 0 : index
    %0 = vector.load %arg1[%c0, %c0_0] : memref<128x48xf32, #tpu.memory_space<vmem>>, vector<128x48xf32>
    %c0_1 = arith.constant 0 : index
    %c0_2 = arith.constant 0 : index
    %1 = vector.load %arg2[%c0_1, %c0_2] : memref<48x32xf32, #tpu.memory_space<vmem>>, vector<48x32xf32>
    %2 = arith.truncf %0 : vector<128x48xf32> to vector<128x48xbf16>
    %3 = arith.truncf %1 : vector<48x32xf32> to vector<48x32xbf16>
    %cst = arith.constant dense<0.000000e+00> : vector<128x32xf32>
    %4 = tpu.matmul %2, %3, %cst {dimension_numbers = #tpu.dot_dimension_numbers<[1], [0], [0], [1], [0, 0, 1, 1], [], []>} : vector<128x48xbf16>, vector<48x32xbf16>, vector<128x32xf32> -> vector<128x32xf32>
    %c0_3 = arith.constant 0 : index
    %c0_4 = arith.constant 0 : index
    %5 = vector.load %arg3[%c0_3, %c0_4] : memref<1x32xf32, #tpu.memory_space<vmem>>, vector<1x32xf32>
    %6 = vector.broadcast %5 : vector<1x32xf32> to vector<128x32xf32>
    %7 = arith.addf %4, %6 : vector<128x32xf32>
    %cst_5 = arith.constant dense<0.000000e+00> : vector<128xf32>
    %8 = vector.multi_reduction <add>, %7, %cst_5 [1] : vector<128x32xf32> to vector<128xf32>
    %9 = vector.shape_cast %8 : vector<128xf32> to vector<128x1xf32>
    %cst_6 = arith.constant 3.200000e+01 : f32
    %10 = vector.broadcast %cst_6 : f32 to vector<128x1xf32>
    %11 = arith.divf %9, %10 : vector<128x1xf32>
    %12 = vector.broadcast %11 : vector<128x1xf32> to vector<128x32xf32>
    %13 = arith.subf %7, %12 : vector<128x32xf32>
    %14 = arith.mulf %13, %13 : vector<128x32xf32>
    %cst_7 = arith.constant dense<0.000000e+00> : vector<128xf32>
    %15 = vector.multi_reduction <add>, %14, %cst_7 [1] : vector<128x32xf32> to vector<128xf32>
    %16 = vector.shape_cast %15 : vector<128xf32> to vector<128x1xf32>
    %cst_8 = arith.constant 3.200000e+01 : f32
    %17 = vector.broadcast %cst_8 : f32 to vector<128x1xf32>
    %18 = arith.divf %16, %17 : vector<128x1xf32>
    %cst_9 = arith.constant 9.99999974E-6 : f32
    %19 = vector.broadcast %cst_9 : f32 to vector<128x1xf32>
    %20 = arith.addf %18, %19 : vector<128x1xf32>
    %21 = math.rsqrt %20 : vector<128x1xf32>
    %22 = vector.broadcast %21 : vector<128x1xf32> to vector<128x32xf32>
    %23 = arith.mulf %13, %22 : vector<128x32xf32>
    %c0_10 = arith.constant 0 : index
    %c0_11 = arith.constant 0 : index
    %24 = vector.load %arg4[%c0_10, %c0_11] : memref<1x32xf32, #tpu.memory_space<vmem>>, vector<1x32xf32>
    %25 = vector.broadcast %24 : vector<1x32xf32> to vector<128x32xf32>
    %26 = arith.mulf %23, %25 : vector<128x32xf32>
    %c0_12 = arith.constant 0 : index
    %c0_13 = arith.constant 0 : index
    %27 = vector.load %arg5[%c0_12, %c0_13] : memref<1x32xf32, #tpu.memory_space<vmem>>, vector<1x32xf32>
    %28 = vector.broadcast %27 : vector<1x32xf32> to vector<128x32xf32>
    %29 = arith.addf %26, %28 : vector<128x32xf32>
    %c0_14 = arith.constant 0 : index
    %c0_15 = arith.constant 0 : index
    %30 = vector.load %arg6[%c0_14, %c0_15] : memref<128x32xf32, #tpu.memory_space<vmem>>, vector<128x32xf32>
    tpu.vector_store %arg6[%c0_14, %c0_15], %29 {strides = array<i32>} : memref<128x32xf32, #tpu.memory_space<vmem>>, vector<128x32xf32>,
    return
  }
  func.func @transform_0(%arg0: i32) -> (i32, i32) {
    %c0_i32 = arith.constant 0 : i32
    %c0_i32_0 = arith.constant 0 : i32
    %c0_i32_1 = arith.constant 0 : i32
    return %c0_i32, %c0_i32_0 : i32, i32
  }
  func.func @transform_1(%arg0: i32) -> (i32, i32) {
    %c0_i32 = arith.constant 0 : i32
    %c0_i32_0 = arith.constant 0 : i32
    %c0_i32_1 = arith.constant 0 : i32
    return %c0_i32, %c0_i32_0 : i32, i32
  }
  func.func @transform_2(%arg0: i32) -> (i32, i32) {
    %c0_i32 = arith.constant 0 : i32
    %c0_i32_0 = arith.constant 0 : i32
    %c0_i32_1 = arith.constant 0 : i32
    return %c0_i32, %c0_i32_0 : i32, i32
  }
  func.func @transform_3(%arg0: i32) -> (i32, i32) {
    %c0_i32 = arith.constant 0 : i32
    %c0_i32_0 = arith.constant 0 : i32
    %c0_i32_1 = arith.constant 0 : i32
    return %c0_i32, %c0_i32_0 : i32, i32
  }
  func.func @transform_4(%arg0: i32) -> (i32, i32) {
    %c0_i32 = arith.constant 0 : i32
    %c0_i32_0 = arith.constant 0 : i32
    %c0_i32_1 = arith.constant 0 : i32
    return %c0_i32, %c0_i32_0 : i32, i32
  }
  func.func @transform_5(%arg0: i32) -> (i32, i32) {
    %c0_i32 = arith.constant 0 : i32
    %c0_i32_0 = arith.constant 0 : i32
    %c0_i32_1 = arith.constant 0 : i32
    return %c0_i32, %c0_i32_0 : i32, i32
  }
}

module attributes {stable_mosaic.version = 11 : i64} {
  func.func @_swin_block_kernel(%arg0: i32, %arg1: memref<128x32xf32, #tpu.memory_space<vmem>>, %arg2: memref<1x32xf32, #tpu.memory_space<vmem>>, %arg3: memref<1x32xf32, #tpu.memory_space<vmem>>, %arg4: memref<6x32x16xf32, #tpu.memory_space<vmem>>, %arg5: memref<6x1x16xf32, #tpu.memory_space<vmem>>, %arg6: memref<2x128x128xf32, #tpu.memory_space<vmem>>, %arg7: memref<2x16x32xf32, #tpu.memory_space<vmem>>, %arg8: memref<1x32xf32, #tpu.memory_space<vmem>>, %arg9: memref<1x32xf32, #tpu.memory_space<vmem>>, %arg10: memref<1x32xf32, #tpu.memory_space<vmem>>, %arg11: memref<32x128xf32, #tpu.memory_space<vmem>>, %arg12: memref<1x128xf32, #tpu.memory_space<vmem>>, %arg13: memref<128x32xf32, #tpu.memory_space<vmem>>, %arg14: memref<1x32xf32, #tpu.memory_space<vmem>>, %arg15: memref<128x32xf32, #tpu.memory_space<vmem>>) attributes {dimension_semantics = [#tpu.dimension_semantics<arbitrary>], iteration_bounds = array<i64: 1>, scalar_prefetch = 0 : i64, scratch_operands = 0 : i64, tpu.core_type = #tpu.core_type<tc>, window_params = [{pipeline_mode = #tpu.pipeline_mode<synchronous>, transform_indices = @transform_0, window_bounds = array<i64: 128, 32>}, {pipeline_mode = #tpu.pipeline_mode<synchronous>, transform_indices = @transform_1, window_bounds = array<i64: 1, 32>}, {pipeline_mode = #tpu.pipeline_mode<synchronous>, transform_indices = @transform_2, window_bounds = array<i64: 1, 32>}, {pipeline_mode = #tpu.pipeline_mode<synchronous>, transform_indices = @transform_3, window_bounds = array<i64: 6, 32, 16>}, {pipeline_mode = #tpu.pipeline_mode<synchronous>, transform_indices = @transform_4, window_bounds = array<i64: 6, 1, 16>}, {pipeline_mode = #tpu.pipeline_mode<synchronous>, transform_indices = @transform_5, window_bounds = array<i64: 2, 128, 128>}, {pipeline_mode = #tpu.pipeline_mode<synchronous>, transform_indices = @transform_6, window_bounds = array<i64: 2, 16, 32>}, {pipeline_mode = #tpu.pipeline_mode<synchronous>, transform_indices = @transform_7, window_bounds = array<i64: 1, 32>}, {pipeline_mode = #tpu.pipeline_mode<synchronous>, transform_indices = @transform_8, window_bounds = array<i64: 1, 32>}, {pipeline_mode = #tpu.pipeline_mode<synchronous>, transform_indices = @transform_9, window_bounds = array<i64: 1, 32>}, {pipeline_mode = #tpu.pipeline_mode<synchronous>, transform_indices = @transform_10, window_bounds = array<i64: 32, 128>}, {pipeline_mode = #tpu.pipeline_mode<synchronous>, transform_indices = @transform_11, window_bounds = array<i64: 1, 128>}, {pipeline_mode = #tpu.pipeline_mode<synchronous>, transform_indices = @transform_12, window_bounds = array<i64: 128, 32>}, {pipeline_mode = #tpu.pipeline_mode<synchronous>, transform_indices = @transform_13, window_bounds = array<i64: 1, 32>}, {pipeline_mode = #tpu.pipeline_mode<synchronous>, transform_indices = @transform_14, window_bounds = array<i64: 128, 32>}]} {
    %c0 = arith.constant 0 : index
    %c0_0 = arith.constant 0 : index
    %0 = vector.load %arg1[%c0, %c0_0] : memref<128x32xf32, #tpu.memory_space<vmem>>, vector<128x32xf32>
    %cst = arith.constant dense<0.000000e+00> : vector<128xf32>
    %1 = vector.multi_reduction <add>, %0, %cst [1] : vector<128x32xf32> to vector<128xf32>
    %2 = vector.shape_cast %1 : vector<128xf32> to vector<128x1xf32>
    %cst_1 = arith.constant 3.200000e+01 : f32
    %3 = vector.broadcast %cst_1 : f32 to vector<128x1xf32>
    %4 = arith.divf %2, %3 : vector<128x1xf32>
    %5 = vector.broadcast %4 : vector<128x1xf32> to vector<128x32xf32>
    %6 = arith.subf %0, %5 : vector<128x32xf32>
    %7 = arith.mulf %6, %6 : vector<128x32xf32>
    %cst_2 = arith.constant dense<0.000000e+00> : vector<128xf32>
    %8 = vector.multi_reduction <add>, %7, %cst_2 [1] : vector<128x32xf32> to vector<128xf32>
    %9 = vector.shape_cast %8 : vector<128xf32> to vector<128x1xf32>
    %cst_3 = arith.constant 3.200000e+01 : f32
    %10 = vector.broadcast %cst_3 : f32 to vector<128x1xf32>
    %11 = arith.divf %9, %10 : vector<128x1xf32>
    %cst_4 = arith.constant 9.99999974E-6 : f32
    %12 = vector.broadcast %cst_4 : f32 to vector<128x1xf32>
    %13 = arith.addf %11, %12 : vector<128x1xf32>
    %14 = math.rsqrt %13 : vector<128x1xf32>
    %15 = vector.broadcast %14 : vector<128x1xf32> to vector<128x32xf32>
    %16 = arith.mulf %6, %15 : vector<128x32xf32>
    %c0_5 = arith.constant 0 : index
    %c0_6 = arith.constant 0 : index
    %17 = vector.load %arg2[%c0_5, %c0_6] : memref<1x32xf32, #tpu.memory_space<vmem>>, vector<1x32xf32>
    %18 = vector.broadcast %17 : vector<1x32xf32> to vector<128x32xf32>
    %19 = arith.mulf %16, %18 : vector<128x32xf32>
    %c0_7 = arith.constant 0 : index
    %c0_8 = arith.constant 0 : index
    %20 = vector.load %arg3[%c0_7, %c0_8] : memref<1x32xf32, #tpu.memory_space<vmem>>, vector<1x32xf32>
    %21 = vector.broadcast %20 : vector<1x32xf32> to vector<128x32xf32>
    %22 = arith.addf %19, %21 : vector<128x32xf32>
    %23 = arith.truncf %22 : vector<128x32xf32> to vector<128x32xbf16>
    %cst_9 = arith.constant 0.000000e+00 : f32
    %24 = vector.broadcast %cst_9 : f32 to vector<128x32xf32>
    %c0_10 = arith.constant 0 : index
    %c0_11 = arith.constant 0 : index
    %c0_12 = arith.constant 0 : index
    %25 = vector.load %arg4[%c0_10, %c0_11, %c0_12] : memref<6x32x16xf32, #tpu.memory_space<vmem>>, vector<1x32x16xf32>
    %26 = vector.shape_cast %25 : vector<1x32x16xf32> to vector<32x16xf32>
    %27 = arith.truncf %26 : vector<32x16xf32> to vector<32x16xbf16>
    %cst_13 = arith.constant dense<0.000000e+00> : vector<128x16xf32>
    %28 = tpu.matmul %23, %27, %cst_13 {dimension_numbers = #tpu.dot_dimension_numbers<[1], [0], [0], [1], [0, 0, 1, 1], [], []>} : vector<128x32xbf16>, vector<32x16xbf16>, vector<128x16xf32> -> vector<128x16xf32>
    %c0_14 = arith.constant 0 : index
    %c0_15 = arith.constant 0 : index
    %c0_16 = arith.constant 0 : index
    %29 = vector.load %arg5[%c0_14, %c0_15, %c0_16] : memref<6x1x16xf32, #tpu.memory_space<vmem>>, vector<1x1x16xf32>
    %30 = vector.shape_cast %29 : vector<1x1x16xf32> to vector<1x16xf32>
    %31 = vector.broadcast %30 : vector<1x16xf32> to vector<128x16xf32>
    %32 = arith.addf %28, %31 : vector<128x16xf32>
    %cst_17 = arith.constant 2.500000e-01 : f32
    %33 = vector.broadcast %cst_17 : f32 to vector<128x16xf32>
    %34 = arith.mulf %32, %33 : vector<128x16xf32>
    %c2 = arith.constant 2 : index
    %c0_18 = arith.constant 0 : index
    %c0_19 = arith.constant 0 : index
    %35 = vector.load %arg4[%c2, %c0_18, %c0_19] : memref<6x32x16xf32, #tpu.memory_space<vmem>>, vector<1x32x16xf32>
    %36 = vector.shape_cast %35 : vector<1x32x16xf32> to vector<32x16xf32>
    %37 = arith.truncf %36 : vector<32x16xf32> to vector<32x16xbf16>
    %cst_20 = arith.constant dense<0.000000e+00> : vector<128x16xf32>
    %38 = tpu.matmul %23, %37, %cst_20 {dimension_numbers = #tpu.dot_dimension_numbers<[1], [0], [0], [1], [0, 0, 1, 1], [], []>} : vector<128x32xbf16>, vector<32x16xbf16>, vector<128x16xf32> -> vector<128x16xf32>
    %c2_21 = arith.constant 2 : index
    %c0_22 = arith.constant 0 : index
    %c0_23 = arith.constant 0 : index
    %39 = vector.load %arg5[%c2_21, %c0_22, %c0_23] : memref<6x1x16xf32, #tpu.memory_space<vmem>>, vector<1x1x16xf32>
    %40 = vector.shape_cast %39 : vector<1x1x16xf32> to vector<1x16xf32>
    %41 = vector.broadcast %40 : vector<1x16xf32> to vector<128x16xf32>
    %42 = arith.addf %38, %41 : vector<128x16xf32>
    %c4 = arith.constant 4 : index
    %c0_24 = arith.constant 0 : index
    %c0_25 = arith.constant 0 : index
    %43 = vector.load %arg4[%c4, %c0_24, %c0_25] : memref<6x32x16xf32, #tpu.memory_space<vmem>>, vector<1x32x16xf32>
    %44 = vector.shape_cast %43 : vector<1x32x16xf32> to vector<32x16xf32>
    %45 = arith.truncf %44 : vector<32x16xf32> to vector<32x16xbf16>
    %cst_26 = arith.constant dense<0.000000e+00> : vector<128x16xf32>
    %46 = tpu.matmul %23, %45, %cst_26 {dimension_numbers = #tpu.dot_dimension_numbers<[1], [0], [0], [1], [0, 0, 1, 1], [], []>} : vector<128x32xbf16>, vector<32x16xbf16>, vector<128x16xf32> -> vector<128x16xf32>
    %c4_27 = arith.constant 4 : index
    %c0_28 = arith.constant 0 : index
    %c0_29 = arith.constant 0 : index
    %47 = vector.load %arg5[%c4_27, %c0_28, %c0_29] : memref<6x1x16xf32, #tpu.memory_space<vmem>>, vector<1x1x16xf32>
    %48 = vector.shape_cast %47 : vector<1x1x16xf32> to vector<1x16xf32>
    %49 = vector.broadcast %48 : vector<1x16xf32> to vector<128x16xf32>
    %50 = arith.addf %46, %49 : vector<128x16xf32>
    %51 = arith.truncf %34 : vector<128x16xf32> to vector<128x16xbf16>
    %52 = arith.truncf %42 : vector<128x16xf32> to vector<128x16xbf16>
    %cst_30 = arith.constant dense<0.000000e+00> : vector<128x128xf32>
    %53 = tpu.matmul %51, %52, %cst_30 {dimension_numbers = #tpu.dot_dimension_numbers<[1], [1], [0], [0], [0, 0, 1, 0], [], []>} : vector<128x16xbf16>, vector<128x16xbf16>, vector<128x128xf32> -> vector<128x128xf32>
    %c0_31 = arith.constant 0 : index
    %c0_32 = arith.constant 0 : index
    %c0_33 = arith.constant 0 : index
    %54 = vector.load %arg6[%c0_31, %c0_32, %c0_33] : memref<2x128x128xf32, #tpu.memory_space<vmem>>, vector<1x128x128xf32>
    %55 = vector.shape_cast %54 : vector<1x128x128xf32> to vector<128x128xf32>
    %56 = arith.addf %53, %55 : vector<128x128xf32>
    %cst_34 = arith.constant dense<0xFF800000> : vector<128xf32>
    %57 = vector.multi_reduction <maximumf>, %56, %cst_34 [1] : vector<128x128xf32> to vector<128xf32>
    %58 = vector.shape_cast %57 : vector<128xf32> to vector<128x1xf32>
    %59 = vector.broadcast %58 : vector<128x1xf32> to vector<128x128xf32>
    %60 = arith.subf %56, %59 : vector<128x128xf32>
    %61 = math.exp %60 : vector<128x128xf32>
    %cst_35 = arith.constant dense<0.000000e+00> : vector<128xf32>
    %62 = vector.multi_reduction <add>, %61, %cst_35 [1] : vector<128x128xf32> to vector<128xf32>
    %63 = vector.shape_cast %62 : vector<128xf32> to vector<128x1xf32>
    %64 = tpu.reciprocal %63 {approx = true} : vector<128x1xf32> -> vector<128x1xf32>
    %65 = vector.broadcast %64 : vector<128x1xf32> to vector<128x128xf32>
    %66 = arith.mulf %61, %65 : vector<128x128xf32>
    %67 = arith.truncf %66 : vector<128x128xf32> to vector<128x128xbf16>
    %68 = arith.truncf %50 : vector<128x16xf32> to vector<128x16xbf16>
    %cst_36 = arith.constant dense<0.000000e+00> : vector<128x16xf32>
    %69 = tpu.matmul %67, %68, %cst_36 {dimension_numbers = #tpu.dot_dimension_numbers<[1], [0], [0], [1], [0, 0, 1, 1], [], []>} : vector<128x128xbf16>, vector<128x16xbf16>, vector<128x16xf32> -> vector<128x16xf32>
    %c0_37 = arith.constant 0 : index
    %c0_38 = arith.constant 0 : index
    %c0_39 = arith.constant 0 : index
    %70 = vector.load %arg7[%c0_37, %c0_38, %c0_39] : memref<2x16x32xf32, #tpu.memory_space<vmem>>, vector<1x16x32xf32>
    %71 = vector.shape_cast %70 : vector<1x16x32xf32> to vector<16x32xf32>
    %72 = arith.truncf %69 : vector<128x16xf32> to vector<128x16xbf16>
    %73 = arith.truncf %71 : vector<16x32xf32> to vector<16x32xbf16>
    %cst_40 = arith.constant dense<0.000000e+00> : vector<128x32xf32>
    %74 = tpu.matmul %72, %73, %cst_40 {dimension_numbers = #tpu.dot_dimension_numbers<[1], [0], [0], [1], [0, 0, 1, 1], [], []>} : vector<128x16xbf16>, vector<16x32xbf16>, vector<128x32xf32> -> vector<128x32xf32>
    %75 = arith.addf %24, %74 : vector<128x32xf32>
    %c1 = arith.constant 1 : index
    %c0_41 = arith.constant 0 : index
    %c0_42 = arith.constant 0 : index
    %76 = vector.load %arg4[%c1, %c0_41, %c0_42] : memref<6x32x16xf32, #tpu.memory_space<vmem>>, vector<1x32x16xf32>
    %77 = vector.shape_cast %76 : vector<1x32x16xf32> to vector<32x16xf32>
    %78 = arith.truncf %77 : vector<32x16xf32> to vector<32x16xbf16>
    %cst_43 = arith.constant dense<0.000000e+00> : vector<128x16xf32>
    %79 = tpu.matmul %23, %78, %cst_43 {dimension_numbers = #tpu.dot_dimension_numbers<[1], [0], [0], [1], [0, 0, 1, 1], [], []>} : vector<128x32xbf16>, vector<32x16xbf16>, vector<128x16xf32> -> vector<128x16xf32>
    %c1_44 = arith.constant 1 : index
    %c0_45 = arith.constant 0 : index
    %c0_46 = arith.constant 0 : index
    %80 = vector.load %arg5[%c1_44, %c0_45, %c0_46] : memref<6x1x16xf32, #tpu.memory_space<vmem>>, vector<1x1x16xf32>
    %81 = vector.shape_cast %80 : vector<1x1x16xf32> to vector<1x16xf32>
    %82 = vector.broadcast %81 : vector<1x16xf32> to vector<128x16xf32>
    %83 = arith.addf %79, %82 : vector<128x16xf32>
    %cst_47 = arith.constant 2.500000e-01 : f32
    %84 = vector.broadcast %cst_47 : f32 to vector<128x16xf32>
    %85 = arith.mulf %83, %84 : vector<128x16xf32>
    %c3 = arith.constant 3 : index
    %c0_48 = arith.constant 0 : index
    %c0_49 = arith.constant 0 : index
    %86 = vector.load %arg4[%c3, %c0_48, %c0_49] : memref<6x32x16xf32, #tpu.memory_space<vmem>>, vector<1x32x16xf32>
    %87 = vector.shape_cast %86 : vector<1x32x16xf32> to vector<32x16xf32>
    %88 = arith.truncf %87 : vector<32x16xf32> to vector<32x16xbf16>
    %cst_50 = arith.constant dense<0.000000e+00> : vector<128x16xf32>
    %89 = tpu.matmul %23, %88, %cst_50 {dimension_numbers = #tpu.dot_dimension_numbers<[1], [0], [0], [1], [0, 0, 1, 1], [], []>} : vector<128x32xbf16>, vector<32x16xbf16>, vector<128x16xf32> -> vector<128x16xf32>
    %c3_51 = arith.constant 3 : index
    %c0_52 = arith.constant 0 : index
    %c0_53 = arith.constant 0 : index
    %90 = vector.load %arg5[%c3_51, %c0_52, %c0_53] : memref<6x1x16xf32, #tpu.memory_space<vmem>>, vector<1x1x16xf32>
    %91 = vector.shape_cast %90 : vector<1x1x16xf32> to vector<1x16xf32>
    %92 = vector.broadcast %91 : vector<1x16xf32> to vector<128x16xf32>
    %93 = arith.addf %89, %92 : vector<128x16xf32>
    %c5 = arith.constant 5 : index
    %c0_54 = arith.constant 0 : index
    %c0_55 = arith.constant 0 : index
    %94 = vector.load %arg4[%c5, %c0_54, %c0_55] : memref<6x32x16xf32, #tpu.memory_space<vmem>>, vector<1x32x16xf32>
    %95 = vector.shape_cast %94 : vector<1x32x16xf32> to vector<32x16xf32>
    %96 = arith.truncf %95 : vector<32x16xf32> to vector<32x16xbf16>
    %cst_56 = arith.constant dense<0.000000e+00> : vector<128x16xf32>
    %97 = tpu.matmul %23, %96, %cst_56 {dimension_numbers = #tpu.dot_dimension_numbers<[1], [0], [0], [1], [0, 0, 1, 1], [], []>} : vector<128x32xbf16>, vector<32x16xbf16>, vector<128x16xf32> -> vector<128x16xf32>
    %c5_57 = arith.constant 5 : index
    %c0_58 = arith.constant 0 : index
    %c0_59 = arith.constant 0 : index
    %98 = vector.load %arg5[%c5_57, %c0_58, %c0_59] : memref<6x1x16xf32, #tpu.memory_space<vmem>>, vector<1x1x16xf32>
    %99 = vector.shape_cast %98 : vector<1x1x16xf32> to vector<1x16xf32>
    %100 = vector.broadcast %99 : vector<1x16xf32> to vector<128x16xf32>
    %101 = arith.addf %97, %100 : vector<128x16xf32>
    %102 = arith.truncf %85 : vector<128x16xf32> to vector<128x16xbf16>
    %103 = arith.truncf %93 : vector<128x16xf32> to vector<128x16xbf16>
    %cst_60 = arith.constant dense<0.000000e+00> : vector<128x128xf32>
    %104 = tpu.matmul %102, %103, %cst_60 {dimension_numbers = #tpu.dot_dimension_numbers<[1], [1], [0], [0], [0, 0, 1, 0], [], []>} : vector<128x16xbf16>, vector<128x16xbf16>, vector<128x128xf32> -> vector<128x128xf32>
    %c1_61 = arith.constant 1 : index
    %c0_62 = arith.constant 0 : index
    %c0_63 = arith.constant 0 : index
    %105 = vector.load %arg6[%c1_61, %c0_62, %c0_63] : memref<2x128x128xf32, #tpu.memory_space<vmem>>, vector<1x128x128xf32>
    %106 = vector.shape_cast %105 : vector<1x128x128xf32> to vector<128x128xf32>
    %107 = arith.addf %104, %106 : vector<128x128xf32>
    %cst_64 = arith.constant dense<0xFF800000> : vector<128xf32>
    %108 = vector.multi_reduction <maximumf>, %107, %cst_64 [1] : vector<128x128xf32> to vector<128xf32>
    %109 = vector.shape_cast %108 : vector<128xf32> to vector<128x1xf32>
    %110 = vector.broadcast %109 : vector<128x1xf32> to vector<128x128xf32>
    %111 = arith.subf %107, %110 : vector<128x128xf32>
    %112 = math.exp %111 : vector<128x128xf32>
    %cst_65 = arith.constant dense<0.000000e+00> : vector<128xf32>
    %113 = vector.multi_reduction <add>, %112, %cst_65 [1] : vector<128x128xf32> to vector<128xf32>
    %114 = vector.shape_cast %113 : vector<128xf32> to vector<128x1xf32>
    %115 = tpu.reciprocal %114 {approx = true} : vector<128x1xf32> -> vector<128x1xf32>
    %116 = vector.broadcast %115 : vector<128x1xf32> to vector<128x128xf32>
    %117 = arith.mulf %112, %116 : vector<128x128xf32>
    %118 = arith.truncf %117 : vector<128x128xf32> to vector<128x128xbf16>
    %119 = arith.truncf %101 : vector<128x16xf32> to vector<128x16xbf16>
    %cst_66 = arith.constant dense<0.000000e+00> : vector<128x16xf32>
    %120 = tpu.matmul %118, %119, %cst_66 {dimension_numbers = #tpu.dot_dimension_numbers<[1], [0], [0], [1], [0, 0, 1, 1], [], []>} : vector<128x128xbf16>, vector<128x16xbf16>, vector<128x16xf32> -> vector<128x16xf32>
    %c1_67 = arith.constant 1 : index
    %c0_68 = arith.constant 0 : index
    %c0_69 = arith.constant 0 : index
    %121 = vector.load %arg7[%c1_67, %c0_68, %c0_69] : memref<2x16x32xf32, #tpu.memory_space<vmem>>, vector<1x16x32xf32>
    %122 = vector.shape_cast %121 : vector<1x16x32xf32> to vector<16x32xf32>
    %123 = arith.truncf %120 : vector<128x16xf32> to vector<128x16xbf16>
    %124 = arith.truncf %122 : vector<16x32xf32> to vector<16x32xbf16>
    %cst_70 = arith.constant dense<0.000000e+00> : vector<128x32xf32>
    %125 = tpu.matmul %123, %124, %cst_70 {dimension_numbers = #tpu.dot_dimension_numbers<[1], [0], [0], [1], [0, 0, 1, 1], [], []>} : vector<128x16xbf16>, vector<16x32xbf16>, vector<128x32xf32> -> vector<128x32xf32>
    %126 = arith.addf %75, %125 : vector<128x32xf32>
    %127 = arith.addf %0, %126 : vector<128x32xf32>
    %c0_71 = arith.constant 0 : index
    %c0_72 = arith.constant 0 : index
    %128 = vector.load %arg8[%c0_71, %c0_72] : memref<1x32xf32, #tpu.memory_space<vmem>>, vector<1x32xf32>
    %129 = vector.broadcast %128 : vector<1x32xf32> to vector<128x32xf32>
    %130 = arith.addf %127, %129 : vector<128x32xf32>
    %cst_73 = arith.constant dense<0.000000e+00> : vector<128xf32>
    %131 = vector.multi_reduction <add>, %130, %cst_73 [1] : vector<128x32xf32> to vector<128xf32>
    %132 = vector.shape_cast %131 : vector<128xf32> to vector<128x1xf32>
    %cst_74 = arith.constant 3.200000e+01 : f32
    %133 = vector.broadcast %cst_74 : f32 to vector<128x1xf32>
    %134 = arith.divf %132, %133 : vector<128x1xf32>
    %135 = vector.broadcast %134 : vector<128x1xf32> to vector<128x32xf32>
    %136 = arith.subf %130, %135 : vector<128x32xf32>
    %137 = arith.mulf %136, %136 : vector<128x32xf32>
    %cst_75 = arith.constant dense<0.000000e+00> : vector<128xf32>
    %138 = vector.multi_reduction <add>, %137, %cst_75 [1] : vector<128x32xf32> to vector<128xf32>
    %139 = vector.shape_cast %138 : vector<128xf32> to vector<128x1xf32>
    %cst_76 = arith.constant 3.200000e+01 : f32
    %140 = vector.broadcast %cst_76 : f32 to vector<128x1xf32>
    %141 = arith.divf %139, %140 : vector<128x1xf32>
    %cst_77 = arith.constant 9.99999974E-6 : f32
    %142 = vector.broadcast %cst_77 : f32 to vector<128x1xf32>
    %143 = arith.addf %141, %142 : vector<128x1xf32>
    %144 = math.rsqrt %143 : vector<128x1xf32>
    %145 = vector.broadcast %144 : vector<128x1xf32> to vector<128x32xf32>
    %146 = arith.mulf %136, %145 : vector<128x32xf32>
    %c0_78 = arith.constant 0 : index
    %c0_79 = arith.constant 0 : index
    %147 = vector.load %arg9[%c0_78, %c0_79] : memref<1x32xf32, #tpu.memory_space<vmem>>, vector<1x32xf32>
    %148 = vector.broadcast %147 : vector<1x32xf32> to vector<128x32xf32>
    %149 = arith.mulf %146, %148 : vector<128x32xf32>
    %c0_80 = arith.constant 0 : index
    %c0_81 = arith.constant 0 : index
    %150 = vector.load %arg10[%c0_80, %c0_81] : memref<1x32xf32, #tpu.memory_space<vmem>>, vector<1x32xf32>
    %151 = vector.broadcast %150 : vector<1x32xf32> to vector<128x32xf32>
    %152 = arith.addf %149, %151 : vector<128x32xf32>
    %c0_82 = arith.constant 0 : index
    %c0_83 = arith.constant 0 : index
    %153 = vector.load %arg11[%c0_82, %c0_83] : memref<32x128xf32, #tpu.memory_space<vmem>>, vector<32x128xf32>
    %154 = arith.truncf %152 : vector<128x32xf32> to vector<128x32xbf16>
    %155 = arith.truncf %153 : vector<32x128xf32> to vector<32x128xbf16>
    %cst_84 = arith.constant dense<0.000000e+00> : vector<128x128xf32>
    %156 = tpu.matmul %154, %155, %cst_84 {dimension_numbers = #tpu.dot_dimension_numbers<[1], [0], [0], [1], [0, 0, 1, 1], [], []>} : vector<128x32xbf16>, vector<32x128xbf16>, vector<128x128xf32> -> vector<128x128xf32>
    %c0_85 = arith.constant 0 : index
    %c0_86 = arith.constant 0 : index
    %157 = vector.load %arg12[%c0_85, %c0_86] : memref<1x128xf32, #tpu.memory_space<vmem>>, vector<1x128xf32>
    %158 = vector.broadcast %157 : vector<1x128xf32> to vector<128x128xf32>
    %159 = arith.addf %156, %158 : vector<128x128xf32>
    %160 = arith.mulf %159, %159 : vector<128x128xf32>
    %161 = arith.mulf %159, %160 : vector<128x128xf32>
    %cst_87 = arith.constant 4.471500e-02 : f32
    %162 = vector.broadcast %cst_87 : f32 to vector<128x128xf32>
    %163 = arith.mulf %162, %161 : vector<128x128xf32>
    %164 = arith.addf %159, %163 : vector<128x128xf32>
    %cst_88 = arith.constant 0.797884583 : f32
    %165 = vector.broadcast %cst_88 : f32 to vector<128x128xf32>
    %166 = arith.mulf %165, %164 : vector<128x128xf32>
    %167 = math.tanh %166 : vector<128x128xf32>
    %cst_89 = arith.constant 1.000000e+00 : f32
    %168 = vector.broadcast %cst_89 : f32 to vector<128x128xf32>
    %169 = arith.addf %168, %167 : vector<128x128xf32>
    %cst_90 = arith.constant 5.000000e-01 : f32
    %170 = vector.broadcast %cst_90 : f32 to vector<128x128xf32>
    %171 = arith.mulf %170, %169 : vector<128x128xf32>
    %172 = arith.mulf %159, %171 : vector<128x128xf32>
    %c0_91 = arith.constant 0 : index
    %c0_92 = arith.constant 0 : index
    %173 = vector.load %arg13[%c0_91, %c0_92] : memref<128x32xf32, #tpu.memory_space<vmem>>, vector<128x32xf32>
    %174 = arith.truncf %172 : vector<128x128xf32> to vector<128x128xbf16>
    %175 = arith.truncf %173 : vector<128x32xf32> to vector<128x32xbf16>
    %cst_93 = arith.constant dense<0.000000e+00> : vector<128x32xf32>
    %176 = tpu.matmul %174, %175, %cst_93 {dimension_numbers = #tpu.dot_dimension_numbers<[1], [0], [0], [1], [0, 0, 1, 1], [], []>} : vector<128x128xbf16>, vector<128x32xbf16>, vector<128x32xf32> -> vector<128x32xf32>
    %c0_94 = arith.constant 0 : index
    %c0_95 = arith.constant 0 : index
    %177 = vector.load %arg14[%c0_94, %c0_95] : memref<1x32xf32, #tpu.memory_space<vmem>>, vector<1x32xf32>
    %178 = vector.broadcast %177 : vector<1x32xf32> to vector<128x32xf32>
    %179 = arith.addf %176, %178 : vector<128x32xf32>
    %180 = arith.addf %130, %179 : vector<128x32xf32>
    %c0_96 = arith.constant 0 : index
    %c0_97 = arith.constant 0 : index
    %181 = vector.load %arg15[%c0_96, %c0_97] : memref<128x32xf32, #tpu.memory_space<vmem>>, vector<128x32xf32>
    tpu.vector_store %arg15[%c0_96, %c0_97], %180 {strides = array<i32>} : memref<128x32xf32, #tpu.memory_space<vmem>>, vector<128x32xf32>,
    return
  }
  func.func @transform_0(%arg0: i32) -> (i32, i32) {
    %c0_i32 = arith.constant 0 : i32
    %c0_i32_0 = arith.constant 0 : i32
    %c0_i32_1 = arith.constant 0 : i32
    return %c0_i32, %c0_i32_0 : i32, i32
  }
  func.func @transform_1(%arg0: i32) -> (i32, i32) {
    %c0_i32 = arith.constant 0 : i32
    %c0_i32_0 = arith.constant 0 : i32
    %c0_i32_1 = arith.constant 0 : i32
    return %c0_i32, %c0_i32_0 : i32, i32
  }
  func.func @transform_2(%arg0: i32) -> (i32, i32) {
    %c0_i32 = arith.constant 0 : i32
    %c0_i32_0 = arith.constant 0 : i32
    %c0_i32_1 = arith.constant 0 : i32
    return %c0_i32, %c0_i32_0 : i32, i32
  }
  func.func @transform_3(%arg0: i32) -> (i32, i32, i32) {
    %c0_i32 = arith.constant 0 : i32
    %c0_i32_0 = arith.constant 0 : i32
    %c0_i32_1 = arith.constant 0 : i32
    %c0_i32_2 = arith.constant 0 : i32
    return %c0_i32, %c0_i32_0, %c0_i32_1 : i32, i32, i32
  }
  func.func @transform_4(%arg0: i32) -> (i32, i32, i32) {
    %c0_i32 = arith.constant 0 : i32
    %c0_i32_0 = arith.constant 0 : i32
    %c0_i32_1 = arith.constant 0 : i32
    %c0_i32_2 = arith.constant 0 : i32
    return %c0_i32, %c0_i32_0, %c0_i32_1 : i32, i32, i32
  }
  func.func @transform_5(%arg0: i32) -> (i32, i32, i32) {
    %c0_i32 = arith.constant 0 : i32
    %c0_i32_0 = arith.constant 0 : i32
    %c0_i32_1 = arith.constant 0 : i32
    %c0_i32_2 = arith.constant 0 : i32
    return %c0_i32, %c0_i32_0, %c0_i32_1 : i32, i32, i32
  }
  func.func @transform_6(%arg0: i32) -> (i32, i32, i32) {
    %c0_i32 = arith.constant 0 : i32
    %c0_i32_0 = arith.constant 0 : i32
    %c0_i32_1 = arith.constant 0 : i32
    %c0_i32_2 = arith.constant 0 : i32
    return %c0_i32, %c0_i32_0, %c0_i32_1 : i32, i32, i32
  }
  func.func @transform_7(%arg0: i32) -> (i32, i32) {
    %c0_i32 = arith.constant 0 : i32
    %c0_i32_0 = arith.constant 0 : i32
    %c0_i32_1 = arith.constant 0 : i32
    return %c0_i32, %c0_i32_0 : i32, i32
  }
  func.func @transform_8(%arg0: i32) -> (i32, i32) {
    %c0_i32 = arith.constant 0 : i32
    %c0_i32_0 = arith.constant 0 : i32
    %c0_i32_1 = arith.constant 0 : i32
    return %c0_i32, %c0_i32_0 : i32, i32
  }
  func.func @transform_9(%arg0: i32) -> (i32, i32) {
    %c0_i32 = arith.constant 0 : i32
    %c0_i32_0 = arith.constant 0 : i32
    %c0_i32_1 = arith.constant 0 : i32
    return %c0_i32, %c0_i32_0 : i32, i32
  }
  func.func @transform_10(%arg0: i32) -> (i32, i32) {
    %c0_i32 = arith.constant 0 : i32
    %c0_i32_0 = arith.constant 0 : i32
    %c0_i32_1 = arith.constant 0 : i32
    return %c0_i32, %c0_i32_0 : i32, i32
  }
  func.func @transform_11(%arg0: i32) -> (i32, i32) {
    %c0_i32 = arith.constant 0 : i32
    %c0_i32_0 = arith.constant 0 : i32
    %c0_i32_1 = arith.constant 0 : i32
    return %c0_i32, %c0_i32_0 : i32, i32
  }
  func.func @transform_12(%arg0: i32) -> (i32, i32) {
    %c0_i32 = arith.constant 0 : i32
    %c0_i32_0 = arith.constant 0 : i32
    %c0_i32_1 = arith.constant 0 : i32
    return %c0_i32, %c0_i32_0 : i32, i32
  }
  func.func @transform_13(%arg0: i32) -> (i32, i32) {
    %c0_i32 = arith.constant 0 : i32
    %c0_i32_0 = arith.constant 0 : i32
    %c0_i32_1 = arith.constant 0 : i32
    return %c0_i32, %c0_i32_0 : i32, i32
  }
  func.func @transform_14(%arg0: i32) -> (i32, i32) {
    %c0_i32 = arith.constant 0 : i32
    %c0_i32_0 = arith.constant 0 : i32
    %c0_i32_1 = arith.constant 0 : i32
    return %c0_i32, %c0_i32_0 : i32, i32
  }
}

module attributes {stable_mosaic.version = 11 : i64} {
  func.func @_patch_merge_kernel(%arg0: i32, %arg1: memref<32x128xf32, #tpu.memory_space<vmem>>, %arg2: memref<1x128xf32, #tpu.memory_space<vmem>>, %arg3: memref<1x128xf32, #tpu.memory_space<vmem>>, %arg4: memref<128x64xf32, #tpu.memory_space<vmem>>, %arg5: memref<32x64xf32, #tpu.memory_space<vmem>>) attributes {dimension_semantics = [#tpu.dimension_semantics<arbitrary>], iteration_bounds = array<i64: 1>, scalar_prefetch = 0 : i64, scratch_operands = 0 : i64, tpu.core_type = #tpu.core_type<tc>, window_params = [{pipeline_mode = #tpu.pipeline_mode<synchronous>, transform_indices = @transform_0, window_bounds = array<i64: 32, 128>}, {pipeline_mode = #tpu.pipeline_mode<synchronous>, transform_indices = @transform_1, window_bounds = array<i64: 1, 128>}, {pipeline_mode = #tpu.pipeline_mode<synchronous>, transform_indices = @transform_2, window_bounds = array<i64: 1, 128>}, {pipeline_mode = #tpu.pipeline_mode<synchronous>, transform_indices = @transform_3, window_bounds = array<i64: 128, 64>}, {pipeline_mode = #tpu.pipeline_mode<synchronous>, transform_indices = @transform_4, window_bounds = array<i64: 32, 64>}]} {
    %c0 = arith.constant 0 : index
    %c0_0 = arith.constant 0 : index
    %0 = vector.load %arg1[%c0, %c0_0] : memref<32x128xf32, #tpu.memory_space<vmem>>, vector<32x128xf32>
    %cst = arith.constant dense<0.000000e+00> : vector<32xf32>
    %1 = vector.multi_reduction <add>, %0, %cst [1] : vector<32x128xf32> to vector<32xf32>
    %2 = vector.shape_cast %1 : vector<32xf32> to vector<32x1xf32>
    %cst_1 = arith.constant 1.280000e+02 : f32
    %3 = vector.broadcast %cst_1 : f32 to vector<32x1xf32>
    %4 = arith.divf %2, %3 : vector<32x1xf32>
    %5 = vector.broadcast %4 : vector<32x1xf32> to vector<32x128xf32>
    %6 = arith.subf %0, %5 : vector<32x128xf32>
    %7 = arith.mulf %6, %6 : vector<32x128xf32>
    %cst_2 = arith.constant dense<0.000000e+00> : vector<32xf32>
    %8 = vector.multi_reduction <add>, %7, %cst_2 [1] : vector<32x128xf32> to vector<32xf32>
    %9 = vector.shape_cast %8 : vector<32xf32> to vector<32x1xf32>
    %cst_3 = arith.constant 1.280000e+02 : f32
    %10 = vector.broadcast %cst_3 : f32 to vector<32x1xf32>
    %11 = arith.divf %9, %10 : vector<32x1xf32>
    %cst_4 = arith.constant 9.99999974E-6 : f32
    %12 = vector.broadcast %cst_4 : f32 to vector<32x1xf32>
    %13 = arith.addf %11, %12 : vector<32x1xf32>
    %14 = math.rsqrt %13 : vector<32x1xf32>
    %15 = vector.broadcast %14 : vector<32x1xf32> to vector<32x128xf32>
    %16 = arith.mulf %6, %15 : vector<32x128xf32>
    %c0_5 = arith.constant 0 : index
    %c0_6 = arith.constant 0 : index
    %17 = vector.load %arg2[%c0_5, %c0_6] : memref<1x128xf32, #tpu.memory_space<vmem>>, vector<1x128xf32>
    %18 = vector.broadcast %17 : vector<1x128xf32> to vector<32x128xf32>
    %19 = arith.mulf %16, %18 : vector<32x128xf32>
    %c0_7 = arith.constant 0 : index
    %c0_8 = arith.constant 0 : index
    %20 = vector.load %arg3[%c0_7, %c0_8] : memref<1x128xf32, #tpu.memory_space<vmem>>, vector<1x128xf32>
    %21 = vector.broadcast %20 : vector<1x128xf32> to vector<32x128xf32>
    %22 = arith.addf %19, %21 : vector<32x128xf32>
    %c0_9 = arith.constant 0 : index
    %c0_10 = arith.constant 0 : index
    %23 = vector.load %arg4[%c0_9, %c0_10] : memref<128x64xf32, #tpu.memory_space<vmem>>, vector<128x64xf32>
    %24 = arith.truncf %22 : vector<32x128xf32> to vector<32x128xbf16>
    %25 = arith.truncf %23 : vector<128x64xf32> to vector<128x64xbf16>
    %cst_11 = arith.constant dense<0.000000e+00> : vector<32x64xf32>
    %26 = tpu.matmul %24, %25, %cst_11 {dimension_numbers = #tpu.dot_dimension_numbers<[1], [0], [0], [1], [0, 0, 1, 1], [], []>} : vector<32x128xbf16>, vector<128x64xbf16>, vector<32x64xf32> -> vector<32x64xf32>
    %c0_12 = arith.constant 0 : index
    %c0_13 = arith.constant 0 : index
    %27 = vector.load %arg5[%c0_12, %c0_13] : memref<32x64xf32, #tpu.memory_space<vmem>>, vector<32x64xf32>
    tpu.vector_store %arg5[%c0_12, %c0_13], %26 {strides = array<i32>} : memref<32x64xf32, #tpu.memory_space<vmem>>, vector<32x64xf32>,
    return
  }
  func.func @transform_0(%arg0: i32) -> (i32, i32) {
    %c0_i32 = arith.constant 0 : i32
    %c0_i32_0 = arith.constant 0 : i32
    %c0_i32_1 = arith.constant 0 : i32
    return %c0_i32, %c0_i32_0 : i32, i32
  }
  func.func @transform_1(%arg0: i32) -> (i32, i32) {
    %c0_i32 = arith.constant 0 : i32
    %c0_i32_0 = arith.constant 0 : i32
    %c0_i32_1 = arith.constant 0 : i32
    return %c0_i32, %c0_i32_0 : i32, i32
  }
  func.func @transform_2(%arg0: i32) -> (i32, i32) {
    %c0_i32 = arith.constant 0 : i32
    %c0_i32_0 = arith.constant 0 : i32
    %c0_i32_1 = arith.constant 0 : i32
    return %c0_i32, %c0_i32_0 : i32, i32
  }
  func.func @transform_3(%arg0: i32) -> (i32, i32) {
    %c0_i32 = arith.constant 0 : i32
    %c0_i32_0 = arith.constant 0 : i32
    %c0_i32_1 = arith.constant 0 : i32
    return %c0_i32, %c0_i32_0 : i32, i32
  }
  func.func @transform_4(%arg0: i32) -> (i32, i32) {
    %c0_i32 = arith.constant 0 : i32
    %c0_i32_0 = arith.constant 0 : i32
    %c0_i32_1 = arith.constant 0 : i32
    return %c0_i32, %c0_i32_0 : i32, i32
  }
}

module attributes {stable_mosaic.version = 11 : i64} {
  func.func @_swin_block_kernel(%arg0: i32, %arg1: memref<32x64xf32, #tpu.memory_space<vmem>>, %arg2: memref<1x64xf32, #tpu.memory_space<vmem>>, %arg3: memref<1x64xf32, #tpu.memory_space<vmem>>, %arg4: memref<12x64x16xf32, #tpu.memory_space<vmem>>, %arg5: memref<12x1x16xf32, #tpu.memory_space<vmem>>, %arg6: memref<4x32x32xf32, #tpu.memory_space<vmem>>, %arg7: memref<4x16x64xf32, #tpu.memory_space<vmem>>, %arg8: memref<1x64xf32, #tpu.memory_space<vmem>>, %arg9: memref<1x64xf32, #tpu.memory_space<vmem>>, %arg10: memref<1x64xf32, #tpu.memory_space<vmem>>, %arg11: memref<64x256xf32, #tpu.memory_space<vmem>>, %arg12: memref<1x256xf32, #tpu.memory_space<vmem>>, %arg13: memref<256x64xf32, #tpu.memory_space<vmem>>, %arg14: memref<1x64xf32, #tpu.memory_space<vmem>>, %arg15: memref<32x64xf32, #tpu.memory_space<vmem>>) attributes {dimension_semantics = [#tpu.dimension_semantics<arbitrary>], iteration_bounds = array<i64: 1>, scalar_prefetch = 0 : i64, scratch_operands = 0 : i64, tpu.core_type = #tpu.core_type<tc>, window_params = [{pipeline_mode = #tpu.pipeline_mode<synchronous>, transform_indices = @transform_0, window_bounds = array<i64: 32, 64>}, {pipeline_mode = #tpu.pipeline_mode<synchronous>, transform_indices = @transform_1, window_bounds = array<i64: 1, 64>}, {pipeline_mode = #tpu.pipeline_mode<synchronous>, transform_indices = @transform_2, window_bounds = array<i64: 1, 64>}, {pipeline_mode = #tpu.pipeline_mode<synchronous>, transform_indices = @transform_3, window_bounds = array<i64: 12, 64, 16>}, {pipeline_mode = #tpu.pipeline_mode<synchronous>, transform_indices = @transform_4, window_bounds = array<i64: 12, 1, 16>}, {pipeline_mode = #tpu.pipeline_mode<synchronous>, transform_indices = @transform_5, window_bounds = array<i64: 4, 32, 32>}, {pipeline_mode = #tpu.pipeline_mode<synchronous>, transform_indices = @transform_6, window_bounds = array<i64: 4, 16, 64>}, {pipeline_mode = #tpu.pipeline_mode<synchronous>, transform_indices = @transform_7, window_bounds = array<i64: 1, 64>}, {pipeline_mode = #tpu.pipeline_mode<synchronous>, transform_indices = @transform_8, window_bounds = array<i64: 1, 64>}, {pipeline_mode = #tpu.pipeline_mode<synchronous>, transform_indices = @transform_9, window_bounds = array<i64: 1, 64>}, {pipeline_mode = #tpu.pipeline_mode<synchronous>, transform_indices = @transform_10, window_bounds = array<i64: 64, 256>}, {pipeline_mode = #tpu.pipeline_mode<synchronous>, transform_indices = @transform_11, window_bounds = array<i64: 1, 256>}, {pipeline_mode = #tpu.pipeline_mode<synchronous>, transform_indices = @transform_12, window_bounds = array<i64: 256, 64>}, {pipeline_mode = #tpu.pipeline_mode<synchronous>, transform_indices = @transform_13, window_bounds = array<i64: 1, 64>}, {pipeline_mode = #tpu.pipeline_mode<synchronous>, transform_indices = @transform_14, window_bounds = array<i64: 32, 64>}]} {
    %c0 = arith.constant 0 : index
    %c0_0 = arith.constant 0 : index
    %0 = vector.load %arg1[%c0, %c0_0] : memref<32x64xf32, #tpu.memory_space<vmem>>, vector<32x64xf32>
    %cst = arith.constant dense<0.000000e+00> : vector<32xf32>
    %1 = vector.multi_reduction <add>, %0, %cst [1] : vector<32x64xf32> to vector<32xf32>
    %2 = vector.shape_cast %1 : vector<32xf32> to vector<32x1xf32>
    %cst_1 = arith.constant 6.400000e+01 : f32
    %3 = vector.broadcast %cst_1 : f32 to vector<32x1xf32>
    %4 = arith.divf %2, %3 : vector<32x1xf32>
    %5 = vector.broadcast %4 : vector<32x1xf32> to vector<32x64xf32>
    %6 = arith.subf %0, %5 : vector<32x64xf32>
    %7 = arith.mulf %6, %6 : vector<32x64xf32>
    %cst_2 = arith.constant dense<0.000000e+00> : vector<32xf32>
    %8 = vector.multi_reduction <add>, %7, %cst_2 [1] : vector<32x64xf32> to vector<32xf32>
    %9 = vector.shape_cast %8 : vector<32xf32> to vector<32x1xf32>
    %cst_3 = arith.constant 6.400000e+01 : f32
    %10 = vector.broadcast %cst_3 : f32 to vector<32x1xf32>
    %11 = arith.divf %9, %10 : vector<32x1xf32>
    %cst_4 = arith.constant 9.99999974E-6 : f32
    %12 = vector.broadcast %cst_4 : f32 to vector<32x1xf32>
    %13 = arith.addf %11, %12 : vector<32x1xf32>
    %14 = math.rsqrt %13 : vector<32x1xf32>
    %15 = vector.broadcast %14 : vector<32x1xf32> to vector<32x64xf32>
    %16 = arith.mulf %6, %15 : vector<32x64xf32>
    %c0_5 = arith.constant 0 : index
    %c0_6 = arith.constant 0 : index
    %17 = vector.load %arg2[%c0_5, %c0_6] : memref<1x64xf32, #tpu.memory_space<vmem>>, vector<1x64xf32>
    %18 = vector.broadcast %17 : vector<1x64xf32> to vector<32x64xf32>
    %19 = arith.mulf %16, %18 : vector<32x64xf32>
    %c0_7 = arith.constant 0 : index
    %c0_8 = arith.constant 0 : index
    %20 = vector.load %arg3[%c0_7, %c0_8] : memref<1x64xf32, #tpu.memory_space<vmem>>, vector<1x64xf32>
    %21 = vector.broadcast %20 : vector<1x64xf32> to vector<32x64xf32>
    %22 = arith.addf %19, %21 : vector<32x64xf32>
    %23 = arith.truncf %22 : vector<32x64xf32> to vector<32x64xbf16>
    %cst_9 = arith.constant 0.000000e+00 : f32
    %24 = vector.broadcast %cst_9 : f32 to vector<32x64xf32>
    %c0_10 = arith.constant 0 : index
    %c0_11 = arith.constant 0 : index
    %c0_12 = arith.constant 0 : index
    %25 = vector.load %arg4[%c0_10, %c0_11, %c0_12] : memref<12x64x16xf32, #tpu.memory_space<vmem>>, vector<1x64x16xf32>
    %26 = vector.shape_cast %25 : vector<1x64x16xf32> to vector<64x16xf32>
    %27 = arith.truncf %26 : vector<64x16xf32> to vector<64x16xbf16>
    %cst_13 = arith.constant dense<0.000000e+00> : vector<32x16xf32>
    %28 = tpu.matmul %23, %27, %cst_13 {dimension_numbers = #tpu.dot_dimension_numbers<[1], [0], [0], [1], [0, 0, 1, 1], [], []>} : vector<32x64xbf16>, vector<64x16xbf16>, vector<32x16xf32> -> vector<32x16xf32>
    %c0_14 = arith.constant 0 : index
    %c0_15 = arith.constant 0 : index
    %c0_16 = arith.constant 0 : index
    %29 = vector.load %arg5[%c0_14, %c0_15, %c0_16] : memref<12x1x16xf32, #tpu.memory_space<vmem>>, vector<1x1x16xf32>
    %30 = vector.shape_cast %29 : vector<1x1x16xf32> to vector<1x16xf32>
    %31 = vector.broadcast %30 : vector<1x16xf32> to vector<32x16xf32>
    %32 = arith.addf %28, %31 : vector<32x16xf32>
    %cst_17 = arith.constant 2.500000e-01 : f32
    %33 = vector.broadcast %cst_17 : f32 to vector<32x16xf32>
    %34 = arith.mulf %32, %33 : vector<32x16xf32>
    %c4 = arith.constant 4 : index
    %c0_18 = arith.constant 0 : index
    %c0_19 = arith.constant 0 : index
    %35 = vector.load %arg4[%c4, %c0_18, %c0_19] : memref<12x64x16xf32, #tpu.memory_space<vmem>>, vector<1x64x16xf32>
    %36 = vector.shape_cast %35 : vector<1x64x16xf32> to vector<64x16xf32>
    %37 = arith.truncf %36 : vector<64x16xf32> to vector<64x16xbf16>
    %cst_20 = arith.constant dense<0.000000e+00> : vector<32x16xf32>
    %38 = tpu.matmul %23, %37, %cst_20 {dimension_numbers = #tpu.dot_dimension_numbers<[1], [0], [0], [1], [0, 0, 1, 1], [], []>} : vector<32x64xbf16>, vector<64x16xbf16>, vector<32x16xf32> -> vector<32x16xf32>
    %c4_21 = arith.constant 4 : index
    %c0_22 = arith.constant 0 : index
    %c0_23 = arith.constant 0 : index
    %39 = vector.load %arg5[%c4_21, %c0_22, %c0_23] : memref<12x1x16xf32, #tpu.memory_space<vmem>>, vector<1x1x16xf32>
    %40 = vector.shape_cast %39 : vector<1x1x16xf32> to vector<1x16xf32>
    %41 = vector.broadcast %40 : vector<1x16xf32> to vector<32x16xf32>
    %42 = arith.addf %38, %41 : vector<32x16xf32>
    %c8 = arith.constant 8 : index
    %c0_24 = arith.constant 0 : index
    %c0_25 = arith.constant 0 : index
    %43 = vector.load %arg4[%c8, %c0_24, %c0_25] : memref<12x64x16xf32, #tpu.memory_space<vmem>>, vector<1x64x16xf32>
    %44 = vector.shape_cast %43 : vector<1x64x16xf32> to vector<64x16xf32>
    %45 = arith.truncf %44 : vector<64x16xf32> to vector<64x16xbf16>
    %cst_26 = arith.constant dense<0.000000e+00> : vector<32x16xf32>
    %46 = tpu.matmul %23, %45, %cst_26 {dimension_numbers = #tpu.dot_dimension_numbers<[1], [0], [0], [1], [0, 0, 1, 1], [], []>} : vector<32x64xbf16>, vector<64x16xbf16>, vector<32x16xf32> -> vector<32x16xf32>
    %c8_27 = arith.constant 8 : index
    %c0_28 = arith.constant 0 : index
    %c0_29 = arith.constant 0 : index
    %47 = vector.load %arg5[%c8_27, %c0_28, %c0_29] : memref<12x1x16xf32, #tpu.memory_space<vmem>>, vector<1x1x16xf32>
    %48 = vector.shape_cast %47 : vector<1x1x16xf32> to vector<1x16xf32>
    %49 = vector.broadcast %48 : vector<1x16xf32> to vector<32x16xf32>
    %50 = arith.addf %46, %49 : vector<32x16xf32>
    %51 = arith.truncf %34 : vector<32x16xf32> to vector<32x16xbf16>
    %52 = arith.truncf %42 : vector<32x16xf32> to vector<32x16xbf16>
    %cst_30 = arith.constant dense<0.000000e+00> : vector<32x32xf32>
    %53 = tpu.matmul %51, %52, %cst_30 {dimension_numbers = #tpu.dot_dimension_numbers<[1], [1], [0], [0], [0, 0, 1, 0], [], []>} : vector<32x16xbf16>, vector<32x16xbf16>, vector<32x32xf32> -> vector<32x32xf32>
    %c0_31 = arith.constant 0 : index
    %c0_32 = arith.constant 0 : index
    %c0_33 = arith.constant 0 : index
    %54 = vector.load %arg6[%c0_31, %c0_32, %c0_33] : memref<4x32x32xf32, #tpu.memory_space<vmem>>, vector<1x32x32xf32>
    %55 = vector.shape_cast %54 : vector<1x32x32xf32> to vector<32x32xf32>
    %56 = arith.addf %53, %55 : vector<32x32xf32>
    %cst_34 = arith.constant dense<0xFF800000> : vector<32xf32>
    %57 = vector.multi_reduction <maximumf>, %56, %cst_34 [1] : vector<32x32xf32> to vector<32xf32>
    %58 = vector.shape_cast %57 : vector<32xf32> to vector<32x1xf32>
    %59 = vector.broadcast %58 : vector<32x1xf32> to vector<32x32xf32>
    %60 = arith.subf %56, %59 : vector<32x32xf32>
    %61 = math.exp %60 : vector<32x32xf32>
    %cst_35 = arith.constant dense<0.000000e+00> : vector<32xf32>
    %62 = vector.multi_reduction <add>, %61, %cst_35 [1] : vector<32x32xf32> to vector<32xf32>
    %63 = vector.shape_cast %62 : vector<32xf32> to vector<32x1xf32>
    %64 = tpu.reciprocal %63 {approx = true} : vector<32x1xf32> -> vector<32x1xf32>
    %65 = vector.broadcast %64 : vector<32x1xf32> to vector<32x32xf32>
    %66 = arith.mulf %61, %65 : vector<32x32xf32>
    %67 = arith.truncf %66 : vector<32x32xf32> to vector<32x32xbf16>
    %68 = arith.truncf %50 : vector<32x16xf32> to vector<32x16xbf16>
    %cst_36 = arith.constant dense<0.000000e+00> : vector<32x16xf32>
    %69 = tpu.matmul %67, %68, %cst_36 {dimension_numbers = #tpu.dot_dimension_numbers<[1], [0], [0], [1], [0, 0, 1, 1], [], []>} : vector<32x32xbf16>, vector<32x16xbf16>, vector<32x16xf32> -> vector<32x16xf32>
    %c0_37 = arith.constant 0 : index
    %c0_38 = arith.constant 0 : index
    %c0_39 = arith.constant 0 : index
    %70 = vector.load %arg7[%c0_37, %c0_38, %c0_39] : memref<4x16x64xf32, #tpu.memory_space<vmem>>, vector<1x16x64xf32>
    %71 = vector.shape_cast %70 : vector<1x16x64xf32> to vector<16x64xf32>
    %72 = arith.truncf %69 : vector<32x16xf32> to vector<32x16xbf16>
    %73 = arith.truncf %71 : vector<16x64xf32> to vector<16x64xbf16>
    %cst_40 = arith.constant dense<0.000000e+00> : vector<32x64xf32>
    %74 = tpu.matmul %72, %73, %cst_40 {dimension_numbers = #tpu.dot_dimension_numbers<[1], [0], [0], [1], [0, 0, 1, 1], [], []>} : vector<32x16xbf16>, vector<16x64xbf16>, vector<32x64xf32> -> vector<32x64xf32>
    %75 = arith.addf %24, %74 : vector<32x64xf32>
    %c1 = arith.constant 1 : index
    %c0_41 = arith.constant 0 : index
    %c0_42 = arith.constant 0 : index
    %76 = vector.load %arg4[%c1, %c0_41, %c0_42] : memref<12x64x16xf32, #tpu.memory_space<vmem>>, vector<1x64x16xf32>
    %77 = vector.shape_cast %76 : vector<1x64x16xf32> to vector<64x16xf32>
    %78 = arith.truncf %77 : vector<64x16xf32> to vector<64x16xbf16>
    %cst_43 = arith.constant dense<0.000000e+00> : vector<32x16xf32>
    %79 = tpu.matmul %23, %78, %cst_43 {dimension_numbers = #tpu.dot_dimension_numbers<[1], [0], [0], [1], [0, 0, 1, 1], [], []>} : vector<32x64xbf16>, vector<64x16xbf16>, vector<32x16xf32> -> vector<32x16xf32>
    %c1_44 = arith.constant 1 : index
    %c0_45 = arith.constant 0 : index
    %c0_46 = arith.constant 0 : index
    %80 = vector.load %arg5[%c1_44, %c0_45, %c0_46] : memref<12x1x16xf32, #tpu.memory_space<vmem>>, vector<1x1x16xf32>
    %81 = vector.shape_cast %80 : vector<1x1x16xf32> to vector<1x16xf32>
    %82 = vector.broadcast %81 : vector<1x16xf32> to vector<32x16xf32>
    %83 = arith.addf %79, %82 : vector<32x16xf32>
    %cst_47 = arith.constant 2.500000e-01 : f32
    %84 = vector.broadcast %cst_47 : f32 to vector<32x16xf32>
    %85 = arith.mulf %83, %84 : vector<32x16xf32>
    %c5 = arith.constant 5 : index
    %c0_48 = arith.constant 0 : index
    %c0_49 = arith.constant 0 : index
    %86 = vector.load %arg4[%c5, %c0_48, %c0_49] : memref<12x64x16xf32, #tpu.memory_space<vmem>>, vector<1x64x16xf32>
    %87 = vector.shape_cast %86 : vector<1x64x16xf32> to vector<64x16xf32>
    %88 = arith.truncf %87 : vector<64x16xf32> to vector<64x16xbf16>
    %cst_50 = arith.constant dense<0.000000e+00> : vector<32x16xf32>
    %89 = tpu.matmul %23, %88, %cst_50 {dimension_numbers = #tpu.dot_dimension_numbers<[1], [0], [0], [1], [0, 0, 1, 1], [], []>} : vector<32x64xbf16>, vector<64x16xbf16>, vector<32x16xf32> -> vector<32x16xf32>
    %c5_51 = arith.constant 5 : index
    %c0_52 = arith.constant 0 : index
    %c0_53 = arith.constant 0 : index
    %90 = vector.load %arg5[%c5_51, %c0_52, %c0_53] : memref<12x1x16xf32, #tpu.memory_space<vmem>>, vector<1x1x16xf32>
    %91 = vector.shape_cast %90 : vector<1x1x16xf32> to vector<1x16xf32>
    %92 = vector.broadcast %91 : vector<1x16xf32> to vector<32x16xf32>
    %93 = arith.addf %89, %92 : vector<32x16xf32>
    %c9 = arith.constant 9 : index
    %c0_54 = arith.constant 0 : index
    %c0_55 = arith.constant 0 : index
    %94 = vector.load %arg4[%c9, %c0_54, %c0_55] : memref<12x64x16xf32, #tpu.memory_space<vmem>>, vector<1x64x16xf32>
    %95 = vector.shape_cast %94 : vector<1x64x16xf32> to vector<64x16xf32>
    %96 = arith.truncf %95 : vector<64x16xf32> to vector<64x16xbf16>
    %cst_56 = arith.constant dense<0.000000e+00> : vector<32x16xf32>
    %97 = tpu.matmul %23, %96, %cst_56 {dimension_numbers = #tpu.dot_dimension_numbers<[1], [0], [0], [1], [0, 0, 1, 1], [], []>} : vector<32x64xbf16>, vector<64x16xbf16>, vector<32x16xf32> -> vector<32x16xf32>
    %c9_57 = arith.constant 9 : index
    %c0_58 = arith.constant 0 : index
    %c0_59 = arith.constant 0 : index
    %98 = vector.load %arg5[%c9_57, %c0_58, %c0_59] : memref<12x1x16xf32, #tpu.memory_space<vmem>>, vector<1x1x16xf32>
    %99 = vector.shape_cast %98 : vector<1x1x16xf32> to vector<1x16xf32>
    %100 = vector.broadcast %99 : vector<1x16xf32> to vector<32x16xf32>
    %101 = arith.addf %97, %100 : vector<32x16xf32>
    %102 = arith.truncf %85 : vector<32x16xf32> to vector<32x16xbf16>
    %103 = arith.truncf %93 : vector<32x16xf32> to vector<32x16xbf16>
    %cst_60 = arith.constant dense<0.000000e+00> : vector<32x32xf32>
    %104 = tpu.matmul %102, %103, %cst_60 {dimension_numbers = #tpu.dot_dimension_numbers<[1], [1], [0], [0], [0, 0, 1, 0], [], []>} : vector<32x16xbf16>, vector<32x16xbf16>, vector<32x32xf32> -> vector<32x32xf32>
    %c1_61 = arith.constant 1 : index
    %c0_62 = arith.constant 0 : index
    %c0_63 = arith.constant 0 : index
    %105 = vector.load %arg6[%c1_61, %c0_62, %c0_63] : memref<4x32x32xf32, #tpu.memory_space<vmem>>, vector<1x32x32xf32>
    %106 = vector.shape_cast %105 : vector<1x32x32xf32> to vector<32x32xf32>
    %107 = arith.addf %104, %106 : vector<32x32xf32>
    %cst_64 = arith.constant dense<0xFF800000> : vector<32xf32>
    %108 = vector.multi_reduction <maximumf>, %107, %cst_64 [1] : vector<32x32xf32> to vector<32xf32>
    %109 = vector.shape_cast %108 : vector<32xf32> to vector<32x1xf32>
    %110 = vector.broadcast %109 : vector<32x1xf32> to vector<32x32xf32>
    %111 = arith.subf %107, %110 : vector<32x32xf32>
    %112 = math.exp %111 : vector<32x32xf32>
    %cst_65 = arith.constant dense<0.000000e+00> : vector<32xf32>
    %113 = vector.multi_reduction <add>, %112, %cst_65 [1] : vector<32x32xf32> to vector<32xf32>
    %114 = vector.shape_cast %113 : vector<32xf32> to vector<32x1xf32>
    %115 = tpu.reciprocal %114 {approx = true} : vector<32x1xf32> -> vector<32x1xf32>
    %116 = vector.broadcast %115 : vector<32x1xf32> to vector<32x32xf32>
    %117 = arith.mulf %112, %116 : vector<32x32xf32>
    %118 = arith.truncf %117 : vector<32x32xf32> to vector<32x32xbf16>
    %119 = arith.truncf %101 : vector<32x16xf32> to vector<32x16xbf16>
    %cst_66 = arith.constant dense<0.000000e+00> : vector<32x16xf32>
    %120 = tpu.matmul %118, %119, %cst_66 {dimension_numbers = #tpu.dot_dimension_numbers<[1], [0], [0], [1], [0, 0, 1, 1], [], []>} : vector<32x32xbf16>, vector<32x16xbf16>, vector<32x16xf32> -> vector<32x16xf32>
    %c1_67 = arith.constant 1 : index
    %c0_68 = arith.constant 0 : index
    %c0_69 = arith.constant 0 : index
    %121 = vector.load %arg7[%c1_67, %c0_68, %c0_69] : memref<4x16x64xf32, #tpu.memory_space<vmem>>, vector<1x16x64xf32>
    %122 = vector.shape_cast %121 : vector<1x16x64xf32> to vector<16x64xf32>
    %123 = arith.truncf %120 : vector<32x16xf32> to vector<32x16xbf16>
    %124 = arith.truncf %122 : vector<16x64xf32> to vector<16x64xbf16>
    %cst_70 = arith.constant dense<0.000000e+00> : vector<32x64xf32>
    %125 = tpu.matmul %123, %124, %cst_70 {dimension_numbers = #tpu.dot_dimension_numbers<[1], [0], [0], [1], [0, 0, 1, 1], [], []>} : vector<32x16xbf16>, vector<16x64xbf16>, vector<32x64xf32> -> vector<32x64xf32>
    %126 = arith.addf %75, %125 : vector<32x64xf32>
    %c2 = arith.constant 2 : index
    %c0_71 = arith.constant 0 : index
    %c0_72 = arith.constant 0 : index
    %127 = vector.load %arg4[%c2, %c0_71, %c0_72] : memref<12x64x16xf32, #tpu.memory_space<vmem>>, vector<1x64x16xf32>
    %128 = vector.shape_cast %127 : vector<1x64x16xf32> to vector<64x16xf32>
    %129 = arith.truncf %128 : vector<64x16xf32> to vector<64x16xbf16>
    %cst_73 = arith.constant dense<0.000000e+00> : vector<32x16xf32>
    %130 = tpu.matmul %23, %129, %cst_73 {dimension_numbers = #tpu.dot_dimension_numbers<[1], [0], [0], [1], [0, 0, 1, 1], [], []>} : vector<32x64xbf16>, vector<64x16xbf16>, vector<32x16xf32> -> vector<32x16xf32>
    %c2_74 = arith.constant 2 : index
    %c0_75 = arith.constant 0 : index
    %c0_76 = arith.constant 0 : index
    %131 = vector.load %arg5[%c2_74, %c0_75, %c0_76] : memref<12x1x16xf32, #tpu.memory_space<vmem>>, vector<1x1x16xf32>
    %132 = vector.shape_cast %131 : vector<1x1x16xf32> to vector<1x16xf32>
    %133 = vector.broadcast %132 : vector<1x16xf32> to vector<32x16xf32>
    %134 = arith.addf %130, %133 : vector<32x16xf32>
    %cst_77 = arith.constant 2.500000e-01 : f32
    %135 = vector.broadcast %cst_77 : f32 to vector<32x16xf32>
    %136 = arith.mulf %134, %135 : vector<32x16xf32>
    %c6 = arith.constant 6 : index
    %c0_78 = arith.constant 0 : index
    %c0_79 = arith.constant 0 : index
    %137 = vector.load %arg4[%c6, %c0_78, %c0_79] : memref<12x64x16xf32, #tpu.memory_space<vmem>>, vector<1x64x16xf32>
    %138 = vector.shape_cast %137 : vector<1x64x16xf32> to vector<64x16xf32>
    %139 = arith.truncf %138 : vector<64x16xf32> to vector<64x16xbf16>
    %cst_80 = arith.constant dense<0.000000e+00> : vector<32x16xf32>
    %140 = tpu.matmul %23, %139, %cst_80 {dimension_numbers = #tpu.dot_dimension_numbers<[1], [0], [0], [1], [0, 0, 1, 1], [], []>} : vector<32x64xbf16>, vector<64x16xbf16>, vector<32x16xf32> -> vector<32x16xf32>
    %c6_81 = arith.constant 6 : index
    %c0_82 = arith.constant 0 : index
    %c0_83 = arith.constant 0 : index
    %141 = vector.load %arg5[%c6_81, %c0_82, %c0_83] : memref<12x1x16xf32, #tpu.memory_space<vmem>>, vector<1x1x16xf32>
    %142 = vector.shape_cast %141 : vector<1x1x16xf32> to vector<1x16xf32>
    %143 = vector.broadcast %142 : vector<1x16xf32> to vector<32x16xf32>
    %144 = arith.addf %140, %143 : vector<32x16xf32>
    %c10 = arith.constant 10 : index
    %c0_84 = arith.constant 0 : index
    %c0_85 = arith.constant 0 : index
    %145 = vector.load %arg4[%c10, %c0_84, %c0_85] : memref<12x64x16xf32, #tpu.memory_space<vmem>>, vector<1x64x16xf32>
    %146 = vector.shape_cast %145 : vector<1x64x16xf32> to vector<64x16xf32>
    %147 = arith.truncf %146 : vector<64x16xf32> to vector<64x16xbf16>
    %cst_86 = arith.constant dense<0.000000e+00> : vector<32x16xf32>
    %148 = tpu.matmul %23, %147, %cst_86 {dimension_numbers = #tpu.dot_dimension_numbers<[1], [0], [0], [1], [0, 0, 1, 1], [], []>} : vector<32x64xbf16>, vector<64x16xbf16>, vector<32x16xf32> -> vector<32x16xf32>
    %c10_87 = arith.constant 10 : index
    %c0_88 = arith.constant 0 : index
    %c0_89 = arith.constant 0 : index
    %149 = vector.load %arg5[%c10_87, %c0_88, %c0_89] : memref<12x1x16xf32, #tpu.memory_space<vmem>>, vector<1x1x16xf32>
    %150 = vector.shape_cast %149 : vector<1x1x16xf32> to vector<1x16xf32>
    %151 = vector.broadcast %150 : vector<1x16xf32> to vector<32x16xf32>
    %152 = arith.addf %148, %151 : vector<32x16xf32>
    %153 = arith.truncf %136 : vector<32x16xf32> to vector<32x16xbf16>
    %154 = arith.truncf %144 : vector<32x16xf32> to vector<32x16xbf16>
    %cst_90 = arith.constant dense<0.000000e+00> : vector<32x32xf32>
    %155 = tpu.matmul %153, %154, %cst_90 {dimension_numbers = #tpu.dot_dimension_numbers<[1], [1], [0], [0], [0, 0, 1, 0], [], []>} : vector<32x16xbf16>, vector<32x16xbf16>, vector<32x32xf32> -> vector<32x32xf32>
    %c2_91 = arith.constant 2 : index
    %c0_92 = arith.constant 0 : index
    %c0_93 = arith.constant 0 : index
    %156 = vector.load %arg6[%c2_91, %c0_92, %c0_93] : memref<4x32x32xf32, #tpu.memory_space<vmem>>, vector<1x32x32xf32>
    %157 = vector.shape_cast %156 : vector<1x32x32xf32> to vector<32x32xf32>
    %158 = arith.addf %155, %157 : vector<32x32xf32>
    %cst_94 = arith.constant dense<0xFF800000> : vector<32xf32>
    %159 = vector.multi_reduction <maximumf>, %158, %cst_94 [1] : vector<32x32xf32> to vector<32xf32>
    %160 = vector.shape_cast %159 : vector<32xf32> to vector<32x1xf32>
    %161 = vector.broadcast %160 : vector<32x1xf32> to vector<32x32xf32>
    %162 = arith.subf %158, %161 : vector<32x32xf32>
    %163 = math.exp %162 : vector<32x32xf32>
    %cst_95 = arith.constant dense<0.000000e+00> : vector<32xf32>
    %164 = vector.multi_reduction <add>, %163, %cst_95 [1] : vector<32x32xf32> to vector<32xf32>
    %165 = vector.shape_cast %164 : vector<32xf32> to vector<32x1xf32>
    %166 = tpu.reciprocal %165 {approx = true} : vector<32x1xf32> -> vector<32x1xf32>
    %167 = vector.broadcast %166 : vector<32x1xf32> to vector<32x32xf32>
    %168 = arith.mulf %163, %167 : vector<32x32xf32>
    %169 = arith.truncf %168 : vector<32x32xf32> to vector<32x32xbf16>
    %170 = arith.truncf %152 : vector<32x16xf32> to vector<32x16xbf16>
    %cst_96 = arith.constant dense<0.000000e+00> : vector<32x16xf32>
    %171 = tpu.matmul %169, %170, %cst_96 {dimension_numbers = #tpu.dot_dimension_numbers<[1], [0], [0], [1], [0, 0, 1, 1], [], []>} : vector<32x32xbf16>, vector<32x16xbf16>, vector<32x16xf32> -> vector<32x16xf32>
    %c2_97 = arith.constant 2 : index
    %c0_98 = arith.constant 0 : index
    %c0_99 = arith.constant 0 : index
    %172 = vector.load %arg7[%c2_97, %c0_98, %c0_99] : memref<4x16x64xf32, #tpu.memory_space<vmem>>, vector<1x16x64xf32>
    %173 = vector.shape_cast %172 : vector<1x16x64xf32> to vector<16x64xf32>
    %174 = arith.truncf %171 : vector<32x16xf32> to vector<32x16xbf16>
    %175 = arith.truncf %173 : vector<16x64xf32> to vector<16x64xbf16>
    %cst_100 = arith.constant dense<0.000000e+00> : vector<32x64xf32>
    %176 = tpu.matmul %174, %175, %cst_100 {dimension_numbers = #tpu.dot_dimension_numbers<[1], [0], [0], [1], [0, 0, 1, 1], [], []>} : vector<32x16xbf16>, vector<16x64xbf16>, vector<32x64xf32> -> vector<32x64xf32>
    %177 = arith.addf %126, %176 : vector<32x64xf32>
    %c3 = arith.constant 3 : index
    %c0_101 = arith.constant 0 : index
    %c0_102 = arith.constant 0 : index
    %178 = vector.load %arg4[%c3, %c0_101, %c0_102] : memref<12x64x16xf32, #tpu.memory_space<vmem>>, vector<1x64x16xf32>
    %179 = vector.shape_cast %178 : vector<1x64x16xf32> to vector<64x16xf32>
    %180 = arith.truncf %179 : vector<64x16xf32> to vector<64x16xbf16>
    %cst_103 = arith.constant dense<0.000000e+00> : vector<32x16xf32>
    %181 = tpu.matmul %23, %180, %cst_103 {dimension_numbers = #tpu.dot_dimension_numbers<[1], [0], [0], [1], [0, 0, 1, 1], [], []>} : vector<32x64xbf16>, vector<64x16xbf16>, vector<32x16xf32> -> vector<32x16xf32>
    %c3_104 = arith.constant 3 : index
    %c0_105 = arith.constant 0 : index
    %c0_106 = arith.constant 0 : index
    %182 = vector.load %arg5[%c3_104, %c0_105, %c0_106] : memref<12x1x16xf32, #tpu.memory_space<vmem>>, vector<1x1x16xf32>
    %183 = vector.shape_cast %182 : vector<1x1x16xf32> to vector<1x16xf32>
    %184 = vector.broadcast %183 : vector<1x16xf32> to vector<32x16xf32>
    %185 = arith.addf %181, %184 : vector<32x16xf32>
    %cst_107 = arith.constant 2.500000e-01 : f32
    %186 = vector.broadcast %cst_107 : f32 to vector<32x16xf32>
    %187 = arith.mulf %185, %186 : vector<32x16xf32>
    %c7 = arith.constant 7 : index
    %c0_108 = arith.constant 0 : index
    %c0_109 = arith.constant 0 : index
    %188 = vector.load %arg4[%c7, %c0_108, %c0_109] : memref<12x64x16xf32, #tpu.memory_space<vmem>>, vector<1x64x16xf32>
    %189 = vector.shape_cast %188 : vector<1x64x16xf32> to vector<64x16xf32>
    %190 = arith.truncf %189 : vector<64x16xf32> to vector<64x16xbf16>
    %cst_110 = arith.constant dense<0.000000e+00> : vector<32x16xf32>
    %191 = tpu.matmul %23, %190, %cst_110 {dimension_numbers = #tpu.dot_dimension_numbers<[1], [0], [0], [1], [0, 0, 1, 1], [], []>} : vector<32x64xbf16>, vector<64x16xbf16>, vector<32x16xf32> -> vector<32x16xf32>
    %c7_111 = arith.constant 7 : index
    %c0_112 = arith.constant 0 : index
    %c0_113 = arith.constant 0 : index
    %192 = vector.load %arg5[%c7_111, %c0_112, %c0_113] : memref<12x1x16xf32, #tpu.memory_space<vmem>>, vector<1x1x16xf32>
    %193 = vector.shape_cast %192 : vector<1x1x16xf32> to vector<1x16xf32>
    %194 = vector.broadcast %193 : vector<1x16xf32> to vector<32x16xf32>
    %195 = arith.addf %191, %194 : vector<32x16xf32>
    %c11 = arith.constant 11 : index
    %c0_114 = arith.constant 0 : index
    %c0_115 = arith.constant 0 : index
    %196 = vector.load %arg4[%c11, %c0_114, %c0_115] : memref<12x64x16xf32, #tpu.memory_space<vmem>>, vector<1x64x16xf32>
    %197 = vector.shape_cast %196 : vector<1x64x16xf32> to vector<64x16xf32>
    %198 = arith.truncf %197 : vector<64x16xf32> to vector<64x16xbf16>
    %cst_116 = arith.constant dense<0.000000e+00> : vector<32x16xf32>
    %199 = tpu.matmul %23, %198, %cst_116 {dimension_numbers = #tpu.dot_dimension_numbers<[1], [0], [0], [1], [0, 0, 1, 1], [], []>} : vector<32x64xbf16>, vector<64x16xbf16>, vector<32x16xf32> -> vector<32x16xf32>
    %c11_117 = arith.constant 11 : index
    %c0_118 = arith.constant 0 : index
    %c0_119 = arith.constant 0 : index
    %200 = vector.load %arg5[%c11_117, %c0_118, %c0_119] : memref<12x1x16xf32, #tpu.memory_space<vmem>>, vector<1x1x16xf32>
    %201 = vector.shape_cast %200 : vector<1x1x16xf32> to vector<1x16xf32>
    %202 = vector.broadcast %201 : vector<1x16xf32> to vector<32x16xf32>
    %203 = arith.addf %199, %202 : vector<32x16xf32>
    %204 = arith.truncf %187 : vector<32x16xf32> to vector<32x16xbf16>
    %205 = arith.truncf %195 : vector<32x16xf32> to vector<32x16xbf16>
    %cst_120 = arith.constant dense<0.000000e+00> : vector<32x32xf32>
    %206 = tpu.matmul %204, %205, %cst_120 {dimension_numbers = #tpu.dot_dimension_numbers<[1], [1], [0], [0], [0, 0, 1, 0], [], []>} : vector<32x16xbf16>, vector<32x16xbf16>, vector<32x32xf32> -> vector<32x32xf32>
    %c3_121 = arith.constant 3 : index
    %c0_122 = arith.constant 0 : index
    %c0_123 = arith.constant 0 : index
    %207 = vector.load %arg6[%c3_121, %c0_122, %c0_123] : memref<4x32x32xf32, #tpu.memory_space<vmem>>, vector<1x32x32xf32>
    %208 = vector.shape_cast %207 : vector<1x32x32xf32> to vector<32x32xf32>
    %209 = arith.addf %206, %208 : vector<32x32xf32>
    %cst_124 = arith.constant dense<0xFF800000> : vector<32xf32>
    %210 = vector.multi_reduction <maximumf>, %209, %cst_124 [1] : vector<32x32xf32> to vector<32xf32>
    %211 = vector.shape_cast %210 : vector<32xf32> to vector<32x1xf32>
    %212 = vector.broadcast %211 : vector<32x1xf32> to vector<32x32xf32>
    %213 = arith.subf %209, %212 : vector<32x32xf32>
    %214 = math.exp %213 : vector<32x32xf32>
    %cst_125 = arith.constant dense<0.000000e+00> : vector<32xf32>
    %215 = vector.multi_reduction <add>, %214, %cst_125 [1] : vector<32x32xf32> to vector<32xf32>
    %216 = vector.shape_cast %215 : vector<32xf32> to vector<32x1xf32>
    %217 = tpu.reciprocal %216 {approx = true} : vector<32x1xf32> -> vector<32x1xf32>
    %218 = vector.broadcast %217 : vector<32x1xf32> to vector<32x32xf32>
    %219 = arith.mulf %214, %218 : vector<32x32xf32>
    %220 = arith.truncf %219 : vector<32x32xf32> to vector<32x32xbf16>
    %221 = arith.truncf %203 : vector<32x16xf32> to vector<32x16xbf16>
    %cst_126 = arith.constant dense<0.000000e+00> : vector<32x16xf32>
    %222 = tpu.matmul %220, %221, %cst_126 {dimension_numbers = #tpu.dot_dimension_numbers<[1], [0], [0], [1], [0, 0, 1, 1], [], []>} : vector<32x32xbf16>, vector<32x16xbf16>, vector<32x16xf32> -> vector<32x16xf32>
    %c3_127 = arith.constant 3 : index
    %c0_128 = arith.constant 0 : index
    %c0_129 = arith.constant 0 : index
    %223 = vector.load %arg7[%c3_127, %c0_128, %c0_129] : memref<4x16x64xf32, #tpu.memory_space<vmem>>, vector<1x16x64xf32>
    %224 = vector.shape_cast %223 : vector<1x16x64xf32> to vector<16x64xf32>
    %225 = arith.truncf %222 : vector<32x16xf32> to vector<32x16xbf16>
    %226 = arith.truncf %224 : vector<16x64xf32> to vector<16x64xbf16>
    %cst_130 = arith.constant dense<0.000000e+00> : vector<32x64xf32>
    %227 = tpu.matmul %225, %226, %cst_130 {dimension_numbers = #tpu.dot_dimension_numbers<[1], [0], [0], [1], [0, 0, 1, 1], [], []>} : vector<32x16xbf16>, vector<16x64xbf16>, vector<32x64xf32> -> vector<32x64xf32>
    %228 = arith.addf %177, %227 : vector<32x64xf32>
    %229 = arith.addf %0, %228 : vector<32x64xf32>
    %c0_131 = arith.constant 0 : index
    %c0_132 = arith.constant 0 : index
    %230 = vector.load %arg8[%c0_131, %c0_132] : memref<1x64xf32, #tpu.memory_space<vmem>>, vector<1x64xf32>
    %231 = vector.broadcast %230 : vector<1x64xf32> to vector<32x64xf32>
    %232 = arith.addf %229, %231 : vector<32x64xf32>
    %cst_133 = arith.constant dense<0.000000e+00> : vector<32xf32>
    %233 = vector.multi_reduction <add>, %232, %cst_133 [1] : vector<32x64xf32> to vector<32xf32>
    %234 = vector.shape_cast %233 : vector<32xf32> to vector<32x1xf32>
    %cst_134 = arith.constant 6.400000e+01 : f32
    %235 = vector.broadcast %cst_134 : f32 to vector<32x1xf32>
    %236 = arith.divf %234, %235 : vector<32x1xf32>
    %237 = vector.broadcast %236 : vector<32x1xf32> to vector<32x64xf32>
    %238 = arith.subf %232, %237 : vector<32x64xf32>
    %239 = arith.mulf %238, %238 : vector<32x64xf32>
    %cst_135 = arith.constant dense<0.000000e+00> : vector<32xf32>
    %240 = vector.multi_reduction <add>, %239, %cst_135 [1] : vector<32x64xf32> to vector<32xf32>
    %241 = vector.shape_cast %240 : vector<32xf32> to vector<32x1xf32>
    %cst_136 = arith.constant 6.400000e+01 : f32
    %242 = vector.broadcast %cst_136 : f32 to vector<32x1xf32>
    %243 = arith.divf %241, %242 : vector<32x1xf32>
    %cst_137 = arith.constant 9.99999974E-6 : f32
    %244 = vector.broadcast %cst_137 : f32 to vector<32x1xf32>
    %245 = arith.addf %243, %244 : vector<32x1xf32>
    %246 = math.rsqrt %245 : vector<32x1xf32>
    %247 = vector.broadcast %246 : vector<32x1xf32> to vector<32x64xf32>
    %248 = arith.mulf %238, %247 : vector<32x64xf32>
    %c0_138 = arith.constant 0 : index
    %c0_139 = arith.constant 0 : index
    %249 = vector.load %arg9[%c0_138, %c0_139] : memref<1x64xf32, #tpu.memory_space<vmem>>, vector<1x64xf32>
    %250 = vector.broadcast %249 : vector<1x64xf32> to vector<32x64xf32>
    %251 = arith.mulf %248, %250 : vector<32x64xf32>
    %c0_140 = arith.constant 0 : index
    %c0_141 = arith.constant 0 : index
    %252 = vector.load %arg10[%c0_140, %c0_141] : memref<1x64xf32, #tpu.memory_space<vmem>>, vector<1x64xf32>
    %253 = vector.broadcast %252 : vector<1x64xf32> to vector<32x64xf32>
    %254 = arith.addf %251, %253 : vector<32x64xf32>
    %c0_142 = arith.constant 0 : index
    %c0_143 = arith.constant 0 : index
    %255 = vector.load %arg11[%c0_142, %c0_143] : memref<64x256xf32, #tpu.memory_space<vmem>>, vector<64x256xf32>
    %256 = arith.truncf %254 : vector<32x64xf32> to vector<32x64xbf16>
    %257 = arith.truncf %255 : vector<64x256xf32> to vector<64x256xbf16>
    %cst_144 = arith.constant dense<0.000000e+00> : vector<32x256xf32>
    %258 = tpu.matmul %256, %257, %cst_144 {dimension_numbers = #tpu.dot_dimension_numbers<[1], [0], [0], [1], [0, 0, 1, 1], [], []>} : vector<32x64xbf16>, vector<64x256xbf16>, vector<32x256xf32> -> vector<32x256xf32>
    %c0_145 = arith.constant 0 : index
    %c0_146 = arith.constant 0 : index
    %259 = vector.load %arg12[%c0_145, %c0_146] : memref<1x256xf32, #tpu.memory_space<vmem>>, vector<1x256xf32>
    %260 = vector.broadcast %259 : vector<1x256xf32> to vector<32x256xf32>
    %261 = arith.addf %258, %260 : vector<32x256xf32>
    %262 = arith.mulf %261, %261 : vector<32x256xf32>
    %263 = arith.mulf %261, %262 : vector<32x256xf32>
    %cst_147 = arith.constant 4.471500e-02 : f32
    %264 = vector.broadcast %cst_147 : f32 to vector<32x256xf32>
    %265 = arith.mulf %264, %263 : vector<32x256xf32>
    %266 = arith.addf %261, %265 : vector<32x256xf32>
    %cst_148 = arith.constant 0.797884583 : f32
    %267 = vector.broadcast %cst_148 : f32 to vector<32x256xf32>
    %268 = arith.mulf %267, %266 : vector<32x256xf32>
    %269 = math.tanh %268 : vector<32x256xf32>
    %cst_149 = arith.constant 1.000000e+00 : f32
    %270 = vector.broadcast %cst_149 : f32 to vector<32x256xf32>
    %271 = arith.addf %270, %269 : vector<32x256xf32>
    %cst_150 = arith.constant 5.000000e-01 : f32
    %272 = vector.broadcast %cst_150 : f32 to vector<32x256xf32>
    %273 = arith.mulf %272, %271 : vector<32x256xf32>
    %274 = arith.mulf %261, %273 : vector<32x256xf32>
    %c0_151 = arith.constant 0 : index
    %c0_152 = arith.constant 0 : index
    %275 = vector.load %arg13[%c0_151, %c0_152] : memref<256x64xf32, #tpu.memory_space<vmem>>, vector<256x64xf32>
    %276 = arith.truncf %274 : vector<32x256xf32> to vector<32x256xbf16>
    %277 = arith.truncf %275 : vector<256x64xf32> to vector<256x64xbf16>
    %cst_153 = arith.constant dense<0.000000e+00> : vector<32x64xf32>
    %278 = tpu.matmul %276, %277, %cst_153 {dimension_numbers = #tpu.dot_dimension_numbers<[1], [0], [0], [1], [0, 0, 1, 1], [], []>} : vector<32x256xbf16>, vector<256x64xbf16>, vector<32x64xf32> -> vector<32x64xf32>
    %c0_154 = arith.constant 0 : index
    %c0_155 = arith.constant 0 : index
    %279 = vector.load %arg14[%c0_154, %c0_155] : memref<1x64xf32, #tpu.memory_space<vmem>>, vector<1x64xf32>
    %280 = vector.broadcast %279 : vector<1x64xf32> to vector<32x64xf32>
    %281 = arith.addf %278, %280 : vector<32x64xf32>
    %282 = arith.addf %232, %281 : vector<32x64xf32>
    %c0_156 = arith.constant 0 : index
    %c0_157 = arith.constant 0 : index
    %283 = vector.load %arg15[%c0_156, %c0_157] : memref<32x64xf32, #tpu.memory_space<vmem>>, vector<32x64xf32>
    tpu.vector_store %arg15[%c0_156, %c0_157], %282 {strides = array<i32>} : memref<32x64xf32, #tpu.memory_space<vmem>>, vector<32x64xf32>,
    return
  }
  func.func @transform_0(%arg0: i32) -> (i32, i32) {
    %c0_i32 = arith.constant 0 : i32
    %c0_i32_0 = arith.constant 0 : i32
    %c0_i32_1 = arith.constant 0 : i32
    return %c0_i32, %c0_i32_0 : i32, i32
  }
  func.func @transform_1(%arg0: i32) -> (i32, i32) {
    %c0_i32 = arith.constant 0 : i32
    %c0_i32_0 = arith.constant 0 : i32
    %c0_i32_1 = arith.constant 0 : i32
    return %c0_i32, %c0_i32_0 : i32, i32
  }
  func.func @transform_2(%arg0: i32) -> (i32, i32) {
    %c0_i32 = arith.constant 0 : i32
    %c0_i32_0 = arith.constant 0 : i32
    %c0_i32_1 = arith.constant 0 : i32
    return %c0_i32, %c0_i32_0 : i32, i32
  }
  func.func @transform_3(%arg0: i32) -> (i32, i32, i32) {
    %c0_i32 = arith.constant 0 : i32
    %c0_i32_0 = arith.constant 0 : i32
    %c0_i32_1 = arith.constant 0 : i32
    %c0_i32_2 = arith.constant 0 : i32
    return %c0_i32, %c0_i32_0, %c0_i32_1 : i32, i32, i32
  }
  func.func @transform_4(%arg0: i32) -> (i32, i32, i32) {
    %c0_i32 = arith.constant 0 : i32
    %c0_i32_0 = arith.constant 0 : i32
    %c0_i32_1 = arith.constant 0 : i32
    %c0_i32_2 = arith.constant 0 : i32
    return %c0_i32, %c0_i32_0, %c0_i32_1 : i32, i32, i32
  }
  func.func @transform_5(%arg0: i32) -> (i32, i32, i32) {
    %c0_i32 = arith.constant 0 : i32
    %c0_i32_0 = arith.constant 0 : i32
    %c0_i32_1 = arith.constant 0 : i32
    %c0_i32_2 = arith.constant 0 : i32
    return %c0_i32, %c0_i32_0, %c0_i32_1 : i32, i32, i32
  }
  func.func @transform_6(%arg0: i32) -> (i32, i32, i32) {
    %c0_i32 = arith.constant 0 : i32
    %c0_i32_0 = arith.constant 0 : i32
    %c0_i32_1 = arith.constant 0 : i32
    %c0_i32_2 = arith.constant 0 : i32
    return %c0_i32, %c0_i32_0, %c0_i32_1 : i32, i32, i32
  }
  func.func @transform_7(%arg0: i32) -> (i32, i32) {
    %c0_i32 = arith.constant 0 : i32
    %c0_i32_0 = arith.constant 0 : i32
    %c0_i32_1 = arith.constant 0 : i32
    return %c0_i32, %c0_i32_0 : i32, i32
  }
  func.func @transform_8(%arg0: i32) -> (i32, i32) {
    %c0_i32 = arith.constant 0 : i32
    %c0_i32_0 = arith.constant 0 : i32
    %c0_i32_1 = arith.constant 0 : i32
    return %c0_i32, %c0_i32_0 : i32, i32
  }
  func.func @transform_9(%arg0: i32) -> (i32, i32) {
    %c0_i32 = arith.constant 0 : i32
    %c0_i32_0 = arith.constant 0 : i32
    %c0_i32_1 = arith.constant 0 : i32
    return %c0_i32, %c0_i32_0 : i32, i32
  }
  func.func @transform_10(%arg0: i32) -> (i32, i32) {
    %c0_i32 = arith.constant 0 : i32
    %c0_i32_0 = arith.constant 0 : i32
    %c0_i32_1 = arith.constant 0 : i32
    return %c0_i32, %c0_i32_0 : i32, i32
  }
  func.func @transform_11(%arg0: i32) -> (i32, i32) {
    %c0_i32 = arith.constant 0 : i32
    %c0_i32_0 = arith.constant 0 : i32
    %c0_i32_1 = arith.constant 0 : i32
    return %c0_i32, %c0_i32_0 : i32, i32
  }
  func.func @transform_12(%arg0: i32) -> (i32, i32) {
    %c0_i32 = arith.constant 0 : i32
    %c0_i32_0 = arith.constant 0 : i32
    %c0_i32_1 = arith.constant 0 : i32
    return %c0_i32, %c0_i32_0 : i32, i32
  }
  func.func @transform_13(%arg0: i32) -> (i32, i32) {
    %c0_i32 = arith.constant 0 : i32
    %c0_i32_0 = arith.constant 0 : i32
    %c0_i32_1 = arith.constant 0 : i32
    return %c0_i32, %c0_i32_0 : i32, i32
  }
  func.func @transform_14(%arg0: i32) -> (i32, i32) {
    %c0_i32 = arith.constant 0 : i32
    %c0_i32_0 = arith.constant 0 : i32
    %c0_i32_1 = arith.constant 0 : i32
    return %c0_i32, %c0_i32_0 : i32, i32
  }
}

module attributes {stable_mosaic.version = 11 : i64} {
  func.func @_final_kernel(%arg0: i32, %arg1: memref<32x64xf32, #tpu.memory_space<vmem>>, %arg2: memref<1x64xf32, #tpu.memory_space<vmem>>, %arg3: memref<1x64xf32, #tpu.memory_space<vmem>>, %arg4: memref<2x32xf32, #tpu.memory_space<vmem>>, %arg5: memref<64x128xf32, #tpu.memory_space<vmem>>, %arg6: memref<1x128xf32, #tpu.memory_space<vmem>>, %arg7: memref<2x128xf32, #tpu.memory_space<vmem>>) attributes {dimension_semantics = [#tpu.dimension_semantics<arbitrary>], iteration_bounds = array<i64: 1>, scalar_prefetch = 0 : i64, scratch_operands = 0 : i64, tpu.core_type = #tpu.core_type<tc>, window_params = [{pipeline_mode = #tpu.pipeline_mode<synchronous>, transform_indices = @transform_0, window_bounds = array<i64: 32, 64>}, {pipeline_mode = #tpu.pipeline_mode<synchronous>, transform_indices = @transform_1, window_bounds = array<i64: 1, 64>}, {pipeline_mode = #tpu.pipeline_mode<synchronous>, transform_indices = @transform_2, window_bounds = array<i64: 1, 64>}, {pipeline_mode = #tpu.pipeline_mode<synchronous>, transform_indices = @transform_3, window_bounds = array<i64: 2, 32>}, {pipeline_mode = #tpu.pipeline_mode<synchronous>, transform_indices = @transform_4, window_bounds = array<i64: 64, 128>}, {pipeline_mode = #tpu.pipeline_mode<synchronous>, transform_indices = @transform_5, window_bounds = array<i64: 1, 128>}, {pipeline_mode = #tpu.pipeline_mode<synchronous>, transform_indices = @transform_6, window_bounds = array<i64: 2, 128>}]} {
    %c0 = arith.constant 0 : index
    %c0_0 = arith.constant 0 : index
    %0 = vector.load %arg1[%c0, %c0_0] : memref<32x64xf32, #tpu.memory_space<vmem>>, vector<32x64xf32>
    %cst = arith.constant dense<0.000000e+00> : vector<32xf32>
    %1 = vector.multi_reduction <add>, %0, %cst [1] : vector<32x64xf32> to vector<32xf32>
    %2 = vector.shape_cast %1 : vector<32xf32> to vector<32x1xf32>
    %cst_1 = arith.constant 6.400000e+01 : f32
    %3 = vector.broadcast %cst_1 : f32 to vector<32x1xf32>
    %4 = arith.divf %2, %3 : vector<32x1xf32>
    %5 = vector.broadcast %4 : vector<32x1xf32> to vector<32x64xf32>
    %6 = arith.subf %0, %5 : vector<32x64xf32>
    %7 = arith.mulf %6, %6 : vector<32x64xf32>
    %cst_2 = arith.constant dense<0.000000e+00> : vector<32xf32>
    %8 = vector.multi_reduction <add>, %7, %cst_2 [1] : vector<32x64xf32> to vector<32xf32>
    %9 = vector.shape_cast %8 : vector<32xf32> to vector<32x1xf32>
    %cst_3 = arith.constant 6.400000e+01 : f32
    %10 = vector.broadcast %cst_3 : f32 to vector<32x1xf32>
    %11 = arith.divf %9, %10 : vector<32x1xf32>
    %cst_4 = arith.constant 9.99999974E-6 : f32
    %12 = vector.broadcast %cst_4 : f32 to vector<32x1xf32>
    %13 = arith.addf %11, %12 : vector<32x1xf32>
    %14 = math.rsqrt %13 : vector<32x1xf32>
    %15 = vector.broadcast %14 : vector<32x1xf32> to vector<32x64xf32>
    %16 = arith.mulf %6, %15 : vector<32x64xf32>
    %c0_5 = arith.constant 0 : index
    %c0_6 = arith.constant 0 : index
    %17 = vector.load %arg2[%c0_5, %c0_6] : memref<1x64xf32, #tpu.memory_space<vmem>>, vector<1x64xf32>
    %18 = vector.broadcast %17 : vector<1x64xf32> to vector<32x64xf32>
    %19 = arith.mulf %16, %18 : vector<32x64xf32>
    %c0_7 = arith.constant 0 : index
    %c0_8 = arith.constant 0 : index
    %20 = vector.load %arg3[%c0_7, %c0_8] : memref<1x64xf32, #tpu.memory_space<vmem>>, vector<1x64xf32>
    %21 = vector.broadcast %20 : vector<1x64xf32> to vector<32x64xf32>
    %22 = arith.addf %19, %21 : vector<32x64xf32>
    %c0_9 = arith.constant 0 : index
    %c0_10 = arith.constant 0 : index
    %23 = vector.load %arg4[%c0_9, %c0_10] : memref<2x32xf32, #tpu.memory_space<vmem>>, vector<2x32xf32>
    %cst_11 = arith.constant dense<0.000000e+00> : vector<2x64xf32>
    %24 = tpu.matmul %23, %22, %cst_11 {dimension_numbers = #tpu.dot_dimension_numbers<[1], [0], [0], [1], [0, 0, 1, 1], [], []>} : vector<2x32xf32>, vector<32x64xf32>, vector<2x64xf32> -> vector<2x64xf32>
    %c0_12 = arith.constant 0 : index
    %c0_13 = arith.constant 0 : index
    %25 = vector.load %arg5[%c0_12, %c0_13] : memref<64x128xf32, #tpu.memory_space<vmem>>, vector<64x128xf32>
    %26 = arith.truncf %24 : vector<2x64xf32> to vector<2x64xbf16>
    %27 = arith.truncf %25 : vector<64x128xf32> to vector<64x128xbf16>
    %cst_14 = arith.constant dense<0.000000e+00> : vector<2x128xf32>
    %28 = tpu.matmul %26, %27, %cst_14 {dimension_numbers = #tpu.dot_dimension_numbers<[1], [0], [0], [1], [0, 0, 1, 1], [], []>} : vector<2x64xbf16>, vector<64x128xbf16>, vector<2x128xf32> -> vector<2x128xf32>
    %c0_15 = arith.constant 0 : index
    %c0_16 = arith.constant 0 : index
    %29 = vector.load %arg6[%c0_15, %c0_16] : memref<1x128xf32, #tpu.memory_space<vmem>>, vector<1x128xf32>
    %30 = vector.broadcast %29 : vector<1x128xf32> to vector<2x128xf32>
    %31 = arith.addf %28, %30 : vector<2x128xf32>
    %c0_17 = arith.constant 0 : index
    %c0_18 = arith.constant 0 : index
    %32 = vector.load %arg7[%c0_17, %c0_18] : memref<2x128xf32, #tpu.memory_space<vmem>>, vector<2x128xf32>
    tpu.vector_store %arg7[%c0_17, %c0_18], %31 {strides = array<i32>} : memref<2x128xf32, #tpu.memory_space<vmem>>, vector<2x128xf32>,
    return
  }
  func.func @transform_0(%arg0: i32) -> (i32, i32) {
    %c0_i32 = arith.constant 0 : i32
    %c0_i32_0 = arith.constant 0 : i32
    %c0_i32_1 = arith.constant 0 : i32
    return %c0_i32, %c0_i32_0 : i32, i32
  }
  func.func @transform_1(%arg0: i32) -> (i32, i32) {
    %c0_i32 = arith.constant 0 : i32
    %c0_i32_0 = arith.constant 0 : i32
    %c0_i32_1 = arith.constant 0 : i32
    return %c0_i32, %c0_i32_0 : i32, i32
  }
  func.func @transform_2(%arg0: i32) -> (i32, i32) {
    %c0_i32 = arith.constant 0 : i32
    %c0_i32_0 = arith.constant 0 : i32
    %c0_i32_1 = arith.constant 0 : i32
    return %c0_i32, %c0_i32_0 : i32, i32
  }
  func.func @transform_3(%arg0: i32) -> (i32, i32) {
    %c0_i32 = arith.constant 0 : i32
    %c0_i32_0 = arith.constant 0 : i32
    %c0_i32_1 = arith.constant 0 : i32
    return %c0_i32, %c0_i32_0 : i32, i32
  }
  func.func @transform_4(%arg0: i32) -> (i32, i32) {
    %c0_i32 = arith.constant 0 : i32
    %c0_i32_0 = arith.constant 0 : i32
    %c0_i32_1 = arith.constant 0 : i32
    return %c0_i32, %c0_i32_0 : i32, i32
  }
  func.func @transform_5(%arg0: i32) -> (i32, i32) {
    %c0_i32 = arith.constant 0 : i32
    %c0_i32_0 = arith.constant 0 : i32
    %c0_i32_1 = arith.constant 0 : i32
    return %c0_i32, %c0_i32_0 : i32, i32
  }
  func.func @transform_6(%arg0: i32) -> (i32, i32) {
    %c0_i32 = arith.constant 0 : i32
    %c0_i32_0 = arith.constant 0 : i32
    %c0_i32_1 = arith.constant 0 : i32
    return %c0_i32, %c0_i32_0 : i32, i32
  }
}

</mosaic_0001>

<bundles_post_ra>
// kernel: forward.7
= control target key start
LH: loop header
LB: loop body
LE: loop exit
PB: predicated region body
PF: predicated region fallthrough
CT: control target
= control target key end

     0   :  { %vm61_vm0 = vcmask 392192   ;;  %vm183_vm1 = vcmask 261120   ;;  %s926_s1 = inlined_call_operand.vmem [shape: f32[48,32], index: 1, kind: input, shape index: {}]   ;;  %s927_s0 = inlined_call_operand.vmem [shape: f32[128,48], index: 0, kind: input, shape index: {}]   ;;  %s928_s2 = inlined_call_operand.vmem [shape: f32[1,32], index: 2, kind: input, shape index: {}]   ;;  %s929_s3 = inlined_call_operand.vmem [shape: f32[1,32], index: 3, kind: input, shape index: {}]   ;;  %s930_s4 = inlined_call_operand.vmem [shape: f32[1,32], index: 4, kind: input, shape index: {}]   ;;  %s931_s5 = inlined_call_operand.vmem [shape: f32[128,32], index: 5, kind: output, shape index: {}]  }
   0x1   :  { %v41_v0 = vld [vmem:[%s926_s1 + $0x20] sm:$0xff]  ;;  %v42_v1 = vld [vmem:[%s926_s1 + $0x28] sm:$0xff]  ;;  %v39_v2 = vld [vmem:[%s926_s1 + $0x10] sm:$0xff] }
   0x2   :  { %v53_v3 = vpack.c.bf16 %v42_v1, %v41_v0  ;;  %v40_v4 = vld [vmem:[%s926_s1 + $0x18] sm:$0xff]  ;;  %v37_v5 = vld [vmem:[%s926_s1] sm:$0xff]  ;;  %v38_v6 = vld [vmem:[%s926_s1 + $0x8] sm:$0xff] }
   0x3   :  { %v52_v7 = vpack.c.bf16 %v40_v4, %v39_v2  ;;  %v21_v8 = vld [vmem:[%s927_s0] sm:$0xff]  ;;  %v22_v9 = vld [vmem:[%s927_s0 + $0x8] sm:$0xff]  ;;  %v51_v14 = vpack.c.bf16 %v38_v6, %v37_v5  ;;  %v23_v15 = vld [vmem:[%s927_s0 + $0x10] sm:$0xff] }
   0x4   :  { %v29_v10 = vld [vmem:[%s927_s0 + $0x40] sm:$0xff]  ;;  %481 = vmatprep.subr.bf16.mxu0 %v53_v3  ;;  %503 = vmatprep.subr.bf16.mxu1 %v53_v3  ;;  %v43_v11 = vpack.c.bf16 %v22_v9, %v21_v8  ;;  %v30_v12 = vld [vmem:[%s927_s0 + $0x48] sm:$0xff]  ;;  %v24_v16 = vld [vmem:[%s927_s0 + $0x18] sm:$0xff] }
   0x5   :  { %482 = vmatpush3.bf16.msra.mxu0 %v53_v3  ;;  %506 = vmatpush3.bf16.msra.mxu1 %v53_v3  ;;  %v47_v13 = vpack.c.bf16 %v30_v12, %v29_v10  ;;  %v31_v17 = vld [vmem:[%s927_s0 + $0x50] sm:$0xff]  ;;  %v32_v18 = vld [vmem:[%s927_s0 + $0x58] sm:$0xff]  ;;  %v25_v19 = vld [vmem:[%s927_s0 + $0x20] sm:$0xff]  ;;  %v44_v23 = vpack.c.bf16 %v24_v16, %v23_v15 }
   0x6   :  { %483 = vmatprep.subr.bf16.mxu0 %v52_v7  ;;  %504 = vmatprep.subr.bf16.mxu1 %v52_v7  ;;  %v26_v20 = vld [vmem:[%s927_s0 + $0x28] sm:$0xff]  ;;  %v33_v21 = vld [vmem:[%s927_s0 + $0x60] sm:$0xff]  ;;  %v48_v24 = vpack.c.bf16 %v32_v18, %v31_v17  ;;  %v27_v27 = vld [vmem:[%s927_s0 + $0x30] sm:$0xff] }
   0x7   :  { %487 = vmatprep.mubr.msk.bf16.mxu0 %vm61_vm0, %v43_v11  ;;  %495 = vmatprep.mubr.msk.bf16.mxu1 %vm61_vm0, %v47_v13  ;;  %v34_v22 = vld [vmem:[%s927_s0 + $0x68] sm:$0xff]  ;;  %v45_v25 = vpack.c.bf16 %v26_v20, %v25_v19  ;;  %v28_v28 = vld [vmem:[%s927_s0 + $0x38] sm:$0xff]  ;;  %v35_v29 = vld [vmem:[%s927_s0 + $0x70] sm:$0xff] }
   0x8   :  { %v49_v26 = vpack.c.bf16 %v34_v22, %v33_v21  ;;  %v36_v30 = vld [vmem:[%s927_s0 + $0x78] sm:$0xff]  ;;  %v46_v31 = vpack.c.bf16 %v28_v28, %v27_v27  ;;  %v459_v33 = vld [vmem:[%s928_s2] ss:$0 sm:$0xff] }
   0x9   :  { %484 = vmatpush3.bf16.msra.mxu0 %v52_v7  ;;  %507 = vmatpush3.bf16.msra.mxu1 %v52_v7  ;;  %v50_v32 = vpack.c.bf16 %v36_v30, %v35_v29 }
   0xa   :  { %485 = vmatprep.subr.bf16.mxu0 %v51_v14  ;;  %505 = vmatprep.subr.bf16.mxu1 %v51_v14 }
   0xd   :  { %486 = vmatpush3.bf16.msra.mxu0 %v51_v14  ;;  %508 = vmatpush3.bf16.msra.mxu1 %v51_v14 }
  0x10   :  { %488 = vmatmul.mubr.msk.bf16.vlgmr.msra.gmra.mxu0 %vm61_vm0, %v44_v23  ;;  %496 = vmatmul.mubr.msk.bf16.vlgmr.msra.gmra.mxu1 %vm61_vm0, %v48_v24 }
  0x11   :  { %491 = vmatprep.mubr.msk.bf16.mxu0 %vm61_vm0, %v45_v25  ;;  %499 = vmatprep.mubr.msk.bf16.mxu1 %vm61_vm0, %v49_v26 }
  0x18   :  { %492 = vmatmul.mubr.msk.bf16.gmra.mxu0 %vm61_vm0, %v46_v31  ;;  %500 = vmatmul.mubr.msk.bf16.gmra.mxu1 %vm61_vm0, %v50_v32 }
  0xd0   :  { %v489_v34 = vpop.f32.mrf.mxu0  ;;  %v497_v35 = vpop.f32.mrf.mxu1 }
  0xd1   :  { %v648_v36 = vadd.f32 %v489_v34, %v459_v33  ;;  %v650_v37 = vadd.f32 %v497_v35, %v459_v33 }
  0xd2   :  { %v120_v38 = vpop.f32.mrf.mxu0  ;;  %v152_v39 = vpop.f32.mrf.mxu1 }
  0xd3   :  { %v652_v40 = vadd.f32 %v459_v33, %v120_v38  ;;  %v214_v41 = vsel %vm183_vm1, %v650_v37, 0.0  ;;  %v190_v42 = vsel %vm183_vm1, %v648_v36, 0.0  ;;  %v658_v48 = vadd.f32 %v459_v33, %v152_v39 }
  0xd4   :  { %215 = vadd.xlane.f32.xlu0 %v214_v41  ;;  %v498_v43 = vpop.f32.mrf.mxu1  ;;  %191 = vadd.xlane.f32.xlu1 %v190_v42  ;;  %v490_v44 = vpop.f32.mrf.mxu0 }
  0xd5   :  { %v132_v45 = vadd.f32 %v490_v44, %v459_v33  ;;  %v660_v49 = vadd.f32 %v498_v43, %v459_v33  ;;  %v184_v51 = vsel %vm183_vm1, %v652_v40, 0.0  ;;  %v208_v58 = vsel %vm183_vm1, %v658_v48, 0.0 }
  0xd6   :  { %v123_v46 = vpop.f32.mrf.mxu0  ;;  %v155_v47 = vpop.f32.mrf.mxu1 }
  0xd7   :  { %v193_v50 = vsel %vm183_vm1, %v132_v45, 0.0  ;;  %v665_v55 = vadd.f32 %v459_v33, %v123_v46  ;;  %v667_v56 = vadd.f32 %v459_v33, %v155_v47  ;;  %v217_v57 = vsel %vm183_vm1, %v660_v49, 0.0 }
  0xd8   :  { %194 = vadd.xlane.f32.xlu1 %v193_v50  ;;  %185 = vadd.xlane.f32.xlu0 %v184_v51  ;;  %v493_v52 = vpop.f32.mrf.mxu0  ;;  %v501_v53 = vpop.f32.mrf.mxu1 }
  0xd9   :  { %v673_v61 = vadd.f32 %v493_v52, %v459_v33  ;;  %v211_v63 = vsel %vm183_vm1, %v667_v56, 0.0  ;;  %v187_v0 = vsel %vm183_vm1, %v665_v55, 0.0  ;;  %v697_v12 = vadd.f32 %v501_v53, %v459_v33 }
  0xda   :  { %v136_v54 = vpop.f32.mrf.mxu0  ;;  %v168_v60 = vpop.f32.mrf.mxu1 }
  0xdb   :  { %v202_v4 = vsel %vm183_vm1, %v673_v61, 0.0  ;;  %v685_v5 = vadd.f32 %v459_v33, %v136_v54  ;;  %v689_v8 = vadd.f32 %v459_v33, %v168_v60  ;;  %v226_v17 = vsel %vm183_vm1, %v697_v12, 0.0 }
  0xdc   :  { %218 = vadd.xlane.f32.xlu1 %v217_v57  ;;  %209 = vadd.xlane.f32.xlu0 %v208_v58  ;;  %v494_v59 = vpop.f32.mrf.mxu0  ;;  %v502_v2 = vpop.f32.mrf.mxu1 }
  0xdd   :  { %v675_v62 = vadd.f32 %v494_v59, %v459_v33  ;;  %v196_v11 = vsel %vm183_vm1, %v685_v5, 0.0  ;;  %v699_v13 = vadd.f32 %v502_v2, %v459_v33  ;;  %v220_v15 = vsel %vm183_vm1, %v689_v8, 0.0 }
  0xde   :  { %v139_v1 = vpop.f32.mrf.mxu0  ;;  %v171_v7 = vpop.f32.mrf.mxu1 }
  0xdf   :  { %v205_v3 = vsel %vm183_vm1, %v675_v62, 0.0  ;;  %v687_v6 = vadd.f32 %v459_v33, %v139_v1  ;;  %v691_v9 = vadd.f32 %v459_v33, %v171_v7  ;;  %v229_v16 = vsel %vm183_vm1, %v699_v13, 0.0 }
  0xe0   :  { %212 = vadd.xlane.f32.xlu1 %v211_v63  ;;  %188 = vadd.xlane.f32.xlu0 %v187_v0 }
  0xe1   :  { %v199_v10 = vsel %vm183_vm1, %v687_v6, 0.0  ;;  %v223_v14 = vsel %vm183_vm1, %v691_v9, 0.0 }
  0xe4   :  { %206 = vadd.xlane.f32.xlu1 %v205_v3  ;;  %203 = vadd.xlane.f32.xlu0 %v202_v4 }
  0xe8   :  { %200 = vadd.xlane.f32.xlu1 %v199_v10  ;;  %197 = vadd.xlane.f32.xlu0 %v196_v11 }
  0xec   :  { %224 = vadd.xlane.f32.xlu1 %v223_v14  ;;  %221 = vadd.xlane.f32.xlu0 %v220_v15 }
  0xf0   :  { %230 = vadd.xlane.f32.xlu1 %v229_v16  ;;  %227 = vadd.xlane.f32.xlu0 %v226_v17 }
 0x15d   :  { %v216_v18 = vpop.xlane.xlu0 %215  ;;  %v192_v19 = vpop.xlane.xlu1 %191 }
 0x15e   :  { %v243_v20 = vmul.f32 0.03125, %v216_v18  ;;  %v235_v21 = vmul.f32 0.03125, %v192_v19 }
 0x160   :  { %v710_v22 = vsub.f32 %v650_v37, %v243_v20  ;;  %v713_v23 = vsub.f32 %v648_v36, %v235_v21 }
 0x161   :  { %v195_v24 = vpop.xlane.xlu1 %194  ;;  %v186_v25 = vpop.xlane.xlu0 %185 }
 0x162   :  { %v236_v26 = vmul.f32 0.03125, %v195_v24  ;;  %v233_v27 = vmul.f32 0.03125, %v186_v25  ;;  %v267_v28 = vmul.f32 %v713_v23, %v713_v23  ;;  %v275_v32 = vmul.f32 %v710_v22, %v710_v22 }
 0x164   :  { %v717_v29 = vsub.f32 %v132_v45, %v236_v26  ;;  %v720_v30 = vsub.f32 %v652_v40, %v233_v27  ;;  %v287_v31 = vsel %vm183_vm1, %v267_v28, 0.0  ;;  %v311_v42 = vsel %vm183_vm1, %v275_v32, 0.0 }
 0x165   :  { %v219_v33 = vpop.xlane.xlu1 %218  ;;  %288 = vadd.xlane.f32.xlu0 %v287_v31  ;;  %v210_v34 = vpop.xlane.xlu0 %209 }
 0x166   :  { %v244_v35 = vmul.f32 0.03125, %v219_v33  ;;  %v241_v36 = vmul.f32 0.03125, %v210_v34  ;;  %v268_v37 = vmul.f32 %v717_v29, %v717_v29  ;;  %v265_v38 = vmul.f32 %v720_v30, %v720_v30 }
 0x168   :  { %v730_v39 = vsub.f32 %v660_v49, %v244_v35  ;;  %v733_v40 = vsub.f32 %v658_v48, %v241_v36  ;;  %v290_v41 = vsel %vm183_vm1, %v268_v37, 0.0  ;;  %v281_v50 = vsel %vm183_vm1, %v265_v38, 0.0 }
 0x169   :  { %v213_v43 = vpop.xlane.xlu1 %212  ;;  %291 = vadd.xlane.f32.xlu1 %v290_v41  ;;  %312 = vadd.xlane.f32.xlu0 %v311_v42  ;;  %v189_v44 = vpop.xlane.xlu0 %188 }
 0x16a   :  { %v242_v45 = vmul.f32 0.03125, %v213_v43  ;;  %v234_v46 = vmul.f32 0.03125, %v189_v44  ;;  %v276_v47 = vmul.f32 %v730_v39, %v730_v39  ;;  %v273_v52 = vmul.f32 %v733_v40, %v733_v40 }
 0x16c   :  { %v741_v49 = vsub.f32 %v667_v56, %v242_v45  ;;  %v744_v48 = vsub.f32 %v665_v55, %v234_v46  ;;  %v314_v51 = vsel %vm183_vm1, %v276_v47, 0.0  ;;  %v305_v63 = vsel %vm183_vm1, %v273_v52, 0.0 }
 0x16d   :  { %v207_v53 = vpop.xlane.xlu1 %206  ;;  %315 = vadd.xlane.f32.xlu1 %v314_v51  ;;  %282 = vadd.xlane.f32.xlu0 %v281_v50  ;;  %v204_v54 = vpop.xlane.xlu0 %203 }
 0x16e   :  { %v240_v57 = vmul.f32 0.03125, %v207_v53  ;;  %v239_v58 = vmul.f32 0.03125, %v204_v54  ;;  %v266_v59 = vmul.f32 %v744_v48, %v744_v48  ;;  %v274_v56 = vmul.f32 %v741_v49, %v741_v49 }
 0x170   :  { %v754_v55 = vsub.f32 %v675_v62, %v240_v57  ;;  %v757_v60 = vsub.f32 %v673_v61, %v239_v58  ;;  %v284_v0 = vsel %vm183_vm1, %v266_v59, 0.0  ;;  %v308_v10 = vsel %vm183_vm1, %v274_v56, 0.0 }
 0x171   :  { %v201_v1 = vpop.xlane.xlu1 %200  ;;  %306 = vadd.xlane.f32.xlu0 %v305_v63  ;;  %285 = vadd.xlane.f32.xlu1 %v284_v0  ;;  %v198_v2 = vpop.xlane.xlu0 %197 }
 0x172   :  { %v238_v3 = vmul.f32 0.03125, %v201_v1  ;;  %v237_v4 = vmul.f32 0.03125, %v198_v2  ;;  %v271_v7 = vmul.f32 %v757_v60, %v757_v60  ;;  %v272_v14 = vmul.f32 %v754_v55, %v754_v55 }
 0x174   :  { %v765_v62 = vsub.f32 %v687_v6, %v238_v3  ;;  %v768_v61 = vsub.f32 %v685_v5, %v237_v4  ;;  %v299_v11 = vsel %vm183_vm1, %v271_v7, 0.0  ;;  %v302_v21 = vsel %vm183_vm1, %v272_v14, 0.0  ;;  %v807_v14 = vld [vmem:[%s929_s3] ss:$0 sm:$0xff] }
 0x175   :  { %v225_v15 = vpop.xlane.xlu1 %224  ;;  %309 = vadd.xlane.f32.xlu1 %v308_v10  ;;  %300 = vadd.xlane.f32.xlu0 %v299_v11  ;;  %v222_v16 = vpop.xlane.xlu0 %221 }
 0x176   :  { %v246_v17 = vmul.f32 0.03125, %v225_v15  ;;  %v245_v18 = vmul.f32 0.03125, %v222_v16  ;;  %v269_v19 = vmul.f32 %v768_v61, %v768_v61  ;;  %v270_v6 = vmul.f32 %v765_v62, %v765_v62 }
 0x178   :  { %v778_v5 = vsub.f32 %v691_v9, %v246_v17  ;;  %v781_v20 = vsub.f32 %v689_v8, %v245_v18  ;;  %v293_v24 = vsel %vm183_vm1, %v269_v19, 0.0  ;;  %v296_v32 = vsel %vm183_vm1, %v270_v6, 0.0  ;;  %v813_v18 = vld [vmem:[%s930_s4] ss:$0 sm:$0xff] }
 0x179   :  { %v231_v25 = vpop.xlane.xlu1 %230  ;;  %303 = vadd.xlane.f32.xlu1 %v302_v21  ;;  %294 = vadd.xlane.f32.xlu0 %v293_v24  ;;  %v228_v26 = vpop.xlane.xlu0 %227 }
 0x17a   :  { %v248_v27 = vmul.f32 0.03125, %v231_v25  ;;  %v247_v28 = vmul.f32 0.03125, %v228_v26  ;;  %v277_v31 = vmul.f32 %v781_v20, %v781_v20  ;;  %v278_v34 = vmul.f32 %v778_v5, %v778_v5 }
 0x17c   :  { %v789_v9 = vsub.f32 %v699_v13, %v248_v27  ;;  %v792_v8 = vsub.f32 %v697_v12, %v247_v28  ;;  %v317_v33 = vsel %vm183_vm1, %v277_v31, 0.0  ;;  %v320_v36 = vsel %vm183_vm1, %v278_v34, 0.0 }
 0x17d   :  { %297 = vadd.xlane.f32.xlu1 %v296_v32  ;;  %318 = vadd.xlane.f32.xlu0 %v317_v33 }
 0x17e   :  { %v279_v35 = vmul.f32 %v792_v8, %v792_v8  ;;  %v280_v13 = vmul.f32 %v789_v9, %v789_v9 }
 0x180   :  { %v323_v37 = vsel %vm183_vm1, %v279_v35, 0.0  ;;  %v326_v12 = vsel %vm183_vm1, %v280_v13, 0.0 }
 0x181   :  { %321 = vadd.xlane.f32.xlu1 %v320_v36  ;;  %324 = vadd.xlane.f32.xlu0 %v323_v37 }
 0x185   :  { %327 = vadd.xlane.f32.xlu1 %v326_v12 }
 0x1ee   :  { %v289_v38 = vpop.xlane.xlu0 %288 }
 0x1ef   :  { %v331_v41 = vmul.f32 0.03125, %v289_v38 }
 0x1f1   :  { %v347_v42 = vadd.f32 1e-05, %v331_v41 }
 0x1f2   :  { %v292_v43 = vpop.xlane.xlu1 %291  ;;  %v313_v44 = vpop.xlane.xlu0 %312 }
 0x1f3   :  { %509 = vrsqrt.f32 %v347_v42  ;;  %v332_v45 = vmul.f32 0.03125, %v292_v43  ;;  %v339_v46 = vmul.f32 0.03125, %v313_v44 }
 0x1f5   :  { %v348_v47 = vadd.f32 1e-05, %v332_v45  ;;  %v355_v50 = vadd.f32 1e-05, %v339_v46 }
 0x1f6   :  { %v316_v51 = vpop.xlane.xlu1 %315  ;;  %v283_v52 = vpop.xlane.xlu0 %282 }
 0x1f7   :  { %511 = vrsqrt.f32 %v348_v47  ;;  %v340_v53 = vmul.f32 0.03125, %v316_v51  ;;  %v329_v54 = vmul.f32 0.03125, %v283_v52 }
 0x1f8   :  { %513 = vrsqrt.f32 %v355_v50 }
 0x1f9   :  { %v356_v57 = vadd.f32 1e-05, %v340_v53  ;;  %v345_v58 = vadd.f32 1e-05, %v329_v54 }
 0x1fa   :  { %v286_v59 = vpop.xlane.xlu1 %285  ;;  %v307_v56 = vpop.xlane.xlu0 %306 }
 0x1fb   :  { %515 = vrsqrt.f32 %v356_v57  ;;  %v330_v63 = vmul.f32 0.03125, %v286_v59  ;;  %v337_v0 = vmul.f32 0.03125, %v307_v56 }
 0x1fc   :  { %517 = vrsqrt.f32 %v345_v58 }
 0x1fd   :  { %v346_v1 = vadd.f32 1e-05, %v330_v63  ;;  %v353_v2 = vadd.f32 1e-05, %v337_v0 }
 0x1fe   :  { %v310_v3 = vpop.xlane.xlu1 %309  ;;  %v301_v4 = vpop.xlane.xlu0 %300 }
 0x1ff   :  { %519 = vrsqrt.f32 %v346_v1  ;;  %v338_v7 = vmul.f32 0.03125, %v310_v3  ;;  %v335_v10 = vmul.f32 0.03125, %v301_v4 }
 0x200   :  { %v510_v11 = vpop.eup %509  ;;  %521 = vrsqrt.f32 %v353_v2 }
 0x201   :  { %v379_v15 = vmul.f32 %v510_v11, %v713_v23  ;;  %v354_v16 = vadd.f32 1e-05, %v338_v7  ;;  %v351_v17 = vadd.f32 1e-05, %v335_v10 }
 0x202   :  { %v304_v19 = vpop.xlane.xlu1 %303  ;;  %v295_v6 = vpop.xlane.xlu0 %294 }
 0x203   :  { %v402_v21 = vmul.f32 %v807_v14, %v379_v15  ;;  %523 = vrsqrt.f32 %v354_v16  ;;  %v336_v24 = vmul.f32 0.03125, %v304_v19  ;;  %v333_v25 = vmul.f32 0.03125, %v295_v6 }
 0x204   :  { %v512_v26 = vpop.eup %511  ;;  %525 = vrsqrt.f32 %v351_v17 }
 0x205   :  { %v514_v27 = vpop.eup %513  ;;  %v425_v28 = vadd.f32 %v813_v18, %v402_v21  ;;  %v380_v23 = vmul.f32 %v512_v26, %v717_v29  ;;  %v352_v31 = vadd.f32 1e-05, %v336_v24  ;;  %v349_v32 = vadd.f32 1e-05, %v333_v25 }
 0x206   :  { %v387_v33 = vmul.f32 %v514_v27, %v710_v22  ;;  %v298_v34 = vpop.xlane.xlu1 %297  ;;  %v319_v35 = vpop.xlane.xlu0 %318 }
 0x207   :  { %441 = vst.msk [vmem:[%s931_s5 + $0x10] sm:$0xff] %vm183_vm1, %v425_v28  ;;  %v403_v36 = vmul.f32 %v807_v14, %v380_v23  ;;  %527 = vrsqrt.f32 %v352_v31  ;;  %v334_v37 = vmul.f32 0.03125, %v298_v34  ;;  %v341_v13 = vmul.f32 0.03125, %v319_v35 }
 0x208   :  { %v516_v12 = vpop.eup %515  ;;  %v410_v38 = vmul.f32 %v807_v14, %v387_v33  ;;  %529 = vrsqrt.f32 %v349_v32 }
 0x209   :  { %v518_v29 = vpop.eup %517  ;;  %v426_v41 = vadd.f32 %v813_v18, %v403_v36  ;;  %v388_v22 = vmul.f32 %v516_v12, %v730_v39  ;;  %v350_v42 = vadd.f32 1e-05, %v334_v37  ;;  %v357_v43 = vadd.f32 1e-05, %v341_v13 }
 0x20a   :  { %v433_v44 = vadd.f32 %v813_v18, %v410_v38  ;;  %v377_v45 = vmul.f32 %v518_v29, %v720_v30  ;;  %v322_v46 = vpop.xlane.xlu1 %321  ;;  %v325_v47 = vpop.xlane.xlu0 %324 }
 0x20b   :  { %442 = vst.msk [vmem:[%s931_s5 + $0x18] sm:$0xff] %vm183_vm1, %v426_v41  ;;  %v411_v50 = vmul.f32 %v807_v14, %v388_v22  ;;  %531 = vrsqrt.f32 %v350_v42  ;;  %v342_v51 = vmul.f32 0.03125, %v322_v46  ;;  %v343_v52 = vmul.f32 0.03125, %v325_v47 }
 0x20c   :  { %v520_v53 = vpop.eup %519  ;;  %449 = vst.msk [vmem:[%s931_s5 + $0x50] sm:$0xff] %vm183_vm1, %v433_v44  ;;  %v400_v30 = vmul.f32 %v807_v14, %v377_v45  ;;  %533 = vrsqrt.f32 %v357_v43 }
 0x20d   :  { %v522_v39 = vpop.eup %521  ;;  %v434_v54 = vadd.f32 %v813_v18, %v411_v50  ;;  %v378_v57 = vmul.f32 %v520_v53, %v744_v48  ;;  %v358_v58 = vadd.f32 1e-05, %v342_v51  ;;  %v359_v59 = vadd.f32 1e-05, %v343_v52 }
 0x20e   :  { %v423_v56 = vadd.f32 %v813_v18, %v400_v30  ;;  %v385_v63 = vmul.f32 %v522_v39, %v733_v40  ;;  %v328_v0 = vpop.xlane.xlu1 %327 }
 0x20f   :  { %450 = vst.msk [vmem:[%s931_s5 + $0x58] sm:$0xff] %vm183_vm1, %v434_v54  ;;  %v401_v1 = vmul.f32 %v807_v14, %v378_v57  ;;  %535 = vrsqrt.f32 %v358_v58  ;;  %v344_v2 = vmul.f32 0.03125, %v328_v0 }
 0x210   :  { %v524_v3 = vpop.eup %523  ;;  %439 = vst.msk [vmem:[%s931_s5] sm:$0xff] %vm183_vm1, %v423_v56  ;;  %v408_v48 = vmul.f32 %v807_v14, %v385_v63  ;;  %537 = vrsqrt.f32 %v359_v59 }
 0x211   :  { %v526_v40 = vpop.eup %525  ;;  %v424_v4 = vadd.f32 %v813_v18, %v401_v1  ;;  %v386_v7 = vmul.f32 %v524_v3, %v741_v49  ;;  %v360_v10 = vadd.f32 1e-05, %v344_v2 }
 0x212   :  { %v431_v11 = vadd.f32 %v813_v18, %v408_v48  ;;  %v383_v15 = vmul.f32 %v526_v40, %v757_v60 }
 0x213   :  { %440 = vst.msk [vmem:[%s931_s5 + $0x8] sm:$0xff] %vm183_vm1, %v424_v4  ;;  %v409_v16 = vmul.f32 %v807_v14, %v386_v7  ;;  %539 = vrsqrt.f32 %v360_v10 }
 0x214   :  { %v528_v17 = vpop.eup %527  ;;  %447 = vst.msk [vmem:[%s931_s5 + $0x40] sm:$0xff] %vm183_vm1, %v431_v11  ;;  %v406_v49 = vmul.f32 %v807_v14, %v383_v15 }
 0x215   :  { %v530_v19 = vpop.eup %529  ;;  %v432_v6 = vadd.f32 %v813_v18, %v409_v16  ;;  %v384_v60 = vmul.f32 %v528_v17, %v754_v55 }
 0x216   :  { %v429_v21 = vadd.f32 %v813_v18, %v406_v49  ;;  %v381_v24 = vmul.f32 %v530_v19, %v768_v61 }
 0x217   :  { %448 = vst.msk [vmem:[%s931_s5 + $0x48] sm:$0xff] %vm183_vm1, %v432_v6  ;;  %v407_v25 = vmul.f32 %v807_v14, %v384_v60 }
 0x218   :  { %v532_v26 = vpop.eup %531  ;;  %445 = vst.msk [vmem:[%s931_s5 + $0x30] sm:$0xff] %vm183_vm1, %v429_v21  ;;  %v404_v27 = vmul.f32 %v807_v14, %v381_v24 }
 0x219   :  { %v534_v55 = vpop.eup %533  ;;  %v430_v28 = vadd.f32 %v813_v18, %v407_v25  ;;  %v382_v61 = vmul.f32 %v532_v26, %v765_v62 }
 0x21a   :  { %v427_v23 = vadd.f32 %v813_v18, %v404_v27  ;;  %v389_v31 = vmul.f32 %v534_v55, %v781_v20 }
 0x21b   :  { %446 = vst.msk [vmem:[%s931_s5 + $0x38] sm:$0xff] %vm183_vm1, %v430_v28  ;;  %v405_v32 = vmul.f32 %v807_v14, %v382_v61 }
 0x21c   :  { %v536_v33 = vpop.eup %535  ;;  %443 = vst.msk [vmem:[%s931_s5 + $0x20] sm:$0xff] %vm183_vm1, %v427_v23  ;;  %v412_v34 = vmul.f32 %v807_v14, %v389_v31 }
 0x21d   :  { %v538_v62 = vpop.eup %537  ;;  %v428_v35 = vadd.f32 %v813_v18, %v405_v32  ;;  %v390_v20 = vmul.f32 %v536_v33, %v778_v5 }
 0x21e   :  { %v435_v36 = vadd.f32 %v813_v18, %v412_v34  ;;  %v391_v37 = vmul.f32 %v538_v62, %v792_v8 }
 0x21f   :  { %444 = vst.msk [vmem:[%s931_s5 + $0x28] sm:$0xff] %vm183_vm1, %v428_v35  ;;  %v413_v13 = vmul.f32 %v807_v14, %v390_v20 }
 0x220   :  { %v540_v12 = vpop.eup %539  ;;  %451 = vst.msk [vmem:[%s931_s5 + $0x60] sm:$0xff] %vm183_vm1, %v435_v36  ;;  %v414_v38 = vmul.f32 %v807_v14, %v391_v37 }
 0x221   :  { %v436_v5 = vadd.f32 %v813_v18, %v413_v13  ;;  %v392_v29 = vmul.f32 %v540_v12, %v789_v9 }
 0x222   :  { %v437_v8 = vadd.f32 %v813_v18, %v414_v38 }
 0x223   :  { %452 = vst.msk [vmem:[%s931_s5 + $0x68] sm:$0xff] %vm183_vm1, %v436_v5  ;;  %v415_v41 = vmul.f32 %v807_v14, %v392_v29 }
 0x224   :  { %453 = vst.msk [vmem:[%s931_s5 + $0x70] sm:$0xff] %vm183_vm1, %v437_v8 }
 0x225   :  { %v438_v22 = vadd.f32 %v813_v18, %v415_v41 }
 0x227   :  { %454 = vst.msk [vmem:[%s931_s5 + $0x78] sm:$0xff] %vm183_vm1, %v438_v22 }

// kernel: forward.10
= control target key start
LH: loop header
LB: loop body
LE: loop exit
PB: predicated region body
PF: predicated region fallthrough
CT: control target
= control target key end

     0   :  { %vm164_vm0 = vcmask 523264   ;;  %s336_s0 = inlined_call_operand.vmem [shape: f32[32,128], index: 0, kind: input, shape index: {}]   ;;  %s337_s3 = inlined_call_operand.vmem [shape: f32[128,64], index: 3, kind: input, shape index: {}]   ;;  %s338_s1 = inlined_call_operand.vmem [shape: f32[1,128], index: 1, kind: input, shape index: {}]   ;;  %s339_s2 = inlined_call_operand.vmem [shape: f32[1,128], index: 2, kind: input, shape index: {}]   ;;  %s340_s4 = inlined_call_operand.vmem [shape: f32[32,64], index: 4, kind: output, shape index: {}]  }
   0x1   :  { %v18_v0 = vld [vmem:[%s336_s0] sm:$0xff]  ;;  %v20_v1 = vld [vmem:[%s336_s0 + $0x10] sm:$0xff]  ;;  %v19_v2 = vld [vmem:[%s336_s0 + $0x8] sm:$0xff] }
   0x2   :  { %22 = vadd.xlane.f32.xlu0 %v18_v0  ;;  %26 = vadd.xlane.f32.xlu1 %v20_v1  ;;  %v21_v3 = vld [vmem:[%s336_s0 + $0x18] sm:$0xff]  ;;  %v103_v20 = vld [vmem:[%s337_s3 + $0x70] sm:$0xff]  ;;  %v101_v23 = vld [vmem:[%s337_s3 + $0x60] sm:$0xff] }
   0x3   :  { %v104_v21 = vld [vmem:[%s337_s3 + $0x78] sm:$0xff]  ;;  %v102_v24 = vld [vmem:[%s337_s3 + $0x68] sm:$0xff]  ;;  %v99_v26 = vld [vmem:[%s337_s3 + $0x50] sm:$0xff] }
   0x4   :  { %v114_v22 = vpack.c.bf16 %v104_v21, %v103_v20  ;;  %v113_v25 = vpack.c.bf16 %v102_v24, %v101_v23  ;;  %v100_v27 = vld [vmem:[%s337_s3 + $0x58] sm:$0xff]  ;;  %v97_v29 = vld [vmem:[%s337_s3 + $0x40] sm:$0xff]  ;;  %v98_v30 = vld [vmem:[%s337_s3 + $0x48] sm:$0xff] }
   0x5   :  { %v112_v28 = vpack.c.bf16 %v100_v27, %v99_v26  ;;  %v95_v31 = vld [vmem:[%s337_s3 + $0x30] sm:$0xff]  ;;  %v111_v32 = vpack.c.bf16 %v98_v30, %v97_v29  ;;  %v96_v33 = vld [vmem:[%s337_s3 + $0x38] sm:$0xff]  ;;  %v93_v35 = vld [vmem:[%s337_s3 + $0x20] sm:$0xff] }
   0x6   :  { %24 = vadd.xlane.f32.xlu0 %v19_v2  ;;  %28 = vadd.xlane.f32.xlu1 %v21_v3  ;;  %v110_v34 = vpack.c.bf16 %v96_v33, %v95_v31  ;;  %v94_v36 = vld [vmem:[%s337_s3 + $0x28] sm:$0xff]  ;;  %v91_v38 = vld [vmem:[%s337_s3 + $0x10] sm:$0xff]  ;;  %v92_v39 = vld [vmem:[%s337_s3 + $0x18] sm:$0xff] }
   0x7   :  { %185 = vmatprep.subr.bf16.mxu0 %v114_v22  ;;  %v109_v37 = vpack.c.bf16 %v94_v36, %v93_v35  ;;  %v108_v40 = vpack.c.bf16 %v92_v39, %v91_v38  ;;  %v89_v41 = vld [vmem:[%s337_s3] sm:$0xff]  ;;  %v90_v42 = vld [vmem:[%s337_s3 + $0x8] sm:$0xff] }
   0x8   :  { %186 = vmatpush3.bf16.msra.mxu0 %v114_v22  ;;  %v107_v43 = vpack.c.bf16 %v90_v42, %v89_v41  ;;  %v173_v58 = vld [vmem:[%s338_s1] ss:$0 sm:$0xff] }
   0x9   :  { %187 = vmatprep.subr.bf16.mxu0 %v113_v25  ;;  %v174_v63 = vld [vmem:[%s339_s2] ss:$0 sm:$0xff] }
   0xc   :  { %188 = vmatpush3.bf16.msra.mxu0 %v113_v25 }
   0xd   :  { %189 = vmatprep.subr.bf16.mxu0 %v112_v28 }
  0x10   :  { %190 = vmatpush3.bf16.msra.mxu0 %v112_v28 }
  0x11   :  { %191 = vmatprep.subr.bf16.mxu0 %v111_v32 }
  0x14   :  { %192 = vmatpush3.bf16.msra.mxu0 %v111_v32 }
  0x15   :  { %193 = vmatprep.subr.bf16.mxu0 %v110_v34 }
  0x18   :  { %194 = vmatpush3.bf16.msra.mxu0 %v110_v34 }
  0x19   :  { %195 = vmatprep.subr.bf16.mxu0 %v109_v37 }
  0x1c   :  { %196 = vmatpush3.bf16.msra.mxu0 %v109_v37 }
  0x1d   :  { %197 = vmatprep.subr.bf16.mxu0 %v108_v40 }
  0x20   :  { %198 = vmatpush3.bf16.msra.mxu0 %v108_v40 }
  0x21   :  { %199 = vmatprep.subr.bf16.mxu0 %v107_v43 }
  0x24   :  { %200 = vmatpush3.bf16.msra.mxu0 %v107_v43 }
  0x8b   :  { %v23_v4 = vpop.xlane.xlu0 %22  ;;  %v27_v5 = vpop.xlane.xlu1 %26 }
  0x8c   :  { %v31_v6 = vmul.f32 0.0078125, %v23_v4  ;;  %v33_v7 = vmul.f32 0.0078125, %v27_v5 }
  0x8e   :  { %v250_v8 = vsub.f32 %v18_v0, %v31_v6  ;;  %v252_v9 = vsub.f32 %v20_v1, %v33_v7 }
  0x8f   :  { %v25_v10 = vpop.xlane.xlu0 %24  ;;  %v29_v11 = vpop.xlane.xlu1 %28 }
  0x90   :  { %v32_v12 = vmul.f32 0.0078125, %v25_v10  ;;  %v39_v13 = vmul.f32 %v250_v8, %v250_v8  ;;  %v34_v14 = vmul.f32 0.0078125, %v29_v11  ;;  %v41_v17 = vmul.f32 %v252_v9, %v252_v9 }
  0x92   :  { %v256_v15 = vsub.f32 %v19_v2, %v32_v12  ;;  %43 = vadd.xlane.f32.xlu0 %v39_v13  ;;  %v258_v16 = vsub.f32 %v21_v3, %v34_v14 }
  0x94   :  { %v40_v18 = vmul.f32 %v256_v15, %v256_v15  ;;  %v42_v19 = vmul.f32 %v258_v16, %v258_v16 }
  0x96   :  { %47 = vadd.xlane.f32.xlu0 %v41_v17  ;;  %45 = vadd.xlane.f32.xlu1 %v40_v18 }
  0x9a   :  { %49 = vadd.xlane.f32.xlu1 %v42_v19 }
 0x11b   :  { %v44_v44 = vpop.xlane.xlu0 %43 }
 0x11c   :  { %v51_v45 = vmul.f32 0.0078125, %v44_v44 }
 0x11e   :  { %v55_v46 = vadd.f32 1e-05, %v51_v45 }
 0x11f   :  { %v46_v47 = vpop.xlane.xlu1 %45  ;;  %v48_v48 = vpop.xlane.xlu0 %47 }
 0x120   :  { %205 = vrsqrt.f32 %v55_v46  ;;  %v52_v49 = vmul.f32 0.0078125, %v46_v47  ;;  %v53_v50 = vmul.f32 0.0078125, %v48_v48 }
 0x122   :  { %v56_v51 = vadd.f32 1e-05, %v52_v49  ;;  %v57_v52 = vadd.f32 1e-05, %v53_v50 }
 0x123   :  { %v50_v53 = vpop.xlane.xlu1 %49 }
 0x124   :  { %207 = vrsqrt.f32 %v56_v51  ;;  %v54_v54 = vmul.f32 0.0078125, %v50_v53 }
 0x125   :  { %209 = vrsqrt.f32 %v57_v52 }
 0x126   :  { %v58_v55 = vadd.f32 1e-05, %v54_v54 }
 0x128   :  { %211 = vrsqrt.f32 %v58_v55 }
 0x12d   :  { %v206_v56 = vpop.eup %205 }
 0x12e   :  { %v63_v57 = vmul.f32 %v206_v56, %v250_v8 }
 0x130   :  { %v74_v62 = vmul.f32 %v173_v58, %v63_v57 }
 0x131   :  { %v208_v59 = vpop.eup %207 }
 0x132   :  { %v210_v60 = vpop.eup %209  ;;  %v64_v61 = vmul.f32 %v208_v59, %v256_v15  ;;  %v85_v3 = vadd.f32 %v174_v63, %v74_v62 }
 0x133   :  { %v65_v0 = vmul.f32 %v210_v60, %v252_v9 }
 0x134   :  { %v75_v1 = vmul.f32 %v173_v58, %v64_v61 }
 0x135   :  { %v212_v2 = vpop.eup %211  ;;  %v76_v6 = vmul.f32 %v173_v58, %v65_v0 }
 0x136   :  { %v86_v4 = vadd.f32 %v174_v63, %v75_v1  ;;  %v66_v5 = vmul.f32 %v212_v2, %v258_v16 }
 0x137   :  { %v87_v10 = vadd.f32 %v174_v63, %v76_v6 }
 0x138   :  { %v105_v7 = vpack.c.bf16 %v86_v4, %v85_v3  ;;  %v77_v8 = vmul.f32 %v173_v58, %v66_v5 }
 0x13a   :  { %201 = vmatprep.mubr.bf16.mxu0 %v105_v7  ;;  %v88_v11 = vadd.f32 %v174_v63, %v77_v8 }
 0x13c   :  { %v106_v12 = vpack.c.bf16 %v88_v11, %v87_v10 }
 0x13e   :  { %202 = vmatmul.mubr.bf16.vlgmr.msra.gmra.mxu0 %v106_v12 }
 0x1fe   :  { %v203_v13 = vpop.f32.mrf.mxu0 }
 0x1ff   :  { %167 = vst.msk [vmem:[%s340_s4 + $0x10] sm:$0xff] %vm164_vm0, %v203_v13 }
 0x200   :  { %v149_v9 = vpop.f32.mrf.mxu0 }
 0x201   :  { %165 = vst.msk [vmem:[%s340_s4] sm:$0xff] %vm164_vm0, %v149_v9 }
 0x202   :  { %v204_v14 = vpop.f32.mrf.mxu0 }
 0x203   :  { %168 = vst.msk [vmem:[%s340_s4 + $0x18] sm:$0xff] %vm164_vm0, %v204_v14 }
 0x204   :  { %v152_v15 = vpop.f32.mrf.mxu0 }
 0x205   :  { %166 = vst.msk [vmem:[%s340_s4 + $0x8] sm:$0xff] %vm164_vm0, %v152_v15 }

// kernel: forward.8
= control target key start
LH: loop header
LB: loop body
LE: loop exit
PB: predicated region body
PF: predicated region fallthrough
CT: control target
= control target key end

     0   :  { %vm64_vm0 = vcmask 261120   ;;  %vm734_vm1 = vcmask 130048   ;;  %s5555_s0 = inlined_call_operand.vmem [shape: f32[128,32], index: 0, kind: input, shape index: {}]   ;;  %s5556_s3 = inlined_call_operand.vmem [shape: f32[6,32,16], index: 3, kind: input, shape index: {}]   ;;  %s5557_s1 = inlined_call_operand.vmem [shape: f32[1,32], index: 1, kind: input, shape index: {}]   ;;  %s5558_s2 = inlined_call_operand.vmem [shape: f32[1,32], index: 2, kind: input, shape index: {}]   ;;  %s5559_s4 = inlined_call_operand.vmem [shape: f32[6,1,16], index: 4, kind: input, shape index: {}]   ;;  %s5560_s5 = inlined_call_operand.vmem [shape: f32[2,128,128], index: 5, kind: input, shape index: {}]   ;;  %s5561_s6 = inlined_call_operand.vmem [shape: f32[2,16,32], index: 6, kind: input, shape index: {}]   ;;  %s5562_s7 = inlined_call_operand.vmem [shape: f32[1,32], index: 7, kind: input, shape index: {}]   ;;  %s5563_s10 = inlined_call_operand.vmem [shape: f32[32,128], index: 10, kind: input, shape index: {}]   ;;  %s5564_s8 = inlined_call_operand.vmem [shape: f32[1,32], index: 8, kind: input, shape index: {}]   ;;  %s5565_s9 = inlined_call_operand.vmem [shape: f32[1,32], index: 9, kind: input, shape index: {}]   ;;  %s5566_s12 = inlined_call_operand.vmem [shape: f32[128,32], index: 12, kind: input, shape index: {}]   ;;  %s5567_s11 = inlined_call_operand.vmem [shape: f32[1,128], index: 11, kind: input, shape index: {}]   ;;  %s5568_s13 = inlined_call_operand.vmem [shape: f32[1,32], index: 13, kind: input, shape index: {}]   ;;  %s5569_s14 = inlined_call_operand.vmem [shape: f32[128,32], index: 14, kind: output, shape index: {}]  }
   0x1   :  { %v48_v0 = vld [vmem:[%s5555_s0] sm:$0xff]  ;;  %v50_v1 = vld [vmem:[%s5555_s0 + $0x10] sm:$0xff]  ;;  %v49_v2 = vld [vmem:[%s5555_s0 + $0x8] sm:$0xff] }
   0x2   :  { %v65_v3 = vsel %vm64_vm0, %v48_v0, 0.0  ;;  %v71_v4 = vsel %vm64_vm0, %v50_v1, 0.0  ;;  %v51_v5 = vld [vmem:[%s5555_s0 + $0x18] sm:$0xff]  ;;  %v68_v6 = vsel %vm64_vm0, %v49_v2, 0.0  ;;  %v52_v8 = vld [vmem:[%s5555_s0 + $0x20] sm:$0xff]  ;;  %v53_v9 = vld [vmem:[%s5555_s0 + $0x28] sm:$0xff] }
   0x3   :  { %66 = vadd.xlane.f32.xlu0 %v65_v3  ;;  %72 = vadd.xlane.f32.xlu1 %v71_v4  ;;  %v74_v7 = vsel %vm64_vm0, %v51_v5, 0.0  ;;  %v77_v10 = vsel %vm64_vm0, %v52_v8, 0.0  ;;  %v80_v11 = vsel %vm64_vm0, %v53_v9, 0.0  ;;  %v3946_v12 = vld [vmem:[%s5555_s0 + $0x30] sm:$0xff]  ;;  %v3951_v13 = vld [vmem:[%s5555_s0 + $0x38] sm:$0xff]  ;;  %v3960_v16 = vld [vmem:[%s5555_s0 + $0x40] sm:$0xff] }
   0x4   :  { %v83_v14 = vsel %vm64_vm0, %v3946_v12, 0.0  ;;  %v86_v15 = vsel %vm64_vm0, %v3951_v13, 0.0  ;;  %v3965_v17 = vld [vmem:[%s5555_s0 + $0x48] sm:$0xff]  ;;  %v89_v18 = vsel %vm64_vm0, %v3960_v16, 0.0  ;;  %v3974_v20 = vld [vmem:[%s5555_s0 + $0x50] sm:$0xff]  ;;  %v3979_v21 = vld [vmem:[%s5555_s0 + $0x58] sm:$0xff] }
   0x5   :  { %v92_v19 = vsel %vm64_vm0, %v3965_v17, 0.0  ;;  %v95_v22 = vsel %vm64_vm0, %v3974_v20, 0.0  ;;  %v98_v23 = vsel %vm64_vm0, %v3979_v21, 0.0  ;;  %v3988_v24 = vld [vmem:[%s5555_s0 + $0x60] sm:$0xff]  ;;  %v3993_v25 = vld [vmem:[%s5555_s0 + $0x68] sm:$0xff]  ;;  %v4002_v28 = vld [vmem:[%s5555_s0 + $0x70] sm:$0xff] }
   0x6   :  { %v101_v26 = vsel %vm64_vm0, %v3988_v24, 0.0  ;;  %v104_v27 = vsel %vm64_vm0, %v3993_v25, 0.0  ;;  %v4007_v29 = vld [vmem:[%s5555_s0 + $0x78] sm:$0xff]  ;;  %v107_v30 = vsel %vm64_vm0, %v4002_v28, 0.0 }
   0x7   :  { %69 = vadd.xlane.f32.xlu0 %v68_v6  ;;  %75 = vadd.xlane.f32.xlu1 %v74_v7  ;;  %v110_v31 = vsel %vm64_vm0, %v4007_v29, 0.0 }
   0xb   :  { %78 = vadd.xlane.f32.xlu0 %v77_v10  ;;  %81 = vadd.xlane.f32.xlu1 %v80_v11 }
   0xf   :  { %84 = vadd.xlane.f32.xlu0 %v83_v14  ;;  %87 = vadd.xlane.f32.xlu1 %v86_v15 }
  0x13   :  { %90 = vadd.xlane.f32.xlu0 %v89_v18  ;;  %93 = vadd.xlane.f32.xlu1 %v92_v19 }
  0x17   :  { %96 = vadd.xlane.f32.xlu0 %v95_v22  ;;  %99 = vadd.xlane.f32.xlu1 %v98_v23 }
  0x1b   :  { %102 = vadd.xlane.f32.xlu0 %v101_v26  ;;  %105 = vadd.xlane.f32.xlu1 %v104_v27 }
  0x1f   :  { %108 = vadd.xlane.f32.xlu0 %v107_v30  ;;  %111 = vadd.xlane.f32.xlu1 %v110_v31 }
  0x8c   :  { %v67_v32 = vpop.xlane.xlu0 %66  ;;  %v73_v33 = vpop.xlane.xlu1 %72 }
  0x8d   :  { %v114_v34 = vmul.f32 0.03125, %v67_v32  ;;  %v116_v35 = vmul.f32 0.03125, %v73_v33 }
  0x8f   :  { %v4013_v36 = vsub.f32 %v48_v0, %v114_v34  ;;  %v4015_v37 = vsub.f32 %v50_v1, %v116_v35 }
  0x90   :  { %v70_v38 = vpop.xlane.xlu0 %69  ;;  %v76_v39 = vpop.xlane.xlu1 %75 }
  0x91   :  { %v115_v40 = vmul.f32 0.03125, %v70_v38  ;;  %v117_v41 = vmul.f32 0.03125, %v76_v39  ;;  %v146_v42 = vmul.f32 %v4013_v36, %v4013_v36  ;;  %v148_v43 = vmul.f32 %v4015_v37, %v4015_v37 }
  0x93   :  { %v4021_v44 = vsub.f32 %v49_v2, %v115_v40  ;;  %v4023_v45 = vsub.f32 %v51_v5, %v117_v41  ;;  %v162_v46 = vsel %vm64_vm0, %v146_v42, 0.0  ;;  %v168_v49 = vsel %vm64_vm0, %v148_v43, 0.0 }
  0x94   :  { %163 = vadd.xlane.f32.xlu0 %v162_v46  ;;  %v79_v47 = vpop.xlane.xlu0 %78  ;;  %v82_v48 = vpop.xlane.xlu1 %81 }
  0x95   :  { %v118_v50 = vmul.f32 0.03125, %v79_v47  ;;  %v119_v51 = vmul.f32 0.03125, %v82_v48  ;;  %v147_v52 = vmul.f32 %v4021_v44, %v4021_v44  ;;  %v149_v53 = vmul.f32 %v4023_v45, %v4023_v45 }
  0x97   :  { %v4031_v54 = vsub.f32 %v52_v8, %v118_v50  ;;  %v4033_v55 = vsub.f32 %v53_v9, %v119_v51  ;;  %v165_v56 = vsel %vm64_vm0, %v147_v52, 0.0  ;;  %v171_v59 = vsel %vm64_vm0, %v149_v53, 0.0  ;;  %v331_v53 = vld [vmem:[%s5556_s3 + $0x18] sm:$0xff] }
  0x98   :  { %169 = vadd.xlane.f32.xlu0 %v168_v49  ;;  %166 = vadd.xlane.f32.xlu1 %v165_v56  ;;  %v85_v57 = vpop.xlane.xlu0 %84  ;;  %v88_v58 = vpop.xlane.xlu1 %87  ;;  %v2953_v56 = vld [vmem:[%s5556_s3 + $0x50] sm:$0xff] }
  0x99   :  { %v120_v60 = vmul.f32 0.03125, %v85_v57  ;;  %v121_v61 = vmul.f32 0.03125, %v88_v58  ;;  %v150_v62 = vmul.f32 %v4031_v54, %v4031_v54  ;;  %v151_v63 = vmul.f32 %v4033_v55, %v4033_v55  ;;  %v2954_v58 = vld [vmem:[%s5556_s3 + $0x58] sm:$0xff] }
  0x9b   :  { %v4042_v0 = vsub.f32 %v3946_v12, %v120_v60  ;;  %v4045_v1 = vsub.f32 %v3951_v13, %v121_v61  ;;  %v174_v2 = vsel %vm64_vm0, %v150_v62, 0.0  ;;  %v177_v5 = vsel %vm64_vm0, %v151_v63, 0.0  ;;  %v328_v60 = vld [vmem:[%s5556_s3] sm:$0xff]  ;;  %v329_v61 = vld [vmem:[%s5556_s3 + $0x8] sm:$0xff] }
  0x9c   :  { %172 = vadd.xlane.f32.xlu1 %v171_v59  ;;  %175 = vadd.xlane.f32.xlu0 %v174_v2  ;;  %v91_v3 = vpop.xlane.xlu0 %90  ;;  %v94_v4 = vpop.xlane.xlu1 %93  ;;  %v484_v59 = vpack.c.bf16 %v2954_v58, %v2953_v56  ;;  %v2951_v62 = vld [vmem:[%s5556_s3 + $0x40] sm:$0xff]  ;;  %v332_v63 = vpack.c.bf16 %v329_v61, %v328_v60  ;;  %v2952_v2 = vld [vmem:[%s5556_s3 + $0x48] sm:$0xff] }
  0x9d   :  { %v122_v6 = vmul.f32 0.03125, %v91_v3  ;;  %v123_v7 = vmul.f32 0.03125, %v94_v4  ;;  %v152_v8 = vmul.f32 %v4042_v0, %v4042_v0  ;;  %v153_v9 = vmul.f32 %v4045_v1, %v4045_v1  ;;  %v2967_v4 = vld [vmem:[%s5556_s3 + $0x90] sm:$0xff] }
  0x9e   :  { %3272 = vmatprep.subr.bf16.mxu1 %v484_v59  ;;  %v483_v3 = vpack.c.bf16 %v2952_v2, %v2951_v62 }
  0x9f   :  { %v4054_v10 = vsub.f32 %v3960_v16, %v122_v6  ;;  %v4057_v11 = vsub.f32 %v3965_v17, %v123_v7  ;;  %v180_v12 = vsel %vm64_vm0, %v152_v8, 0.0  ;;  %v183_v15 = vsel %vm64_vm0, %v153_v9, 0.0  ;;  %3273 = vmatpush3.bf16.msra.mxu1 %v484_v59 }
  0xa0   :  { %178 = vadd.xlane.f32.xlu1 %v177_v5  ;;  %181 = vadd.xlane.f32.xlu0 %v180_v12  ;;  %v97_v13 = vpop.xlane.xlu0 %96  ;;  %v100_v14 = vpop.xlane.xlu1 %99  ;;  %v2968_v5 = vld [vmem:[%s5556_s3 + $0x98] sm:$0xff] }
  0xa1   :  { %v124_v18 = vmul.f32 0.03125, %v97_v13  ;;  %v125_v19 = vmul.f32 0.03125, %v100_v14  ;;  %v154_v22 = vmul.f32 %v4054_v10, %v4054_v10  ;;  %v155_v16 = vmul.f32 %v4057_v11, %v4057_v11  ;;  %3274 = vmatprep.subr.bf16.mxu1 %v483_v3 }
  0xa2   :  { %v4133_v6 = vpack.c.bf16 %v2968_v5, %v2967_v4  ;;  %v4149_v4 = vld [vmem:[%s5558_s2] ss:$0 sm:$0xff] }
  0xa3   :  { %v4066_v23 = vsub.f32 %v3974_v20, %v124_v18  ;;  %v4069_v17 = vsub.f32 %v3979_v21, %v125_v19  ;;  %v186_v26 = vsel %vm64_vm0, %v154_v22, 0.0  ;;  %v189_v31 = vsel %vm64_vm0, %v155_v16, 0.0  ;;  %3275 = vmatpush3.bf16.msra.mxu1 %v483_v3 }
  0xa4   :  { %184 = vadd.xlane.f32.xlu1 %v183_v15  ;;  %187 = vadd.xlane.f32.xlu0 %v186_v26  ;;  %v103_v27 = vpop.xlane.xlu0 %102  ;;  %v106_v30 = vpop.xlane.xlu1 %105 }
  0xa5   :  { %v126_v32 = vmul.f32 0.03125, %v103_v27  ;;  %v127_v33 = vmul.f32 0.03125, %v106_v30  ;;  %v156_v34 = vmul.f32 %v4066_v23, %v4066_v23  ;;  %v157_v20 = vmul.f32 %v4069_v17, %v4069_v17 }
  0xa7   :  { %v4078_v35 = vsub.f32 %v3988_v24, %v126_v32  ;;  %v4081_v21 = vsub.f32 %v3993_v25, %v127_v33  ;;  %v192_v38 = vsel %vm64_vm0, %v156_v34, 0.0  ;;  %v195_v41 = vsel %vm64_vm0, %v157_v20, 0.0 }
  0xa8   :  { %190 = vadd.xlane.f32.xlu1 %v189_v31  ;;  %193 = vadd.xlane.f32.xlu0 %v192_v38  ;;  %v109_v39 = vpop.xlane.xlu0 %108  ;;  %v112_v40 = vpop.xlane.xlu1 %111 }
  0xa9   :  { %v128_v42 = vmul.f32 0.03125, %v109_v39  ;;  %v129_v43 = vmul.f32 0.03125, %v112_v40  ;;  %v158_v46 = vmul.f32 %v4078_v35, %v4078_v35  ;;  %v159_v24 = vmul.f32 %v4081_v21, %v4081_v21 }
  0xab   :  { %v4090_v47 = vsub.f32 %v4002_v28, %v128_v42  ;;  %v4093_v25 = vsub.f32 %v4007_v29, %v129_v43  ;;  %v198_v48 = vsel %vm64_vm0, %v158_v46, 0.0  ;;  %v201_v49 = vsel %vm64_vm0, %v159_v24, 0.0  ;;  %v330_v29 = vld [vmem:[%s5556_s3 + $0x10] sm:$0xff] }
  0xac   :  { %196 = vadd.xlane.f32.xlu1 %v195_v41  ;;  %199 = vadd.xlane.f32.xlu0 %v198_v48  ;;  %v333_v57 = vpack.c.bf16 %v331_v53, %v330_v29 }
  0xad   :  { %v160_v50 = vmul.f32 %v4090_v47, %v4090_v47  ;;  %v161_v51 = vmul.f32 %v4093_v25, %v4093_v25 }
  0xae   :  { %3252 = vmatprep.subr.bf16.mxu0 %v333_v57 }
  0xaf   :  { %v204_v52 = vsel %vm64_vm0, %v160_v50, 0.0  ;;  %v207_v28 = vsel %vm64_vm0, %v161_v51, 0.0  ;;  %3253 = vmatpush3.bf16.msra.mxu0 %v333_v57 }
  0xb0   :  { %202 = vadd.xlane.f32.xlu1 %v201_v49  ;;  %205 = vadd.xlane.f32.xlu0 %v204_v52  ;;  %v4140_v52 = vld [vmem:[%s5557_s1] ss:$0 sm:$0xff] }
  0xb1   :  { %3254 = vmatprep.subr.bf16.mxu0 %v332_v63 }
  0xb3   :  { %3255 = vmatpush3.bf16.msra.mxu0 %v332_v63 }
  0xb4   :  { %208 = vadd.xlane.f32.xlu1 %v207_v28  ;;  %3292 = vmatprep.subr.bf16.mxu0 %v4133_v6 }
 0x11d   :  { %v164_v7 = vpop.xlane.xlu0 %163 }
 0x11e   :  { %v210_v8 = vmul.f32 0.03125, %v164_v7 }
 0x120   :  { %v226_v9 = vadd.f32 1e-05, %v210_v8 }
 0x121   :  { %v167_v12 = vpop.xlane.xlu1 %166  ;;  %v170_v13 = vpop.xlane.xlu0 %169 }
 0x122   :  { %3604 = vrsqrt.f32 %v226_v9  ;;  %v211_v14 = vmul.f32 0.03125, %v167_v12  ;;  %v212_v15 = vmul.f32 0.03125, %v170_v13 }
 0x124   :  { %v227_v18 = vadd.f32 1e-05, %v211_v14  ;;  %v228_v19 = vadd.f32 1e-05, %v212_v15 }
 0x125   :  { %v173_v22 = vpop.xlane.xlu1 %172  ;;  %v176_v16 = vpop.xlane.xlu0 %175 }
 0x126   :  { %3606 = vrsqrt.f32 %v227_v18  ;;  %v213_v26 = vmul.f32 0.03125, %v173_v22  ;;  %v214_v27 = vmul.f32 0.03125, %v176_v16 }
 0x127   :  { %3608 = vrsqrt.f32 %v228_v19 }
 0x128   :  { %v229_v30 = vadd.f32 1e-05, %v213_v26  ;;  %v230_v31 = vadd.f32 1e-05, %v214_v27  ;;  %v2965_v26 = vld [vmem:[%s5556_s3 + $0x80] sm:$0xff] }
 0x129   :  { %v179_v32 = vpop.xlane.xlu1 %178  ;;  %v182_v33 = vpop.xlane.xlu0 %181 }
 0x12a   :  { %3610 = vrsqrt.f32 %v229_v30  ;;  %v215_v34 = vmul.f32 0.03125, %v179_v32  ;;  %v216_v20 = vmul.f32 0.03125, %v182_v33 }
 0x12b   :  { %3612 = vrsqrt.f32 %v230_v31 }
 0x12c   :  { %v231_v38 = vadd.f32 1e-05, %v215_v34  ;;  %v232_v39 = vadd.f32 1e-05, %v216_v20 }
 0x12d   :  { %v185_v40 = vpop.xlane.xlu1 %184  ;;  %v188_v41 = vpop.xlane.xlu0 %187 }
 0x12e   :  { %3614 = vrsqrt.f32 %v231_v38  ;;  %v217_v42 = vmul.f32 0.03125, %v185_v40  ;;  %v218_v43 = vmul.f32 0.03125, %v188_v41 }
 0x12f   :  { %v3605_v46 = vpop.eup %3604  ;;  %3616 = vrsqrt.f32 %v232_v39 }
 0x130   :  { %v233_v24 = vadd.f32 1e-05, %v217_v42  ;;  %v234_v48 = vadd.f32 1e-05, %v218_v43  ;;  %v258_v49 = vmul.f32 %v3605_v46, %v4013_v36 }
 0x131   :  { %v191_v50 = vpop.xlane.xlu1 %190  ;;  %v194_v51 = vpop.xlane.xlu0 %193 }
 0x132   :  { %3618 = vrsqrt.f32 %v233_v24  ;;  %v219_v28 = vmul.f32 0.03125, %v191_v50  ;;  %v220_v29 = vmul.f32 0.03125, %v194_v51  ;;  %v281_v60 = vmul.f32 %v4140_v52, %v258_v49 }
 0x133   :  { %v3607_v53 = vpop.eup %3606  ;;  %3620 = vrsqrt.f32 %v234_v48 }
 0x134   :  { %v3609_v56 = vpop.eup %3608  ;;  %v259_v57 = vmul.f32 %v3607_v53, %v4021_v44  ;;  %v235_v58 = vadd.f32 1e-05, %v219_v28  ;;  %v236_v59 = vadd.f32 1e-05, %v220_v29  ;;  %v304_v18 = vadd.f32 %v4149_v4, %v281_v60 }
 0x135   :  { %v260_v36 = vmul.f32 %v3609_v56, %v4015_v37  ;;  %v197_v61 = vpop.xlane.xlu1 %196  ;;  %v200_v62 = vpop.xlane.xlu0 %199 }
 0x136   :  { %v282_v63 = vmul.f32 %v4140_v52, %v259_v57  ;;  %3622 = vrsqrt.f32 %v235_v58  ;;  %v221_v2 = vmul.f32 0.03125, %v197_v61  ;;  %v222_v3 = vmul.f32 0.03125, %v200_v62 }
 0x137   :  { %v3611_v5 = vpop.eup %3610  ;;  %v283_v44 = vmul.f32 %v4140_v52, %v260_v36  ;;  %3624 = vrsqrt.f32 %v236_v59 }
 0x138   :  { %v3613_v7 = vpop.eup %3612  ;;  %v261_v8 = vmul.f32 %v3611_v5, %v4023_v45  ;;  %v237_v37 = vadd.f32 1e-05, %v221_v2  ;;  %v238_v9 = vadd.f32 1e-05, %v222_v3  ;;  %v305_v12 = vadd.f32 %v4149_v4, %v282_v63  ;;  %v2966_v45 = vld [vmem:[%s5556_s3 + $0x88] sm:$0xff] }
 0x139   :  { %v262_v13 = vmul.f32 %v3613_v7, %v4031_v54  ;;  %v203_v14 = vpop.xlane.xlu1 %202  ;;  %v206_v15 = vpop.xlane.xlu0 %205  ;;  %v306_v31 = vadd.f32 %v4149_v4, %v283_v44  ;;  %v595_v41 = vpack.c.bf16 %v2966_v45, %v2965_v26 }
 0x13a   :  { %v284_v19 = vmul.f32 %v4140_v52, %v261_v8  ;;  %3626 = vrsqrt.f32 %v237_v37  ;;  %v223_v22 = vmul.f32 0.03125, %v203_v14  ;;  %v224_v16 = vmul.f32 0.03125, %v206_v15 }
 0x13b   :  { %v3615_v27 = vpop.eup %3614  ;;  %v285_v54 = vmul.f32 %v4140_v52, %v262_v13  ;;  %3628 = vrsqrt.f32 %v238_v9  ;;  %v4164_v30 = vpack.c.bf16 %v305_v12, %v304_v18 }
 0x13c   :  { %v3617_v32 = vpop.eup %3616  ;;  %v263_v33 = vmul.f32 %v3615_v27, %v4033_v55  ;;  %v239_v34 = vadd.f32 1e-05, %v223_v22  ;;  %v240_v20 = vadd.f32 1e-05, %v224_v16  ;;  %v307_v38 = vadd.f32 %v4149_v4, %v284_v19 }
 0x13d   :  { %v264_v39 = vmul.f32 %v3617_v32, %v4042_v0  ;;  %3256 = vmatprep.mubr.msk.bf16.mxu0 %vm64_vm0, %v4164_v30  ;;  %3276 = vmatprep.mubr.msk.bf16.mxu1 %vm64_vm0, %v4164_v30  ;;  %v209_v40 = vpop.xlane.xlu1 %208  ;;  %v308_v24 = vadd.f32 %v4149_v4, %v285_v54 }
 0x13e   :  { %v286_v42 = vmul.f32 %v4140_v52, %v263_v33  ;;  %3630 = vrsqrt.f32 %v239_v34  ;;  %v225_v43 = vmul.f32 0.03125, %v209_v40  ;;  %v4175_v46 = vpack.c.bf16 %v307_v38, %v306_v31  ;;  %v4274_v31 = vld [vmem:[%s5559_s4 + $0x2] ss:$0 sm:$0xff] }
 0x13f   :  { %v3619_v55 = vpop.eup %3618  ;;  %3632 = vrsqrt.f32 %v240_v20  ;;  %v287_v0 = vmul.f32 %v4140_v52, %v264_v39 }
 0x140   :  { %v3621_v48 = vpop.eup %3620  ;;  %v265_v49 = vmul.f32 %v3619_v55, %v4045_v1  ;;  %v241_v50 = vadd.f32 1e-05, %v225_v43  ;;  %3257 = vmatmul.mubr.msk.bf16.vlgmr.msra.gmra.mxu0 %vm64_vm0, %v4175_v46  ;;  %3277 = vmatmul.mubr.msk.bf16.vlgmr.msra.gmra.mxu1 %vm64_vm0, %v4175_v46  ;;  %v309_v51 = vadd.f32 %v4149_v4, %v286_v42 }
 0x141   :  { %v266_v28 = vmul.f32 %v3621_v48, %v4054_v10  ;;  %3293 = vmatpush3.bf16.msra.mxu0 %v4133_v6  ;;  %v310_v10 = vadd.f32 %v4149_v4, %v287_v0 }
 0x142   :  { %v288_v29 = vmul.f32 %v4140_v52, %v265_v49  ;;  %3634 = vrsqrt.f32 %v241_v50  ;;  %v4188_v53 = vpack.c.bf16 %v309_v51, %v308_v24  ;;  %3294 = vmatprep.subr.bf16.mxu0 %v595_v41 }
 0x143   :  { %v3623_v1 = vpop.eup %3622  ;;  %v289_v56 = vmul.f32 %v4140_v52, %v266_v28 }
 0x144   :  { %v3625_v57 = vpop.eup %3624  ;;  %v267_v58 = vmul.f32 %v3623_v1, %v4057_v11  ;;  %3260 = vmatprep.mubr.msk.bf16.mxu0 %vm64_vm0, %v4188_v53  ;;  %3280 = vmatprep.mubr.msk.bf16.mxu1 %vm64_vm0, %v4188_v53  ;;  %v311_v6 = vadd.f32 %v4149_v4, %v288_v29 }
 0x145   :  { %v268_v59 = vmul.f32 %v3625_v57, %v4066_v23  ;;  %3295 = vmatpush3.bf16.msra.mxu0 %v595_v41  ;;  %v312_v11 = vadd.f32 %v4149_v4, %v289_v56 }
 0x146   :  { %v290_v60 = vmul.f32 %v4140_v52, %v267_v58  ;;  %v4200_v36 = vpack.c.bf16 %v311_v6, %v310_v10 }
 0x147   :  { %v3627_v61 = vpop.eup %3626  ;;  %v291_v63 = vmul.f32 %v4140_v52, %v268_v59 }
 0x148   :  { %v3629_v62 = vpop.eup %3628  ;;  %v269_v2 = vmul.f32 %v3627_v61, %v4069_v17  ;;  %3261 = vmatmul.mubr.msk.bf16.gmra.mxu0 %vm64_vm0, %v4200_v36  ;;  %3281 = vmatmul.mubr.msk.bf16.gmra.mxu1 %vm64_vm0, %v4200_v36  ;;  %v313_v23 = vadd.f32 %v4149_v4, %v290_v60 }
 0x149   :  { %v270_v3 = vmul.f32 %v3629_v62, %v4078_v35  ;;  %v314_v9 = vadd.f32 %v4149_v4, %v291_v63 }
 0x14a   :  { %v292_v5 = vmul.f32 %v4140_v52, %v269_v2  ;;  %v4212_v44 = vpack.c.bf16 %v313_v23, %v312_v11 }
 0x14b   :  { %v3631_v7 = vpop.eup %3630  ;;  %v293_v8 = vmul.f32 %v4140_v52, %v270_v3 }
 0x14c   :  { %v3633_v37 = vpop.eup %3632  ;;  %v271_v17 = vmul.f32 %v3631_v7, %v4081_v21  ;;  %3264 = vmatprep.mubr.msk.bf16.mxu0 %vm64_vm0, %v4212_v44  ;;  %3284 = vmatprep.mubr.msk.bf16.mxu1 %vm64_vm0, %v4212_v44  ;;  %v315_v35 = vadd.f32 %v4149_v4, %v292_v5 }
 0x14d   :  { %v272_v12 = vmul.f32 %v3633_v37, %v4090_v47  ;;  %v316_v18 = vadd.f32 %v4149_v4, %v293_v8 }
 0x14e   :  { %v294_v13 = vmul.f32 %v4140_v52, %v271_v17  ;;  %v4224_v14 = vpack.c.bf16 %v315_v35, %v314_v9 }
 0x14f   :  { %v3635_v15 = vpop.eup %3634  ;;  %v295_v21 = vmul.f32 %v4140_v52, %v272_v12 }
 0x150   :  { %v273_v19 = vmul.f32 %v3635_v15, %v4093_v25  ;;  %3265 = vmatmul.mubr.msk.bf16.gmra.mxu0 %vm64_vm0, %v4224_v14  ;;  %3285 = vmatmul.mubr.msk.bf16.gmra.mxu1 %vm64_vm0, %v4224_v14  ;;  %v317_v22 = vadd.f32 %v4149_v4, %v294_v13 }
 0x151   :  { %v318_v25 = vadd.f32 %v4149_v4, %v295_v21 }
 0x152   :  { %v296_v47 = vmul.f32 %v4140_v52, %v273_v19  ;;  %v4235_v16 = vpack.c.bf16 %v317_v22, %v316_v18  ;;  %v4268_v52 = vld [vmem:[%s5559_s4] ss:$0 sm:$0xff] }
 0x154   :  { %3268 = vmatprep.mubr.msk.bf16.mxu0 %vm64_vm0, %v4235_v16  ;;  %3288 = vmatprep.mubr.msk.bf16.mxu1 %vm64_vm0, %v4235_v16  ;;  %v319_v26 = vadd.f32 %v4149_v4, %v296_v47 }
 0x156   :  { %v4243_v45 = vpack.c.bf16 %v319_v26, %v318_v25 }
 0x158   :  { %3269 = vmatmul.mubr.msk.bf16.gmra.mxu0 %vm64_vm0, %v4243_v45  ;;  %3289 = vmatmul.mubr.msk.bf16.gmra.mxu1 %vm64_vm0, %v4243_v45 }
 0x159   :  { %3296 = vmatprep.mubr.msk.bf16.mxu0 %vm64_vm0, %v4164_v30 }
 0x160   :  { %3297 = vmatmul.mubr.msk.bf16.vlgmr.msra.gmra.mxu0 %vm64_vm0, %v4175_v46 }
 0x161   :  { %3300 = vmatprep.mubr.msk.bf16.mxu0 %vm64_vm0, %v4188_v53 }
 0x168   :  { %3301 = vmatmul.mubr.msk.bf16.gmra.mxu0 %vm64_vm0, %v4200_v36 }
 0x169   :  { %3304 = vmatprep.mubr.msk.bf16.mxu0 %vm64_vm0, %v4212_v44 }
 0x170   :  { %3305 = vmatmul.mubr.msk.bf16.gmra.mxu0 %vm64_vm0, %v4224_v14 }
 0x171   :  { %3308 = vmatprep.mubr.msk.bf16.mxu0 %vm64_vm0, %v4235_v16 }
 0x178   :  { %3309 = vmatmul.mubr.msk.bf16.gmra.mxu0 %vm64_vm0, %v4243_v45 }
 0x200   :  { %v3258_v4 = vpop.f32.mrf.mxu0  ;;  %v3278_v27 = vpop.f32.mrf.mxu1 }
 0x201   :  { %v408_v54 = vadd.f32 %v3258_v4, %v4268_v52  ;;  %v536_v39 = vadd.f32 %v3278_v27, %v4274_v31 }
 0x202   :  { %v399_v32 = vpop.f32.mrf.mxu0  ;;  %v527_v33 = vpop.f32.mrf.mxu1 }
 0x203   :  { %v400_v34 = vadd.f32 %v4268_v52, %v399_v32  ;;  %v4280_v42 = vmul.f32 0.25, %v408_v54  ;;  %v528_v43 = vadd.f32 %v4274_v31, %v527_v33 }
 0x204   :  { %v3259_v20 = vpop.f32.mrf.mxu0  ;;  %v3279_v38 = vpop.f32.mrf.mxu1 }
 0x205   :  { %v411_v40 = vadd.f32 %v3259_v20, %v4268_v52  ;;  %v539_v41 = vadd.f32 %v3279_v38, %v4274_v31  ;;  %v462_v51 = vmul.f32 0.25, %v400_v34 }
 0x206   :  { %v402_v55 = vpop.f32.mrf.mxu0  ;;  %v530_v24 = vpop.f32.mrf.mxu1 }
 0x207   :  { %v4283_v48 = vmul.f32 0.25, %v411_v40  ;;  %v4285_v0 = vpack.c.bf16 %v539_v41, %v536_v39  ;;  %v403_v49 = vadd.f32 %v4268_v52, %v402_v55  ;;  %v531_v50 = vadd.f32 %v4274_v31, %v530_v24 }
 0x208   :  { %v3262_v28 = vpop.f32.mrf.mxu0  ;;  %v4289_v29 = vpop.f32.mrf.mxu1 }
 0x209   :  { %v703_v1 = vpack.c.bf16 %v4283_v48, %v4280_v42  ;;  %v463_v56 = vmul.f32 0.25, %v403_v49  ;;  %v4293_v57 = vpack.c.bf16 %v531_v50, %v528_v43  ;;  %v424_v58 = vadd.f32 %v3262_v28, %v4268_v52  ;;  %v718_v48 = vld [vmem:[%s5560_s5] sm:$0xff] }
 0x20a   :  { %v415_v10 = vpop.f32.mrf.mxu0  ;;  %v4296_v6 = vpop.f32.mrf.mxu1 }
 0x20b   :  { %v702_v59 = vpack.c.bf16 %v463_v56, %v462_v51  ;;  %v416_v60 = vadd.f32 %v4268_v52, %v415_v10  ;;  %v4305_v23 = vmul.f32 0.25, %v424_v58 }
 0x20c   :  { %v3263_v61 = vpop.f32.mrf.mxu0  ;;  %v4299_v11 = vpop.f32.mrf.mxu1 }
 0x20d   :  { %v427_v62 = vadd.f32 %v3263_v61, %v4268_v52  ;;  %3328 = vmatprep.mubr.msk.bf16.mxu1 %vm734_vm1, %v702_v59  ;;  %v4310_v37 = vmul.f32 0.25, %v416_v60 }
 0x20e   :  { %v418_v63 = vpop.f32.mrf.mxu0  ;;  %v4303_v2 = vpop.f32.mrf.mxu1 }
 0x20f   :  { %v4307_v3 = vmul.f32 0.25, %v427_v62  ;;  %v419_v5 = vadd.f32 %v4268_v52, %v418_v63 }
 0x210   :  { %v3266_v7 = vpop.f32.mrf.mxu0  ;;  %v3286_v8 = vpop.f32.mrf.mxu1 }
 0x211   :  { %v705_v17 = vpack.c.bf16 %v4307_v3, %v4305_v23  ;;  %v4314_v9 = vmul.f32 0.25, %v419_v5  ;;  %v440_v35 = vadd.f32 %v3266_v7, %v4268_v52  ;;  %v720_v23 = vld [vmem:[%s5560_s5 + $0x10] sm:$0xff] }
 0x212   :  { %v431_v12 = vpop.f32.mrf.mxu0  ;;  %v559_v13 = vpop.f32.mrf.mxu1 }
 0x213   :  { %v704_v15 = vpack.c.bf16 %v4314_v9, %v4310_v37  ;;  %v432_v18 = vadd.f32 %v4268_v52, %v431_v12  ;;  %v4321_v26 = vmul.f32 0.25, %v440_v35  ;;  %v719_v37 = vld [vmem:[%s5560_s5 + $0x8] sm:$0xff] }
 0x214   :  { %v3267_v21 = vpop.f32.mrf.mxu0  ;;  %v3287_v19 = vpop.f32.mrf.mxu1 }
 0x215   :  { %v443_v22 = vadd.f32 %v3267_v21, %v4268_v52  ;;  %v4326_v33 = vmul.f32 0.25, %v432_v18 }
 0x216   :  { %v434_v47 = vpop.f32.mrf.mxu0  ;;  %v562_v25 = vpop.f32.mrf.mxu1 }
 0x217   :  { %v4323_v4 = vmul.f32 0.25, %v443_v22  ;;  %v435_v27 = vadd.f32 %v4268_v52, %v434_v47  ;;  %v571_v47 = vadd.f32 %v3287_v19, %v4274_v31 }
 0x218   :  { %v3270_v54 = vpop.f32.mrf.mxu0  ;;  %v3290_v32 = vpop.f32.mrf.mxu1 }
 0x219   :  { %v707_v34 = vpack.c.bf16 %v4323_v4, %v4321_v26  ;;  %v4330_v20 = vmul.f32 0.25, %v435_v27  ;;  %v456_v38 = vadd.f32 %v3270_v54, %v4268_v52  ;;  %v584_v49 = vadd.f32 %v3290_v32, %v4274_v31  ;;  %v721_v26 = vld [vmem:[%s5560_s5 + $0x18] sm:$0xff] }
 0x21a   :  { %v447_v39 = vpop.f32.mrf.mxu0  ;;  %v575_v40 = vpop.f32.mrf.mxu1  ;;  %v568_v54 = vadd.f32 %v3286_v8, %v4274_v31 }
 0x21b   :  { %v706_v41 = vpack.c.bf16 %v4330_v20, %v4326_v33  ;;  %v448_v43 = vadd.f32 %v4268_v52, %v447_v39  ;;  %v4339_v28 = vmul.f32 0.25, %v456_v38  ;;  %v576_v56 = vadd.f32 %v4274_v31, %v575_v40  ;;  %v722_v33 = vld [vmem:[%s5560_s5 + $0x20] sm:$0xff] }
 0x21c   :  { %v3271_v55 = vpop.f32.mrf.mxu0  ;;  %v3291_v24 = vpop.f32.mrf.mxu1  ;;  %v715_v38 = vpack.c.bf16 %v571_v47, %v568_v54 }
 0x21d   :  { %v459_v50 = vadd.f32 %v3271_v55, %v4268_v52  ;;  %v587_v51 = vadd.f32 %v3291_v24, %v4274_v31  ;;  %v4348_v5 = vmul.f32 0.25, %v448_v43  ;;  %v563_v55 = vadd.f32 %v4274_v31, %v562_v25 }
 0x21e   :  { %v450_v58 = vpop.f32.mrf.mxu0  ;;  %v578_v10 = vpop.f32.mrf.mxu1 }
 0x21f   :  { %v4342_v59 = vmul.f32 0.25, %v459_v50  ;;  %v717_v60 = vpack.c.bf16 %v587_v51, %v584_v49  ;;  %v451_v61 = vadd.f32 %v4268_v52, %v450_v58  ;;  %v579_v62 = vadd.f32 %v4274_v31, %v578_v10 }
 0x220   :  { %v4346_v63 = vpop.f32.mrf.mxu0  ;;  %v560_v49 = vadd.f32 %v4274_v31, %v559_v13  ;;  %v555_v58 = vadd.f32 %v4299_v11, %v4274_v31  ;;  %v547_v11 = vadd.f32 %v4274_v31, %v4303_v2 }
 0x221   :  { %v709_v7 = vpack.c.bf16 %v4342_v59, %v4339_v28  ;;  %v4352_v35 = vmul.f32 0.25, %v451_v61  ;;  %v716_v12 = vpack.c.bf16 %v579_v62, %v576_v56  ;;  %3588 = vmatprep.subr.msk.bf16.mxu1 %vm734_vm1, %v717_v60  ;;  %v781_v21 = vsel %vm734_vm1, %v717_v60, 0  ;;  %v724_v28 = vld [vmem:[%s5560_s5 + $0x30] sm:$0xff] }
 0x222   :  { %v4355_v18 = vpop.f32.mrf.mxu0  ;;  %3313 = vmatpush3.bf16.xpose.msra.mxu1 %v781_v21  ;;  %v714_v19 = vpack.c.bf16 %v563_v55, %v560_v49  ;;  %v775_v56 = vsel %vm734_vm1, %v715_v38, 0  ;;  %v552_v60 = vadd.f32 %v4289_v29, %v4274_v31  ;;  %v544_v49 = vadd.f32 %v4274_v31, %v4296_v6 }
 0x223   :  { %v708_v52 = vpack.c.bf16 %v4352_v35, %v4348_v5  ;;  %3589 = vmatprep.subr.msk.bf16.mxu1 %vm734_vm1, %v716_v12  ;;  %v778_v40 = vsel %vm734_vm1, %v716_v12, 0  ;;  %v2970_v12 = vld [vmem:[%s5559_s4 + $0x4] ss:$0 sm:$0xff]  ;;  %v723_v5 = vld [vmem:[%s5560_s5 + $0x28] sm:$0xff] }
 0x224   :  { %v4361_v22 = vpop.f32.mrf.mxu0  ;;  %v713_v61 = vpack.c.bf16 %v555_v58, %v552_v60  ;;  %v772_v13 = vsel %vm734_vm1, %v714_v19, 0  ;;  %v712_v58 = vpack.c.bf16 %v547_v11, %v544_v49 }
 0x226   :  { %v4364_v27 = vpop.f32.mrf.mxu0  ;;  %v769_v60 = vsel %vm734_vm1, %v713_v61, 0  ;;  %v766_v31 = vsel %vm734_vm1, %v712_v58, 0 }
 0x228   :  { %v3302_v32 = vpop.f32.mrf.mxu0 }
 0x229   :  { %v664_v6 = vadd.f32 %v3302_v32, %v2970_v12 }
 0x22a   :  { %v655_v39 = vpop.f32.mrf.mxu0  ;;  %3315 = vmatpush3.bf16.xpose.msra.mxu1 %v778_v40 }
 0x22b   :  { %3590 = vmatprep.subr.msk.bf16.mxu1 %vm734_vm1, %v715_v38 }
 0x22c   :  { %v3303_v43 = vpop.f32.mrf.mxu0 }
 0x22e   :  { %v658_v24 = vpop.f32.mrf.mxu0 }
 0x230   :  { %v3306_v50 = vpop.f32.mrf.mxu0 }
 0x232   :  { %v671_v51 = vpop.f32.mrf.mxu0  ;;  %3317 = vmatpush3.bf16.xpose.msra.mxu1 %v775_v56 }
 0x233   :  { %3591 = vmatprep.subr.msk.bf16.mxu1 %vm734_vm1, %v714_v19 }
 0x234   :  { %v3307_v8 = vpop.f32.mrf.mxu0 }
 0x235   :  { %v683_v19 = vadd.f32 %v3307_v8, %v2970_v12  ;;  %v659_v8 = vadd.f32 %v2970_v12, %v658_v24  ;;  %v643_v24 = vadd.f32 %v2970_v12, %v4364_v27  ;;  %v3001_v27 = vld [vmem:[%s5556_s3 + $0x60] sm:$0xff] }
 0x236   :  { %v674_v10 = vpop.f32.mrf.mxu0 }
 0x238   :  { %v3310_v25 = vpop.f32.mrf.mxu0 }
 0x239   :  { %v696_v47 = vadd.f32 %v3310_v25, %v2970_v12  ;;  %v675_v25 = vadd.f32 %v2970_v12, %v674_v10  ;;  %v651_v10 = vadd.f32 %v4361_v22, %v2970_v12  ;;  %v3004_v22 = vld [vmem:[%s5556_s3 + $0x78] sm:$0xff] }
 0x23a   :  { %v687_v62 = vpop.f32.mrf.mxu0  ;;  %3319 = vmatpush3.bf16.xpose.msra.mxu1 %v772_v13  ;;  %v680_v13 = vadd.f32 %v3306_v50, %v2970_v12 }
 0x23b   :  { %3592 = vmatprep.subr.msk.bf16.mxu1 %vm734_vm1, %v713_v61  ;;  %v688_v29 = vadd.f32 %v2970_v12, %v687_v62  ;;  %v672_v62 = vadd.f32 %v2970_v12, %v671_v51  ;;  %v656_v61 = vadd.f32 %v2970_v12, %v655_v39  ;;  %v3003_v39 = vld [vmem:[%s5556_s3 + $0x70] sm:$0xff] }
 0x23c   :  { %v3311_v21 = vpop.f32.mrf.mxu0  ;;  %v1037_v2 = vpack.c.bf16 %v683_v19, %v680_v13  ;;  %v727_v13 = vld [vmem:[%s5560_s5 + $0x48] sm:$0xff] }
 0x23d   :  { %v699_v54 = vadd.f32 %v3311_v21, %v2970_v12  ;;  %v667_v21 = vadd.f32 %v3303_v43, %v2970_v12  ;;  %v1034_v51 = vpack.c.bf16 %v659_v8, %v656_v61  ;;  %v763_v43 = vsel %vm734_vm1, %v4285_v0, 0  ;;  %v732_v61 = vld [vmem:[%s5560_s5 + $0x70] sm:$0xff] }
 0x23e   :  { %v690_v38 = vpop.f32.mrf.mxu0 }
 0x23f   :  { %v1039_v40 = vpack.c.bf16 %v699_v54, %v696_v47  ;;  %v691_v55 = vadd.f32 %v2970_v12, %v690_v38  ;;  %v1036_v47 = vpack.c.bf16 %v675_v25, %v672_v62  ;;  %v1035_v50 = vpack.c.bf16 %v667_v21, %v664_v6  ;;  %v729_v21 = vld [vmem:[%s5560_s5 + $0x58] sm:$0xff] }
 0x240   :  { %v648_v54 = vadd.f32 %v4346_v63, %v2970_v12  ;;  %v1282_v63 = vpack.c.bf16 %v3004_v22, %v3003_v39  ;;  %v760_v38 = vsel %vm734_vm1, %v4293_v57, 0  ;;  %v3006_v22 = vld [vmem:[%s5559_s4 + $0x3] ss:$0 sm:$0xff] }
 0x241   :  { %v1038_v56 = vpack.c.bf16 %v691_v55, %v688_v29  ;;  %3344 = vmatprep.subr.bf16.mxu0 %v1039_v40  ;;  %v3002_v29 = vld [vmem:[%s5556_s3 + $0x68] sm:$0xff]  ;;  %v726_v55 = vld [vmem:[%s5560_s5 + $0x40] sm:$0xff] }
 0x242   :  { %3345 = vmatpush3.bf16.msra.mxu0 %v1039_v40  ;;  %3321 = vmatpush3.bf16.xpose.msra.mxu1 %v769_v60  ;;  %v1033_v32 = vpack.c.bf16 %v651_v10, %v648_v54 }
 0x243   :  { %3346 = vmatprep.subr.bf16.mxu0 %v1038_v56  ;;  %3593 = vmatprep.subr.msk.bf16.mxu1 %vm734_vm1, %v712_v58  ;;  %v728_v58 = vld [vmem:[%s5560_s5 + $0x50] sm:$0xff] }
 0x246   :  { %3347 = vmatpush3.bf16.msra.mxu0 %v1038_v56 }
 0x247   :  { %3348 = vmatprep.subr.bf16.mxu0 %v1037_v2 }
 0x24a   :  { %3349 = vmatpush3.bf16.msra.mxu0 %v1037_v2  ;;  %3323 = vmatpush3.bf16.xpose.msra.mxu1 %v766_v31  ;;  %v730_v31 = vld [vmem:[%s5560_s5 + $0x60] sm:$0xff] }
 0x24b   :  { %3350 = vmatprep.subr.bf16.mxu0 %v1036_v47  ;;  %3594 = vmatprep.subr.msk.bf16.mxu1 %vm734_vm1, %v4285_v0  ;;  %v640_v0 = vadd.f32 %v2970_v12, %v4355_v18  ;;  %v1281_v18 = vpack.c.bf16 %v3002_v29, %v3001_v27  ;;  %v725_v12 = vld [vmem:[%s5560_s5 + $0x38] sm:$0xff] }
 0x24d   :  { %v1032_v11 = vpack.c.bf16 %v643_v24, %v640_v0  ;;  %v733_v24 = vld [vmem:[%s5560_s5 + $0x78] sm:$0xff] }
 0x24e   :  { %3351 = vmatpush3.bf16.msra.mxu0 %v1036_v47 }
 0x24f   :  { %3352 = vmatprep.subr.bf16.mxu0 %v1035_v50 }
 0x252   :  { %3353 = vmatpush3.bf16.msra.mxu0 %v1035_v50  ;;  %3325 = vmatpush3.bf16.xpose.msra.mxu1 %v763_v43 }
 0x253   :  { %3354 = vmatprep.subr.bf16.mxu0 %v1034_v51  ;;  %3595 = vmatprep.subr.msk.bf16.mxu1 %vm734_vm1, %v4293_v57 }
 0x256   :  { %3355 = vmatpush3.bf16.msra.mxu0 %v1034_v51  ;;  %v731_v51 = vld [vmem:[%s5560_s5 + $0x68] sm:$0xff] }
 0x257   :  { %3356 = vmatprep.subr.bf16.mxu0 %v1033_v32 }
 0x25a   :  { %3357 = vmatpush3.bf16.msra.mxu0 %v1033_v32  ;;  %3327 = vmatpush3.bf16.xpose.msra.mxu1 %v760_v38 }
 0x25b   :  { %3358 = vmatprep.subr.bf16.mxu0 %v1032_v11  ;;  %3396 = vmatprep.subr.bf16.mxu1 %v1282_v63 }
 0x25e   :  { %3359 = vmatpush3.bf16.msra.mxu0 %v1032_v11 }
 0x261   :  { %3329 = vmatmul.mubr.msk.bf16.vlgmr.msra.gmra.mxu1 %vm734_vm1, %v703_v1 }
 0x262   :  { %3332 = vmatprep.mubr.msk.bf16.mxu1 %vm734_vm1, %v704_v15  ;;  %3397 = vmatpush3.bf16.msra.mxu1 %v1282_v63 }
 0x263   :  { %3398 = vmatprep.subr.bf16.mxu1 %v1281_v18 }
 0x266   :  { %3399 = vmatpush3.bf16.msra.mxu1 %v1281_v18 }
 0x269   :  { %3333 = vmatmul.mubr.msk.bf16.gmra.mxu1 %vm734_vm1, %v705_v17 }
 0x26a   :  { %3336 = vmatprep.mubr.msk.bf16.mxu1 %vm734_vm1, %v706_v41 }
 0x271   :  { %3337 = vmatmul.mubr.msk.bf16.gmra.mxu1 %vm734_vm1, %v707_v34 }
 0x272   :  { %3340 = vmatprep.mubr.msk.bf16.mxu1 %vm734_vm1, %v708_v52 }
 0x279   :  { %3341 = vmatmul.mubr.msk.bf16.gmra.mxu1 %vm734_vm1, %v709_v7 }
 0x27a   :  { %3400 = vmatprep.mubr.msk.bf16.mxu1 %vm64_vm0, %v4164_v30 }
 0x281   :  { %3401 = vmatmul.mubr.msk.bf16.vlgmr.msra.gmra.mxu1 %vm64_vm0, %v4175_v46 }
 0x282   :  { %3404 = vmatprep.mubr.msk.bf16.mxu1 %vm64_vm0, %v4188_v53 }
 0x289   :  { %3405 = vmatmul.mubr.msk.bf16.gmra.mxu1 %vm64_vm0, %v4200_v36 }
 0x28a   :  { %3408 = vmatprep.mubr.msk.bf16.mxu1 %vm64_vm0, %v4212_v44 }
 0x291   :  { %3409 = vmatmul.mubr.msk.bf16.gmra.mxu1 %vm64_vm0, %v4224_v14 }
 0x292   :  { %3412 = vmatprep.mubr.msk.bf16.mxu1 %vm64_vm0, %v4235_v16 }
 0x299   :  { %3413 = vmatmul.mubr.msk.bf16.gmra.mxu1 %vm64_vm0, %v4243_v45 }
 0x321   :  { %v3330_v42 = vpop.f32.mrf.mxu1 }
 0x322   :  { %v4469_v9 = vadd.f32 %v3330_v42, %v720_v23 }
 0x323   :  { %v817_v1 = vpop.f32.mrf.mxu1 }
 0x324   :  { %v4460_v57 = vadd.f32 %v817_v1, %v718_v48 }
 0x325   :  { %v3331_v3 = vpop.f32.mrf.mxu1 }
 0x326   :  { %880 = vmax.xlane.f32.xlu0 %v4460_v57  ;;  %v4481_v20 = vadd.f32 %v3331_v3, %v721_v26 }
 0x327   :  { %v820_v17 = vpop.f32.mrf.mxu1 }
 0x328   :  { %v4471_v15 = vadd.f32 %v820_v17, %v719_v37 }
 0x329   :  { %v3334_v4 = vpop.f32.mrf.mxu1 }
 0x32a   :  { %882 = vmax.xlane.f32.xlu1 %v4471_v15  ;;  %884 = vmax.xlane.f32.xlu0 %v4469_v9  ;;  %v4493_v35 = vadd.f32 %v3334_v4, %v724_v28 }
 0x32b   :  { %v833_v34 = vpop.f32.mrf.mxu1 }
 0x32c   :  { %v4483_v41 = vadd.f32 %v833_v34, %v722_v33 }
 0x32d   :  { %v3335_v59 = vpop.f32.mrf.mxu1 }
 0x32e   :  { %886 = vmax.xlane.f32.xlu1 %v4481_v20  ;;  %888 = vmax.xlane.f32.xlu0 %v4483_v41  ;;  %v4505_v19 = vadd.f32 %v3335_v59, %v725_v12 }
 0x32f   :  { %v836_v7 = vpop.f32.mrf.mxu1 }
 0x330   :  { %v4495_v52 = vadd.f32 %v836_v7, %v723_v5 }
 0x331   :  { %v3338_v40 = vpop.f32.mrf.mxu1 }
 0x332   :  { %890 = vmax.xlane.f32.xlu1 %v4495_v52  ;;  %892 = vmax.xlane.f32.xlu0 %v4493_v35  ;;  %v4517_v25 = vadd.f32 %v3338_v40, %v728_v58 }
 0x333   :  { %v849_v49 = vpop.f32.mrf.mxu1 }
 0x334   :  { %v4507_v56 = vadd.f32 %v849_v49, %v726_v55 }
 0x335   :  { %v3339_v60 = vpop.f32.mrf.mxu1 }
 0x336   :  { %894 = vmax.xlane.f32.xlu1 %v4505_v19  ;;  %896 = vmax.xlane.f32.xlu0 %v4507_v56  ;;  %v4529_v50 = vadd.f32 %v3339_v60, %v729_v21 }
 0x337   :  { %v852_v2 = vpop.f32.mrf.mxu1 }
 0x338   :  { %v4519_v62 = vadd.f32 %v852_v2, %v727_v13 }
 0x339   :  { %v3342_v47 = vpop.f32.mrf.mxu1 }
 0x33a   :  { %898 = vmax.xlane.f32.xlu1 %v4519_v62  ;;  %900 = vmax.xlane.f32.xlu0 %v4517_v25  ;;  %v4541_v54 = vadd.f32 %v3342_v47, %v732_v61 }
 0x33b   :  { %v865_v6 = vpop.f32.mrf.mxu1 }
 0x33c   :  { %v4531_v8 = vadd.f32 %v865_v6, %v730_v31 }
 0x33d   :  { %v3343_v10 = vpop.f32.mrf.mxu1 }
 0x33e   :  { %902 = vmax.xlane.f32.xlu1 %v4529_v50  ;;  %904 = vmax.xlane.f32.xlu0 %v4531_v8  ;;  %v4553_v63 = vadd.f32 %v3343_v10, %v733_v24 }
 0x33f   :  { %v868_v43 = vpop.f32.mrf.mxu1 }
 0x340   :  { %v4543_v32 = vadd.f32 %v868_v43, %v731_v51 }
 0x341   :  { %v3402_v39 = vpop.f32.mrf.mxu1 }
 0x342   :  { %906 = vmax.xlane.f32.xlu1 %v4543_v32  ;;  %908 = vmax.xlane.f32.xlu0 %v4541_v54  ;;  %v1334_v38 = vadd.f32 %v3402_v39, %v3006_v22 }
 0x343   :  { %v1325_v0 = vpop.f32.mrf.mxu1 }
 0x344   :  { %v1326_v18 = vadd.f32 %v3006_v22, %v1325_v0 }
 0x345   :  { %v3403_v11 = vpop.f32.mrf.mxu1 }
 0x346   :  { %v1337_v27 = vadd.f32 %v3403_v11, %v3006_v22  ;;  %910 = vmax.xlane.f32.xlu1 %v4553_v63 }
 0x347   :  { %v1328_v29 = vpop.f32.mrf.mxu1 }
 0x348   :  { %v1509_v42 = vpack.c.bf16 %v1337_v27, %v1334_v38  ;;  %v1329_v48 = vadd.f32 %v3006_v22, %v1328_v29 }
 0x349   :  { %v3406_v1 = vpop.f32.mrf.mxu1 }
 0x34a   :  { %v1508_v23 = vpack.c.bf16 %v1329_v48, %v1326_v18  ;;  %v1350_v24 = vadd.f32 %v3406_v1, %v3006_v22  ;;  %v1561_v48 = vsel %vm734_vm1, %v1509_v42, 0 }
 0x34b   :  { %v1341_v3 = vpop.f32.mrf.mxu1 }
 0x34c   :  { %v1342_v38 = vadd.f32 %v3006_v22, %v1341_v3  ;;  %v1558_v1 = vsel %vm734_vm1, %v1508_v23, 0 }
 0x34d   :  { %v3407_v37 = vpop.f32.mrf.mxu1 }
 0x34e   :  { %v1353_v43 = vadd.f32 %v3407_v37, %v3006_v22 }
 0x34f   :  { %v1344_v17 = vpop.f32.mrf.mxu1 }
 0x350   :  { %v1511_v39 = vpack.c.bf16 %v1353_v43, %v1350_v24  ;;  %v1345_v11 = vadd.f32 %v3006_v22, %v1344_v17 }
 0x351   :  { %v3410_v26 = vpop.f32.mrf.mxu1 }
 0x352   :  { %v1366_v21 = vadd.f32 %v3410_v26, %v3006_v22  ;;  %v1510_v27 = vpack.c.bf16 %v1345_v11, %v1342_v38  ;;  %v1567_v29 = vsel %vm734_vm1, %v1511_v39, 0 }
 0x353   :  { %v1357_v4 = vpop.f32.mrf.mxu1 }
 0x354   :  { %v1358_v61 = vadd.f32 %v3006_v22, %v1357_v4  ;;  %v1564_v18 = vsel %vm734_vm1, %v1510_v27, 0 }
 0x355   :  { %v3411_v33 = vpop.f32.mrf.mxu1 }
 0x356   :  { %v1369_v2 = vadd.f32 %v3411_v33, %v3006_v22 }
 0x357   :  { %v1360_v34 = vpop.f32.mrf.mxu1 }
 0x358   :  { %v1513_v47 = vpack.c.bf16 %v1369_v2, %v1366_v21  ;;  %v1361_v6 = vadd.f32 %v3006_v22, %v1360_v34 }
 0x359   :  { %v3414_v28 = vpop.f32.mrf.mxu1 }
 0x35a   :  { %v1382_v7 = vadd.f32 %v3414_v28, %v3006_v22  ;;  %v1512_v10 = vpack.c.bf16 %v1361_v6, %v1358_v61  ;;  %v1573_v51 = vsel %vm734_vm1, %v1513_v47, 0 }
 0x35b   :  { %v1373_v59 = vpop.f32.mrf.mxu1 }
 0x35c   :  { %v1374_v55 = vadd.f32 %v3006_v22, %v1373_v59  ;;  %v1570_v0 = vsel %vm734_vm1, %v1512_v10, 0 }
 0x35d   :  { %v3415_v5 = vpop.f32.mrf.mxu1 }
 0x35e   :  { %v1385_v12 = vadd.f32 %v3415_v5, %v3006_v22 }
 0x35f   :  { %v1376_v40 = vpop.f32.mrf.mxu1 }
 0x360   :  { %v1515_v49 = vpack.c.bf16 %v1385_v12, %v1382_v7  ;;  %v1377_v58 = vadd.f32 %v3006_v22, %v1376_v40 }
 0x362   :  { %v1514_v60 = vpack.c.bf16 %v1377_v58, %v1374_v55  ;;  %3596 = vmatprep.subr.msk.bf16.mxu1 %vm734_vm1, %v1515_v49  ;;  %v1579_v13 = vsel %vm734_vm1, %v1515_v49, 0 }
 0x363   :  { %3437 = vmatpush3.bf16.xpose.msra.mxu1 %v1579_v13 }
 0x364   :  { %3597 = vmatprep.subr.msk.bf16.mxu1 %vm734_vm1, %v1514_v60  ;;  %v1576_v31 = vsel %vm734_vm1, %v1514_v60, 0 }
 0x36b   :  { %3439 = vmatpush3.bf16.xpose.msra.mxu1 %v1576_v31 }
 0x36c   :  { %3598 = vmatprep.subr.msk.bf16.mxu1 %vm734_vm1, %v1513_v47 }
 0x373   :  { %3441 = vmatpush3.bf16.xpose.msra.mxu1 %v1573_v51 }
 0x374   :  { %3599 = vmatprep.subr.msk.bf16.mxu1 %vm734_vm1, %v1512_v10 }
 0x37b   :  { %3443 = vmatpush3.bf16.xpose.msra.mxu1 %v1570_v0 }
 0x37c   :  { %3600 = vmatprep.subr.msk.bf16.mxu1 %vm734_vm1, %v1511_v39 }
 0x383   :  { %3445 = vmatpush3.bf16.xpose.msra.mxu1 %v1567_v29 }
 0x384   :  { %3601 = vmatprep.subr.msk.bf16.mxu1 %vm734_vm1, %v1510_v27 }
 0x38b   :  { %3447 = vmatpush3.bf16.xpose.msra.mxu1 %v1564_v18 }
 0x38c   :  { %3602 = vmatprep.subr.msk.bf16.mxu1 %vm734_vm1, %v1509_v42 }
 0x393   :  { %3449 = vmatpush3.bf16.xpose.msra.mxu1 %v1561_v48 }
 0x394   :  { %3603 = vmatprep.subr.msk.bf16.mxu1 %vm734_vm1, %v1508_v23 }
 0x39b   :  { %3451 = vmatpush3.bf16.xpose.msra.mxu1 %v1558_v1 }
 0x3af   :  { %v881_v22 = vpop.xlane.xlu0 %880 }
 0x3b0   :  { %v912_v3 = vsub.f32 %v4460_v57, %v881_v22 }
 0x3b2   :  { %v928_v37 = vmul.f32 1.442695, %v912_v3 }
 0x3b3   :  { %v883_v17 = vpop.xlane.xlu1 %882  ;;  %v885_v26 = vpop.xlane.xlu0 %884 }
 0x3b4   :  { %3636 = vpow2.f32 %v928_v37  ;;  %v913_v4 = vsub.f32 %v4471_v15, %v883_v17  ;;  %v914_v33 = vsub.f32 %v4469_v9, %v885_v26 }
 0x3b6   :  { %v930_v34 = vmul.f32 1.442695, %v913_v4  ;;  %v932_v28 = vmul.f32 1.442695, %v914_v33 }
 0x3b7   :  { %v887_v42 = vpop.xlane.xlu1 %886  ;;  %v889_v59 = vpop.xlane.xlu0 %888 }
 0x3b8   :  { %3638 = vpow2.f32 %v930_v34  ;;  %v915_v5 = vsub.f32 %v4481_v20, %v887_v42  ;;  %v916_v23 = vsub.f32 %v4483_v41, %v889_v59  ;;  %v2990_v42 = vld [vmem:[%s5556_s3 + $0x38] sm:$0xff] }
 0x3b9   :  { %3640 = vpow2.f32 %v932_v28  ;;  %v2989_v28 = vld [vmem:[%s5556_s3 + $0x30] sm:$0xff] }
 0x3ba   :  { %v934_v7 = vmul.f32 1.442695, %v915_v5  ;;  %v936_v57 = vmul.f32 1.442695, %v916_v23  ;;  %v1154_v59 = vpack.c.bf16 %v2990_v42, %v2989_v28 }
 0x3bb   :  { %v891_v12 = vpop.xlane.xlu1 %890  ;;  %v893_v40 = vpop.xlane.xlu0 %892 }
 0x3bc   :  { %3642 = vpow2.f32 %v934_v7  ;;  %v917_v55 = vsub.f32 %v4495_v52, %v891_v12  ;;  %v918_v15 = vsub.f32 %v4493_v35, %v893_v40  ;;  %3376 = vmatprep.subr.bf16.mxu0 %v1154_v59 }
 0x3bd   :  { %3644 = vpow2.f32 %v936_v57 }
 0x3be   :  { %v938_v9 = vmul.f32 1.442695, %v917_v55  ;;  %v940_v49 = vmul.f32 1.442695, %v918_v15 }
 0x3bf   :  { %v895_v58 = vpop.xlane.xlu1 %894  ;;  %v897_v60 = vpop.xlane.xlu0 %896 }
 0x3c0   :  { %3646 = vpow2.f32 %v938_v9  ;;  %v919_v20 = vsub.f32 %v4505_v19, %v895_v58  ;;  %v920_v41 = vsub.f32 %v4507_v56, %v897_v60 }
 0x3c1   :  { %v4581_v13 = vpop.eup %3636  ;;  %3648 = vpow2.f32 %v940_v49 }
 0x3c2   :  { %v942_v2 = vmul.f32 1.442695, %v919_v20  ;;  %v944_v21 = vmul.f32 1.442695, %v920_v41  ;;  %960 = vadd.xlane.f32.xlu0 %v4581_v13 }
 0x3c3   :  { %v899_v52 = vpop.xlane.xlu1 %898  ;;  %v901_v47 = vpop.xlane.xlu0 %900 }
 0x3c4   :  { %3650 = vpow2.f32 %v942_v2  ;;  %v921_v35 = vsub.f32 %v4519_v62, %v899_v52  ;;  %v922_v31 = vsub.f32 %v4517_v25, %v901_v47 }
 0x3c5   :  { %v4586_v6 = vpop.eup %3638  ;;  %3652 = vpow2.f32 %v944_v21 }
 0x3c6   :  { %v4588_v19 = vpop.eup %3640  ;;  %v946_v56 = vmul.f32 1.442695, %v921_v35  ;;  %v948_v61 = vmul.f32 1.442695, %v922_v31  ;;  %962 = vadd.xlane.f32.xlu1 %v4586_v6  ;;  %v2987_v35 = vld [vmem:[%s5556_s3 + $0x20] sm:$0xff]  ;;  %v2988_v31 = vld [vmem:[%s5556_s3 + $0x28] sm:$0xff] }
 0x3c7   :  { %964 = vadd.xlane.f32.xlu0 %v4588_v19  ;;  %v903_v10 = vpop.xlane.xlu1 %902  ;;  %v905_v51 = vpop.xlane.xlu0 %904 }
 0x3c8   :  { %3654 = vpow2.f32 %v946_v56  ;;  %v923_v43 = vsub.f32 %v4529_v50, %v903_v10  ;;  %v924_v62 = vsub.f32 %v4531_v8, %v905_v51 }
 0x3c9   :  { %v4594_v24 = vpop.eup %3642  ;;  %3656 = vpow2.f32 %v948_v61 }
 0x3ca   :  { %v4596_v25 = vpop.eup %3644  ;;  %v950_v39 = vmul.f32 1.442695, %v923_v43  ;;  %v952_v0 = vmul.f32 1.442695, %v924_v62  ;;  %966 = vadd.xlane.f32.xlu1 %v4594_v24  ;;  %v1153_v43 = vpack.c.bf16 %v2988_v31, %v2987_v35 }
 0x3cb   :  { %968 = vadd.xlane.f32.xlu0 %v4596_v25  ;;  %v907_v11 = vpop.xlane.xlu1 %906  ;;  %v909_v38 = vpop.xlane.xlu0 %908 }
 0x3cc   :  { %3658 = vpow2.f32 %v950_v39  ;;  %v925_v27 = vsub.f32 %v4543_v32, %v907_v11  ;;  %v926_v50 = vsub.f32 %v4541_v54, %v909_v38  ;;  %v3017_v39 = vld [vmem:[%s5556_s3 + $0xb0] sm:$0xff] }
 0x3cd   :  { %v4602_v29 = vpop.eup %3646  ;;  %3660 = vpow2.f32 %v952_v0  ;;  %v3018_v0 = vld [vmem:[%s5556_s3 + $0xb8] sm:$0xff] }
 0x3ce   :  { %v4604_v8 = vpop.eup %3648  ;;  %v954_v18 = vmul.f32 1.442695, %v925_v27  ;;  %v956_v48 = vmul.f32 1.442695, %v926_v50  ;;  %970 = vadd.xlane.f32.xlu1 %v4602_v29 }
 0x3cf   :  { %972 = vadd.xlane.f32.xlu0 %v4604_v8  ;;  %v911_v1 = vpop.xlane.xlu1 %910 }
 0x3d0   :  { %3662 = vpow2.f32 %v954_v18  ;;  %v927_v22 = vsub.f32 %v4553_v63, %v911_v1  ;;  %v1394_v18 = vpack.c.bf16 %v3018_v0, %v3017_v39 }
 0x3d1   :  { %v4609_v3 = vpop.eup %3650  ;;  %3664 = vpow2.f32 %v956_v48 }
 0x3d2   :  { %v4611_v32 = vpop.eup %3652  ;;  %v958_v54 = vmul.f32 1.442695, %v927_v22  ;;  %974 = vadd.xlane.f32.xlu1 %v4609_v3 }
 0x3d3   :  { %976 = vadd.xlane.f32.xlu0 %v4611_v32 }
 0x3d4   :  { %3666 = vpow2.f32 %v958_v54 }
 0x3d5   :  { %v4615_v37 = vpop.eup %3654 }
 0x3d6   :  { %v4617_v17 = vpop.eup %3656  ;;  %978 = vadd.xlane.f32.xlu1 %v4615_v37 }
 0x3d7   :  { %980 = vadd.xlane.f32.xlu0 %v4617_v17 }
 0x3d9   :  { %v4621_v63 = vpop.eup %3658 }
 0x3da   :  { %v4623_v26 = vpop.eup %3660  ;;  %982 = vadd.xlane.f32.xlu1 %v4621_v63 }
 0x3db   :  { %984 = vadd.xlane.f32.xlu0 %v4623_v26 }
 0x3dd   :  { %v4627_v4 = vpop.eup %3662 }
 0x3de   :  { %v4629_v33 = vpop.eup %3664  ;;  %986 = vadd.xlane.f32.xlu1 %v4627_v4 }
 0x3df   :  { %988 = vadd.xlane.f32.xlu0 %v4629_v33 }
 0x3e1   :  { %v4633_v34 = vpop.eup %3666 }
 0x3e2   :  { %990 = vadd.xlane.f32.xlu1 %v4633_v34 }
 0x44b   :  { %v961_v5 = vpop.xlane.xlu0 %960 }
 0x44c   :  { %3668 = vrcp.f32 %v961_v5 }
 0x44f   :  { %v963_v23 = vpop.xlane.xlu1 %962 }
 0x450   :  { %3670 = vrcp.f32 %v963_v23  ;;  %v965_v7 = vpop.xlane.xlu0 %964 }
 0x451   :  { %3672 = vrcp.f32 %v965_v7 }
 0x453   :  { %v967_v57 = vpop.xlane.xlu1 %966 }
 0x454   :  { %3674 = vrcp.f32 %v967_v57  ;;  %v969_v12 = vpop.xlane.xlu0 %968 }
 0x455   :  { %3676 = vrcp.f32 %v969_v12 }
 0x457   :  { %v971_v40 = vpop.xlane.xlu1 %970 }
 0x458   :  { %3678 = vrcp.f32 %v971_v40  ;;  %v973_v55 = vpop.xlane.xlu0 %972 }
 0x459   :  { %3680 = vrcp.f32 %v973_v55  ;;  %v3669_v15 = vpop.eup %3668 }
 0x45a   :  { %v1008_v60 = vmul.f32 %v3669_v15, %v4581_v13 }
 0x45b   :  { %v975_v9 = vpop.xlane.xlu1 %974 }
 0x45c   :  { %3682 = vrcp.f32 %v975_v9  ;;  %v977_v49 = vpop.xlane.xlu0 %976 }
 0x45d   :  { %v3671_v58 = vpop.eup %3670  ;;  %3684 = vrcp.f32 %v977_v49 }
 0x45e   :  { %v1009_v20 = vmul.f32 %v3671_v58, %v4586_v6  ;;  %v3673_v41 = vpop.eup %3672 }
 0x45f   :  { %v979_v2 = vpop.xlane.xlu1 %978  ;;  %v1010_v13 = vmul.f32 %v3673_v41, %v4588_v19 }
 0x460   :  { %3686 = vrcp.f32 %v979_v2  ;;  %v981_v21 = vpop.xlane.xlu0 %980  ;;  %v1024_v52 = vpack.c.bf16 %v1009_v20, %v1008_v60 }
 0x461   :  { %v3675_v47 = vpop.eup %3674  ;;  %3688 = vrcp.f32 %v981_v21 }
 0x462   :  { %3360 = vmatprep.mubr.bf16.mxu0 %v1024_v52  ;;  %v1011_v6 = vmul.f32 %v3675_v47, %v4594_v24  ;;  %v3677_v56 = vpop.eup %3676 }
 0x463   :  { %v983_v61 = vpop.xlane.xlu1 %982  ;;  %v1012_v19 = vmul.f32 %v3677_v56, %v4596_v25 }
 0x464   :  { %3690 = vrcp.f32 %v983_v61  ;;  %v985_v10 = vpop.xlane.xlu0 %984  ;;  %v1025_v51 = vpack.c.bf16 %v1011_v6, %v1010_v13 }
 0x465   :  { %v3679_v62 = vpop.eup %3678  ;;  %3692 = vrcp.f32 %v985_v10 }
 0x466   :  { %3361 = vmatmul.mubr.bf16.vlgmr.msra.gmra.mxu0 %v1025_v51  ;;  %v1013_v24 = vmul.f32 %v3679_v62, %v4602_v29  ;;  %v3681_v11 = vpop.eup %3680 }
 0x467   :  { %3377 = vmatpush3.bf16.msra.mxu0 %v1154_v59  ;;  %v987_v38 = vpop.xlane.xlu1 %986  ;;  %v1014_v1 = vmul.f32 %v3681_v11, %v4604_v8 }
 0x468   :  { %3694 = vrcp.f32 %v987_v38  ;;  %v989_v27 = vpop.xlane.xlu0 %988  ;;  %v1026_v50 = vpack.c.bf16 %v1013_v24, %v1012_v19  ;;  %3378 = vmatprep.subr.bf16.mxu0 %v1153_v43 }
 0x469   :  { %v3683_v48 = vpop.eup %3682  ;;  %3696 = vrcp.f32 %v989_v27 }
 0x46a   :  { %3364 = vmatprep.mubr.bf16.mxu0 %v1026_v50  ;;  %v1015_v22 = vmul.f32 %v3683_v48, %v4609_v3  ;;  %v3685_v54 = vpop.eup %3684 }
 0x46b   :  { %v991_v28 = vpop.xlane.xlu1 %990  ;;  %3379 = vmatpush3.bf16.msra.mxu0 %v1153_v43  ;;  %v1016_v42 = vmul.f32 %v3685_v54, %v4611_v32  ;;  %v2992_v43 = vld [vmem:[%s5559_s4 + $0x1] ss:$0 sm:$0xff] }
 0x46c   :  { %3698 = vrcp.f32 %v991_v28  ;;  %v1027_v25 = vpack.c.bf16 %v1015_v22, %v1014_v1  ;;  %3416 = vmatprep.subr.bf16.mxu0 %v1394_v18 }
 0x46d   :  { %v3687_v29 = vpop.eup %3686 }
 0x46e   :  { %3365 = vmatmul.mubr.bf16.gmra.mxu0 %v1027_v25  ;;  %v1017_v59 = vmul.f32 %v3687_v29, %v4615_v37  ;;  %v3689_v5 = vpop.eup %3688 }
 0x46f   :  { %v1018_v8 = vmul.f32 %v3689_v5, %v4617_v17  ;;  %v3015_v17 = vld [vmem:[%s5556_s3 + $0xa0] sm:$0xff] }
 0x470   :  { %v1028_v23 = vpack.c.bf16 %v1017_v59, %v1016_v42 }
 0x471   :  { %v3691_v7 = vpop.eup %3690 }
 0x472   :  { %3368 = vmatprep.mubr.bf16.mxu0 %v1028_v23  ;;  %v1019_v3 = vmul.f32 %v3691_v7, %v4621_v63  ;;  %v3693_v57 = vpop.eup %3692  ;;  %v3016_v63 = vld [vmem:[%s5556_s3 + $0xa8] sm:$0xff] }
 0x473   :  { %v1020_v55 = vmul.f32 %v3693_v57, %v4623_v26  ;;  %v1393_v26 = vpack.c.bf16 %v3016_v63, %v3015_v17 }
 0x474   :  { %v1029_v12 = vpack.c.bf16 %v1019_v3, %v1018_v8 }
 0x475   :  { %v3695_v40 = vpop.eup %3694 }
 0x476   :  { %3369 = vmatmul.mubr.bf16.gmra.mxu0 %v1029_v12  ;;  %v1021_v15 = vmul.f32 %v3695_v40, %v4627_v4  ;;  %v3697_v9 = vpop.eup %3696 }
 0x477   :  { %v1022_v37 = vmul.f32 %v3697_v9, %v4629_v33 }
 0x478   :  { %v1030_v32 = vpack.c.bf16 %v1021_v15, %v1020_v55 }
 0x479   :  { %v3699_v49 = vpop.eup %3698 }
 0x47a   :  { %3372 = vmatprep.mubr.bf16.mxu0 %v1030_v32  ;;  %v1023_v58 = vmul.f32 %v3699_v49, %v4633_v34 }
 0x47c   :  { %v1031_v60 = vpack.c.bf16 %v1023_v58, %v1022_v37 }
 0x47e   :  { %3373 = vmatmul.mubr.bf16.gmra.mxu0 %v1031_v60 }
 0x47f   :  { %3380 = vmatprep.mubr.msk.bf16.mxu0 %vm64_vm0, %v4164_v30 }
 0x486   :  { %3381 = vmatmul.mubr.msk.bf16.vlgmr.msra.gmra.mxu0 %vm64_vm0, %v4175_v46 }
 0x487   :  { %3384 = vmatprep.mubr.msk.bf16.mxu0 %vm64_vm0, %v4188_v53  ;;  %3417 = vmatpush3.bf16.msra.mxu0 %v1394_v18 }
 0x488   :  { %3418 = vmatprep.subr.bf16.mxu0 %v1393_v26 }
 0x48b   :  { %3419 = vmatpush3.bf16.msra.mxu0 %v1393_v26 }
 0x48e   :  { %3385 = vmatmul.mubr.msk.bf16.gmra.mxu0 %vm64_vm0, %v4200_v36 }
 0x48f   :  { %3388 = vmatprep.mubr.msk.bf16.mxu0 %vm64_vm0, %v4212_v44 }
 0x496   :  { %3389 = vmatmul.mubr.msk.bf16.gmra.mxu0 %vm64_vm0, %v4224_v14 }
 0x497   :  { %3392 = vmatprep.mubr.msk.bf16.mxu0 %vm64_vm0, %v4235_v16 }
 0x49e   :  { %3393 = vmatmul.mubr.msk.bf16.gmra.mxu0 %vm64_vm0, %v4243_v45 }
 0x49f   :  { %3420 = vmatprep.mubr.msk.bf16.mxu0 %vm64_vm0, %v4164_v30  ;;  %v1137_v30 = vld [vmem:[%s5561_s6] sm:$0xff] }
 0x4a6   :  { %3421 = vmatmul.mubr.msk.bf16.vlgmr.msra.gmra.mxu0 %vm64_vm0, %v4175_v46  ;;  %v1138_v46 = vld [vmem:[%s5561_s6 + $0x8] sm:$0xff] }
 0x4a7   :  { %3424 = vmatprep.mubr.msk.bf16.mxu0 %vm64_vm0, %v4188_v53  ;;  %v1147_v53 = vpack.c.bf16 %v1138_v46, %v1137_v30 }
 0x4a9   :  { %3518 = vmatprep.subr.bf16.mxu1 %v1147_v53 }
 0x4ae   :  { %3425 = vmatmul.mubr.msk.bf16.gmra.mxu0 %vm64_vm0, %v4200_v36 }
 0x4af   :  { %3428 = vmatprep.mubr.msk.bf16.mxu0 %vm64_vm0, %v4212_v44 }
 0x4b6   :  { %3429 = vmatmul.mubr.msk.bf16.gmra.mxu0 %vm64_vm0, %v4224_v14 }
 0x4b7   :  { %3432 = vmatprep.mubr.msk.bf16.mxu0 %vm64_vm0, %v4235_v16 }
 0x4be   :  { %3433 = vmatmul.mubr.msk.bf16.gmra.mxu0 %vm64_vm0, %v4243_v45 }
 0x526   :  { %v4714_v36 = vpop.f32.mrf.mxu0 }
 0x528   :  { %v4716_v44 = vpop.f32.mrf.mxu0 }
 0x52a   :  { %v4718_v14 = vpop.f32.mrf.mxu0 }
 0x52b   :  { %v1140_v16 = vpack.c.bf16 %v4718_v14, %v4714_v36  ;;  %v3020_v14 = vld [vmem:[%s5559_s4 + $0x5] ss:$0 sm:$0xff] }
 0x52c   :  { %v4722_v45 = vpop.f32.mrf.mxu0 }
 0x52e   :  { %v4724_v4 = vpop.f32.mrf.mxu0 }
 0x530   :  { %v4726_v33 = vpop.f32.mrf.mxu0 }
 0x532   :  { %v4728_v34 = vpop.f32.mrf.mxu0 }
 0x533   :  { %v1142_v20 = vpack.c.bf16 %v4728_v34, %v4724_v4 }
 0x534   :  { %v4732_v41 = vpop.f32.mrf.mxu0 }
 0x536   :  { %v4734_v2 = vpop.f32.mrf.mxu0 }
 0x538   :  { %v4736_v21 = vpop.f32.mrf.mxu0 }
 0x53a   :  { %v4738_v52 = vpop.f32.mrf.mxu0 }
 0x53b   :  { %v1144_v47 = vpack.c.bf16 %v4738_v52, %v4734_v2 }
 0x53c   :  { %v4742_v35 = vpop.f32.mrf.mxu0 }
 0x53e   :  { %v4744_v31 = vpop.f32.mrf.mxu0 }
 0x540   :  { %v4746_v13 = vpop.f32.mrf.mxu0 }
 0x542   :  { %v4748_v6 = vpop.f32.mrf.mxu0 }
 0x543   :  { %v1146_v56 = vpack.c.bf16 %v4748_v6, %v4744_v31 }
 0x544   :  { %v4752_v61 = vpop.f32.mrf.mxu0 }
 0x546   :  { %v3382_v10 = vpop.f32.mrf.mxu0 }
 0x547   :  { %v1206_v19 = vadd.f32 %v3382_v10, %v2992_v43 }
 0x548   :  { %v1197_v51 = vpop.f32.mrf.mxu0 }
 0x549   :  { %v1198_v39 = vadd.f32 %v2992_v43, %v1197_v51  ;;  %v1262_v48 = vmul.f32 0.25, %v1206_v19 }
 0x54a   :  { %v3383_v62 = vpop.f32.mrf.mxu0 }
 0x54b   :  { %v1209_v0 = vadd.f32 %v3383_v62, %v2992_v43  ;;  %v1260_v50 = vmul.f32 0.25, %v1198_v39 }
 0x54c   :  { %v1200_v24 = vpop.f32.mrf.mxu0 }
 0x54d   :  { %v1201_v11 = vadd.f32 %v2992_v43, %v1200_v24  ;;  %v1263_v38 = vmul.f32 0.25, %v1209_v0 }
 0x54e   :  { %v3386_v27 = vpop.f32.mrf.mxu0 }
 0x54f   :  { %v1261_v18 = vmul.f32 0.25, %v1201_v11  ;;  %v1501_v54 = vpack.c.bf16 %v1263_v38, %v1262_v48  ;;  %v1222_v42 = vadd.f32 %v3386_v27, %v2992_v43 }
 0x550   :  { %v1213_v1 = vpop.f32.mrf.mxu0 }
 0x551   :  { %v1500_v22 = vpack.c.bf16 %v1261_v18, %v1260_v50  ;;  %v1214_v25 = vadd.f32 %v2992_v43, %v1213_v1  ;;  %v1266_v57 = vmul.f32 0.25, %v1222_v42 }
 0x552   :  { %v3387_v28 = vpop.f32.mrf.mxu0 }
 0x553   :  { %v1225_v29 = vadd.f32 %v3387_v28, %v2992_v43  ;;  %3452 = vmatprep.mubr.msk.bf16.mxu1 %vm734_vm1, %v1500_v22  ;;  %v1264_v8 = vmul.f32 0.25, %v1214_v25  ;;  %v1139_v28 = vpack.c.bf16 %v4722_v45, %v4716_v44 }
 0x554   :  { %v1216_v59 = vpop.f32.mrf.mxu0  ;;  %3453 = vmatmul.mubr.msk.bf16.vlgmr.msra.gmra.mxu1 %vm734_vm1, %v1501_v54 }
 0x555   :  { %v1217_v5 = vadd.f32 %v2992_v43, %v1216_v59  ;;  %3519 = vmatpush3.bf16.msra.mxu1 %v1147_v53  ;;  %v1267_v23 = vmul.f32 0.25, %v1225_v29  ;;  %v1141_v59 = vpack.c.bf16 %v4732_v41, %v4726_v33  ;;  %v1145_v41 = vpack.c.bf16 %v4752_v61, %v4746_v13 }
 0x556   :  { %v3390_v7 = vpop.f32.mrf.mxu0 }
 0x557   :  { %v1265_v3 = vmul.f32 0.25, %v1217_v5  ;;  %v1503_v55 = vpack.c.bf16 %v1267_v23, %v1266_v57  ;;  %v1238_v49 = vadd.f32 %v3390_v7, %v2992_v43  ;;  %v1143_v7 = vpack.c.bf16 %v4742_v35, %v4736_v21 }
 0x558   :  { %v1229_v12 = vpop.f32.mrf.mxu0 }
 0x559   :  { %v1502_v40 = vpack.c.bf16 %v1265_v3, %v1264_v8  ;;  %v1230_v9 = vadd.f32 %v2992_v43, %v1229_v12  ;;  %v1270_v30 = vmul.f32 0.25, %v1238_v49 }
 0x55a   :  { %v3391_v15 = vpop.f32.mrf.mxu0 }
 0x55b   :  { %v1241_v32 = vadd.f32 %v3391_v15, %v2992_v43  ;;  %3456 = vmatprep.mubr.msk.bf16.mxu1 %vm734_vm1, %v1502_v40  ;;  %v1268_v63 = vmul.f32 0.25, %v1230_v9 }
 0x55c   :  { %v1232_v37 = vpop.f32.mrf.mxu0  ;;  %3457 = vmatmul.mubr.msk.bf16.gmra.mxu1 %vm734_vm1, %v1503_v55 }
 0x55d   :  { %v1233_v58 = vadd.f32 %v2992_v43, %v1232_v37  ;;  %v1271_v60 = vmul.f32 0.25, %v1241_v32 }
 0x55e   :  { %v3394_v17 = vpop.f32.mrf.mxu0 }
 0x55f   :  { %v1269_v26 = vmul.f32 0.25, %v1233_v58  ;;  %v1505_v10 = vpack.c.bf16 %v1271_v60, %v1270_v30  ;;  %v1254_v0 = vadd.f32 %v3394_v17, %v2992_v43 }
 0x560   :  { %v1245_v46 = vpop.f32.mrf.mxu0 }
 0x561   :  { %v1504_v53 = vpack.c.bf16 %v1269_v26, %v1268_v63  ;;  %v1246_v62 = vadd.f32 %v2992_v43, %v1245_v46  ;;  %v1274_v18 = vmul.f32 0.25, %v1254_v0  ;;  %v3029_v63 = vld [vmem:[%s5560_s5 + $0x80] sm:$0xff]  ;;  %v3031_v46 = vld [vmem:[%s5560_s5 + $0x90] sm:$0xff]  ;;  %v3032_v0 = vld [vmem:[%s5560_s5 + $0x98] sm:$0xff] }
 0x562   :  { %v3395_v51 = vpop.f32.mrf.mxu0 }
 0x563   :  { %v1257_v39 = vadd.f32 %v3395_v51, %v2992_v43  ;;  %3460 = vmatprep.mubr.msk.bf16.mxu1 %vm734_vm1, %v1504_v53  ;;  %v1272_v27 = vmul.f32 0.25, %v1246_v62 }
 0x564   :  { %v1248_v19 = vpop.f32.mrf.mxu0  ;;  %3461 = vmatmul.mubr.msk.bf16.gmra.mxu1 %vm734_vm1, %v1505_v10  ;;  %v3030_v10 = vld [vmem:[%s5560_s5 + $0x88] sm:$0xff] }
 0x565   :  { %v1249_v24 = vadd.f32 %v2992_v43, %v1248_v19  ;;  %v1275_v11 = vmul.f32 0.25, %v1257_v39 }
 0x566   :  { %v4763_v38 = vpop.f32.mrf.mxu0 }
 0x567   :  { %v1273_v50 = vmul.f32 0.25, %v1249_v24  ;;  %v1507_v22 = vpack.c.bf16 %v1275_v11, %v1274_v18  ;;  %v1446_v58 = vadd.f32 %v4763_v38, %v3020_v14  ;;  %v3033_v24 = vld [vmem:[%s5560_s5 + $0xa0] sm:$0xff] }
 0x568   :  { %v4765_v48 = vpop.f32.mrf.mxu0 }
 0x569   :  { %v1506_v1 = vpack.c.bf16 %v1273_v50, %v1272_v27  ;;  %v3035_v50 = vld [vmem:[%s5560_s5 + $0xb0] sm:$0xff] }
 0x56a   :  { %v3423_v54 = vpop.f32.mrf.mxu0 }
 0x56b   :  { %3464 = vmatprep.mubr.msk.bf16.mxu1 %vm734_vm1, %v1506_v1  ;;  %v1449_v49 = vadd.f32 %v3423_v54, %v3020_v14 }
 0x56c   :  { %v1440_v25 = vpop.f32.mrf.mxu0  ;;  %3465 = vmatmul.mubr.msk.bf16.gmra.mxu1 %vm734_vm1, %v1507_v22 }
 0x56d   :  { %3520 = vmatprep.mubr.msk.bf16.mxu1 %vm734_vm1, %v1139_v28  ;;  %v1831_v31 = vpack.c.bf16 %v1449_v49, %v1446_v58  ;;  %v1441_v6 = vadd.f32 %v3020_v14, %v1440_v25  ;;  %v3036_v28 = vld [vmem:[%s5560_s5 + $0xb8] sm:$0xff] }
 0x56e   :  { %v3426_v43 = vpop.f32.mrf.mxu0 }
 0x56f   :  { %v1462_v55 = vadd.f32 %v3426_v43, %v3020_v14  ;;  %v3037_v43 = vld [vmem:[%s5560_s5 + $0xc0] sm:$0xff] }
 0x570   :  { %v1453_v29 = vpop.f32.mrf.mxu0 }
 0x571   :  { %v1454_v32 = vadd.f32 %v3020_v14, %v1453_v29 }
 0x572   :  { %v3427_v42 = vpop.f32.mrf.mxu0 }
 0x573   :  { %v1465_v52 = vadd.f32 %v3427_v42, %v3020_v14 }
 0x574   :  { %v1456_v5 = vpop.f32.mrf.mxu0  ;;  %3521 = vmatmul.mubr.msk.bf16.vlgmr.msra.gmra.mxu1 %vm734_vm1, %v1140_v16 }
 0x575   :  { %3524 = vmatprep.mubr.msk.bf16.mxu1 %vm734_vm1, %v1141_v59  ;;  %v1833_v15 = vpack.c.bf16 %v1465_v52, %v1462_v55  ;;  %v1457_v9 = vadd.f32 %v3020_v14, %v1456_v5  ;;  %v3039_v5 = vld [vmem:[%s5560_s5 + $0xd0] sm:$0xff] }
 0x576   :  { %v3430_v44 = vpop.f32.mrf.mxu0 }
 0x577   :  { %v1478_v40 = vadd.f32 %v3430_v44, %v3020_v14  ;;  %v1832_v37 = vpack.c.bf16 %v1457_v9, %v1454_v32 }
 0x578   :  { %v1469_v45 = vpop.f32.mrf.mxu0 }
 0x579   :  { %v1470_v2 = vadd.f32 %v3020_v14, %v1469_v45  ;;  %v3038_v45 = vld [vmem:[%s5560_s5 + $0xc8] sm:$0xff] }
 0x57a   :  { %v3431_v23 = vpop.f32.mrf.mxu0 }
 0x57b   :  { %v1481_v57 = vadd.f32 %v3431_v23, %v3020_v14 }
 0x57c   :  { %v1472_v8 = vpop.f32.mrf.mxu0  ;;  %3525 = vmatmul.mubr.msk.bf16.gmra.mxu1 %vm734_vm1, %v1142_v20 }
 0x57d   :  { %3528 = vmatprep.mubr.msk.bf16.mxu1 %vm734_vm1, %v1143_v7  ;;  %v1835_v13 = vpack.c.bf16 %v1481_v57, %v1478_v40  ;;  %v1473_v61 = vadd.f32 %v3020_v14, %v1472_v8 }
 0x57e   :  { %v3434_v33 = vpop.f32.mrf.mxu0 }
 0x57f   :  { %v1494_v3 = vadd.f32 %v3434_v33, %v3020_v14  ;;  %v3040_v33 = vld [vmem:[%s5560_s5 + $0xd8] sm:$0xff] }
 0x580   :  { %v1485_v36 = vpop.f32.mrf.mxu0 }
 0x581   :  { %v1486_v4 = vadd.f32 %v3020_v14, %v1485_v36 }
 0x582   :  { %v3435_v16 = vpop.f32.mrf.mxu0 }
 0x583   :  { %v1497_v21 = vadd.f32 %v3435_v16, %v3020_v14 }
 0x584   :  { %v1488_v35 = vpop.f32.mrf.mxu0  ;;  %3529 = vmatmul.mubr.msk.bf16.gmra.mxu1 %vm734_vm1, %v1144_v47  ;;  %v1834_v47 = vpack.c.bf16 %v1473_v61, %v1470_v2 }
 0x585   :  { %v1837_v34 = vpack.c.bf16 %v1497_v21, %v1494_v3  ;;  %v1489_v20 = vadd.f32 %v3020_v14, %v1488_v35  ;;  %3532 = vmatprep.mubr.msk.bf16.mxu1 %vm734_vm1, %v1145_v41  ;;  %v3043_v21 = vld [vmem:[%s5560_s5 + $0xf0] sm:$0xff] }
 0x587   :  { %v1836_v12 = vpack.c.bf16 %v1489_v20, %v1486_v4  ;;  %3468 = vmatprep.subr.bf16.mxu0 %v1837_v34  ;;  %v3042_v4 = vld [vmem:[%s5560_s5 + $0xe8] sm:$0xff] }
 0x588   :  { %3469 = vmatpush3.bf16.msra.mxu0 %v1837_v34 }
 0x589   :  { %3470 = vmatprep.subr.bf16.mxu0 %v1836_v12 }
 0x58c   :  { %3471 = vmatpush3.bf16.msra.mxu0 %v1836_v12  ;;  %3533 = vmatmul.mubr.msk.bf16.gmra.mxu1 %vm734_vm1, %v1146_v56  ;;  %v1438_v56 = vadd.f32 %v3020_v14, %v4765_v48  ;;  %v3034_v48 = vld [vmem:[%s5560_s5 + $0xa8] sm:$0xff]  ;;  %v3041_v14 = vld [vmem:[%s5560_s5 + $0xe0] sm:$0xff]  ;;  %v3044_v12 = vld [vmem:[%s5560_s5 + $0xf8] sm:$0xff] }
 0x58d   :  { %3472 = vmatprep.subr.bf16.mxu0 %v1835_v13 }
 0x58e   :  { %v1830_v60 = vpack.c.bf16 %v1441_v6, %v1438_v56 }
 0x590   :  { %3473 = vmatpush3.bf16.msra.mxu0 %v1835_v13 }
 0x591   :  { %3474 = vmatprep.subr.bf16.mxu0 %v1834_v47 }
 0x594   :  { %3475 = vmatpush3.bf16.msra.mxu0 %v1834_v47 }
 0x595   :  { %3476 = vmatprep.subr.bf16.mxu0 %v1833_v15 }
 0x598   :  { %3477 = vmatpush3.bf16.msra.mxu0 %v1833_v15 }
 0x599   :  { %3478 = vmatprep.subr.bf16.mxu0 %v1832_v37 }
 0x59c   :  { %3479 = vmatpush3.bf16.msra.mxu0 %v1832_v37 }
 0x59d   :  { %3480 = vmatprep.subr.bf16.mxu0 %v1831_v31 }
 0x5a0   :  { %3481 = vmatpush3.bf16.msra.mxu0 %v1831_v31 }
 0x5a1   :  { %3482 = vmatprep.subr.bf16.mxu0 %v1830_v60 }
 0x5a4   :  { %3483 = vmatpush3.bf16.msra.mxu0 %v1830_v60 }
 0x614   :  { %v3454_v17 = vpop.f32.mrf.mxu1 }
 0x615   :  { %v4814_v62 = vadd.f32 %v3454_v17, %v3031_v46 }
 0x616   :  { %v1615_v26 = vpop.f32.mrf.mxu1 }
 0x617   :  { %v4805_v30 = vadd.f32 %v3029_v63, %v1615_v26 }
 0x618   :  { %v3455_v53 = vpop.f32.mrf.mxu1 }
 0x619   :  { %1678 = vmax.xlane.f32.xlu0 %v4805_v30  ;;  %v4823_v38 = vadd.f32 %v3455_v53, %v3032_v0 }
 0x61a   :  { %v1618_v51 = vpop.f32.mrf.mxu1 }
 0x61b   :  { %v1619_v39 = vadd.f32 %v3030_v10, %v1618_v51 }
 0x61c   :  { %v3458_v19 = vpop.f32.mrf.mxu1 }
 0x61d   :  { %1680 = vmax.xlane.f32.xlu1 %v1619_v39  ;;  %1682 = vmax.xlane.f32.xlu0 %v4814_v62  ;;  %v4835_v22 = vadd.f32 %v3458_v19, %v3035_v50 }
 0x61e   :  { %v1631_v11 = vpop.f32.mrf.mxu1 }
 0x61f   :  { %v4825_v27 = vadd.f32 %v3033_v24, %v1631_v11 }
 0x620   :  { %v3459_v18 = vpop.f32.mrf.mxu1 }
 0x621   :  { %1684 = vmax.xlane.f32.xlu1 %v4823_v38  ;;  %1686 = vmax.xlane.f32.xlu0 %v4825_v27  ;;  %v4844_v42 = vadd.f32 %v3459_v18, %v3036_v28 }
 0x622   :  { %v1634_v1 = vpop.f32.mrf.mxu1 }
 0x623   :  { %v1635_v54 = vadd.f32 %v3034_v48, %v1634_v1 }
 0x624   :  { %v3462_v25 = vpop.f32.mrf.mxu1 }
 0x625   :  { %1688 = vmax.xlane.f32.xlu1 %v1635_v54  ;;  %1690 = vmax.xlane.f32.xlu0 %v4835_v22  ;;  %v4856_v7 = vadd.f32 %v3462_v25, %v3039_v5 }
 0x626   :  { %v1647_v29 = vpop.f32.mrf.mxu1 }
 0x627   :  { %v4846_v59 = vadd.f32 %v3037_v43, %v1647_v29 }
 0x628   :  { %v3463_v44 = vpop.f32.mrf.mxu1 }
 0x629   :  { %1692 = vmax.xlane.f32.xlu1 %v4844_v42  ;;  %1694 = vmax.xlane.f32.xlu0 %v4846_v59  ;;  %v4868_v41 = vadd.f32 %v3463_v44, %v3040_v33 }
 0x62a   :  { %v1650_v23 = vpop.f32.mrf.mxu1 }
 0x62b   :  { %v4858_v8 = vadd.f32 %v3038_v45, %v1650_v23 }
 0x62c   :  { %v3466_v36 = vpop.f32.mrf.mxu1 }
 0x62d   :  { %1696 = vmax.xlane.f32.xlu1 %v4858_v8  ;;  %1698 = vmax.xlane.f32.xlu0 %v4856_v7  ;;  %v4880_v20 = vadd.f32 %v3466_v36, %v3043_v21 }
 0x62e   :  { %v1663_v16 = vpop.f32.mrf.mxu1 }
 0x62f   :  { %v4870_v3 = vadd.f32 %v3041_v14, %v1663_v16 }
 0x630   :  { %v3467_v35 = vpop.f32.mrf.mxu1 }
 0x631   :  { %1700 = vmax.xlane.f32.xlu1 %v4868_v41  ;;  %1702 = vmax.xlane.f32.xlu0 %v4870_v3  ;;  %v4889_v40 = vadd.f32 %v3467_v35, %v3044_v12 }
 0x632   :  { %v1666_v34 = vpop.f32.mrf.mxu1 }
 0x633   :  { %v4882_v57 = vadd.f32 %v3042_v4, %v1666_v34 }
 0x635   :  { %1704 = vmax.xlane.f32.xlu1 %v4882_v57  ;;  %1706 = vmax.xlane.f32.xlu0 %v4880_v20 }
 0x639   :  { %1708 = vmax.xlane.f32.xlu1 %v4889_v40 }
 0x6a2   :  { %v1679_v13 = vpop.xlane.xlu0 %1678 }
 0x6a3   :  { %v1710_v61 = vsub.f32 %v4805_v30, %v1679_v13  ;;  %v3053_v13 = vld [vmem:[%s5561_s6 + $0x10] sm:$0xff] }
 0x6a5   :  { %v1726_v2 = vmul.f32 1.442695, %v1710_v61  ;;  %v3054_v61 = vld [vmem:[%s5561_s6 + $0x18] sm:$0xff] }
 0x6a6   :  { %v1681_v52 = vpop.xlane.xlu1 %1680  ;;  %v1683_v47 = vpop.xlane.xlu0 %1682 }
 0x6a7   :  { %3700 = vpow2.f32 %v1726_v2  ;;  %v1711_v55 = vsub.f32 %v1619_v39, %v1681_v52  ;;  %v1712_v15 = vsub.f32 %v4814_v62, %v1683_v47  ;;  %v1946_v2 = vpack.c.bf16 %v3054_v61, %v3053_v13 }
 0x6a9   :  { %v1728_v9 = vmul.f32 1.442695, %v1711_v55  ;;  %v1730_v32 = vmul.f32 1.442695, %v1712_v15  ;;  %3500 = vmatprep.subr.bf16.mxu0 %v1946_v2 }
 0x6aa   :  { %v1685_v49 = vpop.xlane.xlu1 %1684  ;;  %v1687_v37 = vpop.xlane.xlu0 %1686 }
 0x6ab   :  { %3702 = vpow2.f32 %v1728_v9  ;;  %v1713_v58 = vsub.f32 %v4823_v38, %v1685_v49  ;;  %v1714_v31 = vsub.f32 %v4825_v27, %v1687_v37 }
 0x6ac   :  { %3704 = vpow2.f32 %v1730_v32 }
 0x6ad   :  { %v1732_v6 = vmul.f32 1.442695, %v1713_v58  ;;  %v1734_v56 = vmul.f32 1.442695, %v1714_v31 }
 0x6ae   :  { %v1689_v60 = vpop.xlane.xlu1 %1688  ;;  %v1691_v17 = vpop.xlane.xlu0 %1690 }
 0x6af   :  { %3706 = vpow2.f32 %v1732_v6  ;;  %v1715_v63 = vsub.f32 %v1635_v54, %v1689_v60  ;;  %v1716_v26 = vsub.f32 %v4835_v22, %v1691_v17 }
 0x6b0   :  { %3708 = vpow2.f32 %v1734_v56 }
 0x6b1   :  { %v1736_v30 = vmul.f32 1.442695, %v1715_v63  ;;  %v1738_v46 = vmul.f32 1.442695, %v1716_v26 }
 0x6b2   :  { %v1693_v53 = vpop.xlane.xlu1 %1692  ;;  %v1695_v10 = vpop.xlane.xlu0 %1694 }
 0x6b3   :  { %3710 = vpow2.f32 %v1736_v30  ;;  %v1717_v51 = vsub.f32 %v4844_v42, %v1693_v53  ;;  %v1718_v62 = vsub.f32 %v4846_v59, %v1695_v10 }
 0x6b4   :  { %v4899_v39 = vpop.eup %3700  ;;  %3712 = vpow2.f32 %v1738_v46 }
 0x6b5   :  { %v1740_v0 = vmul.f32 1.442695, %v1717_v51  ;;  %v1742_v19 = vmul.f32 1.442695, %v1718_v62  ;;  %1758 = vadd.xlane.f32.xlu0 %v4899_v39 }
 0x6b6   :  { %v1697_v24 = vpop.xlane.xlu1 %1696  ;;  %v1699_v11 = vpop.xlane.xlu0 %1698 }
 0x6b7   :  { %3714 = vpow2.f32 %v1740_v0  ;;  %v1719_v38 = vsub.f32 %v4858_v8, %v1697_v24  ;;  %v1720_v27 = vsub.f32 %v4856_v7, %v1699_v11 }
 0x6b8   :  { %v4904_v50 = vpop.eup %3702  ;;  %3716 = vpow2.f32 %v1742_v19 }
 0x6b9   :  { %v4906_v18 = vpop.eup %3704  ;;  %v1744_v48 = vmul.f32 1.442695, %v1719_v38  ;;  %v1746_v1 = vmul.f32 1.442695, %v1720_v27  ;;  %1760 = vadd.xlane.f32.xlu1 %v4904_v50 }
 0x6ba   :  { %1762 = vadd.xlane.f32.xlu0 %v4906_v18  ;;  %v1701_v22 = vpop.xlane.xlu1 %1700  ;;  %v1703_v54 = vpop.xlane.xlu0 %1702 }
 0x6bb   :  { %3718 = vpow2.f32 %v1744_v48  ;;  %v1721_v28 = vsub.f32 %v4868_v41, %v1701_v22  ;;  %v1722_v25 = vsub.f32 %v4870_v3, %v1703_v54 }
 0x6bc   :  { %v4912_v43 = vpop.eup %3706  ;;  %3720 = vpow2.f32 %v1746_v1 }
 0x6bd   :  { %v4914_v29 = vpop.eup %3708  ;;  %v1748_v42 = vmul.f32 1.442695, %v1721_v28  ;;  %v1750_v59 = vmul.f32 1.442695, %v1722_v25  ;;  %1764 = vadd.xlane.f32.xlu1 %v4912_v43 }
 0x6be   :  { %1766 = vadd.xlane.f32.xlu0 %v4914_v29  ;;  %v1705_v5 = vpop.xlane.xlu1 %1704  ;;  %v1707_v44 = vpop.xlane.xlu0 %1706 }
 0x6bf   :  { %3722 = vpow2.f32 %v1748_v42  ;;  %v1723_v45 = vsub.f32 %v4882_v57, %v1705_v5  ;;  %v1724_v23 = vsub.f32 %v4880_v20, %v1707_v44 }
 0x6c0   :  { %v4920_v7 = vpop.eup %3710  ;;  %3724 = vpow2.f32 %v1750_v59 }
 0x6c1   :  { %v4922_v8 = vpop.eup %3712  ;;  %v1752_v33 = vmul.f32 1.442695, %v1723_v45  ;;  %v1754_v36 = vmul.f32 1.442695, %v1724_v23  ;;  %1768 = vadd.xlane.f32.xlu1 %v4920_v7 }
 0x6c2   :  { %1770 = vadd.xlane.f32.xlu0 %v4922_v8  ;;  %v1709_v14 = vpop.xlane.xlu1 %1708 }
 0x6c3   :  { %3726 = vpow2.f32 %v1752_v33  ;;  %v1725_v16 = vsub.f32 %v4889_v40, %v1709_v14 }
 0x6c4   :  { %v4927_v41 = vpop.eup %3714  ;;  %3728 = vpow2.f32 %v1754_v36 }
 0x6c5   :  { %v4929_v3 = vpop.eup %3716  ;;  %v1756_v21 = vmul.f32 1.442695, %v1725_v16  ;;  %1772 = vadd.xlane.f32.xlu1 %v4927_v41 }
 0x6c6   :  { %1774 = vadd.xlane.f32.xlu0 %v4929_v3 }
 0x6c7   :  { %3730 = vpow2.f32 %v1756_v21 }
 0x6c8   :  { %v4933_v35 = vpop.eup %3718 }
 0x6c9   :  { %v4935_v4 = vpop.eup %3720  ;;  %1776 = vadd.xlane.f32.xlu1 %v4933_v35 }
 0x6ca   :  { %1778 = vadd.xlane.f32.xlu0 %v4935_v4 }
 0x6cc   :  { %v4939_v34 = vpop.eup %3722 }
 0x6cd   :  { %v4941_v20 = vpop.eup %3724  ;;  %1780 = vadd.xlane.f32.xlu1 %v4939_v34 }
 0x6ce   :  { %1782 = vadd.xlane.f32.xlu0 %v4941_v20 }
 0x6d0   :  { %v4945_v57 = vpop.eup %3726 }
 0x6d1   :  { %v4947_v12 = vpop.eup %3728  ;;  %1784 = vadd.xlane.f32.xlu1 %v4945_v57 }
 0x6d2   :  { %1786 = vadd.xlane.f32.xlu0 %v4947_v12 }
 0x6d4   :  { %v4951_v40 = vpop.eup %3730 }
 0x6d5   :  { %1788 = vadd.xlane.f32.xlu1 %v4951_v40 }
 0x73e   :  { %v1759_v52 = vpop.xlane.xlu0 %1758 }
 0x73f   :  { %3732 = vrcp.f32 %v1759_v52 }
 0x742   :  { %v1761_v47 = vpop.xlane.xlu1 %1760 }
 0x743   :  { %3734 = vrcp.f32 %v1761_v47  ;;  %v1763_v55 = vpop.xlane.xlu0 %1762 }
 0x744   :  { %3736 = vrcp.f32 %v1763_v55 }
 0x746   :  { %v1765_v15 = vpop.xlane.xlu1 %1764 }
 0x747   :  { %3738 = vrcp.f32 %v1765_v15  ;;  %v1767_v9 = vpop.xlane.xlu0 %1766 }
 0x748   :  { %3740 = vrcp.f32 %v1767_v9 }
 0x74a   :  { %v1769_v32 = vpop.xlane.xlu1 %1768 }
 0x74b   :  { %3742 = vrcp.f32 %v1769_v32  ;;  %v1771_v49 = vpop.xlane.xlu0 %1770 }
 0x74c   :  { %3744 = vrcp.f32 %v1771_v49  ;;  %v3733_v37 = vpop.eup %3732 }
 0x74d   :  { %v1806_v56 = vmul.f32 %v3733_v37, %v4899_v39 }
 0x74e   :  { %v1773_v58 = vpop.xlane.xlu1 %1772 }
 0x74f   :  { %3746 = vrcp.f32 %v1773_v58  ;;  %v1775_v31 = vpop.xlane.xlu0 %1774 }
 0x750   :  { %v3735_v6 = vpop.eup %3734  ;;  %3748 = vrcp.f32 %v1775_v31 }
 0x751   :  { %v1807_v60 = vmul.f32 %v3735_v6, %v4904_v50  ;;  %v3737_v17 = vpop.eup %3736 }
 0x752   :  { %v1777_v63 = vpop.xlane.xlu1 %1776  ;;  %v1808_v53 = vmul.f32 %v3737_v17, %v4906_v18 }
 0x753   :  { %3750 = vrcp.f32 %v1777_v63  ;;  %v1779_v26 = vpop.xlane.xlu0 %1778  ;;  %v1822_v30 = vpack.c.bf16 %v1807_v60, %v1806_v56 }
 0x754   :  { %v3739_v46 = vpop.eup %3738  ;;  %3752 = vrcp.f32 %v1779_v26 }
 0x755   :  { %3484 = vmatprep.mubr.bf16.mxu0 %v1822_v30  ;;  %v1809_v10 = vmul.f32 %v3739_v46, %v4912_v43  ;;  %v3741_v51 = vpop.eup %3740  ;;  %v3522_v30 = vpop.f32.mrf.mxu1 }
 0x756   :  { %v1781_v62 = vpop.xlane.xlu1 %1780  ;;  %v1810_v24 = vmul.f32 %v3741_v51, %v4914_v29 }
 0x757   :  { %3754 = vrcp.f32 %v1781_v62  ;;  %v1783_v0 = vpop.xlane.xlu0 %1782  ;;  %v1823_v19 = vpack.c.bf16 %v1809_v10, %v1808_v53  ;;  %v2126_v46 = vpop.f32.mrf.mxu1 }
 0x758   :  { %v3743_v39 = vpop.eup %3742  ;;  %3756 = vrcp.f32 %v1783_v0 }
 0x759   :  { %3485 = vmatmul.mubr.bf16.vlgmr.msra.gmra.mxu0 %v1823_v19  ;;  %v1811_v11 = vmul.f32 %v3743_v39, %v4920_v7  ;;  %v3745_v38 = vpop.eup %3744  ;;  %v3523_v53 = vpop.f32.mrf.mxu1 }
 0x75a   :  { %v1785_v27 = vpop.xlane.xlu1 %1784  ;;  %3501 = vmatpush3.bf16.msra.mxu0 %v1946_v2  ;;  %v1812_v1 = vmul.f32 %v3745_v38, %v4922_v8 }
 0x75b   :  { %3758 = vrcp.f32 %v1785_v27  ;;  %v1787_v50 = vpop.xlane.xlu0 %1786  ;;  %v1824_v18 = vpack.c.bf16 %v1811_v11, %v1810_v24  ;;  %v2129_v10 = vpop.f32.mrf.mxu1 }
 0x75c   :  { %v3747_v48 = vpop.eup %3746  ;;  %3760 = vrcp.f32 %v1787_v50 }
 0x75d   :  { %3488 = vmatprep.mubr.bf16.mxu0 %v1824_v18  ;;  %v1813_v22 = vmul.f32 %v3747_v48, %v4927_v41  ;;  %v3749_v54 = vpop.eup %3748  ;;  %v3526_v51 = vpop.f32.mrf.mxu1  ;;  %v3828_v18 = vld [vmem:[%s5555_s0 + $0x10] sm:$0xff] }
 0x75e   :  { %v1789_v28 = vpop.xlane.xlu1 %1788  ;;  %v1814_v29 = vmul.f32 %v3749_v54, %v4929_v3 }
 0x75f   :  { %3762 = vrcp.f32 %v1789_v28  ;;  %v1825_v25 = vpack.c.bf16 %v1813_v22, %v1812_v1  ;;  %v2142_v62 = vpop.f32.mrf.mxu1  ;;  %v3829_v1 = vld [vmem:[%s5555_s0] sm:$0xff] }
 0x760   :  { %v3751_v43 = vpop.eup %3750 }
 0x761   :  { %3489 = vmatmul.mubr.bf16.gmra.mxu0 %v1825_v25  ;;  %v1815_v42 = vmul.f32 %v3751_v43, %v4933_v35  ;;  %v3753_v59 = vpop.eup %3752  ;;  %v3527_v0 = vpop.f32.mrf.mxu1  ;;  %v4993_v25 = vld [vmem:[%s5562_s7] ss:$0 sm:$0xff] }
 0x762   :  { %v1816_v45 = vmul.f32 %v3753_v59, %v4935_v4  ;;  %v3830_v59 = vld [vmem:[%s5555_s0 + $0x18] sm:$0xff] }
 0x763   :  { %v1826_v5 = vpack.c.bf16 %v1815_v42, %v1814_v29  ;;  %v2145_v19 = vpop.f32.mrf.mxu1 }
 0x764   :  { %v3755_v44 = vpop.eup %3754 }
 0x765   :  { %3492 = vmatprep.mubr.bf16.mxu0 %v1826_v5  ;;  %v1817_v23 = vmul.f32 %v3755_v44, %v4939_v34  ;;  %v3757_v7 = vpop.eup %3756  ;;  %v3530_v11 = vpop.f32.mrf.mxu1 }
 0x766   :  { %v1818_v36 = vmul.f32 %v3757_v7, %v4941_v20 }
 0x767   :  { %v1827_v8 = vpack.c.bf16 %v1817_v23, %v1816_v45  ;;  %v2158_v28 = vpop.f32.mrf.mxu1  ;;  %v3831_v23 = vld [vmem:[%s5555_s0 + $0x8] sm:$0xff] }
 0x768   :  { %v3759_v33 = vpop.eup %3758 }
 0x769   :  { %3493 = vmatmul.mubr.bf16.gmra.mxu0 %v1827_v8  ;;  %v1819_v14 = vmul.f32 %v3759_v33, %v4945_v57  ;;  %v3761_v16 = vpop.eup %3760 }
 0x76a   :  { %v1820_v21 = vmul.f32 %v3761_v16, %v4947_v12 }
 0x76b   :  { %v1828_v41 = vpack.c.bf16 %v1819_v14, %v1818_v36  ;;  %v3531_v36 = vpop.f32.mrf.mxu1 }
 0x76c   :  { %v3763_v3 = vpop.eup %3762 }
 0x76d   :  { %3496 = vmatprep.mubr.bf16.mxu0 %v1828_v41  ;;  %v1821_v35 = vmul.f32 %v3763_v3, %v4951_v40 }
 0x76f   :  { %v1829_v13 = vpack.c.bf16 %v1821_v35, %v1820_v21  ;;  %v3832_v21 = vld [vmem:[%s5555_s0 + $0x30] sm:$0xff] }
 0x771   :  { %3497 = vmatmul.mubr.bf16.gmra.mxu0 %v1829_v13 }
 0x819   :  { %v3486_v4 = vpop.f32.mrf.mxu0 }
 0x81b   :  { %v1872_v34 = vpop.f32.mrf.mxu0 }
 0x81d   :  { %v3487_v61 = vpop.f32.mrf.mxu0 }
 0x81e   :  { %v1939_v47 = vpack.c.bf16 %v3487_v61, %v3486_v4  ;;  %v3833_v4 = vld [vmem:[%s5555_s0 + $0x20] sm:$0xff] }
 0x81f   :  { %v1875_v2 = vpop.f32.mrf.mxu0 }
 0x820   :  { %v1938_v52 = vpack.c.bf16 %v1875_v2, %v1872_v34 }
 0x821   :  { %v3490_v55 = vpop.f32.mrf.mxu0 }
 0x822   :  { %3502 = vmatprep.mubr.msk.bf16.mxu0 %vm734_vm1, %v1938_v52 }
 0x823   :  { %v1888_v20 = vpop.f32.mrf.mxu0  ;;  %3503 = vmatmul.mubr.msk.bf16.vlgmr.msra.gmra.mxu0 %vm734_vm1, %v1939_v47  ;;  %v2161_v47 = vpop.f32.mrf.mxu1 }
 0x825   :  { %v3491_v57 = vpop.f32.mrf.mxu0 }
 0x826   :  { %v1941_v12 = vpack.c.bf16 %v3491_v57, %v3490_v55 }
 0x827   :  { %v1891_v15 = vpop.f32.mrf.mxu0 }
 0x828   :  { %v1940_v9 = vpack.c.bf16 %v1891_v15, %v1888_v20 }
 0x829   :  { %v3494_v32 = vpop.f32.mrf.mxu0 }
 0x82a   :  { %3506 = vmatprep.mubr.msk.bf16.mxu0 %vm734_vm1, %v1940_v9 }
 0x82b   :  { %v1904_v40 = vpop.f32.mrf.mxu0  ;;  %3507 = vmatmul.mubr.msk.bf16.gmra.mxu0 %vm734_vm1, %v1941_v12 }
 0x82d   :  { %v3495_v49 = vpop.f32.mrf.mxu0 }
 0x82e   :  { %v1943_v31 = vpack.c.bf16 %v3495_v49, %v3494_v32  ;;  %v3834_v32 = vld [vmem:[%s5555_s0 + $0x38] sm:$0xff]  ;;  %v3835_v49 = vld [vmem:[%s5555_s0 + $0x28] sm:$0xff] }
 0x82f   :  { %v1907_v37 = vpop.f32.mrf.mxu0 }
 0x830   :  { %v1942_v58 = vpack.c.bf16 %v1907_v37, %v1904_v40 }
 0x831   :  { %v3498_v6 = vpop.f32.mrf.mxu0 }
 0x832   :  { %3510 = vmatprep.mubr.msk.bf16.mxu0 %vm734_vm1, %v1942_v58 }
 0x833   :  { %v1920_v56 = vpop.f32.mrf.mxu0  ;;  %3511 = vmatmul.mubr.msk.bf16.gmra.mxu0 %vm734_vm1, %v1943_v31 }
 0x835   :  { %v3499_v60 = vpop.f32.mrf.mxu0 }
 0x836   :  { %v1945_v26 = vpack.c.bf16 %v3499_v60, %v3498_v6  ;;  %v3534_v6 = vpop.f32.mrf.mxu1 }
 0x837   :  { %v1923_v17 = vpop.f32.mrf.mxu0 }
 0x838   :  { %v1944_v63 = vpack.c.bf16 %v1923_v17, %v1920_v56 }
 0x83a   :  { %3514 = vmatprep.mubr.msk.bf16.mxu0 %vm734_vm1, %v1944_v63  ;;  %v3836_v63 = vld [vmem:[%s5555_s0 + $0x50] sm:$0xff] }
 0x83b   :  { %3515 = vmatmul.mubr.msk.bf16.gmra.mxu0 %vm734_vm1, %v1945_v26 }
 0x8e3   :  { %v3504_v39 = vpop.f32.mrf.mxu0 }
 0x8e4   :  { %v2135_v24 = vadd.f32 %v3522_v30, %v3504_v39 }
 0x8e5   :  { %v2005_v38 = vpop.f32.mrf.mxu0 }
 0x8e6   :  { %v2127_v27 = vadd.f32 %v2126_v46, %v2005_v38  ;;  %v2191_v48 = vadd.f32 %v3828_v18, %v2135_v24 }
 0x8e7   :  { %v3505_v50 = vpop.f32.mrf.mxu0 }
 0x8e8   :  { %v2189_v22 = vadd.f32 %v3829_v1, %v2127_v27  ;;  %v2138_v54 = vadd.f32 %v3523_v53, %v3505_v50  ;;  %v5002_v45 = vadd.f32 %v4993_v25, %v2191_v48  ;;  %v3838_v27 = vld [vmem:[%s5555_s0 + $0x58] sm:$0xff]  ;;  %v3839_v48 = vld [vmem:[%s5555_s0 + $0x48] sm:$0xff] }
 0x8e9   :  { %v2008_v43 = vpop.f32.mrf.mxu0 }
 0x8ea   :  { %v4996_v29 = vadd.f32 %v4993_v25, %v2189_v22  ;;  %v2130_v42 = vadd.f32 %v2129_v10, %v2008_v43  ;;  %v2192_v5 = vadd.f32 %v3830_v59, %v2138_v54  ;;  %v2234_v2 = vsel %vm64_vm0, %v5002_v45, 0.0  ;;  %v3837_v10 = vld [vmem:[%s5555_s0 + $0x40] sm:$0xff] }
 0x8eb   :  { %v3508_v44 = vpop.f32.mrf.mxu0 }
 0x8ec   :  { %v2190_v7 = vadd.f32 %v3831_v23, %v2130_v42  ;;  %v2151_v8 = vadd.f32 %v3526_v51, %v3508_v44  ;;  %v2228_v33 = vsel %vm64_vm0, %v4996_v29, 0.0  ;;  %v5013_v3 = vadd.f32 %v4993_v25, %v2192_v5 }
 0x8ed   :  { %2229 = vadd.xlane.f32.xlu0 %v2228_v33  ;;  %v2021_v14 = vpop.f32.mrf.mxu0 }
 0x8ee   :  { %v5010_v16 = vadd.f32 %v4993_v25, %v2190_v7  ;;  %v2143_v41 = vadd.f32 %v2142_v62, %v2021_v14  ;;  %v2195_v35 = vadd.f32 %v3832_v21, %v2151_v8  ;;  %v2237_v12 = vsel %vm64_vm0, %v5013_v3, 0.0  ;;  %v3840_v8 = vld [vmem:[%s5555_s0 + $0x70] sm:$0xff] }
 0x8ef   :  { %v3509_v13 = vpop.f32.mrf.mxu0 }
 0x8f0   :  { %v2193_v34 = vadd.f32 %v3833_v4, %v2143_v41  ;;  %v2154_v61 = vadd.f32 %v3527_v0, %v3509_v13  ;;  %v2231_v52 = vsel %vm64_vm0, %v5010_v16, 0.0  ;;  %v5029_v15 = vadd.f32 %v4993_v25, %v2195_v35 }
 0x8f1   :  { %2235 = vadd.xlane.f32.xlu0 %v2234_v2  ;;  %2232 = vadd.xlane.f32.xlu1 %v2231_v52  ;;  %v2024_v55 = vpop.f32.mrf.mxu0  ;;  %v3842_v52 = vld [vmem:[%s5555_s0 + $0x78] sm:$0xff] }
 0x8f2   :  { %v5026_v20 = vadd.f32 %v4993_v25, %v2193_v34  ;;  %v2146_v57 = vadd.f32 %v2145_v19, %v2024_v55  ;;  %v2196_v40 = vadd.f32 %v3834_v32, %v2154_v61  ;;  %v2246_v46 = vsel %vm64_vm0, %v5029_v15, 0.0  ;;  %v2174_v19 = vpop.f32.mrf.mxu1  ;;  %v3843_v55 = vld [vmem:[%s5555_s0 + $0x68] sm:$0xff] }
 0x8f3   :  { %v3512_v9 = vpop.f32.mrf.mxu0 }
 0x8f4   :  { %v2194_v37 = vadd.f32 %v3835_v49, %v2146_v57  ;;  %v2167_v58 = vadd.f32 %v3530_v11, %v3512_v9  ;;  %v2240_v31 = vsel %vm64_vm0, %v5026_v20, 0.0  ;;  %v5050_v53 = vadd.f32 %v4993_v25, %v2196_v40  ;;  %v3535_v43 = vpop.f32.mrf.mxu1 }
 0x8f5   :  { %2238 = vadd.xlane.f32.xlu1 %v2237_v12  ;;  %2241 = vadd.xlane.f32.xlu0 %v2240_v31  ;;  %v2037_v56 = vpop.f32.mrf.mxu0 }
 0x8f6   :  { %v5042_v60 = vadd.f32 %v4993_v25, %v2194_v37  ;;  %v2159_v17 = vadd.f32 %v2158_v28, %v2037_v56  ;;  %v2199_v26 = vadd.f32 %v3836_v63, %v2167_v58  ;;  %v2249_v54 = vsel %vm64_vm0, %v5050_v53, 0.0  ;;  %v2177_v35 = vpop.f32.mrf.mxu1 }
 0x8f7   :  { %v3513_v30 = vpop.f32.mrf.mxu0 }
 0x8f8   :  { %v2197_v51 = vadd.f32 %v3837_v10, %v2159_v17  ;;  %v2170_v62 = vadd.f32 %v3531_v36, %v3513_v30  ;;  %v2243_v0 = vsel %vm64_vm0, %v5042_v60, 0.0  ;;  %v5061_v38 = vadd.f32 %v4993_v25, %v2199_v26  ;;  %v3841_v36 = vld [vmem:[%s5555_s0 + $0x60] sm:$0xff] }
 0x8f9   :  { %2247 = vadd.xlane.f32.xlu0 %v2246_v46  ;;  %2244 = vadd.xlane.f32.xlu1 %v2243_v0  ;;  %v2040_v39 = vpop.f32.mrf.mxu0 }
 0x8fa   :  { %v5058_v24 = vadd.f32 %v4993_v25, %v2197_v51  ;;  %v2162_v11 = vadd.f32 %v2161_v47, %v2040_v39  ;;  %v2200_v50 = vadd.f32 %v3838_v27, %v2170_v62  ;;  %v2258_v7 = vsel %vm64_vm0, %v5061_v38, 0.0 }
 0x8fb   :  { %v3516_v18 = vpop.f32.mrf.mxu0 }
 0x8fc   :  { %v2198_v1 = vadd.f32 %v3839_v48, %v2162_v11  ;;  %v2183_v22 = vadd.f32 %v3534_v6, %v3516_v18  ;;  %v2252_v28 = vsel %vm64_vm0, %v5058_v24, 0.0  ;;  %v5077_v44 = vadd.f32 %v4993_v25, %v2200_v50 }
 0x8fd   :  { %2250 = vadd.xlane.f32.xlu1 %v2249_v54  ;;  %2253 = vadd.xlane.f32.xlu0 %v2252_v28  ;;  %v2053_v42 = vpop.f32.mrf.mxu0 }
 0x8fe   :  { %v5074_v59 = vadd.f32 %v4993_v25, %v2198_v1  ;;  %v2175_v5 = vadd.f32 %v2174_v19, %v2053_v42  ;;  %v2203_v33 = vadd.f32 %v3840_v8, %v2183_v22  ;;  %v2261_v61 = vsel %vm64_vm0, %v5077_v44, 0.0 }
 0x8ff   :  { %v3517_v23 = vpop.f32.mrf.mxu0 }
 0x900   :  { %v2201_v14 = vadd.f32 %v3841_v36, %v2175_v5  ;;  %v2186_v41 = vadd.f32 %v3535_v43, %v3517_v23  ;;  %v2255_v21 = vsel %vm64_vm0, %v5074_v59, 0.0  ;;  %v5095_v2 = vadd.f32 %v4993_v25, %v2203_v33 }
 0x901   :  { %2259 = vadd.xlane.f32.xlu0 %v2258_v7  ;;  %2256 = vadd.xlane.f32.xlu1 %v2255_v21  ;;  %v2056_v13 = vpop.f32.mrf.mxu0 }
 0x902   :  { %v5090_v4 = vadd.f32 %v4993_v25, %v2201_v14  ;;  %v2178_v34 = vadd.f32 %v2177_v35, %v2056_v13  ;;  %v2204_v47 = vadd.f32 %v3842_v52, %v2186_v41  ;;  %v2270_v49 = vsel %vm64_vm0, %v5095_v2, 0.0 }
 0x904   :  { %v2202_v57 = vadd.f32 %v3843_v55, %v2178_v34  ;;  %v2264_v9 = vsel %vm64_vm0, %v5090_v4, 0.0  ;;  %v5109_v32 = vadd.f32 %v4993_v25, %v2204_v47 }
 0x905   :  { %2262 = vadd.xlane.f32.xlu1 %v2261_v61  ;;  %2265 = vadd.xlane.f32.xlu0 %v2264_v9 }
 0x906   :  { %v5106_v12 = vadd.f32 %v4993_v25, %v2202_v57  ;;  %v2273_v37 = vsel %vm64_vm0, %v5109_v32, 0.0 }
 0x908   :  { %v2267_v40 = vsel %vm64_vm0, %v5106_v12, 0.0 }
 0x909   :  { %2268 = vadd.xlane.f32.xlu1 %v2267_v40  ;;  %2271 = vadd.xlane.f32.xlu0 %v2270_v49 }
 0x90d   :  { %2274 = vadd.xlane.f32.xlu1 %v2273_v37 }
 0x976   :  { %v2230_v58 = vpop.xlane.xlu0 %2229 }
 0x977   :  { %v2276_v31 = vmul.f32 0.03125, %v2230_v58 }
 0x979   :  { %v5118_v6 = vsub.f32 %v4996_v29, %v2276_v31 }
 0x97a   :  { %v2236_v56 = vpop.xlane.xlu0 %2235  ;;  %v2233_v25 = vpop.xlane.xlu1 %2232 }
 0x97b   :  { %v2278_v17 = vmul.f32 0.03125, %v2236_v56  ;;  %v2277_v63 = vmul.f32 0.03125, %v2233_v25  ;;  %v2308_v26 = vmul.f32 %v5118_v6, %v5118_v6  ;;  %v2484_v25 = vld [vmem:[%s5563_s10 + $0x10] sm:$0xff] }
 0x97d   :  { %v5123_v30 = vsub.f32 %v5002_v45, %v2278_v17  ;;  %v5126_v46 = vsub.f32 %v5010_v16, %v2277_v63  ;;  %v2324_v10 = vsel %vm64_vm0, %v2308_v26, 0.0  ;;  %v2485_v17 = vld [vmem:[%s5563_s10 + $0x18] sm:$0xff] }
 0x97e   :  { %v2239_v51 = vpop.xlane.xlu1 %2238  ;;  %v2242_v62 = vpop.xlane.xlu0 %2241  ;;  %2325 = vadd.xlane.f32.xlu0 %v2324_v10  ;;  %v2495_v10 = vpack.c.bf16 %v2485_v17, %v2484_v25 }
 0x97f   :  { %v2279_v0 = vmul.f32 0.03125, %v2239_v51  ;;  %v2280_v19 = vmul.f32 0.03125, %v2242_v62  ;;  %v2309_v39 = vmul.f32 %v5126_v46, %v5126_v46  ;;  %v2310_v11 = vmul.f32 %v5123_v30, %v5123_v30 }
 0x980   :  { %3536 = vmatprep.subr.bf16.mxu0 %v2495_v10 }
 0x981   :  { %v5134_v27 = vsub.f32 %v5013_v3, %v2279_v0  ;;  %v5137_v50 = vsub.f32 %v5026_v20, %v2280_v19  ;;  %v2327_v18 = vsel %vm64_vm0, %v2309_v39, 0.0  ;;  %v2330_v48 = vsel %vm64_vm0, %v2310_v11, 0.0  ;;  %3537 = vmatpush3.bf16.msra.mxu0 %v2495_v10 }
 0x982   :  { %v2248_v1 = vpop.xlane.xlu0 %2247  ;;  %v2245_v22 = vpop.xlane.xlu1 %2244  ;;  %2328 = vadd.xlane.f32.xlu1 %v2327_v18  ;;  %2331 = vadd.xlane.f32.xlu0 %v2330_v48 }
 0x983   :  { %v2282_v54 = vmul.f32 0.03125, %v2248_v1  ;;  %v2281_v28 = vmul.f32 0.03125, %v2245_v22  ;;  %v2311_v43 = vmul.f32 %v5134_v27, %v5134_v27  ;;  %v2312_v42 = vmul.f32 %v5137_v50, %v5137_v50 }
 0x985   :  { %v5146_v5 = vsub.f32 %v5029_v15, %v2282_v54  ;;  %v5149_v23 = vsub.f32 %v5042_v60, %v2281_v28  ;;  %v2333_v7 = vsel %vm64_vm0, %v2311_v43, 0.0  ;;  %v2336_v8 = vsel %vm64_vm0, %v2312_v42, 0.0 }
 0x986   :  { %v2251_v33 = vpop.xlane.xlu1 %2250  ;;  %v2254_v36 = vpop.xlane.xlu0 %2253  ;;  %2334 = vadd.xlane.f32.xlu1 %v2333_v7  ;;  %2337 = vadd.xlane.f32.xlu0 %v2336_v8 }
 0x987   :  { %v2283_v14 = vmul.f32 0.03125, %v2251_v33  ;;  %v2284_v41 = vmul.f32 0.03125, %v2254_v36  ;;  %v2313_v21 = vmul.f32 %v5149_v23, %v5149_v23  ;;  %v2314_v35 = vmul.f32 %v5146_v5, %v5146_v5 }
 0x989   :  { %v5158_v13 = vsub.f32 %v5050_v53, %v2283_v14  ;;  %v5161_v34 = vsub.f32 %v5058_v24, %v2284_v41  ;;  %v2339_v61 = vsel %vm64_vm0, %v2313_v21, 0.0  ;;  %v2342_v52 = vsel %vm64_vm0, %v2314_v35, 0.0 }
 0x98a   :  { %v2260_v47 = vpop.xlane.xlu0 %2259  ;;  %v2257_v55 = vpop.xlane.xlu1 %2256  ;;  %2340 = vadd.xlane.f32.xlu1 %v2339_v61  ;;  %2343 = vadd.xlane.f32.xlu0 %v2342_v52 }
 0x98b   :  { %v2286_v57 = vmul.f32 0.03125, %v2260_v47  ;;  %v2285_v9 = vmul.f32 0.03125, %v2257_v55  ;;  %v2315_v40 = vmul.f32 %v5158_v13, %v5158_v13  ;;  %v2316_v49 = vmul.f32 %v5161_v34, %v5161_v34 }
 0x98d   :  { %v5170_v37 = vsub.f32 %v5061_v38, %v2286_v57  ;;  %v5173_v58 = vsub.f32 %v5074_v59, %v2285_v9  ;;  %v2345_v31 = vsel %vm64_vm0, %v2315_v40, 0.0  ;;  %v2348_v56 = vsel %vm64_vm0, %v2316_v49, 0.0  ;;  %v2482_v9 = vld [vmem:[%s5563_s10] sm:$0xff]  ;;  %v2483_v40 = vld [vmem:[%s5563_s10 + $0x8] sm:$0xff] }
 0x98e   :  { %v2263_v63 = vpop.xlane.xlu1 %2262  ;;  %2346 = vadd.xlane.f32.xlu1 %v2345_v31  ;;  %2349 = vadd.xlane.f32.xlu0 %v2348_v56  ;;  %v2266_v26 = vpop.xlane.xlu0 %2265  ;;  %v2494_v49 = vpack.c.bf16 %v2483_v40, %v2482_v9 }
 0x98f   :  { %v2287_v51 = vmul.f32 0.03125, %v2263_v63  ;;  %v2288_v62 = vmul.f32 0.03125, %v2266_v26  ;;  %v2317_v0 = vmul.f32 %v5173_v58, %v5173_v58  ;;  %v2318_v19 = vmul.f32 %v5170_v37, %v5170_v37 }
 0x990   :  { %3538 = vmatprep.subr.bf16.mxu0 %v2494_v49 }
 0x991   :  { %v5188_v39 = vsub.f32 %v5077_v44, %v2287_v51  ;;  %v5191_v11 = vsub.f32 %v5090_v4, %v2288_v62  ;;  %v2351_v18 = vsel %vm64_vm0, %v2317_v0, 0.0  ;;  %v2354_v48 = vsel %vm64_vm0, %v2318_v19, 0.0  ;;  %3539 = vmatpush3.bf16.msra.mxu0 %v2494_v49  ;;  %v5229_v49 = vld [vmem:[%s5564_s8] ss:$0 sm:$0xff] }
 0x992   :  { %2352 = vadd.xlane.f32.xlu1 %v2351_v18  ;;  %v2269_v1 = vpop.xlane.xlu1 %2268  ;;  %2355 = vadd.xlane.f32.xlu0 %v2354_v48  ;;  %v2272_v22 = vpop.xlane.xlu0 %2271 }
 0x993   :  { %v2289_v54 = vmul.f32 0.03125, %v2269_v1  ;;  %v2290_v28 = vmul.f32 0.03125, %v2272_v22  ;;  %v2319_v43 = vmul.f32 %v5188_v39, %v5188_v39  ;;  %v2320_v42 = vmul.f32 %v5191_v11, %v5191_v11 }
 0x995   :  { %v5200_v7 = vsub.f32 %v5106_v12, %v2289_v54  ;;  %v5203_v8 = vsub.f32 %v5095_v2, %v2290_v28  ;;  %v2357_v33 = vsel %vm64_vm0, %v2319_v43, 0.0  ;;  %v2360_v36 = vsel %vm64_vm0, %v2320_v42, 0.0 }
 0x996   :  { %2358 = vadd.xlane.f32.xlu1 %v2357_v33  ;;  %v2275_v14 = vpop.xlane.xlu1 %2274  ;;  %2361 = vadd.xlane.f32.xlu0 %v2360_v36 }
 0x997   :  { %v2291_v41 = vmul.f32 0.03125, %v2275_v14  ;;  %v2321_v21 = vmul.f32 %v5200_v7, %v5200_v7  ;;  %v2322_v35 = vmul.f32 %v5203_v8, %v5203_v8 }
 0x999   :  { %v5212_v61 = vsub.f32 %v5109_v32, %v2291_v41  ;;  %v2363_v52 = vsel %vm64_vm0, %v2321_v21, 0.0  ;;  %v2366_v47 = vsel %vm64_vm0, %v2322_v35, 0.0 }
 0x99a   :  { %2364 = vadd.xlane.f32.xlu1 %v2363_v52  ;;  %2367 = vadd.xlane.f32.xlu0 %v2366_v47 }
 0x99b   :  { %v2323_v55 = vmul.f32 %v5212_v61, %v5212_v61 }
 0x99d   :  { %v2369_v57 = vsel %vm64_vm0, %v2323_v55, 0.0 }
 0x99e   :  { %2370 = vadd.xlane.f32.xlu1 %v2369_v57 }
 0xa07   :  { %v2326_v31 = vpop.xlane.xlu0 %2325 }
 0xa08   :  { %v2372_v56 = vmul.f32 0.03125, %v2326_v31 }
 0xa0a   :  { %v2388_v25 = vadd.f32 1e-05, %v2372_v56 }
 0xa0b   :  { %v2329_v17 = vpop.xlane.xlu1 %2328  ;;  %v2332_v63 = vpop.xlane.xlu0 %2331 }
 0xa0c   :  { %3764 = vrsqrt.f32 %v2388_v25  ;;  %v2373_v26 = vmul.f32 0.03125, %v2329_v17  ;;  %v2374_v10 = vmul.f32 0.03125, %v2332_v63 }
 0xa0e   :  { %v2389_v51 = vadd.f32 1e-05, %v2373_v26  ;;  %v2390_v62 = vadd.f32 1e-05, %v2374_v10 }
 0xa0f   :  { %v2335_v0 = vpop.xlane.xlu1 %2334  ;;  %v2338_v19 = vpop.xlane.xlu0 %2337 }
 0xa10   :  { %3766 = vrsqrt.f32 %v2389_v51  ;;  %v2375_v18 = vmul.f32 0.03125, %v2335_v0  ;;  %v2376_v48 = vmul.f32 0.03125, %v2338_v19  ;;  %v5237_v19 = vld [vmem:[%s5565_s9] ss:$0 sm:$0xff] }
 0xa11   :  { %3768 = vrsqrt.f32 %v2390_v62 }
 0xa12   :  { %v2391_v1 = vadd.f32 1e-05, %v2375_v18  ;;  %v2392_v22 = vadd.f32 1e-05, %v2376_v48 }
 0xa13   :  { %v2341_v54 = vpop.xlane.xlu1 %2340  ;;  %v2344_v28 = vpop.xlane.xlu0 %2343 }
 0xa14   :  { %3770 = vrsqrt.f32 %v2391_v1  ;;  %v2377_v43 = vmul.f32 0.03125, %v2341_v54  ;;  %v2378_v42 = vmul.f32 0.03125, %v2344_v28 }
 0xa15   :  { %3772 = vrsqrt.f32 %v2392_v22 }
 0xa16   :  { %v2393_v33 = vadd.f32 1e-05, %v2377_v43  ;;  %v2394_v36 = vadd.f32 1e-05, %v2378_v42 }
 0xa17   :  { %v2347_v14 = vpop.xlane.xlu1 %2346  ;;  %v2350_v41 = vpop.xlane.xlu0 %2349 }
 0xa18   :  { %3774 = vrsqrt.f32 %v2393_v33  ;;  %v2379_v21 = vmul.f32 0.03125, %v2347_v14  ;;  %v2380_v35 = vmul.f32 0.03125, %v2350_v41 }
 0xa19   :  { %v3765_v52 = vpop.eup %3764  ;;  %3776 = vrsqrt.f32 %v2394_v36 }
 0xa1a   :  { %v2395_v47 = vadd.f32 1e-05, %v2379_v21  ;;  %v2396_v55 = vadd.f32 1e-05, %v2380_v35  ;;  %v2420_v40 = vmul.f32 %v3765_v52, %v5118_v6 }
 0xa1b   :  { %v2353_v57 = vpop.xlane.xlu1 %2352  ;;  %v2356_v9 = vpop.xlane.xlu0 %2355 }
 0xa1c   :  { %3778 = vrsqrt.f32 %v2395_v47  ;;  %v2381_v31 = vmul.f32 0.03125, %v2353_v57  ;;  %v2382_v56 = vmul.f32 0.03125, %v2356_v9  ;;  %v2443_v6 = vmul.f32 %v5229_v49, %v2420_v40 }
 0xa1d   :  { %v3767_v25 = vpop.eup %3766  ;;  %3780 = vrsqrt.f32 %v2396_v55 }
 0xa1e   :  { %v3769_v17 = vpop.eup %3768  ;;  %v2397_v63 = vadd.f32 1e-05, %v2381_v31  ;;  %v2398_v26 = vadd.f32 1e-05, %v2382_v56  ;;  %v2421_v10 = vmul.f32 %v3767_v25, %v5126_v46  ;;  %v2466_v14 = vadd.f32 %v5237_v19, %v2443_v6 }
 0xa1f   :  { %v2422_v51 = vmul.f32 %v3769_v17, %v5123_v30  ;;  %v2359_v62 = vpop.xlane.xlu1 %2358  ;;  %v2362_v0 = vpop.xlane.xlu0 %2361 }
 0xa20   :  { %3782 = vrsqrt.f32 %v2397_v63  ;;  %v2383_v18 = vmul.f32 0.03125, %v2359_v62  ;;  %v2384_v48 = vmul.f32 0.03125, %v2362_v0  ;;  %v2444_v1 = vmul.f32 %v5229_v49, %v2421_v10 }
 0xa21   :  { %v3771_v22 = vpop.eup %3770  ;;  %v2445_v54 = vmul.f32 %v5229_v49, %v2422_v51  ;;  %3784 = vrsqrt.f32 %v2398_v26 }
 0xa22   :  { %v3773_v46 = vpop.eup %3772  ;;  %v2423_v30 = vmul.f32 %v3771_v22, %v5134_v27  ;;  %v2399_v28 = vadd.f32 1e-05, %v2383_v18  ;;  %v2400_v43 = vadd.f32 1e-05, %v2384_v48  ;;  %v2467_v42 = vadd.f32 %v5237_v19, %v2444_v1 }
 0xa23   :  { %v2365_v33 = vpop.xlane.xlu1 %2364  ;;  %v2368_v36 = vpop.xlane.xlu0 %2367  ;;  %v2424_v41 = vmul.f32 %v3773_v46, %v5137_v50  ;;  %v2468_v55 = vadd.f32 %v5237_v19, %v2445_v54 }
 0xa24   :  { %v2446_v21 = vmul.f32 %v5229_v49, %v2423_v30  ;;  %3786 = vrsqrt.f32 %v2399_v28  ;;  %v2385_v35 = vmul.f32 0.03125, %v2365_v33  ;;  %v2386_v52 = vmul.f32 0.03125, %v2368_v36 }
 0xa25   :  { %v3775_v47 = vpop.eup %3774  ;;  %3788 = vrsqrt.f32 %v2400_v43  ;;  %v2486_v27 = vpack.c.bf16 %v2467_v42, %v2466_v14  ;;  %v2447_v57 = vmul.f32 %v5229_v49, %v2424_v41 }
 0xa26   :  { %v3777_v9 = vpop.eup %3776  ;;  %v2469_v40 = vadd.f32 %v5237_v19, %v2446_v21  ;;  %v2401_v31 = vadd.f32 1e-05, %v2385_v35  ;;  %v2402_v56 = vadd.f32 1e-05, %v2386_v52  ;;  %v2425_v25 = vmul.f32 %v3775_v47, %v5149_v23 }
 0xa27   :  { %v2426_v50 = vmul.f32 %v3777_v9, %v5146_v5  ;;  %3540 = vmatprep.mubr.msk.bf16.mxu0 %vm64_vm0, %v2486_v27  ;;  %v2371_v17 = vpop.xlane.xlu1 %2370  ;;  %v2470_v62 = vadd.f32 %v5237_v19, %v2447_v57 }
 0xa28   :  { %v2487_v63 = vpack.c.bf16 %v2469_v40, %v2468_v55  ;;  %3790 = vrsqrt.f32 %v2401_v31  ;;  %v2387_v26 = vmul.f32 0.03125, %v2371_v17  ;;  %v2448_v10 = vmul.f32 %v5229_v49, %v2425_v25 }
 0xa29   :  { %v3779_v51 = vpop.eup %3778  ;;  %3792 = vrsqrt.f32 %v2402_v56  ;;  %v2449_v23 = vmul.f32 %v5229_v49, %v2426_v50 }
 0xa2a   :  { %v3781_v0 = vpop.eup %3780  ;;  %v2427_v6 = vmul.f32 %v3779_v51, %v5158_v13  ;;  %v2403_v18 = vadd.f32 1e-05, %v2387_v26  ;;  %3541 = vmatmul.mubr.msk.bf16.vlgmr.msra.gmra.mxu0 %vm64_vm0, %v2487_v63  ;;  %v2471_v5 = vadd.f32 %v5237_v19, %v2448_v10 }
 0xa2b   :  { %v2428_v48 = vmul.f32 %v3781_v0, %v5161_v34  ;;  %v2472_v30 = vadd.f32 %v5237_v19, %v2449_v23  ;;  %v2783_v0 = vld [vmem:[%s5566_s12 + $0x78] sm:$0xff] }
 0xa2c   :  { %3794 = vrsqrt.f32 %v2403_v18  ;;  %v2488_v1 = vpack.c.bf16 %v2471_v5, %v2470_v62  ;;  %v2450_v22 = vmul.f32 %v5229_v49, %v2427_v6  ;;  %v2778_v5 = vld [vmem:[%s5566_s12 + $0x50] sm:$0xff]  ;;  %v2779_v23 = vld [vmem:[%s5566_s12 + $0x58] sm:$0xff] }
 0xa2d   :  { %v3783_v54 = vpop.eup %3782  ;;  %v2451_v43 = vmul.f32 %v5229_v49, %v2428_v48  ;;  %v2797_v48 = vpack.c.bf16 %v2779_v23, %v2778_v5 }
 0xa2e   :  { %v3785_v46 = vpop.eup %3784  ;;  %3544 = vmatprep.mubr.msk.bf16.mxu0 %vm64_vm0, %v2488_v1  ;;  %v2473_v13 = vadd.f32 %v5237_v19, %v2450_v22  ;;  %v2429_v28 = vmul.f32 %v3783_v54, %v5173_v58  ;;  %v2776_v1 = vld [vmem:[%s5566_s12 + $0x40] sm:$0xff]  ;;  %v2777_v22 = vld [vmem:[%s5566_s12 + $0x48] sm:$0xff] }
 0xa2f   :  { %v2430_v42 = vmul.f32 %v3785_v46, %v5170_v37  ;;  %v2474_v21 = vadd.f32 %v5237_v19, %v2451_v43  ;;  %v2796_v54 = vpack.c.bf16 %v2777_v22, %v2776_v1  ;;  %v2774_v46 = vld [vmem:[%s5566_s12 + $0x30] sm:$0xff]  ;;  %v2773_v43 = vld [vmem:[%s5566_s12 + $0x28] sm:$0xff] }
 0xa30   :  { %v2489_v33 = vpack.c.bf16 %v2473_v13, %v2472_v30  ;;  %v2452_v34 = vmul.f32 %v5229_v49, %v2429_v28  ;;  %v2775_v30 = vld [vmem:[%s5566_s12 + $0x38] sm:$0xff]  ;;  %v2772_v28 = vld [vmem:[%s5566_s12 + $0x20] sm:$0xff] }
 0xa31   :  { %v3787_v36 = vpop.eup %3786  ;;  %v2453_v52 = vmul.f32 %v5229_v49, %v2430_v42  ;;  %v2795_v13 = vpack.c.bf16 %v2775_v30, %v2774_v46  ;;  %v2794_v42 = vpack.c.bf16 %v2773_v43, %v2772_v28 }
 0xa32   :  { %v3789_v14 = vpop.eup %3788  ;;  %v2431_v41 = vmul.f32 %v3787_v36, %v5188_v39  ;;  %3545 = vmatmul.mubr.msk.bf16.gmra.mxu0 %vm64_vm0, %v2489_v33  ;;  %v2475_v35 = vadd.f32 %v5237_v19, %v2452_v34  ;;  %v2770_v33 = vld [vmem:[%s5566_s12 + $0x10] sm:$0xff]  ;;  %v2771_v34 = vld [vmem:[%s5566_s12 + $0x18] sm:$0xff] }
 0xa33   :  { %v2432_v58 = vmul.f32 %v3789_v14, %v5191_v11  ;;  %v2476_v57 = vadd.f32 %v5237_v19, %v2453_v52  ;;  %v2793_v36 = vpack.c.bf16 %v2771_v34, %v2770_v33  ;;  %v2768_v14 = vld [vmem:[%s5566_s12] sm:$0xff] }
 0xa34   :  { %v2490_v47 = vpack.c.bf16 %v2475_v35, %v2474_v21  ;;  %v2454_v37 = vmul.f32 %v5229_v49, %v2431_v41  ;;  %v2769_v41 = vld [vmem:[%s5566_s12 + $0x8] sm:$0xff]  ;;  %v5342_v35 = vld [vmem:[%s5567_s11] ss:$0 sm:$0xff] }
 0xa35   :  { %v3791_v55 = vpop.eup %3790  ;;  %v2455_v40 = vmul.f32 %v5229_v49, %v2432_v58  ;;  %v2792_v21 = vpack.c.bf16 %v2769_v41, %v2768_v14 }
 0xa36   :  { %v3793_v27 = vpop.eup %3792  ;;  %3548 = vmatprep.mubr.msk.bf16.mxu0 %vm64_vm0, %v2490_v47  ;;  %v2477_v39 = vadd.f32 %v5237_v19, %v2454_v37  ;;  %v2433_v9 = vmul.f32 %v3791_v55, %v5200_v7 }
 0xa37   :  { %v2434_v31 = vmul.f32 %v3793_v27, %v5203_v8  ;;  %v2478_v17 = vadd.f32 %v5237_v19, %v2455_v40 }
 0xa38   :  { %v2491_v56 = vpack.c.bf16 %v2477_v39, %v2476_v57  ;;  %v2456_v11 = vmul.f32 %v5229_v49, %v2433_v9 }
 0xa39   :  { %v3795_v25 = vpop.eup %3794  ;;  %v2457_v26 = vmul.f32 %v5229_v49, %v2434_v31 }
 0xa3a   :  { %v2435_v50 = vmul.f32 %v3795_v25, %v5212_v61  ;;  %3549 = vmatmul.mubr.msk.bf16.gmra.mxu0 %vm64_vm0, %v2491_v56  ;;  %v2479_v63 = vadd.f32 %v5237_v19, %v2456_v11  ;;  %v2782_v61 = vld [vmem:[%s5566_s12 + $0x70] sm:$0xff] }
 0xa3b   :  { %v2480_v8 = vadd.f32 %v5237_v19, %v2457_v26  ;;  %v2799_v6 = vpack.c.bf16 %v2783_v0, %v2782_v61 }
 0xa3c   :  { %v2492_v10 = vpack.c.bf16 %v2479_v63, %v2478_v17  ;;  %v2458_v7 = vmul.f32 %v5229_v49, %v2435_v50  ;;  %v2780_v49 = vld [vmem:[%s5566_s12 + $0x60] sm:$0xff] }
 0xa3d   :  { %3556 = vmatprep.subr.bf16.mxu1 %v2799_v6 }
 0xa3e   :  { %3552 = vmatprep.mubr.msk.bf16.mxu0 %vm64_vm0, %v2492_v10  ;;  %v2481_v51 = vadd.f32 %v5237_v19, %v2458_v7  ;;  %3557 = vmatpush3.bf16.msra.mxu1 %v2799_v6  ;;  %v2781_v19 = vld [vmem:[%s5566_s12 + $0x68] sm:$0xff] }
 0xa3f   :  { %v2798_v18 = vpack.c.bf16 %v2781_v19, %v2780_v49 }
 0xa40   :  { %v2493_v62 = vpack.c.bf16 %v2481_v51, %v2480_v8 }
 0xa41   :  { %3558 = vmatprep.subr.bf16.mxu1 %v2798_v18 }
 0xa42   :  { %3553 = vmatmul.mubr.msk.bf16.gmra.mxu0 %vm64_vm0, %v2493_v62  ;;  %3559 = vmatpush3.bf16.msra.mxu1 %v2798_v18 }
 0xa43   :  { %3560 = vmatprep.subr.bf16.mxu1 %v2797_v48 }
 0xa46   :  { %3561 = vmatpush3.bf16.msra.mxu1 %v2797_v48 }
 0xa47   :  { %3562 = vmatprep.subr.bf16.mxu1 %v2796_v54 }
 0xa4a   :  { %3563 = vmatpush3.bf16.msra.mxu1 %v2796_v54 }
 0xa4b   :  { %3564 = vmatprep.subr.bf16.mxu1 %v2795_v13 }
 0xa4e   :  { %3565 = vmatpush3.bf16.msra.mxu1 %v2795_v13 }
 0xa4f   :  { %3566 = vmatprep.subr.bf16.mxu1 %v2794_v42 }
 0xa52   :  { %3567 = vmatpush3.bf16.msra.mxu1 %v2794_v42 }
 0xa53   :  { %3568 = vmatprep.subr.bf16.mxu1 %v2793_v36 }
 0xa56   :  { %3569 = vmatpush3.bf16.msra.mxu1 %v2793_v36 }
 0xa57   :  { %3570 = vmatprep.subr.bf16.mxu1 %v2792_v21 }
 0xa5a   :  { %3571 = vmatpush3.bf16.msra.mxu1 %v2792_v21 }
 0xaea   :  { %v3542_v52 = vpop.f32.mrf.mxu0 }
 0xaeb   :  { %v5345_v58 = vadd.f32 %v3542_v52, %v5342_v35 }
 0xaec   :  { %v2561_v47 = vpop.f32.mrf.mxu0 }
 0xaed   :  { %v2626_v37 = vmul.f32 %v5345_v58, %v5345_v58  ;;  %v5350_v55 = vadd.f32 %v5342_v35, %v2561_v47 }
 0xaee   :  { %v3543_v27 = vpop.f32.mrf.mxu0 }
 0xaef   :  { %v2642_v57 = vmul.f32 %v2626_v37, %v5345_v58  ;;  %v2624_v39 = vmul.f32 %v5350_v55, %v5350_v55  ;;  %v5356_v9 = vadd.f32 %v3543_v27, %v5342_v35 }
 0xaf0   :  { %v2564_v40 = vpop.f32.mrf.mxu0 }
 0xaf1   :  { %v2658_v31 = vmul.f32 0.044715, %v2642_v57  ;;  %v2640_v56 = vmul.f32 %v2624_v39, %v5350_v55  ;;  %v2627_v11 = vmul.f32 %v5356_v9, %v5356_v9  ;;  %v5362_v25 = vadd.f32 %v5342_v35, %v2564_v40 }
 0xaf2   :  { %v3546_v50 = vpop.f32.mrf.mxu0 }
 0xaf3   :  { %v2674_v17 = vadd.f32 %v2658_v31, %v5345_v58  ;;  %v2656_v63 = vmul.f32 0.044715, %v2640_v56  ;;  %v2643_v26 = vmul.f32 %v2627_v11, %v5356_v9  ;;  %v2625_v10 = vmul.f32 %v5362_v25, %v5362_v25 }
 0xaf4   :  { %v5369_v7 = vadd.f32 %v3546_v50, %v5342_v35  ;;  %v2577_v8 = vpop.f32.mrf.mxu0 }
 0xaf5   :  { %v2690_v51 = vmul.f32 0.7978846, %v2674_v17  ;;  %v2672_v62 = vadd.f32 %v2656_v63, %v5350_v55  ;;  %v2659_v61 = vmul.f32 0.044715, %v2643_v26  ;;  %v2641_v0 = vmul.f32 %v2625_v10, %v5362_v25 }
 0xaf6   :  { %v2630_v6 = vmul.f32 %v5369_v7, %v5369_v7  ;;  %v5376_v49 = vadd.f32 %v5342_v35, %v2577_v8  ;;  %v3547_v19 = vpop.f32.mrf.mxu0 }
 0xaf7   :  { %3796 = vtanh.f32 %v2690_v51  ;;  %v2688_v18 = vmul.f32 0.7978846, %v2672_v62  ;;  %v2675_v5 = vadd.f32 %v2659_v61, %v5356_v9  ;;  %v2657_v23 = vmul.f32 0.044715, %v2641_v0 }
 0xaf8   :  { %v2646_v48 = vmul.f32 %v2630_v6, %v5369_v7  ;;  %v2628_v1 = vmul.f32 %v5376_v49, %v5376_v49  ;;  %v5383_v22 = vadd.f32 %v3547_v19, %v5342_v35  ;;  %v2580_v54 = vpop.f32.mrf.mxu0 }
 0xaf9   :  { %v2691_v46 = vmul.f32 0.7978846, %v2675_v5  ;;  %v2673_v30 = vadd.f32 %v2657_v23, %v5362_v25  ;;  %v5387_v13 = vadd.f32 %v5342_v35, %v2580_v54  ;;  %3798 = vtanh.f32 %v2688_v18 }
 0xafa   :  { %v2662_v28 = vmul.f32 0.044715, %v2646_v48  ;;  %v2644_v43 = vmul.f32 %v2628_v1, %v5376_v49  ;;  %v2631_v42 = vmul.f32 %v5383_v22, %v5383_v22  ;;  %v3550_v33 = vpop.f32.mrf.mxu0 }
 0xafb   :  { %3800 = vtanh.f32 %v2691_v46  ;;  %v2689_v34 = vmul.f32 0.7978846, %v2673_v30  ;;  %v2629_v36 = vmul.f32 %v5387_v13, %v5387_v13  ;;  %v5395_v14 = vadd.f32 %v3550_v33, %v5342_v35 }
 0xafc   :  { %v2678_v41 = vadd.f32 %v2662_v28, %v5369_v7  ;;  %v2660_v21 = vmul.f32 0.044715, %v2644_v43  ;;  %v2647_v52 = vmul.f32 %v2631_v42, %v5383_v22  ;;  %v2593_v47 = vpop.f32.mrf.mxu0 }
 0xafd   :  { %3802 = vtanh.f32 %v2689_v34  ;;  %v2645_v37 = vmul.f32 %v2629_v36, %v5387_v13  ;;  %v2634_v27 = vmul.f32 %v5395_v14, %v5395_v14  ;;  %v5403_v57 = vadd.f32 %v5342_v35, %v2593_v47 }
 0xafe   :  { %v2694_v39 = vmul.f32 0.7978846, %v2678_v41  ;;  %v2676_v40 = vadd.f32 %v2660_v21, %v5376_v49  ;;  %v2663_v31 = vmul.f32 0.044715, %v2647_v52  ;;  %v3551_v56 = vpop.f32.mrf.mxu0 }
 0xaff   :  { %v2661_v11 = vmul.f32 0.044715, %v2645_v37  ;;  %v2650_v50 = vmul.f32 %v2634_v27, %v5395_v14  ;;  %v2632_v17 = vmul.f32 %v5403_v57, %v5403_v57  ;;  %v5410_v63 = vadd.f32 %v3551_v56, %v5342_v35 }
 0xb00   :  { %3804 = vtanh.f32 %v2694_v39  ;;  %v2692_v26 = vmul.f32 0.7978846, %v2676_v40  ;;  %v2679_v10 = vadd.f32 %v2663_v31, %v5383_v22  ;;  %v2596_v8 = vpop.f32.mrf.mxu0 }
 0xb01   :  { %v2677_v51 = vadd.f32 %v2661_v11, %v5387_v13  ;;  %v2666_v62 = vmul.f32 0.044715, %v2650_v50  ;;  %v2648_v61 = vmul.f32 %v2632_v17, %v5403_v57  ;;  %v2635_v0 = vmul.f32 %v5410_v63, %v5410_v63 }
 0xb02   :  { %3806 = vtanh.f32 %v2692_v26  ;;  %v2695_v6 = vmul.f32 0.7978846, %v2679_v10  ;;  %v5418_v19 = vadd.f32 %v5342_v35, %v2596_v8  ;;  %v3554_v18 = vpop.f32.mrf.mxu0 }
 0xb03   :  { %v2693_v5 = vmul.f32 0.7978846, %v2677_v51  ;;  %v2682_v23 = vadd.f32 %v2666_v62, %v5395_v14  ;;  %v2664_v48 = vmul.f32 0.044715, %v2648_v61  ;;  %v2651_v1 = vmul.f32 %v2635_v0, %v5410_v63 }
 0xb04   :  { %v3797_v54 = vpop.eup %3796  ;;  %3808 = vtanh.f32 %v2695_v6  ;;  %v2633_v46 = vmul.f32 %v5418_v19, %v5418_v19  ;;  %v5425_v30 = vadd.f32 %v3554_v18, %v5342_v35  ;;  %v2609_v28 = vpop.f32.mrf.mxu0 }
 0xb05   :  { %v2722_v43 = vadd.f32 1.0, %v3797_v54  ;;  %3810 = vtanh.f32 %v2693_v5  ;;  %v2698_v42 = vmul.f32 0.7978846, %v2682_v23  ;;  %v2680_v33 = vadd.f32 %v2664_v48, %v5403_v57 }
 0xb06   :  { %v2667_v34 = vmul.f32 0.044715, %v2651_v1  ;;  %v2649_v36 = vmul.f32 %v2633_v46, %v5418_v19  ;;  %v2638_v41 = vmul.f32 %v5425_v30, %v5425_v30  ;;  %v5432_v21 = vadd.f32 %v5342_v35, %v2609_v28  ;;  %v3555_v52 = vpop.f32.mrf.mxu0  ;;  %v3799_v47 = vpop.eup %3798 }
 0xb07   :  { %3812 = vtanh.f32 %v2698_v42  ;;  %v2696_v37 = vmul.f32 0.7978846, %v2680_v33  ;;  %v5435_v27 = vadd.f32 %v3555_v52, %v5342_v35  ;;  %v2738_v17 = vmul.f32 0.5, %v2722_v43 }
 0xb08   :  { %v3801_v39 = vpop.eup %3800  ;;  %v2683_v40 = vadd.f32 %v2667_v34, %v5410_v63  ;;  %v2665_v31 = vmul.f32 0.044715, %v2649_v36  ;;  %v2654_v56 = vmul.f32 %v2638_v41, %v5425_v30  ;;  %v2636_v11 = vmul.f32 %v5432_v21, %v5432_v21  ;;  %v2612_v50 = vpop.f32.mrf.mxu0 }
 0xb09   :  { %v2723_v26 = vadd.f32 1.0, %v3801_v39  ;;  %3814 = vtanh.f32 %v2696_v37  ;;  %v2639_v10 = vmul.f32 %v5435_v27, %v5435_v27  ;;  %v5447_v5 = vadd.f32 %v5342_v35, %v2612_v50 }
 0xb0a   :  { %v3803_v8 = vpop.eup %3802  ;;  %v2699_v51 = vmul.f32 0.7978846, %v2683_v40  ;;  %v2681_v62 = vadd.f32 %v2665_v31, %v5418_v19  ;;  %v2670_v61 = vmul.f32 0.044715, %v2654_v56  ;;  %v2652_v0 = vmul.f32 %v2636_v11, %v5432_v21 }
 0xb0b   :  { %v2739_v6 = vmul.f32 0.5, %v2723_v26  ;;  %v2655_v18 = vmul.f32 %v2639_v10, %v5435_v27  ;;  %v2720_v23 = vadd.f32 1.0, %v3799_v47  ;;  %v2637_v43 = vmul.f32 %v5447_v5, %v5447_v5 }
 0xb0c   :  { %3816 = vtanh.f32 %v2699_v51  ;;  %v2697_v48 = vmul.f32 0.7978846, %v2681_v62  ;;  %v2686_v1 = vadd.f32 %v2670_v61, %v5425_v30  ;;  %v2668_v54 = vmul.f32 0.044715, %v2652_v0 }
 0xb0d   :  { %v3805_v46 = vpop.eup %3804  ;;  %v2671_v28 = vmul.f32 0.044715, %v2655_v18  ;;  %v2721_v42 = vadd.f32 1.0, %v3803_v8  ;;  %v2736_v36 = vmul.f32 0.5, %v2720_v23  ;;  %v2754_v35 = vmul.f32 %v2738_v17, %v5345_v58 }
 0xb0e   :  { %3818 = vtanh.f32 %v2697_v48  ;;  %v2702_v33 = vmul.f32 0.7978846, %v2686_v1  ;;  %v2684_v34 = vadd.f32 %v2668_v54, %v5432_v21  ;;  %v2653_v47 = vmul.f32 %v2637_v43, %v5447_v5 }
 0xb0f   :  { %v3807_v41 = vpop.eup %3806  ;;  %v2687_v52 = vadd.f32 %v2671_v28, %v5435_v27  ;;  %v2737_v37 = vmul.f32 0.5, %v2721_v42  ;;  %v2755_v39 = vmul.f32 %v2739_v6, %v5356_v9  ;;  %v2752_v26 = vmul.f32 %v2736_v36, %v5350_v55 }
 0xb10   :  { %3820 = vtanh.f32 %v2702_v33  ;;  %v2700_v40 = vmul.f32 0.7978846, %v2684_v34  ;;  %v2724_v31 = vadd.f32 1.0, %v3807_v41  ;;  %v2669_v50 = vmul.f32 0.044715, %v2653_v47 }
 0xb11   :  { %v3809_v56 = vpop.eup %3808  ;;  %v2703_v11 = vmul.f32 0.7978846, %v2687_v52  ;;  %v2753_v10 = vmul.f32 %v2737_v37, %v5362_v25  ;;  %v2726_v17 = vadd.f32 1.0, %v3805_v46  ;;  %v2785_v6 = vpack.c.bf16 %v2755_v39, %v2754_v35 }
 0xb12   :  { %v3811_v8 = vpop.eup %3810  ;;  %3822 = vtanh.f32 %v2700_v40  ;;  %v2740_v58 = vmul.f32 0.5, %v2724_v31  ;;  %v2727_v51 = vadd.f32 1.0, %v3809_v56  ;;  %v2685_v62 = vadd.f32 %v2669_v50, %v5447_v5 }
 0xb13   :  { %3824 = vtanh.f32 %v2703_v11  ;;  %v2784_v61 = vpack.c.bf16 %v2753_v10, %v2752_v26  ;;  %v2725_v9 = vadd.f32 1.0, %v3811_v8  ;;  %v2742_v55 = vmul.f32 0.5, %v2726_v17 }
 0xb14   :  { %v3813_v0 = vpop.eup %3812  ;;  %v2743_v18 = vmul.f32 0.5, %v2727_v51  ;;  %v2701_v23 = vmul.f32 0.7978846, %v2685_v62  ;;  %v2756_v25 = vmul.f32 %v2740_v58, %v5376_v49 }
 0xb15   :  { %3572 = vmatprep.mubr.bf16.mxu1 %v2784_v61  ;;  %v2741_v48 = vmul.f32 0.5, %v2725_v9  ;;  %v2758_v33 = vmul.f32 %v2742_v55, %v5369_v7  ;;  %v2730_v34 = vadd.f32 1.0, %v3813_v0 }
 0xb16   :  { %v3815_v1 = vpop.eup %3814  ;;  %3573 = vmatmul.mubr.bf16.vlgmr.msra.gmra.mxu1 %v2785_v6  ;;  %3826 = vtanh.f32 %v2701_v23  ;;  %v2759_v46 = vmul.f32 %v2743_v18, %v5383_v22  ;;  %v3083_v23 = vld [vmem:[%s5568_s13] ss:$0 sm:$0xff] }
 0xb17   :  { %v2757_v54 = vmul.f32 %v2741_v48, %v5387_v13  ;;  %v2728_v28 = vadd.f32 1.0, %v3815_v1  ;;  %v2746_v40 = vmul.f32 0.5, %v2730_v34 }
 0xb18   :  { %v2787_v35 = vpack.c.bf16 %v2759_v46, %v2758_v33 }
 0xb19   :  { %v3817_v43 = vpop.eup %3816  ;;  %v2786_v42 = vpack.c.bf16 %v2757_v54, %v2756_v25  ;;  %v2744_v47 = vmul.f32 0.5, %v2728_v28  ;;  %v2762_v10 = vmul.f32 %v2746_v40, %v5395_v14 }
 0xb1a   :  { %v2731_v36 = vadd.f32 1.0, %v3817_v43 }
 0xb1b   :  { %v3819_v41 = vpop.eup %3818  ;;  %3576 = vmatprep.mubr.bf16.mxu1 %v2786_v42  ;;  %v2760_v22 = vmul.f32 %v2744_v47, %v5403_v57 }
 0xb1c   :  { %v2729_v52 = vadd.f32 1.0, %v3819_v41  ;;  %v2747_v37 = vmul.f32 0.5, %v2731_v36 }
 0xb1d   :  { %v3821_v39 = vpop.eup %3820 }
 0xb1e   :  { %3577 = vmatmul.mubr.bf16.gmra.mxu1 %v2787_v35  ;;  %v2745_v49 = vmul.f32 0.5, %v2729_v52  ;;  %v2763_v7 = vmul.f32 %v2747_v37, %v5410_v63  ;;  %v2734_v8 = vadd.f32 1.0, %v3821_v39 }
 0xb1f   :  { %v3823_v13 = vpop.eup %3822 }
 0xb20   :  { %v3825_v31 = vpop.eup %3824  ;;  %v2761_v56 = vmul.f32 %v2745_v49, %v5418_v19  ;;  %v2732_v11 = vadd.f32 1.0, %v3823_v13  ;;  %v2789_v17 = vpack.c.bf16 %v2763_v7, %v2762_v10  ;;  %v2750_v9 = vmul.f32 0.5, %v2734_v8 }
 0xb21   :  { %v2735_v50 = vadd.f32 1.0, %v3825_v31 }
 0xb22   :  { %v2788_v26 = vpack.c.bf16 %v2761_v56, %v2760_v22  ;;  %v2748_v61 = vmul.f32 0.5, %v2732_v11  ;;  %v2766_v6 = vmul.f32 %v2750_v9, %v5425_v30 }
 0xb23   :  { %v3827_v58 = vpop.eup %3826  ;;  %v2751_v51 = vmul.f32 0.5, %v2735_v50 }
 0xb24   :  { %3580 = vmatprep.mubr.bf16.mxu1 %v2788_v26  ;;  %v2733_v62 = vadd.f32 1.0, %v3827_v58  ;;  %v2764_v19 = vmul.f32 %v2748_v61, %v5432_v21 }
 0xb25   :  { %v2767_v57 = vmul.f32 %v2751_v51, %v5435_v27 }
 0xb26   :  { %3581 = vmatmul.mubr.bf16.gmra.mxu1 %v2789_v17  ;;  %v2749_v0 = vmul.f32 0.5, %v2733_v62 }
 0xb27   :  { %v2791_v14 = vpack.c.bf16 %v2767_v57, %v2766_v6 }
 0xb28   :  { %v2765_v63 = vmul.f32 %v2749_v0, %v5447_v5 }
 0xb2a   :  { %v2790_v18 = vpack.c.bf16 %v2765_v63, %v2764_v19 }
 0xb2c   :  { %3584 = vmatprep.mubr.bf16.mxu1 %v2790_v18 }
 0xb2e   :  { %3585 = vmatmul.mubr.bf16.gmra.mxu1 %v2791_v14 }
 0xbd6   :  { %v3574_v48 = vpop.f32.mrf.mxu1 }
 0xbd7   :  { %v2850_v1 = vadd.f32 %v3574_v48, %v3083_v23 }
 0xbd8   :  { %v2841_v55 = vpop.f32.mrf.mxu1 }
 0xbd9   :  { %v2906_v25 = vadd.f32 %v2850_v1, %v5002_v45  ;;  %v2842_v27 = vadd.f32 %v3083_v23, %v2841_v55 }
 0xbda   :  { %v3575_v54 = vpop.f32.mrf.mxu1 }
 0xbdb   :  { %2922 = vst.msk [vmem:[%s5569_s14 + $0x10] sm:$0xff] %vm64_vm0, %v2906_v25  ;;  %v2904_v30 = vadd.f32 %v2842_v27, %v4996_v29  ;;  %v2853_v21 = vadd.f32 %v3575_v54, %v3083_v23 }
 0xbdc   :  { %v2844_v5 = vpop.f32.mrf.mxu1 }
 0xbdd   :  { %2920 = vst.msk [vmem:[%s5569_s14] sm:$0xff] %vm64_vm0, %v2904_v30  ;;  %v2907_v46 = vadd.f32 %v2853_v21, %v5013_v3  ;;  %v2845_v28 = vadd.f32 %v3083_v23, %v2844_v5 }
 0xbde   :  { %v3578_v45 = vpop.f32.mrf.mxu1 }
 0xbdf   :  { %2923 = vst.msk [vmem:[%s5569_s14 + $0x18] sm:$0xff] %vm64_vm0, %v2907_v46  ;;  %v2905_v43 = vadd.f32 %v2845_v28, %v5010_v16  ;;  %v2866_v42 = vadd.f32 %v3578_v45, %v3083_v23 }
 0xbe0   :  { %v2857_v29 = vpop.f32.mrf.mxu1 }
 0xbe1   :  { %2921 = vst.msk [vmem:[%s5569_s14 + $0x8] sm:$0xff] %vm64_vm0, %v2905_v43  ;;  %v2910_v33 = vadd.f32 %v2866_v42, %v5029_v15  ;;  %v2858_v34 = vadd.f32 %v3083_v23, %v2857_v29 }
 0xbe2   :  { %v3579_v3 = vpop.f32.mrf.mxu1 }
 0xbe3   :  { %2926 = vst.msk [vmem:[%s5569_s14 + $0x30] sm:$0xff] %vm64_vm0, %v2910_v33  ;;  %v2908_v36 = vadd.f32 %v2858_v34, %v5026_v20  ;;  %v2869_v41 = vadd.f32 %v3579_v3, %v3083_v23 }
 0xbe4   :  { %v2860_v16 = vpop.f32.mrf.mxu1 }
 0xbe5   :  { %2924 = vst.msk [vmem:[%s5569_s14 + $0x20] sm:$0xff] %vm64_vm0, %v2908_v36  ;;  %v2911_v35 = vadd.f32 %v2869_v41, %v5050_v53  ;;  %v2861_v52 = vadd.f32 %v3083_v23, %v2860_v16 }
 0xbe6   :  { %v3582_v15 = vpop.f32.mrf.mxu1 }
 0xbe7   :  { %2927 = vst.msk [vmem:[%s5569_s14 + $0x38] sm:$0xff] %vm64_vm0, %v2911_v35  ;;  %v2909_v47 = vadd.f32 %v2861_v52, %v5042_v60  ;;  %v2882_v37 = vadd.f32 %v3582_v15, %v3083_v23 }
 0xbe8   :  { %v2873_v20 = vpop.f32.mrf.mxu1 }
 0xbe9   :  { %2925 = vst.msk [vmem:[%s5569_s14 + $0x28] sm:$0xff] %vm64_vm0, %v2909_v47  ;;  %v2914_v39 = vadd.f32 %v2882_v37, %v5061_v38  ;;  %v2874_v49 = vadd.f32 %v3083_v23, %v2873_v20 }
 0xbea   :  { %v3583_v53 = vpop.f32.mrf.mxu1 }
 0xbeb   :  { %2930 = vst.msk [vmem:[%s5569_s14 + $0x50] sm:$0xff] %vm64_vm0, %v2914_v39  ;;  %v2912_v40 = vadd.f32 %v2874_v49, %v5058_v24  ;;  %v2885_v13 = vadd.f32 %v3583_v53, %v3083_v23 }
 0xbec   :  { %v2876_v60 = vpop.f32.mrf.mxu1 }
 0xbed   :  { %2928 = vst.msk [vmem:[%s5569_s14 + $0x40] sm:$0xff] %vm64_vm0, %v2912_v40  ;;  %v2915_v31 = vadd.f32 %v2885_v13, %v5077_v44  ;;  %v2877_v22 = vadd.f32 %v3083_v23, %v2876_v60 }
 0xbee   :  { %v3586_v38 = vpop.f32.mrf.mxu1 }
 0xbef   :  { %2931 = vst.msk [vmem:[%s5569_s14 + $0x58] sm:$0xff] %vm64_vm0, %v2915_v31  ;;  %v2913_v56 = vadd.f32 %v2877_v22, %v5074_v59  ;;  %v2898_v7 = vadd.f32 %v3586_v38, %v3083_v23 }
 0xbf0   :  { %v2889_v24 = vpop.f32.mrf.mxu1 }
 0xbf1   :  { %2929 = vst.msk [vmem:[%s5569_s14 + $0x48] sm:$0xff] %vm64_vm0, %v2913_v56  ;;  %v2918_v11 = vadd.f32 %v2898_v7, %v5095_v2  ;;  %v2890_v50 = vadd.f32 %v3083_v23, %v2889_v24 }
 0xbf2   :  { %v3587_v44 = vpop.f32.mrf.mxu1 }
 0xbf3   :  { %2934 = vst.msk [vmem:[%s5569_s14 + $0x70] sm:$0xff] %vm64_vm0, %v2918_v11  ;;  %v2916_v26 = vadd.f32 %v2890_v50, %v5090_v4  ;;  %v2901_v10 = vadd.f32 %v3587_v44, %v3083_v23 }
 0xbf4   :  { %v2892_v59 = vpop.f32.mrf.mxu1 }
 0xbf5   :  { %2932 = vst.msk [vmem:[%s5569_s14 + $0x60] sm:$0xff] %vm64_vm0, %v2916_v26  ;;  %v2919_v8 = vadd.f32 %v2901_v10, %v5109_v32  ;;  %v2893_v58 = vadd.f32 %v3083_v23, %v2892_v59 }
 0xbf7   :  { %2935 = vst.msk [vmem:[%s5569_s14 + $0x78] sm:$0xff] %vm64_vm0, %v2919_v8  ;;  %v2917_v2 = vadd.f32 %v2893_v58, %v5106_v12 }
 0xbf9   :  { %2933 = vst.msk [vmem:[%s5569_s14 + $0x68] sm:$0xff] %vm64_vm0, %v2917_v2 }

// kernel: forward.13
= control target key start
LH: loop header
LB: loop body
LE: loop exit
PB: predicated region body
PF: predicated region fallthrough
CT: control target
= control target key end

     0   :  { %vm29_vm0 = vcmask 523264   ;;  %s432_s0 = inlined_call_operand.vmem [shape: f32[32,64], index: 0, kind: input, shape index: {}]   ;;  %s433_s1 = inlined_call_operand.vmem [shape: f32[1,64], index: 1, kind: input, shape index: {}]   ;;  %s434_s2 = inlined_call_operand.vmem [shape: f32[1,64], index: 2, kind: input, shape index: {}]   ;;  %s435_s3 = inlined_call_operand.vmem [shape: f32[2,32], index: 3, kind: input, shape index: {}]   ;;  %s436_s4 = inlined_call_operand.vmem [shape: f32[64,128], index: 4, kind: input, shape index: {}]   ;;  %s437_s5 = inlined_call_operand.vmem [shape: f32[1,128], index: 5, kind: input, shape index: {}]   ;;  %s438_s6 = inlined_call_operand.hbm [shape: f32[2,128], index: 6, kind: output, shape index: {}]  }
   0x1   :  { %v28_v0 = vld [vmem:[%s432_s0 + $0x18] sm:$0xff]  ;;  %v27_v1 = vld [vmem:[%s432_s0 + $0x10] sm:$0xff]  ;;  %v26_v2 = vld [vmem:[%s432_s0 + $0x8] sm:$0xff] }
   0x2   :  { %v39_v3 = vsel %vm29_vm0, %v28_v0, 0.0  ;;  %v33_v4 = vsel %vm29_vm0, %v26_v2, 0.0  ;;  %v25_v5 = vld [vmem:[%s432_s0] sm:$0xff] }
   0x3   :  { %11 = vsyncpa [#allocation3], 0  ;;  %40 = vadd.xlane.f32.xlu0 %v39_v3  ;;  %34 = vadd.xlane.f32.xlu1 %v33_v4  ;;  %v36_v6 = vsel %vm29_vm0, %v27_v1, 0.0  ;;  %v30_v7 = vsel %vm29_vm0, %v25_v5, 0.0  ;;  %v329_v28 = vmov 0.0   ;;  %vm330_vm1 = vmmov 0  }
   0x4   :  { %273 = vmatprep.subr.mxu0 %v329_v28  ;;  %284 = vmatprep.subr.bf16.mxu1 %v329_v28  ;;  %v186_v29 = vld [vmem:[%s436_s4 + $0x30] sm:$0xff]  ;;  %v187_v30 = vld [vmem:[%s436_s4 + $0x38] sm:$0xff]  ;;  %v184_v31 = vld [vmem:[%s436_s4 + $0x20] sm:$0xff]  ;;  %vm106_vm2 = vcmask 261120   ;;  %s331_s25 = smov [#allocation2]  }
   0x5   :  { %281 = vmatprep.mubr.msk.f32.mxu0 %vm330_vm1, %v329_v28  ;;  %292 = vmatprep.mubr.msk.bf16.mxu1 %vm330_vm1, %v329_v28  ;;  %v192_v32 = vpack.c.bf16 %v187_v30, %v186_v29  ;;  %v185_v33 = vld [vmem:[%s436_s4 + $0x28] sm:$0xff]  ;;  %v182_v35 = vld [vmem:[%s436_s4 + $0x10] sm:$0xff]  ;;  %v183_v36 = vld [vmem:[%s436_s4 + $0x18] sm:$0xff]  ;;  %s250_s26 = sshll.u32 %s331_s25, 4  ;;  %s251_s26 = int_to_ptr.vmem [resolvable:$true] %s250_s26 }
   0x6   :  { %v191_v34 = vpack.c.bf16 %v185_v33, %v184_v31  ;;  %v190_v37 = vpack.c.bf16 %v183_v36, %v182_v35  ;;  %v258_v51 = vld [vmem:[%s433_s1] ss:$0 sm:$0xff]  ;;  %p312_p1 = scmp.lt.s32.totalorder %s251_s26, %s251_s26 }
   0x7   :  { %37 = vadd.xlane.f32.xlu0 %v36_v6  ;;  %31 = vadd.xlane.f32.xlu1 %v30_v7  ;;  %v259_v53 = vld [vmem:[%s434_s2] ss:$0 sm:$0xff]  ;;  %v181_v6 = vld [vmem:[%s436_s4 + $0x8] sm:$0xff] }
   0x8   :  { %285 = vmatpush3.bf16.msra.mxu1 %v192_v32  ;;  %v105_v4 = vld [vmem:[%s435_s3] sm:$0x3] }
   0x9   :  { %286 = vmatprep.subr.bf16.mxu1 %v329_v28 }
   0xc   :  { %287 = vmatpush3.bf16.msra.mxu1 %v191_v34 }
   0xd   :  { %288 = vmatprep.subr.bf16.mxu1 %v329_v28 }
  0x10   :  { %289 = vmatpush3.bf16.msra.mxu1 %v190_v37 }
  0x11   :  { %290 = vmatprep.subr.bf16.mxu1 %v329_v28 }
  0x8c   :  { %v41_v8 = vpop.xlane.xlu0 %40  ;;  %v35_v9 = vpop.xlane.xlu1 %34 }
  0x8d   :  { %v46_v10 = vmul.f32 0.015625, %v41_v8  ;;  %v44_v11 = vmul.f32 0.015625, %v35_v9 }
  0x8f   :  { %v50_v12 = vsub.f32 %v28_v0, %v46_v10  ;;  %v383_v13 = vsub.f32 %v26_v2, %v44_v11  ;;  %v261_v11 = vld [vmem:[%s437_s5] ss:$0 sm:$0xff] }
  0x90   :  { %v38_v14 = vpop.xlane.xlu0 %37  ;;  %v32_v15 = vpop.xlane.xlu1 %31 }
  0x91   :  { %v45_v16 = vmul.f32 0.015625, %v38_v14  ;;  %v54_v17 = vmul.f32 %v50_v12, %v50_v12  ;;  %v43_v18 = vmul.f32 0.015625, %v32_v15  ;;  %v52_v19 = vmul.f32 %v383_v13, %v383_v13 }
  0x93   :  { %v49_v20 = vsub.f32 %v27_v1, %v45_v16  ;;  %v64_v21 = vsel %vm29_vm0, %v54_v17, 0.0  ;;  %v47_v22 = vsub.f32 %v25_v5, %v43_v18  ;;  %v58_v23 = vsel %vm29_vm0, %v52_v19, 0.0  ;;  %v180_v5 = vld [vmem:[%s436_s4] sm:$0xff]  ;;  %s307_s4 = scalar_lea.vmem %s251_s26, 32 }
  0x94   :  { %65 = vadd.xlane.f32.xlu0 %v64_v21  ;;  %v189_v7 = vpack.c.bf16 %v181_v6, %v180_v5  ;;  %p308_p0 = scmp.ne.s32.totalorder %s251_s26, %s307_s4  ;;  %p313_p2 = scmp.lt.s32.totalorder %s307_s4, %s307_s4 }
  0x95   :  { %v53_v24 = vmul.f32 %v49_v20, %v49_v20  ;;  %v51_v25 = vmul.f32 %v47_v22, %v47_v22 }
  0x96   :  { %291 = vmatpush3.bf16.msra.mxu1 %v189_v7  ;;  %p314_p3 = por %p313_p2, %p312_p1 }
  0x97   :  { %v61_v26 = vsel %vm29_vm0, %v53_v24, 0.0  ;;  %v55_v27 = vsel %vm29_vm0, %v51_v25, 0.0 }
  0x98   :  { %59 = vadd.xlane.f32.xlu0 %v58_v23  ;;  %62 = vadd.xlane.f32.xlu1 %v61_v26  ;;  %p315_p4 = pnand %p314_p3, %p308_p0 }
  0x9c   :  { %56 = vadd.xlane.f32.xlu1 %v55_v27 }
 0x11d   :  { %v66_v38 = vpop.xlane.xlu0 %65 }
 0x11e   :  { %v70_v39 = vmul.f32 0.015625, %v66_v38 }
 0x120   :  { %v74_v40 = vadd.f32 1e-05, %v70_v39 }
 0x121   :  { %v60_v41 = vpop.xlane.xlu0 %59  ;;  %v63_v42 = vpop.xlane.xlu1 %62 }
 0x122   :  { %299 = vrsqrt.f32 %v74_v40  ;;  %v68_v43 = vmul.f32 0.015625, %v60_v41  ;;  %v69_v44 = vmul.f32 0.015625, %v63_v42 }
 0x124   :  { %v72_v45 = vadd.f32 1e-05, %v68_v43  ;;  %v73_v46 = vadd.f32 1e-05, %v69_v44 }
 0x125   :  { %v57_v47 = vpop.xlane.xlu1 %56 }
 0x126   :  { %301 = vrsqrt.f32 %v72_v45  ;;  %v67_v48 = vmul.f32 0.015625, %v57_v47 }
 0x127   :  { %303 = vrsqrt.f32 %v73_v46 }
 0x128   :  { %v71_v49 = vadd.f32 1e-05, %v67_v48 }
 0x12a   :  { %305 = vrsqrt.f32 %v71_v49 }
 0x12f   :  { %v300_v50 = vpop.eup %299 }
 0x130   :  { %v82_v52 = vmul.f32 %v300_v50, %v50_v12 }
 0x132   :  { %v93_v54 = vmul.f32 %v258_v51, %v82_v52 }
 0x133   :  { %v302_v55 = vpop.eup %301 }
 0x134   :  { %v304_v56 = vpop.eup %303  ;;  %v104_v57 = vadd.f32 %v259_v53, %v93_v54  ;;  %v80_v58 = vmul.f32 %v302_v55, %v383_v13 }
 0x135   :  { %v81_v59 = vmul.f32 %v304_v56, %v49_v20 }
 0x136   :  { %274 = vmatpush3.msra.mxu0 %v104_v57  ;;  %v91_v62 = vmul.f32 %v258_v51, %v80_v58 }
 0x137   :  { %v306_v60 = vpop.eup %305  ;;  %275 = vmatprep.subr.mxu0 %v329_v28  ;;  %v92_v61 = vmul.f32 %v258_v51, %v81_v59 }
 0x138   :  { %v79_v63 = vmul.f32 %v306_v60, %v47_v22  ;;  %v102_v2 = vadd.f32 %v259_v53, %v91_v62 }
 0x139   :  { %v103_v0 = vadd.f32 %v259_v53, %v92_v61 }
 0x13a   :  { %v90_v1 = vmul.f32 %v258_v51, %v79_v63 }
 0x13b   :  { %276 = vmatpush3.msra.mxu0 %v103_v0 }
 0x13c   :  { %277 = vmatprep.subr.mxu0 %v329_v28  ;;  %v101_v3 = vadd.f32 %v259_v53, %v90_v1 }
 0x13d   :  { %278 = vmatpush3.msra.mxu0 %v102_v2 }
 0x13e   :  { %279 = vmatprep.subr.mxu0 %v329_v28 }
 0x13f   :  { %280 = vmatpush3.msra.mxu0 %v101_v3 }
 0x140   :  { %282 = vmatmul.mubr.msk.f32.vlgmr.msra.gmra.mxu0 %vm106_vm2, %v105_v4 }
 0x200   :  { %v176_v8 = vpop.f32.mrf.mxu0 }
 0x201   :  { %v188_v9 = vpack.c.bf16 %v176_v8, %v176_v8 }
 0x202   :  { %v283_v10 = vpop.f32.mrf.mxu0 }
 0x203   :  { %293 = vmatmul.mubr.msk.bf16.vlgmr.msra.gmra.mxu1 %vm29_vm0, %v188_v9 }
 0x2c3   :  { %v237_v12 = vpop.f32.mrf.mxu1 }
 0x2c4   :  { %v238_v13 = vadd.f32 %v261_v11, %v237_v12 }
 0x2c5   :  { %v294_v14 = vpop.f32.mrf.mxu1 }
 0x2c6   :  { %243 = vst [vmem:[#allocation2] sm:$0x3] %v238_v13 }
 0x2c7   :  { %v240_v15 = vpop.f32.mrf.mxu1 }
 0x2c8   :  { %318 = shalt.err (!%p315_p4)
}
 0x2c9   :  { %253 = dma.vmem_to_hbm [thread:$0]  %s251_s26, 32, %s438_s6, [#allocation3]   ;;  %v295_v16 = vpop.f32.mrf.mxu1 }
 0x2ca   :  { %327 = dma.done.wait [#allocation3], 32  }
 0x2cb   :  { %328 = vsyncadd [#allocation3], 4294967264 }
 0x2cc   :  { %257 = vsyncpa [#allocation3], 1 }

// kernel: forward.11
= control target key start
LH: loop header
LB: loop body
LE: loop exit
PB: predicated region body
PF: predicated region fallthrough
CT: control target
= control target key end

     0   :  { %vm52_vm0 = vcmask 523264   ;;  %vm356_vm1 = vcmask 130048   ;;  %vm418_vm2 = vcmask 261120   ;;  %s3957_s0 = inlined_call_operand.vmem [shape: f32[32,64], index: 0, kind: input, shape index: {}]   ;;  %s3958_s3 = inlined_call_operand.vmem [shape: f32[12,64,16], index: 3, kind: input, shape index: {}]   ;;  %s3959_s1 = inlined_call_operand.vmem [shape: f32[1,64], index: 1, kind: input, shape index: {}]   ;;  %s3960_s2 = inlined_call_operand.vmem [shape: f32[1,64], index: 2, kind: input, shape index: {}]   ;;  %s3961_s4 = inlined_call_operand.vmem [shape: f32[12,1,16], index: 4, kind: input, shape index: {}]   ;;  %s3962_s5 = inlined_call_operand.vmem [shape: f32[4,32,32], index: 5, kind: input, shape index: {}]   ;;  %s3963_s6 = inlined_call_operand.vmem [shape: f32[4,16,64], index: 6, kind: input, shape index: {}]   ;;  %s3964_s7 = inlined_call_operand.vmem [shape: f32[1,64], index: 7, kind: input, shape index: {}]   ;;  %s3965_s10 = inlined_call_operand.vmem [shape: f32[64,256], index: 10, kind: input, shape index: {}]   ;;  %s3966_s8 = inlined_call_operand.vmem [shape: f32[1,64], index: 8, kind: input, shape index: {}]   ;;  %s3967_s9 = inlined_call_operand.vmem [shape: f32[1,64], index: 9, kind: input, shape index: {}]   ;;  %s3968_s12 = inlined_call_operand.vmem [shape: f32[256,64], index: 12, kind: input, shape index: {}]   ;;  %s3969_s11 = inlined_call_operand.vmem [shape: f32[1,256], index: 11, kind: input, shape index: {}]   ;;  %s3970_s13 = inlined_call_operand.vmem [shape: f32[1,64], index: 13, kind: input, shape index: {}]   ;;  %s3971_s14 = inlined_call_operand.vmem [shape: f32[32,64], index: 14, kind: output, shape index: {}]  }
   0x1   :  { %v48_v0 = vld [vmem:[%s3957_s0] sm:$0xff]  ;;  %v50_v1 = vld [vmem:[%s3957_s0 + $0x10] sm:$0xff]  ;;  %v49_v2 = vld [vmem:[%s3957_s0 + $0x8] sm:$0xff] }
   0x2   :  { %v53_v3 = vsel %vm52_vm0, %v48_v0, 0.0  ;;  %v59_v4 = vsel %vm52_vm0, %v50_v1, 0.0  ;;  %v51_v5 = vld [vmem:[%s3957_s0 + $0x18] sm:$0xff]  ;;  %v56_v6 = vsel %vm52_vm0, %v49_v2, 0.0  ;;  %v136_v28 = vld [vmem:[%s3958_s3 + $0x30] sm:$0xff]  ;;  %v134_v34 = vld [vmem:[%s3958_s3 + $0x20] sm:$0xff] }
   0x3   :  { %54 = vadd.xlane.f32.xlu0 %v53_v3  ;;  %60 = vadd.xlane.f32.xlu1 %v59_v4  ;;  %v62_v7 = vsel %vm52_vm0, %v51_v5, 0.0  ;;  %v137_v29 = vld [vmem:[%s3958_s3 + $0x38] sm:$0xff]  ;;  %v2323_v31 = vld [vmem:[%s3958_s3 + $0x130] sm:$0xff]  ;;  %v135_v35 = vld [vmem:[%s3958_s3 + $0x28] sm:$0xff] }
   0x4   :  { %v141_v30 = vpack.c.bf16 %v137_v29, %v136_v28  ;;  %v2324_v32 = vld [vmem:[%s3958_s3 + $0x138] sm:$0xff]  ;;  %v140_v36 = vpack.c.bf16 %v135_v35, %v134_v34  ;;  %v2321_v37 = vld [vmem:[%s3958_s3 + $0x120] sm:$0xff]  ;;  %v2322_v38 = vld [vmem:[%s3958_s3 + $0x128] sm:$0xff] }
   0x5   :  { %v220_v33 = vpack.c.bf16 %v2324_v32, %v2323_v31  ;;  %v219_v39 = vpack.c.bf16 %v2322_v38, %v2321_v37  ;;  %v132_v40 = vld [vmem:[%s3958_s3 + $0x10] sm:$0xff]  ;;  %v133_v41 = vld [vmem:[%s3958_s3 + $0x18] sm:$0xff]  ;;  %v130_v46 = vld [vmem:[%s3958_s3] sm:$0xff] }
   0x6   :  { %2641 = vmatprep.subr.bf16.mxu0 %v141_v30  ;;  %v139_v42 = vpack.c.bf16 %v133_v41, %v132_v40  ;;  %v2319_v43 = vld [vmem:[%s3958_s3 + $0x110] sm:$0xff]  ;;  %v2320_v44 = vld [vmem:[%s3958_s3 + $0x118] sm:$0xff]  ;;  %v131_v47 = vld [vmem:[%s3958_s3 + $0x8] sm:$0xff] }
   0x7   :  { %57 = vadd.xlane.f32.xlu0 %v56_v6  ;;  %63 = vadd.xlane.f32.xlu1 %v62_v7  ;;  %v218_v45 = vpack.c.bf16 %v2320_v44, %v2319_v43  ;;  %v138_v48 = vpack.c.bf16 %v131_v47, %v130_v46  ;;  %v2317_v49 = vld [vmem:[%s3958_s3 + $0x100] sm:$0xff]  ;;  %v2318_v50 = vld [vmem:[%s3958_s3 + $0x108] sm:$0xff]  ;;  %v2335_v52 = vld [vmem:[%s3958_s3 + $0x230] sm:$0xff] }
   0x8   :  { %2642 = vmatpush3.bf16.msra.mxu0 %v141_v30  ;;  %2653 = vmatprep.subr.bf16.mxu1 %v220_v33  ;;  %v217_v51 = vpack.c.bf16 %v2318_v50, %v2317_v49  ;;  %v2336_v53 = vld [vmem:[%s3958_s3 + $0x238] sm:$0xff]  ;;  %v2329_v29 = vld [vmem:[%s3958_s3 + $0x200] sm:$0xff]  ;;  %v2330_v30 = vld [vmem:[%s3958_s3 + $0x208] sm:$0xff] }
   0x9   :  { %2654 = vmatpush3.bf16.msra.mxu1 %v220_v33  ;;  %2643 = vmatprep.subr.bf16.mxu0 %v140_v36  ;;  %v290_v54 = vpack.c.bf16 %v2336_v53, %v2335_v52  ;;  %v287_v31 = vpack.c.bf16 %v2330_v30, %v2329_v29  ;;  %v2326_v34 = vld [vmem:[%s3961_s4 + $0x4] ss:$0 sm:$0xff]  ;;  %v2314_v37 = vld [vmem:[%s3961_s4] ss:$0 sm:$0xff] }
   0xa   :  { %2655 = vmatprep.subr.bf16.mxu1 %v219_v39  ;;  %v2369_v30 = vld [vmem:[%s3958_s3 + $0x240] sm:$0xff] }
   0xc   :  { %2644 = vmatpush3.bf16.msra.mxu0 %v140_v36 }
   0xd   :  { %2656 = vmatpush3.bf16.msra.mxu1 %v219_v39  ;;  %2645 = vmatprep.subr.bf16.mxu0 %v139_v42 }
   0xe   :  { %2657 = vmatprep.subr.bf16.mxu1 %v218_v45 }
  0x10   :  { %2646 = vmatpush3.bf16.msra.mxu0 %v139_v42 }
  0x11   :  { %2658 = vmatpush3.bf16.msra.mxu1 %v218_v45  ;;  %2647 = vmatprep.subr.bf16.mxu0 %v138_v48 }
  0x12   :  { %2659 = vmatprep.subr.bf16.mxu1 %v217_v51 }
  0x14   :  { %2648 = vmatpush3.bf16.msra.mxu0 %v138_v48 }
  0x15   :  { %2660 = vmatpush3.bf16.msra.mxu1 %v217_v51  ;;  %2665 = vmatprep.subr.bf16.mxu0 %v290_v54 }
  0x8c   :  { %v55_v8 = vpop.xlane.xlu0 %54  ;;  %v61_v9 = vpop.xlane.xlu1 %60 }
  0x8d   :  { %v66_v10 = vmul.f32 0.015625, %v55_v8  ;;  %v68_v11 = vmul.f32 0.015625, %v61_v9 }
  0x8f   :  { %v3074_v12 = vsub.f32 %v48_v0, %v66_v10  ;;  %v3076_v13 = vsub.f32 %v50_v1, %v68_v11  ;;  %v2313_v10 = vld [vmem:[%s3960_s2] ss:$0 sm:$0xff] }
  0x90   :  { %v58_v14 = vpop.xlane.xlu0 %57  ;;  %v64_v15 = vpop.xlane.xlu1 %63 }
  0x91   :  { %v67_v16 = vmul.f32 0.015625, %v58_v14  ;;  %v69_v17 = vmul.f32 0.015625, %v64_v15  ;;  %v74_v18 = vmul.f32 %v3074_v12, %v3074_v12  ;;  %v76_v19 = vmul.f32 %v3076_v13, %v3076_v13 }
  0x93   :  { %v3082_v20 = vsub.f32 %v49_v2, %v67_v16  ;;  %v3084_v21 = vsub.f32 %v51_v5, %v69_v17  ;;  %v78_v22 = vsel %vm52_vm0, %v74_v18, 0.0  ;;  %v84_v23 = vsel %vm52_vm0, %v76_v19, 0.0  ;;  %v2312_v5 = vld [vmem:[%s3959_s1] ss:$0 sm:$0xff] }
  0x94   :  { %79 = vadd.xlane.f32.xlu0 %v78_v22 }
  0x95   :  { %v75_v24 = vmul.f32 %v3082_v20, %v3082_v20  ;;  %v77_v25 = vmul.f32 %v3084_v21, %v3084_v21 }
  0x97   :  { %v81_v26 = vsel %vm52_vm0, %v75_v24, 0.0  ;;  %v87_v27 = vsel %vm52_vm0, %v77_v25, 0.0 }
  0x98   :  { %85 = vadd.xlane.f32.xlu0 %v84_v23  ;;  %82 = vadd.xlane.f32.xlu1 %v81_v26  ;;  %v2334_v23 = vld [vmem:[%s3958_s3 + $0x228] sm:$0xff]  ;;  %v2331_v26 = vld [vmem:[%s3958_s3 + $0x210] sm:$0xff] }
  0x9c   :  { %88 = vadd.xlane.f32.xlu1 %v87_v27  ;;  %v2332_v27 = vld [vmem:[%s3958_s3 + $0x218] sm:$0xff] }
  0x9d   :  { %v288_v28 = vpack.c.bf16 %v2332_v27, %v2331_v26  ;;  %v2371_v27 = vld [vmem:[%s3958_s3 + $0x250] sm:$0xff] }
 0x11d   :  { %v80_v55 = vpop.xlane.xlu0 %79 }
 0x11e   :  { %v90_v56 = vmul.f32 0.015625, %v80_v55  ;;  %v2352_v55 = vld [vmem:[%s3958_s3 + $0x78] sm:$0xff] }
 0x120   :  { %v94_v57 = vadd.f32 1e-05, %v90_v56 }
 0x121   :  { %v83_v58 = vpop.xlane.xlu1 %82  ;;  %v86_v59 = vpop.xlane.xlu0 %85 }
 0x122   :  { %2882 = vrsqrt.f32 %v94_v57  ;;  %v91_v60 = vmul.f32 0.015625, %v83_v58  ;;  %v92_v61 = vmul.f32 0.015625, %v86_v59 }
 0x124   :  { %v95_v62 = vadd.f32 1e-05, %v91_v60  ;;  %v96_v63 = vadd.f32 1e-05, %v92_v61  ;;  %v2338_v61 = vld [vmem:[%s3961_s4 + $0x8] ss:$0 sm:$0xff] }
 0x125   :  { %v89_v0 = vpop.xlane.xlu1 %88 }
 0x126   :  { %2884 = vrsqrt.f32 %v95_v62  ;;  %v93_v1 = vmul.f32 0.015625, %v89_v0 }
 0x127   :  { %2886 = vrsqrt.f32 %v96_v63 }
 0x128   :  { %v97_v2 = vadd.f32 1e-05, %v93_v1 }
 0x12a   :  { %2888 = vrsqrt.f32 %v97_v2 }
 0x12f   :  { %v2883_v3 = vpop.eup %2882 }
 0x130   :  { %v102_v4 = vmul.f32 %v2883_v3, %v3074_v12 }
 0x132   :  { %v113_v8 = vmul.f32 %v2312_v5, %v102_v4  ;;  %v2349_v4 = vld [vmem:[%s3958_s3 + $0x60] sm:$0xff] }
 0x133   :  { %v2885_v6 = vpop.eup %2884 }
 0x134   :  { %v2887_v7 = vpop.eup %2886  ;;  %v103_v9 = vmul.f32 %v2885_v6, %v3082_v20  ;;  %v124_v16 = vadd.f32 %v2313_v10, %v113_v8  ;;  %v2333_v20 = vld [vmem:[%s3958_s3 + $0x220] sm:$0xff] }
 0x135   :  { %v104_v11 = vmul.f32 %v2887_v7, %v3076_v13  ;;  %v289_v25 = vpack.c.bf16 %v2334_v23, %v2333_v20  ;;  %v2375_v20 = vld [vmem:[%s3958_s3 + $0x270] sm:$0xff]  ;;  %v2376_v23 = vld [vmem:[%s3958_s3 + $0x278] sm:$0xff] }
 0x136   :  { %v114_v14 = vmul.f32 %v2312_v5, %v103_v9 }
 0x137   :  { %v2889_v15 = vpop.eup %2888  ;;  %v115_v12 = vmul.f32 %v2312_v5, %v104_v11 }
 0x138   :  { %v125_v17 = vadd.f32 %v2313_v10, %v114_v14  ;;  %v105_v18 = vmul.f32 %v2889_v15, %v3084_v21  ;;  %v2347_v14 = vld [vmem:[%s3958_s3 + $0x50] sm:$0xff]  ;;  %v2348_v15 = vld [vmem:[%s3958_s3 + $0x58] sm:$0xff] }
 0x139   :  { %v126_v24 = vadd.f32 %v2313_v10, %v115_v12  ;;  %v2345_v12 = vld [vmem:[%s3958_s3 + $0x40] sm:$0xff] }
 0x13a   :  { %v3158_v19 = vpack.c.bf16 %v125_v17, %v124_v16  ;;  %v116_v22 = vmul.f32 %v2312_v5, %v105_v18  ;;  %v2350_v5 = vld [vmem:[%s3958_s3 + $0x68] sm:$0xff]  ;;  %v537_v17 = vpack.c.bf16 %v2348_v15, %v2347_v14 }
 0x13b   :  { %v538_v11 = vpack.c.bf16 %v2350_v5, %v2349_v4  ;;  %v2346_v18 = vld [vmem:[%s3958_s3 + $0x48] sm:$0xff] }
 0x13c   :  { %v127_v13 = vadd.f32 %v2313_v10, %v116_v22  ;;  %2649 = vmatprep.mubr.msk.bf16.mxu0 %vm52_vm0, %v3158_v19  ;;  %2661 = vmatprep.mubr.msk.bf16.mxu1 %vm52_vm0, %v3158_v19  ;;  %v536_v22 = vpack.c.bf16 %v2346_v18, %v2345_v12 }
 0x13e   :  { %v3170_v21 = vpack.c.bf16 %v127_v13, %v126_v24  ;;  %v683_v24 = vpack.c.bf16 %v2376_v23, %v2375_v20  ;;  %v2373_v13 = vld [vmem:[%s3958_s3 + $0x260] sm:$0xff] }
 0x140   :  { %2650 = vmatmul.mubr.msk.bf16.vlgmr.msra.gmra.mxu0 %vm52_vm0, %v3170_v21  ;;  %2662 = vmatmul.mubr.msk.bf16.vlgmr.msra.gmra.mxu1 %vm52_vm0, %v3170_v21 }
 0x141   :  { %2666 = vmatpush3.bf16.msra.mxu0 %v290_v54  ;;  %2673 = vmatprep.mubr.msk.bf16.mxu0 %vm52_vm0, %v3158_v19  ;;  %v2351_v54 = vld [vmem:[%s3958_s3 + $0x70] sm:$0xff] }
 0x142   :  { %2667 = vmatprep.subr.bf16.mxu0 %v289_v25  ;;  %v539_v57 = vpack.c.bf16 %v2352_v55, %v2351_v54 }
 0x145   :  { %2668 = vmatpush3.bf16.msra.mxu0 %v289_v25  ;;  %v2374_v25 = vld [vmem:[%s3958_s3 + $0x268] sm:$0xff] }
 0x146   :  { %2669 = vmatprep.subr.bf16.mxu0 %v288_v28  ;;  %v682_v26 = vpack.c.bf16 %v2374_v25, %v2373_v13 }
 0x149   :  { %2670 = vmatpush3.bf16.msra.mxu0 %v288_v28  ;;  %v2372_v28 = vld [vmem:[%s3958_s3 + $0x258] sm:$0xff] }
 0x14a   :  { %2671 = vmatprep.subr.bf16.mxu0 %v287_v31  ;;  %v681_v29 = vpack.c.bf16 %v2372_v28, %v2371_v27 }
 0x14d   :  { %2672 = vmatpush3.bf16.msra.mxu0 %v287_v31  ;;  %v2370_v31 = vld [vmem:[%s3958_s3 + $0x248] sm:$0xff] }
 0x150   :  { %2674 = vmatmul.mubr.msk.bf16.vlgmr.msra.gmra.mxu0 %vm52_vm0, %v3170_v21 }
 0x200   :  { %v2651_v32 = vpop.f32.mrf.mxu0  ;;  %v2663_v33 = vpop.f32.mrf.mxu1 }
 0x201   :  { %v272_v40 = vadd.f32 %v2663_v33, %v2326_v34  ;;  %v198_v59 = vadd.f32 %v2651_v32, %v2314_v37  ;;  %v680_v32 = vpack.c.bf16 %v2370_v31, %v2369_v30  ;;  %v2361_v30 = vld [vmem:[%s3958_s3 + $0x160] sm:$0xff]  ;;  %v2362_v31 = vld [vmem:[%s3958_s3 + $0x168] sm:$0xff] }
 0x202   :  { %v189_v35 = vpop.f32.mrf.mxu0  ;;  %v263_v36 = vpop.f32.mrf.mxu1 }
 0x203   :  { %v190_v41 = vadd.f32 %v2314_v37, %v189_v35  ;;  %v264_v45 = vadd.f32 %v2326_v34, %v263_v36  ;;  %v206_v1 = vmul.f32 0.25, %v198_v59  ;;  %v354_v35 = vld [vmem:[%s3962_s5 + $0x10] sm:$0xff] }
 0x204   :  { %v2652_v38 = vpop.f32.mrf.mxu0  ;;  %v2664_v39 = vpop.f32.mrf.mxu1 }
 0x205   :  { %v275_v42 = vadd.f32 %v2664_v39, %v2326_v34  ;;  %v204_v49 = vmul.f32 0.25, %v190_v41  ;;  %v201_v56 = vadd.f32 %v2652_v38, %v2314_v37  ;;  %v353_v39 = vld [vmem:[%s3962_s5 + $0x8] sm:$0xff] }
 0x206   :  { %v192_v43 = vpop.f32.mrf.mxu0  ;;  %v266_v44 = vpop.f32.mrf.mxu1 }
 0x207   :  { %v351_v46 = vpack.c.bf16 %v275_v42, %v272_v40  ;;  %v193_v47 = vadd.f32 %v2314_v37, %v192_v43  ;;  %v267_v48 = vadd.f32 %v2326_v34, %v266_v44  ;;  %v207_v63 = vmul.f32 0.25, %v201_v56  ;;  %v352_v34 = vld [vmem:[%s3962_s5] sm:$0xff]  ;;  %v355_v42 = vld [vmem:[%s3962_s5 + $0x18] sm:$0xff] }
 0x209   :  { %v205_v50 = vmul.f32 0.25, %v193_v47  ;;  %v350_v51 = vpack.c.bf16 %v267_v48, %v264_v45  ;;  %2873 = vmatprep.subr.msk.bf16.mxu1 %vm356_vm1, %v351_v46  ;;  %v367_v52 = vsel %vm356_vm1, %v351_v46, 0  ;;  %v349_v7 = vpack.c.bf16 %v207_v63, %v206_v1 }
 0x20a   :  { %2678 = vmatpush3.bf16.xpose.msra.mxu1 %v367_v52 }
 0x20b   :  { %v348_v53 = vpack.c.bf16 %v205_v50, %v204_v49  ;;  %2874 = vmatprep.subr.msk.bf16.mxu1 %vm356_vm1, %v350_v51  ;;  %v364_v60 = vsel %vm356_vm1, %v350_v51, 0  ;;  %v3282_v49 = vld [vmem:[%s3961_s4 + $0x1] ss:$0 sm:$0xff] }
 0x20d   :  { %2681 = vmatprep.mubr.msk.bf16.mxu1 %vm356_vm1, %v348_v53 }
 0x210   :  { %v2675_v58 = vpop.f32.mrf.mxu0 }
 0x211   :  { %v342_v2 = vadd.f32 %v2675_v58, %v2338_v61 }
 0x212   :  { %v333_v62 = vpop.f32.mrf.mxu0  ;;  %2680 = vmatpush3.bf16.xpose.msra.mxu1 %v364_v60 }
 0x213   :  { %2693 = vmatprep.subr.bf16.mxu1 %v539_v57  ;;  %v334_v8 = vadd.f32 %v2338_v61, %v333_v62 }
 0x214   :  { %v2676_v0 = vpop.f32.mrf.mxu0 }
 0x215   :  { %v345_v3 = vadd.f32 %v2676_v0, %v2338_v61 }
 0x216   :  { %v336_v6 = vpop.f32.mrf.mxu0 }
 0x217   :  { %v466_v9 = vpack.c.bf16 %v345_v3, %v342_v2  ;;  %v337_v10 = vadd.f32 %v2338_v61, %v336_v6 }
 0x219   :  { %v465_v16 = vpack.c.bf16 %v337_v10, %v334_v8  ;;  %2685 = vmatprep.subr.bf16.mxu0 %v466_v9  ;;  %2682 = vmatmul.mubr.msk.bf16.vlgmr.msra.gmra.mxu1 %vm356_vm1, %v349_v7 }
 0x21a   :  { %2686 = vmatpush3.bf16.msra.mxu0 %v466_v9  ;;  %2694 = vmatpush3.bf16.msra.mxu1 %v539_v57 }
 0x21b   :  { %2687 = vmatprep.subr.bf16.mxu0 %v465_v16  ;;  %2701 = vmatprep.mubr.msk.bf16.mxu1 %vm52_vm0, %v3158_v19 }
 0x21c   :  { %2695 = vmatprep.subr.bf16.mxu1 %v538_v11 }
 0x21e   :  { %2688 = vmatpush3.bf16.msra.mxu0 %v465_v16  ;;  %2696 = vmatpush3.bf16.msra.mxu1 %v538_v11  ;;  %v2363_v16 = vld [vmem:[%s3958_s3 + $0x170] sm:$0xff] }
 0x21f   :  { %2697 = vmatprep.subr.bf16.mxu1 %v537_v17 }
 0x222   :  { %2698 = vmatpush3.bf16.msra.mxu1 %v537_v17  ;;  %v2364_v17 = vld [vmem:[%s3958_s3 + $0x178] sm:$0xff] }
 0x223   :  { %2699 = vmatprep.subr.bf16.mxu1 %v536_v22  ;;  %v613_v12 = vpack.c.bf16 %v2364_v17, %v2363_v16 }
 0x225   :  { %2705 = vmatprep.subr.bf16.mxu0 %v613_v12 }
 0x226   :  { %2700 = vmatpush3.bf16.msra.mxu1 %v536_v22 }
 0x227   :  { %2717 = vmatprep.subr.bf16.mxu1 %v683_v24 }
 0x229   :  { %2702 = vmatmul.mubr.msk.bf16.vlgmr.msra.gmra.mxu1 %vm52_vm0, %v3170_v21 }
 0x22a   :  { %2718 = vmatpush3.bf16.msra.mxu1 %v683_v24  ;;  %2725 = vmatprep.mubr.msk.bf16.mxu1 %vm52_vm0, %v3158_v19 }
 0x22b   :  { %2719 = vmatprep.subr.bf16.mxu1 %v682_v26 }
 0x22e   :  { %2720 = vmatpush3.bf16.msra.mxu1 %v682_v26 }
 0x22f   :  { %2721 = vmatprep.subr.bf16.mxu1 %v681_v29 }
 0x232   :  { %2722 = vmatpush3.bf16.msra.mxu1 %v681_v29 }
 0x233   :  { %2723 = vmatprep.subr.bf16.mxu1 %v680_v32 }
 0x236   :  { %2724 = vmatpush3.bf16.msra.mxu1 %v680_v32 }
 0x239   :  { %2726 = vmatmul.mubr.msk.bf16.vlgmr.msra.gmra.mxu1 %vm52_vm0, %v3170_v21 }
 0x2d9   :  { %v2683_v33 = vpop.f32.mrf.mxu1 }
 0x2da   :  { %v412_v40 = vadd.f32 %v2683_v33, %v354_v35  ;;  %v612_v35 = vpack.c.bf16 %v2362_v31, %v2361_v30 }
 0x2db   :  { %v403_v36 = vpop.f32.mrf.mxu1 }
 0x2dc   :  { %v404_v37 = vadd.f32 %v403_v36, %v352_v34  ;;  %v425_v47 = vsel %vm418_vm2, %v412_v40, -inf  ;;  %v2359_v36 = vld [vmem:[%s3958_s3 + $0x150] sm:$0xff] }
 0x2dd   :  { %v2684_v38 = vpop.f32.mrf.mxu1 }
 0x2de   :  { %v419_v41 = vsel %vm418_vm2, %v404_v37, -inf  ;;  %v415_v45 = vadd.f32 %v2684_v38, %v355_v42 }
 0x2df   :  { %v406_v43 = vpop.f32.mrf.mxu1  ;;  %420 = vmax.xlane.f32.xlu0 %v419_v41 }
 0x2e0   :  { %v407_v44 = vadd.f32 %v406_v43, %v353_v39  ;;  %v428_v48 = vsel %vm418_vm2, %v415_v45, -inf  ;;  %v2357_v39 = vld [vmem:[%s3958_s3 + $0x140] sm:$0xff] }
 0x2e2   :  { %v422_v46 = vsel %vm418_vm2, %v407_v44, -inf }
 0x2e3   :  { %423 = vmax.xlane.f32.xlu1 %v422_v46  ;;  %426 = vmax.xlane.f32.xlu0 %v425_v47 }
 0x2e7   :  { %429 = vmax.xlane.f32.xlu1 %v428_v48  ;;  %v522_v48 = vld [vmem:[%s3963_s6] sm:$0xff] }
 0x2e9   :  { %v2703_v50 = vpop.f32.mrf.mxu1 }
 0x2ea   :  { %v591_v51 = vadd.f32 %v2703_v50, %v3282_v49  ;;  %v523_v50 = vld [vmem:[%s3963_s6 + $0x8] sm:$0xff] }
 0x2eb   :  { %v3285_v52 = vpop.f32.mrf.mxu1 }
 0x2ec   :  { %v3288_v55 = vmul.f32 0.25, %v591_v51  ;;  %v2413_v51 = vld [vmem:[%s3958_s3 + $0x1b0] sm:$0xff] }
 0x2ed   :  { %v2704_v53 = vpop.f32.mrf.mxu1 }
 0x2ee   :  { %v594_v54 = vadd.f32 %v2704_v53, %v3282_v49 }
 0x2ef   :  { %v585_v41 = vpop.f32.mrf.mxu1 }
 0x2f0   :  { %v3290_v56 = vmul.f32 0.25, %v594_v54  ;;  %v586_v43 = vadd.f32 %v3282_v49, %v585_v41 }
 0x2f2   :  { %v742_v57 = vpack.c.bf16 %v3290_v56, %v3288_v55 }
 0x368   :  { %v421_v58 = vpop.xlane.xlu0 %420 }
 0x369   :  { %v431_v59 = vsub.f32 %v404_v37, %v421_v58  ;;  %v2360_v37 = vld [vmem:[%s3958_s3 + $0x158] sm:$0xff] }
 0x36a   :  { %v611_v38 = vpack.c.bf16 %v2360_v37, %v2359_v36 }
 0x36b   :  { %v435_v60 = vmul.f32 1.442695, %v431_v59 }
 0x36c   :  { %v424_v61 = vpop.xlane.xlu1 %423  ;;  %v427_v62 = vpop.xlane.xlu0 %426 }
 0x36d   :  { %2890 = vpow2.f32 %v435_v60  ;;  %v432_v63 = vsub.f32 %v407_v44, %v424_v61  ;;  %v433_v0 = vsub.f32 %v412_v40, %v427_v62  ;;  %v2358_v40 = vld [vmem:[%s3958_s3 + $0x148] sm:$0xff]  ;;  %v583_v44 = vadd.f32 %v3282_v49, %v3285_v52  ;;  %v2414_v52 = vld [vmem:[%s3958_s3 + $0x1b8] sm:$0xff]  ;;  %v2411_v60 = vld [vmem:[%s3958_s3 + $0x1a0] sm:$0xff] }
 0x36e   :  { %v610_v42 = vpack.c.bf16 %v2358_v40, %v2357_v39  ;;  %v526_v49 = vpack.c.bf16 %v523_v50, %v522_v48  ;;  %v1116_v53 = vpack.c.bf16 %v2414_v52, %v2413_v51  ;;  %v2412_v61 = vld [vmem:[%s3958_s3 + $0x1a8] sm:$0xff]  ;;  %v2416_v39 = vld [vmem:[%s3961_s4 + $0x6] ss:$0 sm:$0xff]  ;;  %v2383_v50 = vld [vmem:[%s3962_s5 + $0x30] sm:$0xff] }
 0x36f   :  { %v437_v1 = vmul.f32 1.442695, %v432_v63  ;;  %v439_v2 = vmul.f32 1.442695, %v433_v0  ;;  %v597_v46 = vmul.f32 0.25, %v583_v44  ;;  %v2381_v48 = vld [vmem:[%s3962_s5 + $0x20] sm:$0xff] }
 0x370   :  { %v430_v3 = vpop.xlane.xlu1 %429  ;;  %2751 = vmatprep.subr.bf16.mxu1 %v526_v49 }
 0x371   :  { %2892 = vpow2.f32 %v437_v1  ;;  %v434_v4 = vsub.f32 %v415_v45, %v430_v3  ;;  %v598_v45 = vmul.f32 0.25, %v586_v43  ;;  %2752 = vmatpush3.bf16.msra.mxu1 %v526_v49  ;;  %v1115_v1 = vpack.c.bf16 %v2412_v61, %v2411_v60  ;;  %v2410_v3 = vld [vmem:[%s3958_s3 + $0x198] sm:$0xff] }
 0x372   :  { %2894 = vpow2.f32 %v439_v2  ;;  %2769 = vmatprep.subr.bf16.mxu1 %v1116_v53  ;;  %v2409_v2 = vld [vmem:[%s3958_s3 + $0x190] sm:$0xff]  ;;  %v2384_v60 = vld [vmem:[%s3962_s5 + $0x38] sm:$0xff] }
 0x373   :  { %v441_v5 = vmul.f32 1.442695, %v434_v4  ;;  %v741_v47 = vpack.c.bf16 %v598_v45, %v597_v46  ;;  %v1114_v4 = vpack.c.bf16 %v2410_v3, %v2409_v2 }
 0x375   :  { %2896 = vpow2.f32 %v441_v5  ;;  %v2407_v5 = vld [vmem:[%s3958_s3 + $0x180] sm:$0xff] }
 0x37a   :  { %v2891_v6 = vpop.eup %2890 }
 0x37b   :  { %v443_v7 = vsel %vm418_vm2, %v2891_v6, 0.0 }
 0x37c   :  { %444 = vadd.xlane.f32.xlu0 %v443_v7 }
 0x37e   :  { %v2893_v8 = vpop.eup %2892 }
 0x37f   :  { %v2895_v9 = vpop.eup %2894  ;;  %v446_v10 = vsel %vm418_vm2, %v2893_v8, 0.0 }
 0x380   :  { %447 = vadd.xlane.f32.xlu1 %v446_v10  ;;  %v449_v11 = vsel %vm418_vm2, %v2895_v9, 0.0  ;;  %v2366_v10 = vld [vmem:[%s3961_s4 + $0x5] ss:$0 sm:$0xff] }
 0x381   :  { %450 = vadd.xlane.f32.xlu0 %v449_v11 }
 0x382   :  { %v2897_v14 = vpop.eup %2896 }
 0x383   :  { %v452_v15 = vsel %vm418_vm2, %v2897_v14, 0.0 }
 0x384   :  { %453 = vadd.xlane.f32.xlu1 %v452_v15 }
 0x405   :  { %v445_v18 = vpop.xlane.xlu0 %444 }
 0x406   :  { %2898 = vrcp.f32 %v445_v18 }
 0x409   :  { %v448_v22 = vpop.xlane.xlu1 %447 }
 0x40a   :  { %2900 = vrcp.f32 %v448_v22  ;;  %v451_v20 = vpop.xlane.xlu0 %450 }
 0x40b   :  { %2902 = vrcp.f32 %v451_v20 }
 0x40d   :  { %v454_v23 = vpop.xlane.xlu1 %453 }
 0x40e   :  { %2904 = vrcp.f32 %v454_v23 }
 0x413   :  { %v2899_v24 = vpop.eup %2898 }
 0x414   :  { %v459_v25 = vmul.f32 %v2899_v24, %v2891_v6  ;;  %v2408_v6 = vld [vmem:[%s3958_s3 + $0x188] sm:$0xff] }
 0x417   :  { %v2901_v13 = vpop.eup %2900 }
 0x418   :  { %v460_v26 = vmul.f32 %v2901_v13, %v2893_v8  ;;  %v2903_v27 = vpop.eup %2902  ;;  %v1113_v8 = vpack.c.bf16 %v2408_v6, %v2407_v5 }
 0x419   :  { %v461_v32 = vmul.f32 %v2903_v27, %v2895_v9  ;;  %v2727_v9 = vpop.f32.mrf.mxu1 }
 0x41a   :  { %v463_v28 = vpack.c.bf16 %v460_v26, %v459_v25  ;;  %v2378_v25 = vld [vmem:[%s3961_s4 + $0x9] ss:$0 sm:$0xff] }
 0x41b   :  { %v2905_v29 = vpop.eup %2904  ;;  %v726_v17 = vpop.f32.mrf.mxu1  ;;  %v735_v27 = vadd.f32 %v2727_v9, %v2378_v25 }
 0x41c   :  { %2689 = vmatprep.mubr.msk.bf16.mxu0 %vm418_vm2, %v463_v28  ;;  %v462_v33 = vmul.f32 %v2905_v29, %v2897_v14 }
 0x41d   :  { %v2728_v13 = vpop.f32.mrf.mxu1 }
 0x41e   :  { %v464_v34 = vpack.c.bf16 %v462_v33, %v461_v32  ;;  %v738_v26 = vadd.f32 %v2728_v13, %v2378_v25  ;;  %v727_v32 = vadd.f32 %v2378_v25, %v726_v17 }
 0x41f   :  { %v729_v30 = vpop.f32.mrf.mxu1 }
 0x420   :  { %2690 = vmatmul.mubr.msk.bf16.vlgmr.msra.gmra.mxu0 %vm418_vm2, %v464_v34  ;;  %v858_v28 = vpack.c.bf16 %v738_v26, %v735_v27  ;;  %v730_v31 = vadd.f32 %v2378_v25, %v729_v30 }
 0x421   :  { %2706 = vmatpush3.bf16.msra.mxu0 %v613_v12  ;;  %2713 = vmatprep.mubr.msk.bf16.mxu0 %vm52_vm0, %v3158_v19 }
 0x422   :  { %2707 = vmatprep.subr.bf16.mxu0 %v612_v35  ;;  %v857_v33 = vpack.c.bf16 %v730_v31, %v727_v32 }
 0x425   :  { %2708 = vmatpush3.bf16.msra.mxu0 %v612_v35 }
 0x426   :  { %2709 = vmatprep.subr.bf16.mxu0 %v611_v38 }
 0x429   :  { %2710 = vmatpush3.bf16.msra.mxu0 %v611_v38 }
 0x42a   :  { %2711 = vmatprep.subr.bf16.mxu0 %v610_v42 }
 0x42d   :  { %2712 = vmatpush3.bf16.msra.mxu0 %v610_v42 }
 0x430   :  { %2714 = vmatmul.mubr.msk.bf16.vlgmr.msra.gmra.mxu0 %vm52_vm0, %v3170_v21 }
 0x431   :  { %2733 = vmatprep.mubr.msk.bf16.mxu0 %vm356_vm1, %v741_v47 }
 0x4e0   :  { %v2691_v54 = vpop.f32.mrf.mxu0 }
 0x4e2   :  { %v507_v58 = vpop.f32.mrf.mxu0 }
 0x4e4   :  { %v2692_v59 = vpop.f32.mrf.mxu0 }
 0x4e5   :  { %v525_v0 = vpack.c.bf16 %v2692_v59, %v2691_v54  ;;  %v2382_v54 = vld [vmem:[%s3962_s5 + $0x28] sm:$0xff] }
 0x4e6   :  { %v510_v62 = vpop.f32.mrf.mxu0 }
 0x4e7   :  { %v524_v63 = vpack.c.bf16 %v510_v62, %v507_v58 }
 0x4e9   :  { %2753 = vmatprep.mubr.msk.bf16.mxu1 %vm356_vm1, %v524_v63 }
 0x4ea   :  { %2754 = vmatmul.mubr.msk.bf16.vlgmr.msra.gmra.mxu1 %vm356_vm1, %v525_v0 }
 0x4eb   :  { %2770 = vmatpush3.bf16.msra.mxu1 %v1116_v53  ;;  %2777 = vmatprep.mubr.msk.bf16.mxu1 %vm52_vm0, %v3158_v19 }
 0x4ec   :  { %2771 = vmatprep.subr.bf16.mxu1 %v1115_v1 }
 0x4ef   :  { %2772 = vmatpush3.bf16.msra.mxu1 %v1115_v1 }
 0x4f0   :  { %v2715_v7 = vpop.f32.mrf.mxu0  ;;  %2773 = vmatprep.subr.bf16.mxu1 %v1114_v4 }
 0x4f1   :  { %v665_v15 = vadd.f32 %v2715_v7, %v2366_v10 }
 0x4f2   :  { %v656_v11 = vpop.f32.mrf.mxu0 }
 0x4f3   :  { %2774 = vmatpush3.bf16.msra.mxu1 %v1114_v4  ;;  %v657_v18 = vadd.f32 %v2366_v10, %v656_v11 }
 0x4f4   :  { %v2716_v14 = vpop.f32.mrf.mxu0  ;;  %2775 = vmatprep.subr.bf16.mxu1 %v1113_v8 }
 0x4f5   :  { %v668_v16 = vadd.f32 %v2716_v14, %v2366_v10 }
 0x4f6   :  { %v659_v12 = vpop.f32.mrf.mxu0 }
 0x4f7   :  { %v744_v22 = vpack.c.bf16 %v668_v16, %v665_v15  ;;  %v660_v20 = vadd.f32 %v2366_v10, %v659_v12  ;;  %2776 = vmatpush3.bf16.msra.mxu1 %v1113_v8 }
 0x4f9   :  { %v743_v23 = vpack.c.bf16 %v660_v20, %v657_v18  ;;  %2875 = vmatprep.subr.msk.bf16.mxu0 %vm356_vm1, %v744_v22  ;;  %v760_v24 = vsel %vm356_vm1, %v744_v22, 0 }
 0x4fa   :  { %2730 = vmatpush3.bf16.xpose.msra.mxu0 %v760_v24  ;;  %2778 = vmatmul.mubr.msk.bf16.vlgmr.msra.gmra.mxu1 %vm52_vm0, %v3170_v21 }
 0x4fb   :  { %2876 = vmatprep.subr.msk.bf16.mxu0 %vm356_vm1, %v743_v23  ;;  %v757_v29 = vsel %vm356_vm1, %v743_v23, 0 }
 0x502   :  { %2732 = vmatpush3.bf16.xpose.msra.mxu0 %v757_v29 }
 0x503   :  { %2737 = vmatprep.subr.bf16.mxu0 %v858_v28 }
 0x509   :  { %2734 = vmatmul.mubr.msk.bf16.vlgmr.msra.gmra.mxu0 %vm356_vm1, %v742_v57 }
 0x50a   :  { %2738 = vmatpush3.bf16.msra.mxu0 %v858_v28 }
 0x50b   :  { %2739 = vmatprep.subr.bf16.mxu0 %v857_v33 }
 0x50e   :  { %2740 = vmatpush3.bf16.msra.mxu0 %v857_v33 }
 0x5aa   :  { %v3382_v34 = vpop.f32.mrf.mxu1 }
 0x5ac   :  { %v3384_v35 = vpop.f32.mrf.mxu1 }
 0x5ae   :  { %v3386_v36 = vpop.f32.mrf.mxu1 }
 0x5b0   :  { %v3388_v37 = vpop.f32.mrf.mxu1 }
 0x5ba   :  { %v2779_v38 = vpop.f32.mrf.mxu1 }
 0x5bb   :  { %v1168_v56 = vadd.f32 %v2779_v38, %v2416_v39 }
 0x5bc   :  { %v1159_v40 = vpop.f32.mrf.mxu1 }
 0x5bd   :  { %v1160_v42 = vadd.f32 %v2416_v39, %v1159_v40 }
 0x5be   :  { %v2780_v55 = vpop.f32.mrf.mxu1 }
 0x5bf   :  { %v1171_v57 = vadd.f32 %v2780_v55, %v2416_v39 }
 0x5c0   :  { %v1162_v41 = vpop.f32.mrf.mxu1 }
 0x5c1   :  { %v1247_v43 = vpack.c.bf16 %v1171_v57, %v1168_v56  ;;  %v1163_v44 = vadd.f32 %v2416_v39, %v1162_v41  ;;  %v2389_v57 = vld [vmem:[%s3963_s6 + $0x10] sm:$0xff]  ;;  %v2390_v41 = vld [vmem:[%s3963_s6 + $0x18] sm:$0xff] }
 0x5c3   :  { %v1246_v45 = vpack.c.bf16 %v1163_v44, %v1160_v42  ;;  %2877 = vmatprep.subr.msk.bf16.mxu1 %vm356_vm1, %v1247_v43  ;;  %v1263_v46 = vsel %vm356_vm1, %v1247_v43, 0  ;;  %v919_v42 = vpack.c.bf16 %v2390_v41, %v2389_v57  ;;  %v2401_v43 = vld [vmem:[%s3958_s3 + $0xb0] sm:$0xff]  ;;  %v2402_v44 = vld [vmem:[%s3958_s3 + $0xb8] sm:$0xff] }
 0x5c4   :  { %2794 = vmatpush3.bf16.xpose.msra.mxu1 %v1263_v46 }
 0x5c5   :  { %2878 = vmatprep.subr.msk.bf16.mxu1 %vm356_vm1, %v1246_v45  ;;  %v1260_v51 = vsel %vm356_vm1, %v1246_v45, 0  ;;  %2745 = vmatprep.subr.bf16.mxu0 %v919_v42  ;;  %v1042_v45 = vpack.c.bf16 %v2402_v44, %v2401_v43 }
 0x5c9   :  { %v2735_v47 = vpop.f32.mrf.mxu0 }
 0x5ca   :  { %v805_v58 = vadd.f32 %v2735_v47, %v2383_v50  ;;  %v2399_v50 = vld [vmem:[%s3958_s3 + $0xa0] sm:$0xff] }
 0x5cb   :  { %v796_v49 = vpop.f32.mrf.mxu0 }
 0x5cc   :  { %v797_v52 = vadd.f32 %v2381_v48, %v796_v49  ;;  %2796 = vmatpush3.bf16.xpose.msra.mxu1 %v1260_v51  ;;  %v817_v1 = vsel %vm418_vm2, %v805_v58, -inf  ;;  %v2400_v49 = vld [vmem:[%s3958_s3 + $0xa8] sm:$0xff] }
 0x5cd   :  { %v2736_v53 = vpop.f32.mrf.mxu0 }
 0x5ce   :  { %v811_v59 = vsel %vm418_vm2, %v797_v52, -inf  ;;  %v808_v63 = vadd.f32 %v2736_v53, %v2384_v60 }
 0x5cf   :  { %v799_v61 = vpop.f32.mrf.mxu0  ;;  %812 = vmax.xlane.f32.xlu0 %v811_v59  ;;  %v2398_v59 = vld [vmem:[%s3958_s3 + $0x98] sm:$0xff] }
 0x5d0   :  { %v800_v62 = vadd.f32 %v2382_v54, %v799_v61  ;;  %v820_v2 = vsel %vm418_vm2, %v808_v63, -inf  ;;  %v1041_v54 = vpack.c.bf16 %v2400_v49, %v2399_v50  ;;  %v2395_v61 = vld [vmem:[%s3958_s3 + $0x80] sm:$0xff] }
 0x5d2   :  { %v814_v0 = vsel %vm418_vm2, %v800_v62, -inf }
 0x5d3   :  { %815 = vmax.xlane.f32.xlu1 %v814_v0  ;;  %818 = vmax.xlane.f32.xlu0 %v817_v1  ;;  %v2425_v0 = vld [vmem:[%s3958_s3 + $0x2b0] sm:$0xff]  ;;  %v2426_v1 = vld [vmem:[%s3958_s3 + $0x2b8] sm:$0xff] }
 0x5d7   :  { %821 = vmax.xlane.f32.xlu1 %v820_v2  ;;  %v1186_v2 = vpack.c.bf16 %v2426_v1, %v2425_v0 }
 0x658   :  { %v813_v3 = vpop.xlane.xlu0 %812 }
 0x659   :  { %v823_v4 = vsub.f32 %v797_v52, %v813_v3  ;;  %v2423_v3 = vld [vmem:[%s3958_s3 + $0x2a0] sm:$0xff] }
 0x65b   :  { %v827_v5 = vmul.f32 1.442695, %v823_v4  ;;  %v2424_v4 = vld [vmem:[%s3958_s3 + $0x2a8] sm:$0xff] }
 0x65c   :  { %v816_v6 = vpop.xlane.xlu1 %815  ;;  %v819_v7 = vpop.xlane.xlu0 %818 }
 0x65d   :  { %2906 = vpow2.f32 %v827_v5  ;;  %v824_v8 = vsub.f32 %v800_v62, %v816_v6  ;;  %v825_v9 = vsub.f32 %v805_v58, %v819_v7  ;;  %v2397_v58 = vld [vmem:[%s3958_s3 + $0x90] sm:$0xff]  ;;  %v2396_v62 = vld [vmem:[%s3958_s3 + $0x88] sm:$0xff]  ;;  %v1185_v5 = vpack.c.bf16 %v2424_v4, %v2423_v3  ;;  %v2422_v7 = vld [vmem:[%s3958_s3 + $0x298] sm:$0xff] }
 0x65e   :  { %v1040_v60 = vpack.c.bf16 %v2398_v59, %v2397_v58  ;;  %v2421_v6 = vld [vmem:[%s3958_s3 + $0x290] sm:$0xff] }
 0x65f   :  { %v829_v10 = vmul.f32 1.442695, %v824_v8  ;;  %v831_v11 = vmul.f32 1.442695, %v825_v9  ;;  %v1184_v8 = vpack.c.bf16 %v2422_v7, %v2421_v6  ;;  %v2419_v9 = vld [vmem:[%s3958_s3 + $0x280] sm:$0xff] }
 0x660   :  { %v822_v14 = vpop.xlane.xlu1 %821 }
 0x661   :  { %2908 = vpow2.f32 %v829_v10  ;;  %v826_v15 = vsub.f32 %v808_v63, %v822_v14  ;;  %v1039_v63 = vpack.c.bf16 %v2396_v62, %v2395_v61  ;;  %v2420_v10 = vld [vmem:[%s3958_s3 + $0x288] sm:$0xff] }
 0x662   :  { %2910 = vpow2.f32 %v831_v11  ;;  %v1183_v11 = vpack.c.bf16 %v2420_v10, %v2419_v9 }
 0x663   :  { %v833_v16 = vmul.f32 1.442695, %v826_v15 }
 0x665   :  { %2912 = vpow2.f32 %v833_v16 }
 0x66a   :  { %v2907_v17 = vpop.eup %2906 }
 0x66b   :  { %v835_v12 = vsel %vm418_vm2, %v2907_v17, 0.0 }
 0x66c   :  { %836 = vadd.xlane.f32.xlu0 %v835_v12 }
 0x66e   :  { %v2909_v18 = vpop.eup %2908 }
 0x66f   :  { %v2911_v22 = vpop.eup %2910  ;;  %v838_v20 = vsel %vm418_vm2, %v2909_v18, 0.0 }
 0x670   :  { %839 = vadd.xlane.f32.xlu1 %v838_v20  ;;  %v841_v23 = vsel %vm418_vm2, %v2911_v22, 0.0 }
 0x671   :  { %842 = vadd.xlane.f32.xlu0 %v841_v23 }
 0x672   :  { %v2913_v24 = vpop.eup %2912 }
 0x673   :  { %v844_v13 = vsel %vm418_vm2, %v2913_v24, 0.0 }
 0x674   :  { %845 = vadd.xlane.f32.xlu1 %v844_v13 }
 0x6f5   :  { %v837_v25 = vpop.xlane.xlu0 %836 }
 0x6f6   :  { %2914 = vrcp.f32 %v837_v25 }
 0x6f9   :  { %v840_v26 = vpop.xlane.xlu1 %839 }
 0x6fa   :  { %2916 = vrcp.f32 %v840_v26  ;;  %v843_v27 = vpop.xlane.xlu0 %842 }
 0x6fb   :  { %2918 = vrcp.f32 %v843_v27 }
 0x6fd   :  { %v846_v28 = vpop.xlane.xlu1 %845 }
 0x6fe   :  { %2920 = vrcp.f32 %v846_v28 }
 0x703   :  { %v2915_v29 = vpop.eup %2914 }
 0x704   :  { %v851_v31 = vmul.f32 %v2915_v29, %v2907_v17 }
 0x707   :  { %v2917_v30 = vpop.eup %2916 }
 0x708   :  { %v852_v32 = vmul.f32 %v2917_v30, %v2909_v18  ;;  %v2919_v33 = vpop.eup %2918 }
 0x709   :  { %v853_v40 = vmul.f32 %v2919_v33, %v2911_v22  ;;  %v2404_v22 = vld [vmem:[%s3961_s4 + $0x2] ss:$0 sm:$0xff] }
 0x70a   :  { %v855_v38 = vpack.c.bf16 %v852_v32, %v851_v31 }
 0x70b   :  { %v2921_v39 = vpop.eup %2920 }
 0x70c   :  { %2741 = vmatprep.mubr.msk.bf16.mxu0 %vm418_vm2, %v855_v38  ;;  %v854_v55 = vmul.f32 %v2921_v39, %v2913_v24  ;;  %v2428_v38 = vld [vmem:[%s3961_s4 + $0xa] ss:$0 sm:$0xff] }
 0x70e   :  { %v856_v56 = vpack.c.bf16 %v854_v55, %v853_v40 }
 0x710   :  { %2742 = vmatmul.mubr.msk.bf16.vlgmr.msra.gmra.mxu0 %vm418_vm2, %v856_v56 }
 0x711   :  { %2746 = vmatpush3.bf16.msra.mxu0 %v919_v42 }
 0x712   :  { %2757 = vmatprep.subr.bf16.mxu0 %v1042_v45 }
 0x7d0   :  { %v2743_v46 = vpop.f32.mrf.mxu0 }
 0x7d2   :  { %v899_v47 = vpop.f32.mrf.mxu0 }
 0x7d4   :  { %v2744_v48 = vpop.f32.mrf.mxu0 }
 0x7d5   :  { %v918_v53 = vpack.c.bf16 %v2744_v48, %v2743_v46  ;;  %v2431_v46 = vld [vmem:[%s3962_s5 + $0x40] sm:$0xff] }
 0x7d6   :  { %v902_v51 = vpop.f32.mrf.mxu0 }
 0x7d7   :  { %v917_v52 = vpack.c.bf16 %v902_v51, %v899_v47  ;;  %v2433_v47 = vld [vmem:[%s3962_s5 + $0x50] sm:$0xff]  ;;  %v2432_v51 = vld [vmem:[%s3962_s5 + $0x48] sm:$0xff] }
 0x7d9   :  { %2747 = vmatprep.mubr.msk.bf16.mxu0 %vm356_vm1, %v917_v52 }
 0x7da   :  { %2748 = vmatmul.mubr.msk.bf16.vlgmr.msra.gmra.mxu0 %vm356_vm1, %v918_v53 }
 0x7db   :  { %2758 = vmatpush3.bf16.msra.mxu0 %v1042_v45  ;;  %2765 = vmatprep.mubr.msk.bf16.mxu0 %vm52_vm0, %v3158_v19 }
 0x7dc   :  { %2759 = vmatprep.subr.bf16.mxu0 %v1041_v54 }
 0x7df   :  { %2760 = vmatpush3.bf16.msra.mxu0 %v1041_v54  ;;  %v2434_v54 = vld [vmem:[%s3962_s5 + $0x58] sm:$0xff] }
 0x7e0   :  { %2761 = vmatprep.subr.bf16.mxu0 %v1040_v60 }
 0x7e3   :  { %2762 = vmatpush3.bf16.msra.mxu0 %v1040_v60 }
 0x7e4   :  { %2763 = vmatprep.subr.bf16.mxu0 %v1039_v63 }
 0x7e7   :  { %2764 = vmatpush3.bf16.msra.mxu0 %v1039_v63 }
 0x7e8   :  { %2781 = vmatprep.subr.bf16.mxu0 %v1186_v2 }
 0x7ea   :  { %2766 = vmatmul.mubr.msk.bf16.vlgmr.msra.gmra.mxu0 %vm52_vm0, %v3170_v21 }
 0x7eb   :  { %2782 = vmatpush3.bf16.msra.mxu0 %v1186_v2  ;;  %2789 = vmatprep.mubr.msk.bf16.mxu0 %vm52_vm0, %v3158_v19 }
 0x7ec   :  { %2783 = vmatprep.subr.bf16.mxu0 %v1185_v5 }
 0x7ef   :  { %2784 = vmatpush3.bf16.msra.mxu0 %v1185_v5 }
 0x7f0   :  { %2785 = vmatprep.subr.bf16.mxu0 %v1184_v8 }
 0x7f3   :  { %2786 = vmatpush3.bf16.msra.mxu0 %v1184_v8 }
 0x7f4   :  { %2787 = vmatprep.subr.bf16.mxu0 %v1183_v11 }
 0x7f7   :  { %2788 = vmatpush3.bf16.msra.mxu0 %v1183_v11 }
 0x7fa   :  { %2790 = vmatmul.mubr.msk.bf16.vlgmr.msra.gmra.mxu0 %vm52_vm0, %v3170_v21 }
 0x89a   :  { %v3483_v14 = vpop.f32.mrf.mxu0 }
 0x89c   :  { %v3485_v15 = vpop.f32.mrf.mxu0 }
 0x89e   :  { %v3487_v16 = vpop.f32.mrf.mxu0 }
 0x8a0   :  { %v3489_v17 = vpop.f32.mrf.mxu0 }
 0x8aa   :  { %v2767_v12 = vpop.f32.mrf.mxu0 }
 0x8ab   :  { %v1094_v13 = vadd.f32 %v2767_v12, %v2404_v22 }
 0x8ac   :  { %v1085_v18 = vpop.f32.mrf.mxu0 }
 0x8ad   :  { %v1086_v23 = vadd.f32 %v2404_v22, %v1085_v18  ;;  %v1102_v30 = vmul.f32 0.25, %v1094_v13 }
 0x8ae   :  { %v2768_v20 = vpop.f32.mrf.mxu0 }
 0x8af   :  { %v1097_v24 = vadd.f32 %v2768_v20, %v2404_v22  ;;  %v1100_v28 = vmul.f32 0.25, %v1086_v23 }
 0x8b0   :  { %v1088_v25 = vpop.f32.mrf.mxu0 }
 0x8b1   :  { %v1089_v26 = vadd.f32 %v2404_v22, %v1088_v25  ;;  %v1103_v27 = vmul.f32 0.25, %v1097_v24 }
 0x8b3   :  { %v1101_v29 = vmul.f32 0.25, %v1089_v26  ;;  %v1245_v32 = vpack.c.bf16 %v1103_v27, %v1102_v30  ;;  %v2449_v26 = vld [vmem:[%s3958_s3 + $0xf0] sm:$0xff]  ;;  %v2450_v27 = vld [vmem:[%s3958_s3 + $0xf8] sm:$0xff] }
 0x8b5   :  { %v1244_v31 = vpack.c.bf16 %v1101_v29, %v1100_v28  ;;  %v1494_v28 = vpack.c.bf16 %v2450_v27, %v2449_v26  ;;  %v2458_v26 = vld [vmem:[%s3958_s3 + $0x1d8] sm:$0xff] }
 0x8b7   :  { %2797 = vmatprep.mubr.msk.bf16.mxu1 %vm356_vm1, %v1244_v31 }
 0x8b8   :  { %2798 = vmatmul.mubr.msk.bf16.vlgmr.msra.gmra.mxu1 %vm356_vm1, %v1245_v32 }
 0x8ba   :  { %v2791_v33 = vpop.f32.mrf.mxu0 }
 0x8bb   :  { %v1238_v55 = vadd.f32 %v2791_v33, %v2428_v38 }
 0x8bc   :  { %v1229_v39 = vpop.f32.mrf.mxu0 }
 0x8bd   :  { %v1230_v41 = vadd.f32 %v2428_v38, %v1229_v39 }
 0x8be   :  { %v2792_v40 = vpop.f32.mrf.mxu0 }
 0x8bf   :  { %v1241_v56 = vadd.f32 %v2792_v40, %v2428_v38 }
 0x8c0   :  { %v1232_v57 = vpop.f32.mrf.mxu0 }
 0x8c1   :  { %v1361_v42 = vpack.c.bf16 %v1241_v56, %v1238_v55  ;;  %v1233_v43 = vadd.f32 %v2428_v38, %v1232_v57 }
 0x8c3   :  { %v1360_v44 = vpack.c.bf16 %v1233_v43, %v1230_v41  ;;  %2801 = vmatprep.subr.bf16.mxu0 %v1361_v42  ;;  %v2447_v41 = vld [vmem:[%s3958_s3 + $0xe0] sm:$0xff] }
 0x8c4   :  { %2802 = vmatpush3.bf16.msra.mxu0 %v1361_v42  ;;  %v2448_v42 = vld [vmem:[%s3958_s3 + $0xe8] sm:$0xff] }
 0x8c5   :  { %2803 = vmatprep.subr.bf16.mxu0 %v1360_v44 }
 0x8c8   :  { %2804 = vmatpush3.bf16.msra.mxu0 %v1360_v44 }
 0x8c9   :  { %2815 = vmatprep.subr.bf16.mxu0 %v1494_v28 }
 0x978   :  { %v2799_v45 = vpop.f32.mrf.mxu1 }
 0x979   :  { %v1308_v52 = vadd.f32 %v2799_v45, %v2433_v47  ;;  %v2445_v47 = vld [vmem:[%s3958_s3 + $0xd0] sm:$0xff] }
 0x97a   :  { %v1299_v48 = vpop.f32.mrf.mxu1 }
 0x97b   :  { %v1300_v50 = vadd.f32 %v2431_v46, %v1299_v48  ;;  %v1320_v62 = vsel %vm418_vm2, %v1308_v52, -inf  ;;  %v1493_v46 = vpack.c.bf16 %v2448_v42, %v2447_v41  ;;  %v2446_v48 = vld [vmem:[%s3958_s3 + $0xd8] sm:$0xff] }
 0x97c   :  { %v2800_v49 = vpop.f32.mrf.mxu1 }
 0x97d   :  { %v1314_v53 = vsel %vm418_vm2, %v1300_v50, -inf  ;;  %v1311_v60 = vadd.f32 %v2800_v49, %v2434_v54  ;;  %v2443_v49 = vld [vmem:[%s3958_s3 + $0xc0] sm:$0xff]  ;;  %v2474_v54 = vld [vmem:[%s3958_s3 + $0x2f8] sm:$0xff] }
 0x97e   :  { %v1302_v58 = vpop.f32.mrf.mxu1  ;;  %1315 = vmax.xlane.f32.xlu0 %v1314_v53  ;;  %v2473_v53 = vld [vmem:[%s3958_s3 + $0x2f0] sm:$0xff] }
 0x97f   :  { %v1303_v59 = vadd.f32 %v2432_v51, %v1302_v58  ;;  %v1323_v63 = vsel %vm418_vm2, %v1311_v60, -inf  ;;  %v2444_v51 = vld [vmem:[%s3958_s3 + $0xc8] sm:$0xff]  ;;  %v1638_v58 = vpack.c.bf16 %v2474_v54, %v2473_v53 }
 0x981   :  { %v1317_v61 = vsel %vm418_vm2, %v1303_v59, -inf }
 0x982   :  { %1318 = vmax.xlane.f32.xlu1 %v1317_v61  ;;  %1321 = vmax.xlane.f32.xlu0 %v1320_v62  ;;  %v2469_v62 = vld [vmem:[%s3958_s3 + $0x2d0] sm:$0xff] }
 0x986   :  { %1324 = vmax.xlane.f32.xlu1 %v1323_v63  ;;  %v2470_v63 = vld [vmem:[%s3958_s3 + $0x2d8] sm:$0xff] }
 0xa07   :  { %v1316_v0 = vpop.xlane.xlu0 %1315 }
 0xa08   :  { %v1326_v1 = vsub.f32 %v1300_v50, %v1316_v0  ;;  %v1492_v50 = vpack.c.bf16 %v2446_v48, %v2445_v47  ;;  %v1636_v0 = vpack.c.bf16 %v2470_v63, %v2469_v62  ;;  %v2476_v47 = vld [vmem:[%s3961_s4 + $0xb] ss:$0 sm:$0xff] }
 0xa0a   :  { %v1330_v2 = vmul.f32 1.442695, %v1326_v1  ;;  %v2467_v1 = vld [vmem:[%s3958_s3 + $0x2c0] sm:$0xff] }
 0xa0b   :  { %v1319_v3 = vpop.xlane.xlu1 %1318  ;;  %v1322_v4 = vpop.xlane.xlu0 %1321 }
 0xa0c   :  { %2922 = vpow2.f32 %v1330_v2  ;;  %v1327_v5 = vsub.f32 %v1303_v59, %v1319_v3  ;;  %v1328_v6 = vsub.f32 %v1308_v52, %v1322_v4  ;;  %v1491_v52 = vpack.c.bf16 %v2444_v51, %v2443_v49  ;;  %v2471_v59 = vld [vmem:[%s3958_s3 + $0x2e0] sm:$0xff]  ;;  %v2468_v2 = vld [vmem:[%s3958_s3 + $0x2c8] sm:$0xff] }
 0xa0d   :  { %v1635_v3 = vpack.c.bf16 %v2468_v2, %v2467_v1  ;;  %v2439_v4 = vld [vmem:[%s3963_s6 + $0x20] sm:$0xff] }
 0xa0e   :  { %v1332_v7 = vmul.f32 1.442695, %v1327_v5  ;;  %v1334_v8 = vmul.f32 1.442695, %v1328_v6  ;;  %v2440_v5 = vld [vmem:[%s3963_s6 + $0x28] sm:$0xff] }
 0xa0f   :  { %v1325_v9 = vpop.xlane.xlu1 %1324  ;;  %v1422_v6 = vpack.c.bf16 %v2440_v5, %v2439_v4 }
 0xa10   :  { %2924 = vpow2.f32 %v1332_v7  ;;  %v1329_v10 = vsub.f32 %v1311_v60, %v1325_v9  ;;  %v2472_v60 = vld [vmem:[%s3958_s3 + $0x2e8] sm:$0xff]  ;;  %v2461_v7 = vld [vmem:[%s3958_s3 + $0x1f0] sm:$0xff] }
 0xa11   :  { %2926 = vpow2.f32 %v1334_v8  ;;  %v1637_v61 = vpack.c.bf16 %v2472_v60, %v2471_v59  ;;  %2809 = vmatprep.subr.bf16.mxu1 %v1422_v6  ;;  %v2462_v8 = vld [vmem:[%s3958_s3 + $0x1f8] sm:$0xff] }
 0xa12   :  { %v1336_v11 = vmul.f32 1.442695, %v1329_v10  ;;  %2810 = vmatpush3.bf16.msra.mxu1 %v1422_v6  ;;  %v1568_v9 = vpack.c.bf16 %v2462_v8, %v2461_v7 }
 0xa14   :  { %2928 = vpow2.f32 %v1336_v11  ;;  %2827 = vmatprep.subr.bf16.mxu1 %v1568_v9 }
 0xa19   :  { %v2923_v12 = vpop.eup %2922 }
 0xa1a   :  { %v1338_v18 = vsel %vm418_vm2, %v2923_v12, 0.0 }
 0xa1b   :  { %1339 = vadd.xlane.f32.xlu0 %v1338_v18  ;;  %v2459_v18 = vld [vmem:[%s3958_s3 + $0x1e0] sm:$0xff] }
 0xa1d   :  { %v2925_v22 = vpop.eup %2924 }
 0xa1e   :  { %v2927_v20 = vpop.eup %2926  ;;  %v1341_v23 = vsel %vm418_vm2, %v2925_v22, 0.0 }
 0xa1f   :  { %1342 = vadd.xlane.f32.xlu1 %v1341_v23  ;;  %v1344_v24 = vsel %vm418_vm2, %v2927_v20, 0.0 }
 0xa20   :  { %1345 = vadd.xlane.f32.xlu0 %v1344_v24 }
 0xa21   :  { %v2929_v13 = vpop.eup %2928 }
 0xa22   :  { %v1347_v25 = vsel %vm418_vm2, %v2929_v13, 0.0 }
 0xa23   :  { %1348 = vadd.xlane.f32.xlu1 %v1347_v25  ;;  %v2457_v25 = vld [vmem:[%s3958_s3 + $0x1d0] sm:$0xff] }
 0xa24   :  { %v1566_v27 = vpack.c.bf16 %v2458_v26, %v2457_v25 }
 0xaa4   :  { %v1340_v29 = vpop.xlane.xlu0 %1339 }
 0xaa5   :  { %2930 = vrcp.f32 %v1340_v29  ;;  %v2456_v29 = vld [vmem:[%s3958_s3 + $0x1c8] sm:$0xff] }
 0xaa8   :  { %v1343_v30 = vpop.xlane.xlu1 %1342 }
 0xaa9   :  { %2932 = vrcp.f32 %v1343_v30  ;;  %v1346_v31 = vpop.xlane.xlu0 %1345  ;;  %v2452_v30 = vld [vmem:[%s3961_s4 + $0x3] ss:$0 sm:$0xff] }
 0xaaa   :  { %2934 = vrcp.f32 %v1346_v31 }
 0xaac   :  { %v1349_v32 = vpop.xlane.xlu1 %1348 }
 0xaad   :  { %2936 = vrcp.f32 %v1349_v32 }
 0xab2   :  { %v2931_v33 = vpop.eup %2930 }
 0xab3   :  { %v1354_v39 = vmul.f32 %v2931_v33, %v2923_v12 }
 0xab6   :  { %v2933_v38 = vpop.eup %2932 }
 0xab7   :  { %v1355_v40 = vmul.f32 %v2933_v38, %v2925_v22  ;;  %v2935_v55 = vpop.eup %2934  ;;  %v2460_v22 = vld [vmem:[%s3958_s3 + $0x1e8] sm:$0xff] }
 0xab8   :  { %v1356_v43 = vmul.f32 %v2935_v55, %v2927_v20 }
 0xab9   :  { %v1358_v56 = vpack.c.bf16 %v1355_v40, %v1354_v39 }
 0xaba   :  { %v2937_v57 = vpop.eup %2936 }
 0xabb   :  { %2805 = vmatprep.mubr.msk.bf16.mxu0 %vm418_vm2, %v1358_v56  ;;  %v1357_v44 = vmul.f32 %v2937_v57, %v2929_v13  ;;  %v1567_v13 = vpack.c.bf16 %v2460_v22, %v2459_v18  ;;  %v2479_v18 = vld [vmem:[%s3962_s5 + $0x60] sm:$0xff]  ;;  %v2481_v22 = vld [vmem:[%s3962_s5 + $0x70] sm:$0xff] }
 0xabd   :  { %v1359_v45 = vpack.c.bf16 %v1357_v44, %v1356_v43 }
 0xabf   :  { %2806 = vmatmul.mubr.msk.bf16.vlgmr.msra.gmra.mxu0 %vm418_vm2, %v1359_v45 }
 0xac0   :  { %2816 = vmatpush3.bf16.msra.mxu0 %v1494_v28  ;;  %2823 = vmatprep.mubr.msk.bf16.mxu0 %vm52_vm0, %v3158_v19  ;;  %v2455_v28 = vld [vmem:[%s3958_s3 + $0x1c0] sm:$0xff] }
 0xac1   :  { %2817 = vmatprep.subr.bf16.mxu0 %v1493_v46  ;;  %v1565_v32 = vpack.c.bf16 %v2456_v29, %v2455_v28 }
 0xac4   :  { %2818 = vmatpush3.bf16.msra.mxu0 %v1493_v46 }
 0xac5   :  { %2819 = vmatprep.subr.bf16.mxu0 %v1492_v50 }
 0xac8   :  { %2820 = vmatpush3.bf16.msra.mxu0 %v1492_v50 }
 0xac9   :  { %2821 = vmatprep.subr.bf16.mxu0 %v1491_v52 }
 0xacc   :  { %2822 = vmatpush3.bf16.msra.mxu0 %v1491_v52 }
 0xacd   :  { %2839 = vmatprep.subr.bf16.mxu0 %v1638_v58 }
 0xacf   :  { %2824 = vmatmul.mubr.msk.bf16.vlgmr.msra.gmra.mxu0 %vm52_vm0, %v3170_v21 }
 0xad0   :  { %2840 = vmatpush3.bf16.msra.mxu0 %v1638_v58  ;;  %2847 = vmatprep.mubr.msk.bf16.mxu0 %vm52_vm0, %v3158_v19 }
 0xad1   :  { %2841 = vmatprep.subr.bf16.mxu0 %v1637_v61 }
 0xad4   :  { %2842 = vmatpush3.bf16.msra.mxu0 %v1637_v61  ;;  %v1016_v61 = vadd.f32 %v3384_v35, %v3485_v15  ;;  %v2464_v35 = vld [vmem:[%s3961_s4 + $0x7] ss:$0 sm:$0xff] }
 0xad5   :  { %2843 = vmatprep.subr.bf16.mxu0 %v1636_v0 }
 0xad8   :  { %2844 = vmatpush3.bf16.msra.mxu0 %v1636_v0  ;;  %v1027_v0 = vadd.f32 %v3386_v36, %v3487_v16 }
 0xad9   :  { %2845 = vmatprep.subr.bf16.mxu0 %v1635_v3 }
 0xadc   :  { %2846 = vmatpush3.bf16.msra.mxu0 %v1635_v3  ;;  %v1019_v3 = vadd.f32 %v3388_v37, %v3489_v17 }
 0xadf   :  { %2848 = vmatmul.mubr.msk.bf16.vlgmr.msra.gmra.mxu0 %vm52_vm0, %v3170_v21 }
 0xb7f   :  { %v2807_v10 = vpop.f32.mrf.mxu0 }
 0xb81   :  { %v1402_v11 = vpop.f32.mrf.mxu0 }
 0xb83   :  { %v2808_v12 = vpop.f32.mrf.mxu0 }
 0xb84   :  { %v1421_v24 = vpack.c.bf16 %v2808_v12, %v2807_v10 }
 0xb85   :  { %v1405_v20 = vpop.f32.mrf.mxu0 }
 0xb86   :  { %v1420_v23 = vpack.c.bf16 %v1405_v20, %v1402_v11 }
 0xb88   :  { %2811 = vmatprep.mubr.msk.bf16.mxu1 %vm356_vm1, %v1420_v23 }
 0xb89   :  { %2812 = vmatmul.mubr.msk.bf16.vlgmr.msra.gmra.mxu1 %vm356_vm1, %v1421_v24 }
 0xb8a   :  { %2828 = vmatpush3.bf16.msra.mxu1 %v1568_v9  ;;  %2835 = vmatprep.mubr.msk.bf16.mxu1 %vm52_vm0, %v3158_v19 }
 0xb8b   :  { %2829 = vmatprep.subr.bf16.mxu1 %v1567_v13 }
 0xb8e   :  { %2830 = vmatpush3.bf16.msra.mxu1 %v1567_v13  ;;  %v2480_v13 = vld [vmem:[%s3962_s5 + $0x68] sm:$0xff] }
 0xb8f   :  { %v2825_v31 = vpop.f32.mrf.mxu0  ;;  %2831 = vmatprep.subr.bf16.mxu1 %v1566_v27 }
 0xb90   :  { %v1546_v33 = vadd.f32 %v2825_v31, %v2452_v30 }
 0xb91   :  { %v1537_v19 = vpop.f32.mrf.mxu0 }
 0xb92   :  { %2832 = vmatpush3.bf16.msra.mxu1 %v1566_v27  ;;  %v1538_v39 = vadd.f32 %v2452_v30, %v1537_v19  ;;  %v1554_v56 = vmul.f32 0.25, %v1546_v33  ;;  %v2482_v27 = vld [vmem:[%s3962_s5 + $0x78] sm:$0xff] }
 0xb93   :  { %v2826_v38 = vpop.f32.mrf.mxu0  ;;  %2833 = vmatprep.subr.bf16.mxu1 %v1565_v32 }
 0xb94   :  { %v1549_v40 = vadd.f32 %v2826_v38, %v2452_v30  ;;  %v1552_v42 = vmul.f32 0.25, %v1538_v39 }
 0xb95   :  { %v1540_v55 = vpop.f32.mrf.mxu0 }
 0xb96   :  { %v1555_v57 = vmul.f32 0.25, %v1549_v40  ;;  %v1541_v41 = vadd.f32 %v2452_v30, %v1540_v55  ;;  %2834 = vmatpush3.bf16.msra.mxu1 %v1565_v32 }
 0xb98   :  { %v1697_v43 = vpack.c.bf16 %v1555_v57, %v1554_v56  ;;  %v1553_v44 = vmul.f32 0.25, %v1541_v41 }
 0xb99   :  { %2836 = vmatmul.mubr.msk.bf16.vlgmr.msra.gmra.mxu1 %vm52_vm0, %v3170_v21  ;;  %v1024_v21 = vadd.f32 %v3382_v34, %v3483_v14 }
 0xb9a   :  { %v1696_v45 = vpack.c.bf16 %v1553_v44, %v1552_v42 }
 0xb9c   :  { %2855 = vmatprep.mubr.msk.bf16.mxu1 %vm356_vm1, %v1696_v45 }
 0xb9f   :  { %v2849_v46 = vpop.f32.mrf.mxu0 }
 0xba0   :  { %v1690_v49 = vadd.f32 %v2849_v46, %v2476_v47 }
 0xba1   :  { %v1681_v48 = vpop.f32.mrf.mxu0 }
 0xba2   :  { %v1682_v53 = vadd.f32 %v2476_v47, %v1681_v48 }
 0xba3   :  { %v2850_v50 = vpop.f32.mrf.mxu0 }
 0xba4   :  { %v1693_v51 = vadd.f32 %v2850_v50, %v2476_v47 }
 0xba5   :  { %v1684_v52 = vpop.f32.mrf.mxu0 }
 0xba6   :  { %v1813_v54 = vpack.c.bf16 %v1693_v51, %v1690_v49  ;;  %v1685_v58 = vadd.f32 %v2476_v47, %v1684_v52 }
 0xba8   :  { %v1812_v59 = vpack.c.bf16 %v1685_v58, %v1682_v53  ;;  %2859 = vmatprep.subr.bf16.mxu0 %v1813_v54 }
 0xba9   :  { %2860 = vmatpush3.bf16.msra.mxu0 %v1813_v54 }
 0xbaa   :  { %2861 = vmatprep.subr.bf16.mxu0 %v1812_v59 }
 0xbad   :  { %2862 = vmatpush3.bf16.msra.mxu0 %v1812_v59 }
 0xc49   :  { %v2813_v60 = vpop.f32.mrf.mxu1 }
 0xc4a   :  { %v3624_v62 = vadd.f32 %v2813_v60, %v1024_v21 }
 0xc4b   :  { %v1463_v63 = vpop.f32.mrf.mxu1 }
 0xc4c   :  { %v3628_v1 = vadd.f32 %v1463_v63, %v1016_v61 }
 0xc4d   :  { %v2814_v2 = vpop.f32.mrf.mxu1 }
 0xc4e   :  { %v3632_v4 = vadd.f32 %v2814_v2, %v1027_v0 }
 0xc4f   :  { %v1466_v5 = vpop.f32.mrf.mxu1 }
 0xc50   :  { %v3634_v34 = vadd.f32 %v1466_v5, %v1019_v3 }
 0xc59   :  { %v2837_v14 = vpop.f32.mrf.mxu1 }
 0xc5a   :  { %v1620_v7 = vadd.f32 %v2837_v14, %v2464_v35 }
 0xc5b   :  { %v1611_v15 = vpop.f32.mrf.mxu1 }
 0xc5c   :  { %v1612_v8 = vadd.f32 %v2464_v35, %v1611_v15 }
 0xc5d   :  { %v2838_v6 = vpop.f32.mrf.mxu1 }
 0xc5e   :  { %v1623_v36 = vadd.f32 %v2838_v6, %v2464_v35  ;;  %v2487_v6 = vld [vmem:[%s3963_s6 + $0x30] sm:$0xff] }
 0xc5f   :  { %v1614_v16 = vpop.f32.mrf.mxu1 }
 0xc60   :  { %v1699_v9 = vpack.c.bf16 %v1623_v36, %v1620_v7  ;;  %v1615_v10 = vadd.f32 %v2464_v35, %v1614_v16  ;;  %v2488_v7 = vld [vmem:[%s3963_s6 + $0x38] sm:$0xff] }
 0xc61   :  { %v1874_v36 = vpack.c.bf16 %v2488_v7, %v2487_v6  ;;  %v2033_v6 = vld [vmem:[%s3965_s10 + $0x50] sm:$0xff] }
 0xc62   :  { %v1698_v11 = vpack.c.bf16 %v1615_v10, %v1612_v8  ;;  %2879 = vmatprep.subr.msk.bf16.mxu1 %vm356_vm1, %v1699_v9  ;;  %v1715_v37 = vsel %vm356_vm1, %v1699_v9, 0 }
 0xc63   :  { %2852 = vmatpush3.bf16.xpose.msra.mxu1 %v1715_v37 }
 0xc64   :  { %2880 = vmatprep.subr.msk.bf16.mxu1 %vm356_vm1, %v1698_v11  ;;  %v1712_v17 = vsel %vm356_vm1, %v1698_v11, 0 }
 0xc6b   :  { %2854 = vmatpush3.bf16.xpose.msra.mxu1 %v1712_v17 }
 0xc6c   :  { %2867 = vmatprep.subr.bf16.mxu1 %v1874_v36 }
 0xc72   :  { %2856 = vmatmul.mubr.msk.bf16.vlgmr.msra.gmra.mxu1 %vm356_vm1, %v1697_v43 }
 0xc73   :  { %2868 = vmatpush3.bf16.msra.mxu1 %v1874_v36  ;;  %v2028_v36 = vld [vmem:[%s3965_s10 + $0x28] sm:$0xff] }
 0xd32   :  { %v2857_v12 = vpop.f32.mrf.mxu1 }
 0xd33   :  { %v1760_v25 = vadd.f32 %v2857_v12, %v2481_v22 }
 0xd34   :  { %v1751_v20 = vpop.f32.mrf.mxu1 }
 0xd35   :  { %v1752_v23 = vadd.f32 %v2479_v18, %v1751_v20  ;;  %v1772_v32 = vsel %vm418_vm2, %v1760_v25, -inf }
 0xd36   :  { %v2858_v24 = vpop.f32.mrf.mxu1 }
 0xd37   :  { %v1766_v26 = vsel %vm418_vm2, %v1752_v23, -inf  ;;  %v1763_v30 = vadd.f32 %v2858_v24, %v2482_v27 }
 0xd38   :  { %v1754_v28 = vpop.f32.mrf.mxu1  ;;  %1767 = vmax.xlane.f32.xlu0 %v1766_v26 }
 0xd39   :  { %v1755_v29 = vadd.f32 %v2480_v13, %v1754_v28  ;;  %v1775_v33 = vsel %vm418_vm2, %v1763_v30, -inf  ;;  %v2979_v13 = vld [vmem:[%s3957_s0] sm:$0xff] }
 0xd3b   :  { %v1769_v31 = vsel %vm418_vm2, %v1755_v29, -inf }
 0xd3c   :  { %1770 = vmax.xlane.f32.xlu1 %v1769_v31  ;;  %1773 = vmax.xlane.f32.xlu0 %v1772_v32 }
 0xd40   :  { %1776 = vmax.xlane.f32.xlu1 %v1775_v33 }
 0xdc1   :  { %v1768_v19 = vpop.xlane.xlu0 %1767 }
 0xdc2   :  { %v1778_v38 = vsub.f32 %v1752_v23, %v1768_v19  ;;  %v2978_v23 = vld [vmem:[%s3957_s0 + $0x10] sm:$0xff] }
 0xdc4   :  { %v1782_v39 = vmul.f32 1.442695, %v1778_v38 }
 0xdc5   :  { %v1771_v40 = vpop.xlane.xlu1 %1770  ;;  %v1774_v55 = vpop.xlane.xlu0 %1773 }
 0xdc6   :  { %2938 = vpow2.f32 %v1782_v39  ;;  %v1779_v56 = vsub.f32 %v1755_v29, %v1771_v40  ;;  %v1780_v57 = vsub.f32 %v1760_v25, %v1774_v55 }
 0xdc8   :  { %v1784_v41 = vmul.f32 1.442695, %v1779_v56  ;;  %v1786_v42 = vmul.f32 1.442695, %v1780_v57 }
 0xdc9   :  { %v1777_v43 = vpop.xlane.xlu1 %1776 }
 0xdca   :  { %2940 = vpow2.f32 %v1784_v41  ;;  %v1781_v44 = vsub.f32 %v1763_v30, %v1777_v43  ;;  %v2980_v30 = vld [vmem:[%s3957_s0 + $0x18] sm:$0xff] }
 0xdcb   :  { %2942 = vpow2.f32 %v1786_v42 }
 0xdcc   :  { %v1788_v45 = vmul.f32 1.442695, %v1781_v44 }
 0xdce   :  { %2944 = vpow2.f32 %v1788_v45 }
 0xdd3   :  { %v2939_v46 = vpop.eup %2938 }
 0xdd4   :  { %v1790_v47 = vsel %vm418_vm2, %v2939_v46, 0.0 }
 0xdd5   :  { %1791 = vadd.xlane.f32.xlu0 %v1790_v47 }
 0xdd7   :  { %v2941_v48 = vpop.eup %2940 }
 0xdd8   :  { %v2943_v50 = vpop.eup %2942  ;;  %v1793_v49 = vsel %vm418_vm2, %v2941_v48, 0.0 }
 0xdd9   :  { %1794 = vadd.xlane.f32.xlu1 %v1793_v49  ;;  %v1796_v51 = vsel %vm418_vm2, %v2943_v50, 0.0 }
 0xdda   :  { %1797 = vadd.xlane.f32.xlu0 %v1796_v51 }
 0xddb   :  { %v2945_v52 = vpop.eup %2944 }
 0xddc   :  { %v1799_v53 = vsel %vm418_vm2, %v2945_v52, 0.0 }
 0xddd   :  { %1800 = vadd.xlane.f32.xlu1 %v1799_v53 }
 0xe5e   :  { %v1792_v54 = vpop.xlane.xlu0 %1791 }
 0xe5f   :  { %2946 = vrcp.f32 %v1792_v54 }
 0xe62   :  { %v1795_v58 = vpop.xlane.xlu1 %1794 }
 0xe63   :  { %2948 = vrcp.f32 %v1795_v58  ;;  %v1798_v59 = vpop.xlane.xlu0 %1797 }
 0xe64   :  { %2950 = vrcp.f32 %v1798_v59 }
 0xe66   :  { %v1801_v21 = vpop.xlane.xlu1 %1800 }
 0xe67   :  { %2952 = vrcp.f32 %v1801_v21 }
 0xe6c   :  { %v2947_v60 = vpop.eup %2946 }
 0xe6d   :  { %v1806_v63 = vmul.f32 %v2947_v60, %v2939_v46  ;;  %v2036_v60 = vld [vmem:[%s3965_s10 + $0x68] sm:$0xff] }
 0xe70   :  { %v2949_v61 = vpop.eup %2948 }
 0xe71   :  { %v1807_v0 = vmul.f32 %v2949_v61, %v2941_v48  ;;  %v2951_v2 = vpop.eup %2950  ;;  %v2038_v61 = vld [vmem:[%s3965_s10 + $0x78] sm:$0xff] }
 0xe72   :  { %v1808_v14 = vmul.f32 %v2951_v2, %v2943_v50  ;;  %v2037_v2 = vld [vmem:[%s3965_s10 + $0x70] sm:$0xff] }
 0xe73   :  { %v1810_v3 = vpack.c.bf16 %v1807_v0, %v1806_v63  ;;  %v2048_v63 = vpack.c.bf16 %v2038_v61, %v2036_v60  ;;  %v2035_v0 = vld [vmem:[%s3965_s10 + $0x60] sm:$0xff]  ;;  %v2206_v60 = vld [vmem:[%s3968_s12 + $0x70] sm:$0xff]  ;;  %v2207_v61 = vld [vmem:[%s3968_s12 + $0x78] sm:$0xff] }
 0xe74   :  { %v2953_v5 = vpop.eup %2952 }
 0xe75   :  { %2863 = vmatprep.mubr.msk.bf16.mxu0 %vm418_vm2, %v1810_v3  ;;  %v1809_v35 = vmul.f32 %v2953_v5, %v2945_v52  ;;  %v2047_v3 = vpack.c.bf16 %v2037_v2, %v2035_v0  ;;  %2075 = vmatprep.subr.bf16.mxu0 %v2048_v63  ;;  %v2032_v5 = vld [vmem:[%s3965_s10 + $0x48] sm:$0xff]  ;;  %v2235_v63 = vpack.c.bf16 %v2207_v61, %v2206_v60  ;;  %v2220_v0 = vld [vmem:[%s3968_s12 + $0xe0] sm:$0xff] }
 0xe76   :  { %v2221_v2 = vld [vmem:[%s3968_s12 + $0xe8] sm:$0xff] }
 0xe77   :  { %v1811_v15 = vpack.c.bf16 %v1809_v35, %v1808_v14  ;;  %v2034_v14 = vld [vmem:[%s3965_s10 + $0x58] sm:$0xff] }
 0xe78   :  { %v2046_v35 = vpack.c.bf16 %v2034_v14, %v2032_v5  ;;  %v2204_v5 = vld [vmem:[%s3968_s12 + $0x60] sm:$0xff]  ;;  %v2205_v14 = vld [vmem:[%s3968_s12 + $0x68] sm:$0xff] }
 0xe79   :  { %2864 = vmatmul.mubr.msk.bf16.vlgmr.msra.gmra.mxu0 %vm418_vm2, %v1811_v15  ;;  %v2031_v15 = vld [vmem:[%s3965_s10 + $0x40] sm:$0xff] }
 0xe7a   :  { %2076 = vmatpush1.bf16.msra.mxu0 %v2047_v3  ;;  %v2045_v7 = vpack.c.bf16 %v2033_v6, %v2031_v15  ;;  %v2242_v3 = vpack.c.bf16 %v2221_v2, %v2220_v0  ;;  %v2218_v15 = vld [vmem:[%s3968_s12 + $0xd0] sm:$0xff]  ;;  %v2219_v6 = vld [vmem:[%s3968_s12 + $0xd8] sm:$0xff] }
 0xe7b   :  { %2077 = vmatprep.subr.bf16.mxu0 %v2046_v35  ;;  %v2234_v35 = vpack.c.bf16 %v2205_v14, %v2204_v5 }
 0xe7e   :  { %2078 = vmatpush1.bf16.msra.mxu0 %v2045_v7  ;;  %v2241_v7 = vpack.c.bf16 %v2219_v6, %v2218_v15 }
 0xf39   :  { %v2865_v16 = vpop.f32.mrf.mxu0 }
 0xf3b   :  { %v1854_v8 = vpop.f32.mrf.mxu0 }
 0xf3d   :  { %v2866_v9 = vpop.f32.mrf.mxu0 }
 0xf3e   :  { %v1873_v37 = vpack.c.bf16 %v2866_v9, %v2865_v16  ;;  %v2030_v16 = vld [vmem:[%s3965_s10 + $0x38] sm:$0xff]  ;;  %v2027_v9 = vld [vmem:[%s3965_s10 + $0x20] sm:$0xff] }
 0xf3f   :  { %v1857_v10 = vpop.f32.mrf.mxu0 }
 0xf40   :  { %v1872_v11 = vpack.c.bf16 %v1857_v10, %v1854_v8  ;;  %v2044_v8 = vpack.c.bf16 %v2030_v16, %v2028_v36  ;;  %v2029_v10 = vld [vmem:[%s3965_s10 + $0x30] sm:$0xff]  ;;  %v2203_v16 = vld [vmem:[%s3968_s12 + $0x58] sm:$0xff] }
 0xf41   :  { %v2202_v36 = vld [vmem:[%s3968_s12 + $0x50] sm:$0xff] }
 0xf42   :  { %2869 = vmatprep.mubr.msk.bf16.mxu1 %vm356_vm1, %v1872_v11  ;;  %v2043_v11 = vpack.c.bf16 %v2029_v10, %v2027_v9  ;;  %2079 = vmatprep.subr.bf16.mxu0 %v2044_v8  ;;  %v2233_v8 = vpack.c.bf16 %v2203_v16, %v2202_v36  ;;  %v2216_v9 = vld [vmem:[%s3968_s12 + $0xc0] sm:$0xff]  ;;  %v2217_v10 = vld [vmem:[%s3968_s12 + $0xc8] sm:$0xff] }
 0xf43   :  { %2870 = vmatmul.mubr.msk.bf16.vlgmr.msra.gmra.mxu1 %vm356_vm1, %v1873_v37  ;;  %v2024_v37 = vld [vmem:[%s3965_s10 + $0x8] sm:$0xff] }
 0xf44   :  { %2080 = vmatpush1.bf16.msra.mxu0 %v2043_v11  ;;  %v2240_v11 = vpack.c.bf16 %v2217_v10, %v2216_v9 }
0x1003   :  { %v2871_v17 = vpop.f32.mrf.mxu1 }
0x1004   :  { %v1932_v12 = vadd.f32 %v2871_v17, %v3624_v62  ;;  %v2491_v62 = vld [vmem:[%s3964_s7] ss:$0 sm:$0xff]  ;;  %v2026_v17 = vld [vmem:[%s3965_s10 + $0x18] sm:$0xff] }
0x1005   :  { %v1915_v18 = vpop.f32.mrf.mxu1 }
0x1006   :  { %v1930_v22 = vadd.f32 %v1915_v18, %v3628_v1  ;;  %v1936_v24 = vadd.f32 %v2978_v23, %v1932_v12  ;;  %v2023_v12 = vld [vmem:[%s3965_s10] sm:$0xff]  ;;  %v2042_v18 = vpack.c.bf16 %v2026_v17, %v2024_v37  ;;  %v2201_v17 = vld [vmem:[%s3968_s12 + $0x48] sm:$0xff] }
0x1007   :  { %v2872_v20 = vpop.f32.mrf.mxu1  ;;  %v2200_v37 = vld [vmem:[%s3968_s12 + $0x40] sm:$0xff] }
0x1008   :  { %v1934_v25 = vadd.f32 %v2979_v13, %v1930_v22  ;;  %v1933_v26 = vadd.f32 %v2872_v20, %v3632_v4  ;;  %v3689_v29 = vadd.f32 %v2491_v62, %v1936_v24  ;;  %v2981_v4 = vld [vmem:[%s3957_s0 + $0x8] sm:$0xff]  ;;  %v2025_v22 = vld [vmem:[%s3965_s10 + $0x10] sm:$0xff]  ;;  %v2982_v20 = vmov 0   ;;  %2081 = vmatprep.subr.bf16.mxu0 %v2042_v18 }
0x1009   :  { %v1918_v27 = vpop.f32.mrf.mxu1  ;;  %2099 = vmatprep.mubr.bf16.mxu0 %v2982_v20  ;;  %v2041_v23 = vpack.c.bf16 %v2025_v22, %v2023_v12  ;;  %v2232_v12 = vpack.c.bf16 %v2201_v17, %v2200_v37  ;;  %v2214_v18 = vld [vmem:[%s3968_s12 + $0xb0] sm:$0xff]  ;;  %v2215_v22 = vld [vmem:[%s3968_s12 + $0xb8] sm:$0xff] }
0x100a   :  { %v3686_v28 = vadd.f32 %v2491_v62, %v1934_v25  ;;  %v1931_v1 = vadd.f32 %v1918_v27, %v3634_v34  ;;  %v1937_v31 = vadd.f32 %v2980_v30, %v1933_v26  ;;  %v1955_v39 = vsel %vm52_vm0, %v3689_v29, 0.0 }
0x100b   :  { %2082 = vmatpush1.bf16.msra.mxu0 %v2041_v23  ;;  %v2198_v23 = vld [vmem:[%s3968_s12 + $0x30] sm:$0xff] }
0x100c   :  { %v1935_v32 = vadd.f32 %v2981_v4, %v1931_v1  ;;  %v1949_v33 = vsel %vm52_vm0, %v3686_v28, 0.0  ;;  %v3701_v38 = vadd.f32 %v2491_v62, %v1937_v31 }
0x100d   :  { %1950 = vadd.xlane.f32.xlu0 %v1949_v33 }
0x100e   :  { %v3699_v19 = vadd.f32 %v2491_v62, %v1935_v32  ;;  %v1958_v40 = vsel %vm52_vm0, %v3701_v38, 0.0 }
0x1010   :  { %v1952_v34 = vsel %vm52_vm0, %v3699_v19, 0.0 }
0x1011   :  { %1953 = vadd.xlane.f32.xlu1 %v1952_v34  ;;  %1956 = vadd.xlane.f32.xlu0 %v1955_v39 }
0x1015   :  { %1959 = vadd.xlane.f32.xlu1 %v1958_v40  ;;  %v2492_v40 = vld [vmem:[%s3966_s8] ss:$0 sm:$0xff] }
0x1096   :  { %v1951_v55 = vpop.xlane.xlu0 %1950 }
0x1097   :  { %v1961_v56 = vmul.f32 0.015625, %v1951_v55 }
0x1099   :  { %v3710_v57 = vsub.f32 %v3686_v28, %v1961_v56 }
0x109a   :  { %v1954_v41 = vpop.xlane.xlu1 %1953  ;;  %v1957_v42 = vpop.xlane.xlu0 %1956 }
0x109b   :  { %v1962_v43 = vmul.f32 0.015625, %v1954_v41  ;;  %v1963_v44 = vmul.f32 0.015625, %v1957_v42  ;;  %v1969_v45 = vmul.f32 %v3710_v57, %v3710_v57 }
0x109d   :  { %v3715_v46 = vsub.f32 %v3699_v19, %v1962_v43  ;;  %v3718_v47 = vsub.f32 %v3689_v29, %v1963_v44  ;;  %v1973_v48 = vsel %vm52_vm0, %v1969_v45, 0.0  ;;  %v2493_v43 = vld [vmem:[%s3967_s9] ss:$0 sm:$0xff] }
0x109e   :  { %v1960_v50 = vpop.xlane.xlu1 %1959  ;;  %1974 = vadd.xlane.f32.xlu0 %v1973_v48 }
0x109f   :  { %v1964_v49 = vmul.f32 0.015625, %v1960_v50  ;;  %v1970_v51 = vmul.f32 %v3715_v46, %v3715_v46  ;;  %v1971_v52 = vmul.f32 %v3718_v47, %v3718_v47 }
0x10a1   :  { %v3726_v53 = vsub.f32 %v3701_v38, %v1964_v49  ;;  %v1976_v54 = vsel %vm52_vm0, %v1970_v51, 0.0  ;;  %v1979_v58 = vsel %vm52_vm0, %v1971_v52, 0.0 }
0x10a2   :  { %1977 = vadd.xlane.f32.xlu1 %v1976_v54  ;;  %1980 = vadd.xlane.f32.xlu0 %v1979_v58 }
0x10a3   :  { %v1972_v59 = vmul.f32 %v3726_v53, %v3726_v53 }
0x10a5   :  { %v1982_v21 = vsel %vm52_vm0, %v1972_v59, 0.0 }
0x10a6   :  { %1983 = vadd.xlane.f32.xlu1 %v1982_v21  ;;  %v2222_v21 = vld [vmem:[%s3968_s12 + $0xf0] sm:$0xff] }
0x1127   :  { %v1975_v24 = vpop.xlane.xlu0 %1974 }
0x1128   :  { %v1985_v13 = vmul.f32 0.015625, %v1975_v24  ;;  %v2199_v24 = vld [vmem:[%s3968_s12 + $0x38] sm:$0xff] }
0x112a   :  { %v1989_v25 = vadd.f32 1e-05, %v1985_v13  ;;  %v2231_v13 = vpack.c.bf16 %v2199_v24, %v2198_v23 }
0x112b   :  { %v1978_v26 = vpop.xlane.xlu1 %1977  ;;  %v1981_v62 = vpop.xlane.xlu0 %1980 }
0x112c   :  { %2954 = vrsqrt.f32 %v1989_v25  ;;  %v1986_v27 = vmul.f32 0.015625, %v1978_v26  ;;  %v1987_v1 = vmul.f32 0.015625, %v1981_v62  ;;  %v2212_v25 = vld [vmem:[%s3968_s12 + $0xa0] sm:$0xff]  ;;  %v2213_v26 = vld [vmem:[%s3968_s12 + $0xa8] sm:$0xff] }
0x112d   :  { %v2238_v62 = vpack.c.bf16 %v2213_v26, %v2212_v25 }
0x112e   :  { %v1990_v30 = vadd.f32 1e-05, %v1986_v27  ;;  %v1991_v31 = vadd.f32 1e-05, %v1987_v1  ;;  %v2196_v27 = vld [vmem:[%s3968_s12 + $0x20] sm:$0xff]  ;;  %v2197_v1 = vld [vmem:[%s3968_s12 + $0x28] sm:$0xff] }
0x112f   :  { %v1984_v4 = vpop.xlane.xlu1 %1983 }
0x1130   :  { %2956 = vrsqrt.f32 %v1990_v30  ;;  %v1988_v32 = vmul.f32 0.015625, %v1984_v4  ;;  %v2230_v30 = vpack.c.bf16 %v2197_v1, %v2196_v27  ;;  %v2211_v4 = vld [vmem:[%s3968_s12 + $0x98] sm:$0xff] }
0x1131   :  { %2958 = vrsqrt.f32 %v1991_v31  ;;  %v2210_v31 = vld [vmem:[%s3968_s12 + $0x90] sm:$0xff] }
0x1132   :  { %v1992_v33 = vadd.f32 1e-05, %v1988_v32  ;;  %v2237_v32 = vpack.c.bf16 %v2211_v4, %v2210_v31 }
0x1134   :  { %2960 = vrsqrt.f32 %v1992_v33  ;;  %v2194_v33 = vld [vmem:[%s3968_s12 + $0x10] sm:$0xff] }
0x1139   :  { %v2955_v34 = vpop.eup %2954 }
0x113a   :  { %v1997_v39 = vmul.f32 %v2955_v34, %v3710_v57  ;;  %v2195_v34 = vld [vmem:[%s3968_s12 + $0x18] sm:$0xff] }
0x113c   :  { %v2008_v41 = vmul.f32 %v2492_v40, %v1997_v39  ;;  %v2229_v39 = vpack.c.bf16 %v2195_v34, %v2194_v33 }
0x113d   :  { %v2957_v55 = vpop.eup %2956 }
0x113e   :  { %v1998_v56 = vmul.f32 %v2957_v55, %v3715_v46  ;;  %v2959_v42 = vpop.eup %2958  ;;  %v2019_v48 = vadd.f32 %v2493_v43, %v2008_v41  ;;  %v2209_v55 = vld [vmem:[%s3968_s12 + $0x88] sm:$0xff] }
0x113f   :  { %v1999_v49 = vmul.f32 %v2959_v42, %v3718_v47  ;;  %v2223_v47 = vld [vmem:[%s3968_s12 + $0xf8] sm:$0xff]  ;;  %v2193_v42 = vld [vmem:[%s3968_s12 + $0x8] sm:$0xff] }
0x1140   :  { %v2009_v44 = vmul.f32 %v2492_v40, %v1998_v56  ;;  %v2192_v56 = vld [vmem:[%s3968_s12] sm:$0xff] }
0x1141   :  { %v2961_v45 = vpop.eup %2960  ;;  %v2010_v54 = vmul.f32 %v2492_v40, %v1999_v49 }
0x1142   :  { %v2020_v50 = vadd.f32 %v2493_v43, %v2009_v44  ;;  %v2000_v57 = vmul.f32 %v2961_v45, %v3726_v53  ;;  %v2243_v53 = vpack.c.bf16 %v2223_v47, %v2222_v21  ;;  %v2051_v44 = vlaneseq }
0x1143   :  { %v2021_v58 = vadd.f32 %v2493_v43, %v2010_v54 }
0x1144   :  { %v2039_v51 = vpack.c.bf16 %v2020_v50, %v2019_v48  ;;  %v2011_v52 = vmul.f32 %v2492_v40, %v2000_v57  ;;  %2613 = vmatprep.subr.bf16.mxu1 %v2243_v53  ;;  %v2208_v40 = vld [vmem:[%s3968_s12 + $0x80] sm:$0xff]  ;;  %v2052_v45 = vshrl.u32 %v2051_v44, 7 }
0x1145   :  { %2614 = vmatpush3.bf16.msra.mxu1 %v2235_v63  ;;  %v2236_v41 = vpack.c.bf16 %v2209_v55, %v2208_v40  ;;  %v2049_v50 = vld [vmem:[%s3969_s11] sm:$0x3] }
0x1146   :  { %2494 = vmatmul.mubr.msk.bf16.vlgmr.msra.gmra.mxu0 %vm52_vm0, %v2039_v51  ;;  %v2022_v46 = vadd.f32 %v2493_v43, %v2011_v52  ;;  %2615 = vmatprep.subr.bf16.mxu1 %v2242_v3  ;;  %v2228_v43 = vpack.c.bf16 %v2193_v42, %v2192_v56  ;;  %v2053_v48 = vsub.s32 0, %v2052_v45  ;;  %v2057_v49 = vsub.s32 1, %v2052_v45 }
0x1147   :  { %2109 = vmatprep.mubr.bf16.mxu0 %v2982_v20  ;;  %v2239_v20 = vpack.c.bf16 %v2215_v22, %v2214_v18 }
0x1148   :  { %v2040_v59 = vpack.c.bf16 %v2022_v46, %v2021_v58  ;;  %v2054_v57 = vrot.slane %v2049_v50, %v2053_v48  ;;  %v2058_v51 = vrot.slane %v2049_v50, %v2057_v49 }
0x1149   :  { %2616 = vmatpush3.bf16.msra.mxu1 %v2234_v35 }
0x114a   :  { %2617 = vmatprep.subr.bf16.mxu1 %v2241_v7 }
0x114d   :  { %2618 = vmatpush3.bf16.msra.mxu1 %v2233_v8 }
0x114e   :  { %2495 = vmatmul.mubr.msk.bf16.gmra.mxu0 %vm52_vm0, %v2040_v59  ;;  %2619 = vmatprep.subr.bf16.mxu1 %v2240_v11 }
0x1151   :  { %2620 = vmatpush3.bf16.msra.mxu1 %v2232_v12 }
0x1152   :  { %2621 = vmatprep.subr.bf16.mxu1 %v2239_v20 }
0x1155   :  { %2622 = vmatpush3.bf16.msra.mxu1 %v2231_v13 }
0x1156   :  { %2623 = vmatprep.subr.bf16.mxu1 %v2238_v62 }
0x1159   :  { %2624 = vmatpush3.bf16.msra.mxu1 %v2230_v30 }
0x115a   :  { %2625 = vmatprep.subr.bf16.mxu1 %v2237_v32 }
0x115d   :  { %2626 = vmatpush3.bf16.msra.mxu1 %v2229_v39 }
0x115e   :  { %2627 = vmatprep.subr.bf16.mxu1 %v2236_v41 }
0x1161   :  { %2628 = vmatpush3.bf16.msra.mxu1 %v2228_v43 }
0x1206   :  { %v2101_v52 = vpop.f32.mrf.mxu0 }
0x1207   :  { %v3892_v54 = vadd.f32 %v2101_v52, %v2054_v57 }
0x1208   :  { %v2103_v46 = vpop.f32.mrf.mxu0 }
0x1209   :  { %v2120_v58 = vmul.f32 %v3892_v54, %v3892_v54  ;;  %v3896_v59 = vadd.f32 %v2103_v46, %v2058_v51 }
0x120a   :  { %v2105_v21 = vpop.f32.mrf.mxu0 }
0x120b   :  { %v2128_v47 = vmul.f32 %v2120_v58, %v3892_v54  ;;  %v2121_v53 = vmul.f32 %v3896_v59, %v3896_v59  ;;  %v3901_v60 = vadd.f32 %v2105_v21, %v2054_v57 }
0x120c   :  { %v2107_v61 = vpop.f32.mrf.mxu0 }
0x120d   :  { %v2136_v63 = vmul.f32 0.044715, %v2128_v47  ;;  %v2129_v0 = vmul.f32 %v2121_v53, %v3896_v59  ;;  %v2122_v2 = vmul.f32 %v3901_v60, %v3901_v60  ;;  %v3906_v3 = vadd.f32 %v2107_v61, %v2058_v51 }
0x120e   :  { %v2111_v5 = vpop.f32.mrf.mxu0 }
0x120f   :  { %v2144_v14 = vadd.f32 %v2136_v63, %v3892_v54  ;;  %v2137_v35 = vmul.f32 0.044715, %v2129_v0  ;;  %v2130_v15 = vmul.f32 %v2122_v2, %v3901_v60  ;;  %v2123_v6 = vmul.f32 %v3906_v3, %v3906_v3 }
0x1210   :  { %v3912_v7 = vadd.f32 %v2111_v5, %v2054_v57  ;;  %v2113_v36 = vpop.f32.mrf.mxu0 }
0x1211   :  { %v2152_v16 = vmul.f32 0.7978846, %v2144_v14  ;;  %v2145_v8 = vadd.f32 %v2137_v35, %v3896_v59  ;;  %v2138_v9 = vmul.f32 0.044715, %v2130_v15  ;;  %v2131_v10 = vmul.f32 %v2123_v6, %v3906_v3 }
0x1212   :  { %v2124_v11 = vmul.f32 %v3912_v7, %v3912_v7  ;;  %v3918_v37 = vadd.f32 %v2113_v36, %v2058_v51  ;;  %v2115_v17 = vpop.f32.mrf.mxu0 }
0x1213   :  { %v2153_v12 = vmul.f32 0.7978846, %v2145_v8  ;;  %v2146_v18 = vadd.f32 %v2138_v9, %v3901_v60  ;;  %v2139_v22 = vmul.f32 0.044715, %v2131_v10  ;;  %2962 = vtanh.f32 %v2152_v16 }
0x1214   :  { %v2132_v20 = vmul.f32 %v2124_v11, %v3912_v7  ;;  %v2125_v23 = vmul.f32 %v3918_v37, %v3918_v37  ;;  %v2116_v24 = vadd.f32 %v2115_v17, %v2054_v57  ;;  %v2117_v13 = vpop.f32.mrf.mxu0 }
0x1215   :  { %2964 = vtanh.f32 %v2153_v12  ;;  %v2154_v25 = vmul.f32 0.7978846, %v2146_v18  ;;  %v2147_v26 = vadd.f32 %v2139_v22, %v3906_v3  ;;  %v2118_v62 = vadd.f32 %v2117_v13, %v2058_v51 }
0x1216   :  { %v2140_v27 = vmul.f32 0.044715, %v2132_v20  ;;  %v2133_v1 = vmul.f32 %v2125_v23, %v3918_v37  ;;  %v2126_v30 = vmul.f32 %v2116_v24, %v2116_v24 }
0x1217   :  { %2966 = vtanh.f32 %v2154_v25  ;;  %v2155_v31 = vmul.f32 0.7978846, %v2147_v26  ;;  %v2127_v4 = vmul.f32 %v2118_v62, %v2118_v62  ;;  %v2496_v26 = vld [vmem:[%s3970_s13] ss:$0 sm:$0xff] }
0x1218   :  { %v2148_v32 = vadd.f32 %v2140_v27, %v3912_v7  ;;  %v2141_v33 = vmul.f32 0.044715, %v2133_v1  ;;  %v2134_v34 = vmul.f32 %v2126_v30, %v2116_v24 }
0x1219   :  { %2968 = vtanh.f32 %v2155_v31  ;;  %v2135_v39 = vmul.f32 %v2127_v4, %v2118_v62 }
0x121a   :  { %v2156_v40 = vmul.f32 0.7978846, %v2148_v32  ;;  %v2149_v55 = vadd.f32 %v2141_v33, %v3918_v37  ;;  %v2142_v56 = vmul.f32 0.044715, %v2134_v34 }
0x121b   :  { %v2143_v41 = vmul.f32 0.044715, %v2135_v39 }
0x121c   :  { %2970 = vtanh.f32 %v2156_v40  ;;  %v2157_v42 = vmul.f32 0.7978846, %v2149_v55  ;;  %v2150_v43 = vadd.f32 %v2142_v56, %v2116_v24 }
0x121d   :  { %v2151_v44 = vadd.f32 %v2143_v41, %v2118_v62 }
0x121e   :  { %2972 = vtanh.f32 %v2157_v42  ;;  %v2158_v45 = vmul.f32 0.7978846, %v2150_v43 }
0x121f   :  { %v2159_v48 = vmul.f32 0.7978846, %v2151_v44 }
0x1220   :  { %2974 = vtanh.f32 %v2158_v45  ;;  %v2963_v50 = vpop.eup %2962 }
0x1221   :  { %2976 = vtanh.f32 %v2159_v48  ;;  %v2168_v52 = vadd.f32 1.0, %v2963_v50 }
0x1222   :  { %v2965_v49 = vpop.eup %2964 }
0x1223   :  { %v2169_v57 = vadd.f32 1.0, %v2965_v49  ;;  %v2176_v61 = vmul.f32 0.5, %v2168_v52 }
0x1224   :  { %v2967_v51 = vpop.eup %2966 }
0x1225   :  { %v2170_v46 = vadd.f32 1.0, %v2967_v51  ;;  %v2177_v53 = vmul.f32 0.5, %v2169_v57  ;;  %v2184_v15 = vmul.f32 %v2176_v61, %v3892_v54 }
0x1226   :  { %v2969_v58 = vpop.eup %2968 }
0x1227   :  { %v2178_v21 = vmul.f32 0.5, %v2170_v46  ;;  %v2171_v47 = vadd.f32 1.0, %v2969_v58  ;;  %v2185_v14 = vmul.f32 %v2177_v53, %v3896_v59 }
0x1229   :  { %v2971_v63 = vpop.eup %2970  ;;  %v2179_v0 = vmul.f32 0.5, %v2171_v47  ;;  %v2186_v2 = vmul.f32 %v2178_v21, %v3901_v60 }
0x122a   :  { %v2172_v36 = vadd.f32 1.0, %v2971_v63 }
0x122b   :  { %v2973_v5 = vpop.eup %2972  ;;  %v2187_v35 = vmul.f32 %v2179_v0, %v3906_v3  ;;  %v2224_v10 = vpack.c.bf16 %v2186_v2, %v2184_v15 }
0x122c   :  { %v2173_v6 = vadd.f32 1.0, %v2973_v5  ;;  %v2180_v18 = vmul.f32 0.5, %v2172_v36 }
0x122d   :  { %v2975_v16 = vpop.eup %2974  ;;  %v2225_v8 = vpack.c.bf16 %v2187_v35, %v2185_v14 }
0x122e   :  { %v2977_v9 = vpop.eup %2976  ;;  %v2174_v11 = vadd.f32 1.0, %v2975_v16  ;;  %v2181_v12 = vmul.f32 0.5, %v2173_v6  ;;  %v2188_v54 = vmul.f32 %v2180_v18, %v3912_v7 }
0x122f   :  { %2283 = vmatprep.mubr.bf16.mxu1 %v2225_v8  ;;  %v2175_v17 = vadd.f32 1.0, %v2977_v9 }
0x1230   :  { %2284 = vmatmul.mubr.bf16.vlgmr.msra.gmra.mxu1 %v2224_v10  ;;  %v2182_v60 = vmul.f32 0.5, %v2174_v11  ;;  %v2189_v59 = vmul.f32 %v2181_v12, %v3918_v37 }
0x1231   :  { %v2183_v22 = vmul.f32 0.5, %v2175_v17 }
0x1232   :  { %v2190_v20 = vmul.f32 %v2182_v60, %v2116_v24 }
0x1233   :  { %v2191_v3 = vmul.f32 %v2183_v22, %v2118_v62 }
0x1234   :  { %v2226_v13 = vpack.c.bf16 %v2190_v20, %v2188_v54 }
0x1235   :  { %v2227_v23 = vpack.c.bf16 %v2191_v3, %v2189_v59 }
0x1237   :  { %2291 = vmatprep.mubr.bf16.mxu1 %v2227_v23 }
0x1238   :  { %2292 = vmatmul.mubr.bf16.gmra.mxu1 %v2226_v13 }
0x12f0   :  { %v2629_v25 = vpop.f32.mrf.mxu1 }
0x12f2   :  { %v2630_v27 = vpop.f32.mrf.mxu1 }
0x12f3   :  { %v2631_v1 = vadd.f32 %v2630_v27, %v2629_v25 }
0x12f4   :  { %v2632_v30 = vpop.f32.mrf.mxu1 }
0x12f5   :  { %v2286_v31 = vadd.f32 %v2631_v1, %v2496_v26 }
0x12f6   :  { %v2633_v4 = vpop.f32.mrf.mxu1 }
0x12f7   :  { %v2300_v24 = vadd.f32 %v2286_v31, %v3686_v28  ;;  %v2634_v37 = vadd.f32 %v2633_v4, %v2632_v30 }
0x12f8   :  { %v2635_v62 = vpop.f32.mrf.mxu1 }
0x12f9   :  { %2304 = vst.msk [vmem:[%s3971_s14] sm:$0xff] %vm52_vm0, %v2300_v24  ;;  %v2289_v7 = vadd.f32 %v2634_v37, %v2496_v26 }
0x12fa   :  { %v2636_v32 = vpop.f32.mrf.mxu1 }
0x12fb   :  { %v2301_v33 = vadd.f32 %v2289_v7, %v3699_v19  ;;  %v2637_v34 = vadd.f32 %v2636_v32, %v2635_v62 }
0x12fc   :  { %v2638_v39 = vpop.f32.mrf.mxu1 }
0x12fd   :  { %2305 = vst.msk [vmem:[%s3971_s14 + $0x8] sm:$0xff] %vm52_vm0, %v2301_v33  ;;  %v2294_v40 = vadd.f32 %v2637_v34, %v2496_v26 }
0x12fe   :  { %v2639_v28 = vpop.f32.mrf.mxu1 }
0x12ff   :  { %v2302_v55 = vadd.f32 %v2294_v40, %v3689_v29  ;;  %v2640_v56 = vadd.f32 %v2639_v28, %v2638_v39 }
0x1301   :  { %2306 = vst.msk [vmem:[%s3971_s14 + $0x10] sm:$0xff] %vm52_vm0, %v2302_v55  ;;  %v2297_v41 = vadd.f32 %v2640_v56, %v2496_v26 }
0x1303   :  { %v2303_v19 = vadd.f32 %v2297_v41, %v3701_v38 }
0x1305   :  { %2307 = vst.msk [vmem:[%s3971_s14 + $0x18] sm:$0xff] %vm52_vm0, %v2303_v19 }

</bundles_post_ra>
